<compile_context>
chip_gen: v7x
topology: tpu7x:2x2x1
jax: 0.10.0
libtpu: 0.0.40
codegen_flags: <defaults>
</compile_context>

<pallas_src>
import jax
import jax.numpy as jnp
import numpy as np
from jax.experimental import pallas as pl
from jax.experimental.pallas import tpu as pltpu

# Problem constants (fixed by the module).
C = 32                  # channels (depthwise: groups == in == out == 32)
K = 10                  # kernel size
STRIDE = 2
PAD = 5
KSUB = K // STRIDE      # 5x5 polyphase sub-kernels
HALO = KSUB // 2        # 2-pixel zero halo around the input

# Chosen small input spatial size.
H_IN = 8
H_OUT = (H_IN - 1) * STRIDE - 2 * PAD + K    # 14
HQ = H_OUT // STRIDE                         # 7 (per-phase output size)
H_PADDED = H_IN + 2 * HALO                   # 12

IMGS_PER_BLK = 4                             # 4 * 32 = 128 -> full lane width
LANES = IMGS_PER_BLK * C


def _make_kernel(b_blk):
    """Kernel processing `b_blk` lane-packed groups of 4 images per grid step."""

    def kernel(x_ref, w_ref, b_ref, o_ref, xpad_ref):
        # x_ref    : (b_blk, 8, 8, 128)       lane-packed input (lane = img*32 + c)
        # w_ref    : (4, 5, 5, 128)           polyphase sub-kernels, ph = 2*rh + rw
        # b_ref    : (1, 128)                 bias + 3.0 (folded)
        # o_ref    : (b_blk, 14, 2, 7, 128)   (group, oh=2p+rh, rw, q, lanes)
        # xpad_ref : VMEM (12, 12, 128)       scratch: input with 2-pixel zero halo

        # ---- zero ONLY the halo strips, once per grid step --------------------
        # (the 8x8 interior is fully overwritten for every group below; do NOT
        #  gate this on program_id==0 — each TensorCore has its own scratch)
        zrow = jnp.zeros((HALO, H_PADDED, LANES), jnp.float32)
        xpad_ref[pl.ds(0, HALO)] = zrow
        xpad_ref[pl.ds(HALO + H_IN, HALO)] = zrow
        zcol = jnp.zeros((H_IN, HALO, LANES), jnp.float32)
        xpad_ref[pl.ds(HALO, H_IN), pl.ds(0, HALO), :] = zcol
        xpad_ref[pl.ds(HALO, H_IN), pl.ds(HALO + H_IN, HALO), :] = zcol

        b3 = b_ref[0]                                   # (128,)  == bias + 3

        def per_group(b):
            # Write this group's 8x8 interior into the halo-padded scratch.
            xpad_ref[pl.ds(HALO, H_IN), pl.ds(HALO, H_IN), :] = x_ref[b]

            # y[2p+rh, 2q+rw] = sum_{i,j} xpad[p+rh+i, q+rw+j] * w_flip[rh+2i, rw+2j]
            # c-outer restructure: ONE sliced load per W offset c = rw + j (0..5),
            # 4 accumulators (all output phases) live at once.
            acc = [[jnp.zeros((HQ, HQ, LANES), jnp.float32) for _ in range(STRIDE)]
                   for _ in range(STRIDE)]
            for c in range(KSUB + 1):                   # 6 distinct W offsets
                xw = xpad_ref[:, pl.ds(c, HQ), :]       # (12, 7, 128)
                for rh in range(STRIDE):
                    for i in range(KSUB):               # H taps: leading-axis slices
                        xs = xw[rh + i:rh + i + HQ]     # (7, 7, 128)
                        for rw in range(STRIDE):
                            j = c - rw
                            if 0 <= j < KSUB:
                                acc[rh][rw] = acc[rh][rw] + xs * w_ref[STRIDE * rh + rw, i, j]

            # hardsigmoid: clamp(v + 3, 0, 6) * (1/6)   (bias+3 pre-folded)
            for rh in range(STRIDE):
                for rw in range(STRIDE):
                    y = (jnp.clip(acc[rh][rw] + b3, 0.0, 6.0) * (1.0 / 6.0))
                    y = y.astype(o_ref.dtype)
                    # Interleave the H phase in-kernel: row oh = 2*p + rh
                    # (leading-axis stores -> no rh de-interleave in the wrapper).
                    for p in range(HQ):
                        o_ref[b, STRIDE * p + rh, rw] = y[p]

        if b_blk == 1:
            per_group(0)
        else:
            pl.loop(0, b_blk, unroll=True)(per_group)

    return kernel


def model_forward(x_nchw, weight, bias, *, max_groups_per_step=8):
    """x_nchw: (N, 32, 8, 8); weight: (32, 1, 10, 10) torch layout; bias: (32,)."""
    N = x_nchw.shape[0]

    # ---- lane-packing / batching geometry ----
    n_pad = (-N) % IMGS_PER_BLK
    G = (N + n_pad) // IMGS_PER_BLK                     # lane-packed groups of 4 imgs
    # groups per grid step: amortize per-step overhead, but keep >= 2 parallel grid
    # steps whenever possible so both v7x TensorCores get work.
    b_blk = max(1, min(max_groups_per_step, G // 2)) if G >= 2 else 1
    GT = G + ((-G) % b_blk)                             # pad group count to b_blk mult
    steps = GT // b_blk

    total_imgs = GT * IMGS_PER_BLK
    if total_imgs != N:
        x_nchw = jnp.concatenate(
            [x_nchw,
             jnp.zeros((total_imgs - N,) + x_nchw.shape[1:], x_nchw.dtype)], axis=0)

    # ---- single input layout change: (N, C, 8, 8) -> (GT, 8, 8, 4*C) lane-packed ----
    x_pk = (x_nchw.reshape(GT, IMGS_PER_BLK, C, H_IN, H_IN)
            .transpose(0, 3, 4, 1, 2)
            .reshape(GT, H_IN, H_IN, LANES))

    # ---- polyphase sub-kernels (tiny, trace-time) ----
    w_flip = weight[:, 0, ::-1, ::-1]                                   # (C, 10, 10)
    subs = [w_flip[:, rh::STRIDE, rw::STRIDE]
            for rh in range(STRIDE) for rw in range(STRIDE)]            # each (C, 5, 5)
    w_sub = jnp.transpose(jnp.stack(subs, axis=0), (0, 2, 3, 1))        # (4, 5, 5, C)
    w_pk = jnp.tile(w_sub, (1, 1, 1, IMGS_PER_BLK)).astype(jnp.float32) # (4, 5, 5, 128)
    b_pk = jnp.tile(bias.astype(jnp.float32) + 3.0,
                    IMGS_PER_BLK).reshape(1, LANES)                     # bias + 3 folded

    out = pl.pallas_call(
        _make_kernel(b_blk),
        out_shape=jax.ShapeDtypeStruct((GT, H_OUT, STRIDE, HQ, LANES), x_pk.dtype),
        grid_spec=pltpu.PrefetchScalarGridSpec(
            num_scalar_prefetch=0,
            grid=(steps,),
            in_specs=[
                pl.BlockSpec((b_blk, H_IN, H_IN, LANES), lambda g: (g, 0, 0, 0)),
                pl.BlockSpec((4, KSUB, KSUB, LANES), lambda g: (0, 0, 0, 0)),
                pl.BlockSpec((1, LANES), lambda g: (0, 0)),
            ],
            out_specs=pl.BlockSpec((b_blk, H_OUT, STRIDE, HQ, LANES),
                                   lambda g: (g, 0, 0, 0, 0)),
            scratch_shapes=[pltpu.VMEM((H_PADDED, H_PADDED, LANES), jnp.float32)],
        ),
        compiler_params=pltpu.CompilerParams(
            dimension_semantics=("parallel",)),
    )(x_pk, w_pk, b_pk)

    # ---- single output layout change: lane unpack + W-phase interleave + NCHW ----
    out = out.reshape(GT, H_OUT, STRIDE, HQ, IMGS_PER_BLK, C)   # (g, oh, rw, q, b, c)
    out = out.transpose(0, 4, 5, 1, 3, 2)                       # (g, b, c, oh, q, rw)
    out = out.reshape(GT * IMGS_PER_BLK, C, H_OUT, H_OUT)
    return out[:N]


def reference_forward(x_nchw, weight, bias):
    """Pure-JAX reference via lax.conv_general_dilated (== ConvTranspose2d)."""
    EDGE = K - 1 - PAD
    x_nhwc = jnp.transpose(x_nchw, (0, 2, 3, 1))
    w_hwio = jnp.transpose(weight[:, 0, ::-1, ::-1], (1, 2, 0))[:, :, None, :]
    y = jax.lax.conv_general_dilated(
        x_nhwc, w_hwio,
        window_strides=(1, 1),
        padding=[(EDGE, EDGE), (EDGE, EDGE)],
        lhs_dilation=(STRIDE, STRIDE),
        dimension_numbers=("NHWC", "HWIO", "NHWC"),
        feature_group_count=C,
    )
    y = y + bias
    y = jnp.clip(y + 3.0, 0.0, 6.0) / 6.0
    return jnp.transpose(y, (0, 3, 1, 2))


if __name__ == "__main__":
    key = jax.random.PRNGKey(0)
    kx, kw, kb = jax.random.split(key, 3)

    N = 8   # two lane-packed groups of 4 images -> 2 parallel grid steps
    x = jax.random.normal(kx, (N, C, H_IN, H_IN), dtype=jnp.float32)
    fan = 1.0 / np.sqrt(C * K * K)
    weight = jax.random.uniform(kw, (C, 1, K, K), jnp.float32, -fan, fan)
    bias = jax.random.uniform(kb, (C,), jnp.float32, -fan, fan)

    fwd = jax.jit(model_forward)

    out = jax.block_until_ready(fwd(x, weight, bias))
    ref = reference_forward(x, weight, bias)
    np.testing.assert_allclose(np.asarray(out), np.asarray(ref), rtol=1e-5, atol=1e-5)
    assert out.shape == (N, C, H_OUT, H_OUT)

    # Also exercise the multi-group-per-step path (G=6 -> 3 groups/step, 2 steps).
    N2 = 24
    x2 = jax.random.normal(kx, (N2, C, H_IN, H_IN), dtype=jnp.float32)
    out2 = jax.block_until_ready(fwd(x2, weight, bias))
    ref2 = reference_forward(x2, weight, bias)
    np.testing.assert_allclose(np.asarray(out2), np.asarray(ref2), rtol=1e-5, atol=1e-5)

    print("KERNEL_OK")
</pallas_src>

<mosaic_0001>
module attributes {stable_mosaic.version = 11 : i64} {
  func.func @kernel(%arg0: i32, %arg1: memref<1x8x8x128xf32, #tpu.memory_space<vmem>>, %arg2: memref<4x5x5x128xf32, #tpu.memory_space<vmem>>, %arg3: memref<1x128xf32, #tpu.memory_space<vmem>>, %arg4: memref<1x14x2x7x128xf32, #tpu.memory_space<vmem>>, %arg5: memref<12x12x128xf32, #tpu.memory_space<vmem>>) attributes {dimension_semantics = [#tpu.dimension_semantics<parallel>], iteration_bounds = array<i64: 2>, scalar_prefetch = 0 : i64, scratch_operands = 1 : i64, tpu.core_type = #tpu.core_type<tc>, window_params = [{transform_indices = @transform_0, window_bounds = array<i64: 1, 8, 8, 128>}, {pipeline_mode = #tpu.pipeline_mode<synchronous>, transform_indices = @transform_1, window_bounds = array<i64: 4, 5, 5, 128>}, {pipeline_mode = #tpu.pipeline_mode<synchronous>, transform_indices = @transform_2, window_bounds = array<i64: 1, 128>}, {transform_indices = @transform_3, window_bounds = array<i64: 1, 14, 2, 7, 128>}]} {
    %cst = arith.constant 0.000000e+00 : f32
    %0 = vector.broadcast %cst : f32 to vector<2x12x128xf32>
    %c0 = arith.constant 0 : index
    %c0_0 = arith.constant 0 : index
    %c0_1 = arith.constant 0 : index
    %1 = vector.load %arg5[%c0, %c0_0, %c0_1] : memref<12x12x128xf32, #tpu.memory_space<vmem>>, vector<2x12x128xf32>
    tpu.vector_store %arg5[%c0, %c0_0, %c0_1], %0 {strides = array<i32>} : memref<12x12x128xf32, #tpu.memory_space<vmem>>, vector<2x12x128xf32>,
    %c10 = arith.constant 10 : index
    %c0_2 = arith.constant 0 : index
    %c0_3 = arith.constant 0 : index
    %2 = vector.load %arg5[%c10, %c0_2, %c0_3] : memref<12x12x128xf32, #tpu.memory_space<vmem>>, vector<2x12x128xf32>
    tpu.vector_store %arg5[%c10, %c0_2, %c0_3], %0 {strides = array<i32>} : memref<12x12x128xf32, #tpu.memory_space<vmem>>, vector<2x12x128xf32>,
    %cst_4 = arith.constant 0.000000e+00 : f32
    %3 = vector.broadcast %cst_4 : f32 to vector<8x2x128xf32>
    %c2 = arith.constant 2 : index
    %c0_5 = arith.constant 0 : index
    %c0_6 = arith.constant 0 : index
    %4 = vector.load %arg5[%c2, %c0_5, %c0_6] : memref<12x12x128xf32, #tpu.memory_space<vmem>>, vector<8x2x128xf32>
    tpu.vector_store %arg5[%c2, %c0_5, %c0_6], %3 {strides = array<i32>} : memref<12x12x128xf32, #tpu.memory_space<vmem>>, vector<8x2x128xf32>,
    %c2_7 = arith.constant 2 : index
    %c10_8 = arith.constant 10 : index
    %c0_9 = arith.constant 0 : index
    %5 = vector.load %arg5[%c2_7, %c10_8, %c0_9] : memref<12x12x128xf32, #tpu.memory_space<vmem>>, vector<8x2x128xf32>
    tpu.vector_store %arg5[%c2_7, %c10_8, %c0_9], %3 {strides = array<i32>} : memref<12x12x128xf32, #tpu.memory_space<vmem>>, vector<8x2x128xf32>,
    %c0_10 = arith.constant 0 : index
    %c0_11 = arith.constant 0 : index
    %6 = vector.load %arg3[%c0_10, %c0_11] : memref<1x128xf32, #tpu.memory_space<vmem>>, vector<1x128xf32>
    %7 = vector.shape_cast %6 : vector<1x128xf32> to vector<128xf32>
    %c0_12 = arith.constant 0 : index
    %c0_13 = arith.constant 0 : index
    %c0_14 = arith.constant 0 : index
    %c0_15 = arith.constant 0 : index
    %8 = vector.load %arg1[%c0_12, %c0_13, %c0_14, %c0_15] : memref<1x8x8x128xf32, #tpu.memory_space<vmem>>, vector<1x8x8x128xf32>
    %9 = vector.shape_cast %8 : vector<1x8x8x128xf32> to vector<8x8x128xf32>
    %c2_16 = arith.constant 2 : index
    %c2_17 = arith.constant 2 : index
    %c0_18 = arith.constant 0 : index
    %10 = vector.load %arg5[%c2_16, %c2_17, %c0_18] : memref<12x12x128xf32, #tpu.memory_space<vmem>>, vector<8x8x128xf32>
    tpu.vector_store %arg5[%c2_16, %c2_17, %c0_18], %9 {strides = array<i32>} : memref<12x12x128xf32, #tpu.memory_space<vmem>>, vector<8x8x128xf32>,
    %cst_19 = arith.constant 0.000000e+00 : f32
    %11 = vector.broadcast %cst_19 : f32 to vector<7x7x128xf32>
    %cst_20 = arith.constant 0.000000e+00 : f32
    %12 = vector.broadcast %cst_20 : f32 to vector<7x7x128xf32>
    %cst_21 = arith.constant 0.000000e+00 : f32
    %13 = vector.broadcast %cst_21 : f32 to vector<7x7x128xf32>
    %cst_22 = arith.constant 0.000000e+00 : f32
    %14 = vector.broadcast %cst_22 : f32 to vector<7x7x128xf32>
    %c0_23 = arith.constant 0 : index
    %c0_24 = arith.constant 0 : index
    %c0_25 = arith.constant 0 : index
    %15 = vector.load %arg5[%c0_23, %c0_24, %c0_25] : memref<12x12x128xf32, #tpu.memory_space<vmem>>, vector<12x7x128xf32>
    %16 = vector.extract_strided_slice %15 {offsets = [0, 0, 0], sizes = [7, 7, 128], strides = [1, 1, 1]} : vector<12x7x128xf32> to vector<7x7x128xf32>
    %c0_26 = arith.constant 0 : index
    %c0_27 = arith.constant 0 : index
    %c0_28 = arith.constant 0 : index
    %c0_29 = arith.constant 0 : index
    %17 = vector.load %arg2[%c0_26, %c0_27, %c0_28, %c0_29] : memref<4x5x5x128xf32, #tpu.memory_space<vmem>>, vector<1x1x1x128xf32>
    %18 = vector.shape_cast %17 : vector<1x1x1x128xf32> to vector<128xf32>
    %19 = vector.shape_cast %18 : vector<128xf32> to vector<1x1x128xf32>
    %20 = vector.broadcast %19 : vector<1x1x128xf32> to vector<7x7x128xf32>
    %21 = arith.mulf %16, %20 : vector<7x7x128xf32>
    %22 = arith.addf %11, %21 : vector<7x7x128xf32>
    %23 = vector.extract_strided_slice %15 {offsets = [1, 0, 0], sizes = [7, 7, 128], strides = [1, 1, 1]} : vector<12x7x128xf32> to vector<7x7x128xf32>
    %c0_30 = arith.constant 0 : index
    %c1 = arith.constant 1 : index
    %c0_31 = arith.constant 0 : index
    %c0_32 = arith.constant 0 : index
    %24 = vector.load %arg2[%c0_30, %c1, %c0_31, %c0_32] : memref<4x5x5x128xf32, #tpu.memory_space<vmem>>, vector<1x1x1x128xf32>
    %25 = vector.shape_cast %24 : vector<1x1x1x128xf32> to vector<128xf32>
    %26 = vector.shape_cast %25 : vector<128xf32> to vector<1x1x128xf32>
    %27 = vector.broadcast %26 : vector<1x1x128xf32> to vector<7x7x128xf32>
    %28 = arith.mulf %23, %27 : vector<7x7x128xf32>
    %29 = arith.addf %22, %28 : vector<7x7x128xf32>
    %30 = vector.extract_strided_slice %15 {offsets = [2, 0, 0], sizes = [7, 7, 128], strides = [1, 1, 1]} : vector<12x7x128xf32> to vector<7x7x128xf32>
    %c0_33 = arith.constant 0 : index
    %c2_34 = arith.constant 2 : index
    %c0_35 = arith.constant 0 : index
    %c0_36 = arith.constant 0 : index
    %31 = vector.load %arg2[%c0_33, %c2_34, %c0_35, %c0_36] : memref<4x5x5x128xf32, #tpu.memory_space<vmem>>, vector<1x1x1x128xf32>
    %32 = vector.shape_cast %31 : vector<1x1x1x128xf32> to vector<128xf32>
    %33 = vector.shape_cast %32 : vector<128xf32> to vector<1x1x128xf32>
    %34 = vector.broadcast %33 : vector<1x1x128xf32> to vector<7x7x128xf32>
    %35 = arith.mulf %30, %34 : vector<7x7x128xf32>
    %36 = arith.addf %29, %35 : vector<7x7x128xf32>
    %37 = vector.extract_strided_slice %15 {offsets = [3, 0, 0], sizes = [7, 7, 128], strides = [1, 1, 1]} : vector<12x7x128xf32> to vector<7x7x128xf32>
    %c0_37 = arith.constant 0 : index
    %c3 = arith.constant 3 : index
    %c0_38 = arith.constant 0 : index
    %c0_39 = arith.constant 0 : index
    %38 = vector.load %arg2[%c0_37, %c3, %c0_38, %c0_39] : memref<4x5x5x128xf32, #tpu.memory_space<vmem>>, vector<1x1x1x128xf32>
    %39 = vector.shape_cast %38 : vector<1x1x1x128xf32> to vector<128xf32>
    %40 = vector.shape_cast %39 : vector<128xf32> to vector<1x1x128xf32>
    %41 = vector.broadcast %40 : vector<1x1x128xf32> to vector<7x7x128xf32>
    %42 = arith.mulf %37, %41 : vector<7x7x128xf32>
    %43 = arith.addf %36, %42 : vector<7x7x128xf32>
    %44 = vector.extract_strided_slice %15 {offsets = [4, 0, 0], sizes = [7, 7, 128], strides = [1, 1, 1]} : vector<12x7x128xf32> to vector<7x7x128xf32>
    %c0_40 = arith.constant 0 : index
    %c4 = arith.constant 4 : index
    %c0_41 = arith.constant 0 : index
    %c0_42 = arith.constant 0 : index
    %45 = vector.load %arg2[%c0_40, %c4, %c0_41, %c0_42] : memref<4x5x5x128xf32, #tpu.memory_space<vmem>>, vector<1x1x1x128xf32>
    %46 = vector.shape_cast %45 : vector<1x1x1x128xf32> to vector<128xf32>
    %47 = vector.shape_cast %46 : vector<128xf32> to vector<1x1x128xf32>
    %48 = vector.broadcast %47 : vector<1x1x128xf32> to vector<7x7x128xf32>
    %49 = arith.mulf %44, %48 : vector<7x7x128xf32>
    %50 = arith.addf %43, %49 : vector<7x7x128xf32>
    %51 = vector.extract_strided_slice %15 {offsets = [1, 0, 0], sizes = [7, 7, 128], strides = [1, 1, 1]} : vector<12x7x128xf32> to vector<7x7x128xf32>
    %c2_43 = arith.constant 2 : index
    %c0_44 = arith.constant 0 : index
    %c0_45 = arith.constant 0 : index
    %c0_46 = arith.constant 0 : index
    %52 = vector.load %arg2[%c2_43, %c0_44, %c0_45, %c0_46] : memref<4x5x5x128xf32, #tpu.memory_space<vmem>>, vector<1x1x1x128xf32>
    %53 = vector.shape_cast %52 : vector<1x1x1x128xf32> to vector<128xf32>
    %54 = vector.shape_cast %53 : vector<128xf32> to vector<1x1x128xf32>
    %55 = vector.broadcast %54 : vector<1x1x128xf32> to vector<7x7x128xf32>
    %56 = arith.mulf %51, %55 : vector<7x7x128xf32>
    %57 = arith.addf %13, %56 : vector<7x7x128xf32>
    %58 = vector.extract_strided_slice %15 {offsets = [2, 0, 0], sizes = [7, 7, 128], strides = [1, 1, 1]} : vector<12x7x128xf32> to vector<7x7x128xf32>
    %c2_47 = arith.constant 2 : index
    %c1_48 = arith.constant 1 : index
    %c0_49 = arith.constant 0 : index
    %c0_50 = arith.constant 0 : index
    %59 = vector.load %arg2[%c2_47, %c1_48, %c0_49, %c0_50] : memref<4x5x5x128xf32, #tpu.memory_space<vmem>>, vector<1x1x1x128xf32>
    %60 = vector.shape_cast %59 : vector<1x1x1x128xf32> to vector<128xf32>
    %61 = vector.shape_cast %60 : vector<128xf32> to vector<1x1x128xf32>
    %62 = vector.broadcast %61 : vector<1x1x128xf32> to vector<7x7x128xf32>
    %63 = arith.mulf %58, %62 : vector<7x7x128xf32>
    %64 = arith.addf %57, %63 : vector<7x7x128xf32>
    %65 = vector.extract_strided_slice %15 {offsets = [3, 0, 0], sizes = [7, 7, 128], strides = [1, 1, 1]} : vector<12x7x128xf32> to vector<7x7x128xf32>
    %c2_51 = arith.constant 2 : index
    %c2_52 = arith.constant 2 : index
    %c0_53 = arith.constant 0 : index
    %c0_54 = arith.constant 0 : index
    %66 = vector.load %arg2[%c2_51, %c2_52, %c0_53, %c0_54] : memref<4x5x5x128xf32, #tpu.memory_space<vmem>>, vector<1x1x1x128xf32>
    %67 = vector.shape_cast %66 : vector<1x1x1x128xf32> to vector<128xf32>
    %68 = vector.shape_cast %67 : vector<128xf32> to vector<1x1x128xf32>
    %69 = vector.broadcast %68 : vector<1x1x128xf32> to vector<7x7x128xf32>
    %70 = arith.mulf %65, %69 : vector<7x7x128xf32>
    %71 = arith.addf %64, %70 : vector<7x7x128xf32>
    %72 = vector.extract_strided_slice %15 {offsets = [4, 0, 0], sizes = [7, 7, 128], strides = [1, 1, 1]} : vector<12x7x128xf32> to vector<7x7x128xf32>
    %c2_55 = arith.constant 2 : index
    %c3_56 = arith.constant 3 : index
    %c0_57 = arith.constant 0 : index
    %c0_58 = arith.constant 0 : index
    %73 = vector.load %arg2[%c2_55, %c3_56, %c0_57, %c0_58] : memref<4x5x5x128xf32, #tpu.memory_space<vmem>>, vector<1x1x1x128xf32>
    %74 = vector.shape_cast %73 : vector<1x1x1x128xf32> to vector<128xf32>
    %75 = vector.shape_cast %74 : vector<128xf32> to vector<1x1x128xf32>
    %76 = vector.broadcast %75 : vector<1x1x128xf32> to vector<7x7x128xf32>
    %77 = arith.mulf %72, %76 : vector<7x7x128xf32>
    %78 = arith.addf %71, %77 : vector<7x7x128xf32>
    %79 = vector.extract_strided_slice %15 {offsets = [5, 0, 0], sizes = [7, 7, 128], strides = [1, 1, 1]} : vector<12x7x128xf32> to vector<7x7x128xf32>
    %c2_59 = arith.constant 2 : index
    %c4_60 = arith.constant 4 : index
    %c0_61 = arith.constant 0 : index
    %c0_62 = arith.constant 0 : index
    %80 = vector.load %arg2[%c2_59, %c4_60, %c0_61, %c0_62] : memref<4x5x5x128xf32, #tpu.memory_space<vmem>>, vector<1x1x1x128xf32>
    %81 = vector.shape_cast %80 : vector<1x1x1x128xf32> to vector<128xf32>
    %82 = vector.shape_cast %81 : vector<128xf32> to vector<1x1x128xf32>
    %83 = vector.broadcast %82 : vector<1x1x128xf32> to vector<7x7x128xf32>
    %84 = arith.mulf %79, %83 : vector<7x7x128xf32>
    %85 = arith.addf %78, %84 : vector<7x7x128xf32>
    %c0_63 = arith.constant 0 : index
    %c1_64 = arith.constant 1 : index
    %c0_65 = arith.constant 0 : index
    %86 = vector.load %arg5[%c0_63, %c1_64, %c0_65] : memref<12x12x128xf32, #tpu.memory_space<vmem>>, vector<12x7x128xf32>
    %87 = vector.extract_strided_slice %86 {offsets = [0, 0, 0], sizes = [7, 7, 128], strides = [1, 1, 1]} : vector<12x7x128xf32> to vector<7x7x128xf32>
    %c0_66 = arith.constant 0 : index
    %c0_67 = arith.constant 0 : index
    %c1_68 = arith.constant 1 : index
    %c0_69 = arith.constant 0 : index
    %88 = vector.load %arg2[%c0_66, %c0_67, %c1_68, %c0_69] : memref<4x5x5x128xf32, #tpu.memory_space<vmem>>, vector<1x1x1x128xf32>
    %89 = vector.shape_cast %88 : vector<1x1x1x128xf32> to vector<128xf32>
    %90 = vector.shape_cast %89 : vector<128xf32> to vector<1x1x128xf32>
    %91 = vector.broadcast %90 : vector<1x1x128xf32> to vector<7x7x128xf32>
    %92 = arith.mulf %87, %91 : vector<7x7x128xf32>
    %93 = arith.addf %50, %92 : vector<7x7x128xf32>
    %c1_70 = arith.constant 1 : index
    %c0_71 = arith.constant 0 : index
    %c0_72 = arith.constant 0 : index
    %c0_73 = arith.constant 0 : index
    %94 = vector.load %arg2[%c1_70, %c0_71, %c0_72, %c0_73] : memref<4x5x5x128xf32, #tpu.memory_space<vmem>>, vector<1x1x1x128xf32>
    %95 = vector.shape_cast %94 : vector<1x1x1x128xf32> to vector<128xf32>
    %96 = vector.shape_cast %95 : vector<128xf32> to vector<1x1x128xf32>
    %97 = vector.broadcast %96 : vector<1x1x128xf32> to vector<7x7x128xf32>
    %98 = arith.mulf %87, %97 : vector<7x7x128xf32>
    %99 = arith.addf %12, %98 : vector<7x7x128xf32>
    %100 = vector.extract_strided_slice %86 {offsets = [1, 0, 0], sizes = [7, 7, 128], strides = [1, 1, 1]} : vector<12x7x128xf32> to vector<7x7x128xf32>
    %c0_74 = arith.constant 0 : index
    %c1_75 = arith.constant 1 : index
    %c1_76 = arith.constant 1 : index
    %c0_77 = arith.constant 0 : index
    %101 = vector.load %arg2[%c0_74, %c1_75, %c1_76, %c0_77] : memref<4x5x5x128xf32, #tpu.memory_space<vmem>>, vector<1x1x1x128xf32>
    %102 = vector.shape_cast %101 : vector<1x1x1x128xf32> to vector<128xf32>
    %103 = vector.shape_cast %102 : vector<128xf32> to vector<1x1x128xf32>
    %104 = vector.broadcast %103 : vector<1x1x128xf32> to vector<7x7x128xf32>
    %105 = arith.mulf %100, %104 : vector<7x7x128xf32>
    %106 = arith.addf %93, %105 : vector<7x7x128xf32>
    %c1_78 = arith.constant 1 : index
    %c1_79 = arith.constant 1 : index
    %c0_80 = arith.constant 0 : index
    %c0_81 = arith.constant 0 : index
    %107 = vector.load %arg2[%c1_78, %c1_79, %c0_80, %c0_81] : memref<4x5x5x128xf32, #tpu.memory_space<vmem>>, vector<1x1x1x128xf32>
    %108 = vector.shape_cast %107 : vector<1x1x1x128xf32> to vector<128xf32>
    %109 = vector.shape_cast %108 : vector<128xf32> to vector<1x1x128xf32>
    %110 = vector.broadcast %109 : vector<1x1x128xf32> to vector<7x7x128xf32>
    %111 = arith.mulf %100, %110 : vector<7x7x128xf32>
    %112 = arith.addf %99, %111 : vector<7x7x128xf32>
    %113 = vector.extract_strided_slice %86 {offsets = [2, 0, 0], sizes = [7, 7, 128], strides = [1, 1, 1]} : vector<12x7x128xf32> to vector<7x7x128xf32>
    %c0_82 = arith.constant 0 : index
    %c2_83 = arith.constant 2 : index
    %c1_84 = arith.constant 1 : index
    %c0_85 = arith.constant 0 : index
    %114 = vector.load %arg2[%c0_82, %c2_83, %c1_84, %c0_85] : memref<4x5x5x128xf32, #tpu.memory_space<vmem>>, vector<1x1x1x128xf32>
    %115 = vector.shape_cast %114 : vector<1x1x1x128xf32> to vector<128xf32>
    %116 = vector.shape_cast %115 : vector<128xf32> to vector<1x1x128xf32>
    %117 = vector.broadcast %116 : vector<1x1x128xf32> to vector<7x7x128xf32>
    %118 = arith.mulf %113, %117 : vector<7x7x128xf32>
    %119 = arith.addf %106, %118 : vector<7x7x128xf32>
    %c1_86 = arith.constant 1 : index
    %c2_87 = arith.constant 2 : index
    %c0_88 = arith.constant 0 : index
    %c0_89 = arith.constant 0 : index
    %120 = vector.load %arg2[%c1_86, %c2_87, %c0_88, %c0_89] : memref<4x5x5x128xf32, #tpu.memory_space<vmem>>, vector<1x1x1x128xf32>
    %121 = vector.shape_cast %120 : vector<1x1x1x128xf32> to vector<128xf32>
    %122 = vector.shape_cast %121 : vector<128xf32> to vector<1x1x128xf32>
    %123 = vector.broadcast %122 : vector<1x1x128xf32> to vector<7x7x128xf32>
    %124 = arith.mulf %113, %123 : vector<7x7x128xf32>
    %125 = arith.addf %112, %124 : vector<7x7x128xf32>
    %126 = vector.extract_strided_slice %86 {offsets = [3, 0, 0], sizes = [7, 7, 128], strides = [1, 1, 1]} : vector<12x7x128xf32> to vector<7x7x128xf32>
    %c0_90 = arith.constant 0 : index
    %c3_91 = arith.constant 3 : index
    %c1_92 = arith.constant 1 : index
    %c0_93 = arith.constant 0 : index
    %127 = vector.load %arg2[%c0_90, %c3_91, %c1_92, %c0_93] : memref<4x5x5x128xf32, #tpu.memory_space<vmem>>, vector<1x1x1x128xf32>
    %128 = vector.shape_cast %127 : vector<1x1x1x128xf32> to vector<128xf32>
    %129 = vector.shape_cast %128 : vector<128xf32> to vector<1x1x128xf32>
    %130 = vector.broadcast %129 : vector<1x1x128xf32> to vector<7x7x128xf32>
    %131 = arith.mulf %126, %130 : vector<7x7x128xf32>
    %132 = arith.addf %119, %131 : vector<7x7x128xf32>
    %c1_94 = arith.constant 1 : index
    %c3_95 = arith.constant 3 : index
    %c0_96 = arith.constant 0 : index
    %c0_97 = arith.constant 0 : index
    %133 = vector.load %arg2[%c1_94, %c3_95, %c0_96, %c0_97] : memref<4x5x5x128xf32, #tpu.memory_space<vmem>>, vector<1x1x1x128xf32>
    %134 = vector.shape_cast %133 : vector<1x1x1x128xf32> to vector<128xf32>
    %135 = vector.shape_cast %134 : vector<128xf32> to vector<1x1x128xf32>
    %136 = vector.broadcast %135 : vector<1x1x128xf32> to vector<7x7x128xf32>
    %137 = arith.mulf %126, %136 : vector<7x7x128xf32>
    %138 = arith.addf %125, %137 : vector<7x7x128xf32>
    %139 = vector.extract_strided_slice %86 {offsets = [4, 0, 0], sizes = [7, 7, 128], strides = [1, 1, 1]} : vector<12x7x128xf32> to vector<7x7x128xf32>
    %c0_98 = arith.constant 0 : index
    %c4_99 = arith.constant 4 : index
    %c1_100 = arith.constant 1 : index
    %c0_101 = arith.constant 0 : index
    %140 = vector.load %arg2[%c0_98, %c4_99, %c1_100, %c0_101] : memref<4x5x5x128xf32, #tpu.memory_space<vmem>>, vector<1x1x1x128xf32>
    %141 = vector.shape_cast %140 : vector<1x1x1x128xf32> to vector<128xf32>
    %142 = vector.shape_cast %141 : vector<128xf32> to vector<1x1x128xf32>
    %143 = vector.broadcast %142 : vector<1x1x128xf32> to vector<7x7x128xf32>
    %144 = arith.mulf %139, %143 : vector<7x7x128xf32>
    %145 = arith.addf %132, %144 : vector<7x7x128xf32>
    %c1_102 = arith.constant 1 : index
    %c4_103 = arith.constant 4 : index
    %c0_104 = arith.constant 0 : index
    %c0_105 = arith.constant 0 : index
    %146 = vector.load %arg2[%c1_102, %c4_103, %c0_104, %c0_105] : memref<4x5x5x128xf32, #tpu.memory_space<vmem>>, vector<1x1x1x128xf32>
    %147 = vector.shape_cast %146 : vector<1x1x1x128xf32> to vector<128xf32>
    %148 = vector.shape_cast %147 : vector<128xf32> to vector<1x1x128xf32>
    %149 = vector.broadcast %148 : vector<1x1x128xf32> to vector<7x7x128xf32>
    %150 = arith.mulf %139, %149 : vector<7x7x128xf32>
    %151 = arith.addf %138, %150 : vector<7x7x128xf32>
    %152 = vector.extract_strided_slice %86 {offsets = [1, 0, 0], sizes = [7, 7, 128], strides = [1, 1, 1]} : vector<12x7x128xf32> to vector<7x7x128xf32>
    %c2_106 = arith.constant 2 : index
    %c0_107 = arith.constant 0 : index
    %c1_108 = arith.constant 1 : index
    %c0_109 = arith.constant 0 : index
    %153 = vector.load %arg2[%c2_106, %c0_107, %c1_108, %c0_109] : memref<4x5x5x128xf32, #tpu.memory_space<vmem>>, vector<1x1x1x128xf32>
    %154 = vector.shape_cast %153 : vector<1x1x1x128xf32> to vector<128xf32>
    %155 = vector.shape_cast %154 : vector<128xf32> to vector<1x1x128xf32>
    %156 = vector.broadcast %155 : vector<1x1x128xf32> to vector<7x7x128xf32>
    %157 = arith.mulf %152, %156 : vector<7x7x128xf32>
    %158 = arith.addf %85, %157 : vector<7x7x128xf32>
    %c3_110 = arith.constant 3 : index
    %c0_111 = arith.constant 0 : index
    %c0_112 = arith.constant 0 : index
    %c0_113 = arith.constant 0 : index
    %159 = vector.load %arg2[%c3_110, %c0_111, %c0_112, %c0_113] : memref<4x5x5x128xf32, #tpu.memory_space<vmem>>, vector<1x1x1x128xf32>
    %160 = vector.shape_cast %159 : vector<1x1x1x128xf32> to vector<128xf32>
    %161 = vector.shape_cast %160 : vector<128xf32> to vector<1x1x128xf32>
    %162 = vector.broadcast %161 : vector<1x1x128xf32> to vector<7x7x128xf32>
    %163 = arith.mulf %152, %162 : vector<7x7x128xf32>
    %164 = arith.addf %14, %163 : vector<7x7x128xf32>
    %165 = vector.extract_strided_slice %86 {offsets = [2, 0, 0], sizes = [7, 7, 128], strides = [1, 1, 1]} : vector<12x7x128xf32> to vector<7x7x128xf32>
    %c2_114 = arith.constant 2 : index
    %c1_115 = arith.constant 1 : index
    %c1_116 = arith.constant 1 : index
    %c0_117 = arith.constant 0 : index
    %166 = vector.load %arg2[%c2_114, %c1_115, %c1_116, %c0_117] : memref<4x5x5x128xf32, #tpu.memory_space<vmem>>, vector<1x1x1x128xf32>
    %167 = vector.shape_cast %166 : vector<1x1x1x128xf32> to vector<128xf32>
    %168 = vector.shape_cast %167 : vector<128xf32> to vector<1x1x128xf32>
    %169 = vector.broadcast %168 : vector<1x1x128xf32> to vector<7x7x128xf32>
    %170 = arith.mulf %165, %169 : vector<7x7x128xf32>
    %171 = arith.addf %158, %170 : vector<7x7x128xf32>
    %c3_118 = arith.constant 3 : index
    %c1_119 = arith.constant 1 : index
    %c0_120 = arith.constant 0 : index
    %c0_121 = arith.constant 0 : index
    %172 = vector.load %arg2[%c3_118, %c1_119, %c0_120, %c0_121] : memref<4x5x5x128xf32, #tpu.memory_space<vmem>>, vector<1x1x1x128xf32>
    %173 = vector.shape_cast %172 : vector<1x1x1x128xf32> to vector<128xf32>
    %174 = vector.shape_cast %173 : vector<128xf32> to vector<1x1x128xf32>
    %175 = vector.broadcast %174 : vector<1x1x128xf32> to vector<7x7x128xf32>
    %176 = arith.mulf %165, %175 : vector<7x7x128xf32>
    %177 = arith.addf %164, %176 : vector<7x7x128xf32>
    %178 = vector.extract_strided_slice %86 {offsets = [3, 0, 0], sizes = [7, 7, 128], strides = [1, 1, 1]} : vector<12x7x128xf32> to vector<7x7x128xf32>
    %c2_122 = arith.constant 2 : index
    %c2_123 = arith.constant 2 : index
    %c1_124 = arith.constant 1 : index
    %c0_125 = arith.constant 0 : index
    %179 = vector.load %arg2[%c2_122, %c2_123, %c1_124, %c0_125] : memref<4x5x5x128xf32, #tpu.memory_space<vmem>>, vector<1x1x1x128xf32>
    %180 = vector.shape_cast %179 : vector<1x1x1x128xf32> to vector<128xf32>
    %181 = vector.shape_cast %180 : vector<128xf32> to vector<1x1x128xf32>
    %182 = vector.broadcast %181 : vector<1x1x128xf32> to vector<7x7x128xf32>
    %183 = arith.mulf %178, %182 : vector<7x7x128xf32>
    %184 = arith.addf %171, %183 : vector<7x7x128xf32>
    %c3_126 = arith.constant 3 : index
    %c2_127 = arith.constant 2 : index
    %c0_128 = arith.constant 0 : index
    %c0_129 = arith.constant 0 : index
    %185 = vector.load %arg2[%c3_126, %c2_127, %c0_128, %c0_129] : memref<4x5x5x128xf32, #tpu.memory_space<vmem>>, vector<1x1x1x128xf32>
    %186 = vector.shape_cast %185 : vector<1x1x1x128xf32> to vector<128xf32>
    %187 = vector.shape_cast %186 : vector<128xf32> to vector<1x1x128xf32>
    %188 = vector.broadcast %187 : vector<1x1x128xf32> to vector<7x7x128xf32>
    %189 = arith.mulf %178, %188 : vector<7x7x128xf32>
    %190 = arith.addf %177, %189 : vector<7x7x128xf32>
    %191 = vector.extract_strided_slice %86 {offsets = [4, 0, 0], sizes = [7, 7, 128], strides = [1, 1, 1]} : vector<12x7x128xf32> to vector<7x7x128xf32>
    %c2_130 = arith.constant 2 : index
    %c3_131 = arith.constant 3 : index
    %c1_132 = arith.constant 1 : index
    %c0_133 = arith.constant 0 : index
    %192 = vector.load %arg2[%c2_130, %c3_131, %c1_132, %c0_133] : memref<4x5x5x128xf32, #tpu.memory_space<vmem>>, vector<1x1x1x128xf32>
    %193 = vector.shape_cast %192 : vector<1x1x1x128xf32> to vector<128xf32>
    %194 = vector.shape_cast %193 : vector<128xf32> to vector<1x1x128xf32>
    %195 = vector.broadcast %194 : vector<1x1x128xf32> to vector<7x7x128xf32>
    %196 = arith.mulf %191, %195 : vector<7x7x128xf32>
    %197 = arith.addf %184, %196 : vector<7x7x128xf32>
    %c3_134 = arith.constant 3 : index
    %c3_135 = arith.constant 3 : index
    %c0_136 = arith.constant 0 : index
    %c0_137 = arith.constant 0 : index
    %198 = vector.load %arg2[%c3_134, %c3_135, %c0_136, %c0_137] : memref<4x5x5x128xf32, #tpu.memory_space<vmem>>, vector<1x1x1x128xf32>
    %199 = vector.shape_cast %198 : vector<1x1x1x128xf32> to vector<128xf32>
    %200 = vector.shape_cast %199 : vector<128xf32> to vector<1x1x128xf32>
    %201 = vector.broadcast %200 : vector<1x1x128xf32> to vector<7x7x128xf32>
    %202 = arith.mulf %191, %201 : vector<7x7x128xf32>
    %203 = arith.addf %190, %202 : vector<7x7x128xf32>
    %204 = vector.extract_strided_slice %86 {offsets = [5, 0, 0], sizes = [7, 7, 128], strides = [1, 1, 1]} : vector<12x7x128xf32> to vector<7x7x128xf32>
    %c2_138 = arith.constant 2 : index
    %c4_139 = arith.constant 4 : index
    %c1_140 = arith.constant 1 : index
    %c0_141 = arith.constant 0 : index
    %205 = vector.load %arg2[%c2_138, %c4_139, %c1_140, %c0_141] : memref<4x5x5x128xf32, #tpu.memory_space<vmem>>, vector<1x1x1x128xf32>
    %206 = vector.shape_cast %205 : vector<1x1x1x128xf32> to vector<128xf32>
    %207 = vector.shape_cast %206 : vector<128xf32> to vector<1x1x128xf32>
    %208 = vector.broadcast %207 : vector<1x1x128xf32> to vector<7x7x128xf32>
    %209 = arith.mulf %204, %208 : vector<7x7x128xf32>
    %210 = arith.addf %197, %209 : vector<7x7x128xf32>
    %c3_142 = arith.constant 3 : index
    %c4_143 = arith.constant 4 : index
    %c0_144 = arith.constant 0 : index
    %c0_145 = arith.constant 0 : index
    %211 = vector.load %arg2[%c3_142, %c4_143, %c0_144, %c0_145] : memref<4x5x5x128xf32, #tpu.memory_space<vmem>>, vector<1x1x1x128xf32>
    %212 = vector.shape_cast %211 : vector<1x1x1x128xf32> to vector<128xf32>
    %213 = vector.shape_cast %212 : vector<128xf32> to vector<1x1x128xf32>
    %214 = vector.broadcast %213 : vector<1x1x128xf32> to vector<7x7x128xf32>
    %215 = arith.mulf %204, %214 : vector<7x7x128xf32>
    %216 = arith.addf %203, %215 : vector<7x7x128xf32>
    %c0_146 = arith.constant 0 : index
    %c2_147 = arith.constant 2 : index
    %c0_148 = arith.constant 0 : index
    %217 = vector.load %arg5[%c0_146, %c2_147, %c0_148] : memref<12x12x128xf32, #tpu.memory_space<vmem>>, vector<12x7x128xf32>
    %218 = vector.extract_strided_slice %217 {offsets = [0, 0, 0], sizes = [7, 7, 128], strides = [1, 1, 1]} : vector<12x7x128xf32> to vector<7x7x128xf32>
    %c0_149 = arith.constant 0 : index
    %c0_150 = arith.constant 0 : index
    %c2_151 = arith.constant 2 : index
    %c0_152 = arith.constant 0 : index
    %219 = vector.load %arg2[%c0_149, %c0_150, %c2_151, %c0_152] : memref<4x5x5x128xf32, #tpu.memory_space<vmem>>, vector<1x1x1x128xf32>
    %220 = vector.shape_cast %219 : vector<1x1x1x128xf32> to vector<128xf32>
    %221 = vector.shape_cast %220 : vector<128xf32> to vector<1x1x128xf32>
    %222 = vector.broadcast %221 : vector<1x1x128xf32> to vector<7x7x128xf32>
    %223 = arith.mulf %218, %222 : vector<7x7x128xf32>
    %224 = arith.addf %145, %223 : vector<7x7x128xf32>
    %c1_153 = arith.constant 1 : index
    %c0_154 = arith.constant 0 : index
    %c1_155 = arith.constant 1 : index
    %c0_156 = arith.constant 0 : index
    %225 = vector.load %arg2[%c1_153, %c0_154, %c1_155, %c0_156] : memref<4x5x5x128xf32, #tpu.memory_space<vmem>>, vector<1x1x1x128xf32>
    %226 = vector.shape_cast %225 : vector<1x1x1x128xf32> to vector<128xf32>
    %227 = vector.shape_cast %226 : vector<128xf32> to vector<1x1x128xf32>
    %228 = vector.broadcast %227 : vector<1x1x128xf32> to vector<7x7x128xf32>
    %229 = arith.mulf %218, %228 : vector<7x7x128xf32>
    %230 = arith.addf %151, %229 : vector<7x7x128xf32>
    %231 = vector.extract_strided_slice %217 {offsets = [1, 0, 0], sizes = [7, 7, 128], strides = [1, 1, 1]} : vector<12x7x128xf32> to vector<7x7x128xf32>
    %c0_157 = arith.constant 0 : index
    %c1_158 = arith.constant 1 : index
    %c2_159 = arith.constant 2 : index
    %c0_160 = arith.constant 0 : index
    %232 = vector.load %arg2[%c0_157, %c1_158, %c2_159, %c0_160] : memref<4x5x5x128xf32, #tpu.memory_space<vmem>>, vector<1x1x1x128xf32>
    %233 = vector.shape_cast %232 : vector<1x1x1x128xf32> to vector<128xf32>
    %234 = vector.shape_cast %233 : vector<128xf32> to vector<1x1x128xf32>
    %235 = vector.broadcast %234 : vector<1x1x128xf32> to vector<7x7x128xf32>
    %236 = arith.mulf %231, %235 : vector<7x7x128xf32>
    %237 = arith.addf %224, %236 : vector<7x7x128xf32>
    %c1_161 = arith.constant 1 : index
    %c1_162 = arith.constant 1 : index
    %c1_163 = arith.constant 1 : index
    %c0_164 = arith.constant 0 : index
    %238 = vector.load %arg2[%c1_161, %c1_162, %c1_163, %c0_164] : memref<4x5x5x128xf32, #tpu.memory_space<vmem>>, vector<1x1x1x128xf32>
    %239 = vector.shape_cast %238 : vector<1x1x1x128xf32> to vector<128xf32>
    %240 = vector.shape_cast %239 : vector<128xf32> to vector<1x1x128xf32>
    %241 = vector.broadcast %240 : vector<1x1x128xf32> to vector<7x7x128xf32>
    %242 = arith.mulf %231, %241 : vector<7x7x128xf32>
    %243 = arith.addf %230, %242 : vector<7x7x128xf32>
    %244 = vector.extract_strided_slice %217 {offsets = [2, 0, 0], sizes = [7, 7, 128], strides = [1, 1, 1]} : vector<12x7x128xf32> to vector<7x7x128xf32>
    %c0_165 = arith.constant 0 : index
    %c2_166 = arith.constant 2 : index
    %c2_167 = arith.constant 2 : index
    %c0_168 = arith.constant 0 : index
    %245 = vector.load %arg2[%c0_165, %c2_166, %c2_167, %c0_168] : memref<4x5x5x128xf32, #tpu.memory_space<vmem>>, vector<1x1x1x128xf32>
    %246 = vector.shape_cast %245 : vector<1x1x1x128xf32> to vector<128xf32>
    %247 = vector.shape_cast %246 : vector<128xf32> to vector<1x1x128xf32>
    %248 = vector.broadcast %247 : vector<1x1x128xf32> to vector<7x7x128xf32>
    %249 = arith.mulf %244, %248 : vector<7x7x128xf32>
    %250 = arith.addf %237, %249 : vector<7x7x128xf32>
    %c1_169 = arith.constant 1 : index
    %c2_170 = arith.constant 2 : index
    %c1_171 = arith.constant 1 : index
    %c0_172 = arith.constant 0 : index
    %251 = vector.load %arg2[%c1_169, %c2_170, %c1_171, %c0_172] : memref<4x5x5x128xf32, #tpu.memory_space<vmem>>, vector<1x1x1x128xf32>
    %252 = vector.shape_cast %251 : vector<1x1x1x128xf32> to vector<128xf32>
    %253 = vector.shape_cast %252 : vector<128xf32> to vector<1x1x128xf32>
    %254 = vector.broadcast %253 : vector<1x1x128xf32> to vector<7x7x128xf32>
    %255 = arith.mulf %244, %254 : vector<7x7x128xf32>
    %256 = arith.addf %243, %255 : vector<7x7x128xf32>
    %257 = vector.extract_strided_slice %217 {offsets = [3, 0, 0], sizes = [7, 7, 128], strides = [1, 1, 1]} : vector<12x7x128xf32> to vector<7x7x128xf32>
    %c0_173 = arith.constant 0 : index
    %c3_174 = arith.constant 3 : index
    %c2_175 = arith.constant 2 : index
    %c0_176 = arith.constant 0 : index
    %258 = vector.load %arg2[%c0_173, %c3_174, %c2_175, %c0_176] : memref<4x5x5x128xf32, #tpu.memory_space<vmem>>, vector<1x1x1x128xf32>
    %259 = vector.shape_cast %258 : vector<1x1x1x128xf32> to vector<128xf32>
    %260 = vector.shape_cast %259 : vector<128xf32> to vector<1x1x128xf32>
    %261 = vector.broadcast %260 : vector<1x1x128xf32> to vector<7x7x128xf32>
    %262 = arith.mulf %257, %261 : vector<7x7x128xf32>
    %263 = arith.addf %250, %262 : vector<7x7x128xf32>
    %c1_177 = arith.constant 1 : index
    %c3_178 = arith.constant 3 : index
    %c1_179 = arith.constant 1 : index
    %c0_180 = arith.constant 0 : index
    %264 = vector.load %arg2[%c1_177, %c3_178, %c1_179, %c0_180] : memref<4x5x5x128xf32, #tpu.memory_space<vmem>>, vector<1x1x1x128xf32>
    %265 = vector.shape_cast %264 : vector<1x1x1x128xf32> to vector<128xf32>
    %266 = vector.shape_cast %265 : vector<128xf32> to vector<1x1x128xf32>
    %267 = vector.broadcast %266 : vector<1x1x128xf32> to vector<7x7x128xf32>
    %268 = arith.mulf %257, %267 : vector<7x7x128xf32>
    %269 = arith.addf %256, %268 : vector<7x7x128xf32>
    %270 = vector.extract_strided_slice %217 {offsets = [4, 0, 0], sizes = [7, 7, 128], strides = [1, 1, 1]} : vector<12x7x128xf32> to vector<7x7x128xf32>
    %c0_181 = arith.constant 0 : index
    %c4_182 = arith.constant 4 : index
    %c2_183 = arith.constant 2 : index
    %c0_184 = arith.constant 0 : index
    %271 = vector.load %arg2[%c0_181, %c4_182, %c2_183, %c0_184] : memref<4x5x5x128xf32, #tpu.memory_space<vmem>>, vector<1x1x1x128xf32>
    %272 = vector.shape_cast %271 : vector<1x1x1x128xf32> to vector<128xf32>
    %273 = vector.shape_cast %272 : vector<128xf32> to vector<1x1x128xf32>
    %274 = vector.broadcast %273 : vector<1x1x128xf32> to vector<7x7x128xf32>
    %275 = arith.mulf %270, %274 : vector<7x7x128xf32>
    %276 = arith.addf %263, %275 : vector<7x7x128xf32>
    %c1_185 = arith.constant 1 : index
    %c4_186 = arith.constant 4 : index
    %c1_187 = arith.constant 1 : index
    %c0_188 = arith.constant 0 : index
    %277 = vector.load %arg2[%c1_185, %c4_186, %c1_187, %c0_188] : memref<4x5x5x128xf32, #tpu.memory_space<vmem>>, vector<1x1x1x128xf32>
    %278 = vector.shape_cast %277 : vector<1x1x1x128xf32> to vector<128xf32>
    %279 = vector.shape_cast %278 : vector<128xf32> to vector<1x1x128xf32>
    %280 = vector.broadcast %279 : vector<1x1x128xf32> to vector<7x7x128xf32>
    %281 = arith.mulf %270, %280 : vector<7x7x128xf32>
    %282 = arith.addf %269, %281 : vector<7x7x128xf32>
    %283 = vector.extract_strided_slice %217 {offsets = [1, 0, 0], sizes = [7, 7, 128], strides = [1, 1, 1]} : vector<12x7x128xf32> to vector<7x7x128xf32>
    %c2_189 = arith.constant 2 : index
    %c0_190 = arith.constant 0 : index
    %c2_191 = arith.constant 2 : index
    %c0_192 = arith.constant 0 : index
    %284 = vector.load %arg2[%c2_189, %c0_190, %c2_191, %c0_192] : memref<4x5x5x128xf32, #tpu.memory_space<vmem>>, vector<1x1x1x128xf32>
    %285 = vector.shape_cast %284 : vector<1x1x1x128xf32> to vector<128xf32>
    %286 = vector.shape_cast %285 : vector<128xf32> to vector<1x1x128xf32>
    %287 = vector.broadcast %286 : vector<1x1x128xf32> to vector<7x7x128xf32>
    %288 = arith.mulf %283, %287 : vector<7x7x128xf32>
    %289 = arith.addf %210, %288 : vector<7x7x128xf32>
    %c3_193 = arith.constant 3 : index
    %c0_194 = arith.constant 0 : index
    %c1_195 = arith.constant 1 : index
    %c0_196 = arith.constant 0 : index
    %290 = vector.load %arg2[%c3_193, %c0_194, %c1_195, %c0_196] : memref<4x5x5x128xf32, #tpu.memory_space<vmem>>, vector<1x1x1x128xf32>
    %291 = vector.shape_cast %290 : vector<1x1x1x128xf32> to vector<128xf32>
    %292 = vector.shape_cast %291 : vector<128xf32> to vector<1x1x128xf32>
    %293 = vector.broadcast %292 : vector<1x1x128xf32> to vector<7x7x128xf32>
    %294 = arith.mulf %283, %293 : vector<7x7x128xf32>
    %295 = arith.addf %216, %294 : vector<7x7x128xf32>
    %296 = vector.extract_strided_slice %217 {offsets = [2, 0, 0], sizes = [7, 7, 128], strides = [1, 1, 1]} : vector<12x7x128xf32> to vector<7x7x128xf32>
    %c2_197 = arith.constant 2 : index
    %c1_198 = arith.constant 1 : index
    %c2_199 = arith.constant 2 : index
    %c0_200 = arith.constant 0 : index
    %297 = vector.load %arg2[%c2_197, %c1_198, %c2_199, %c0_200] : memref<4x5x5x128xf32, #tpu.memory_space<vmem>>, vector<1x1x1x128xf32>
    %298 = vector.shape_cast %297 : vector<1x1x1x128xf32> to vector<128xf32>
    %299 = vector.shape_cast %298 : vector<128xf32> to vector<1x1x128xf32>
    %300 = vector.broadcast %299 : vector<1x1x128xf32> to vector<7x7x128xf32>
    %301 = arith.mulf %296, %300 : vector<7x7x128xf32>
    %302 = arith.addf %289, %301 : vector<7x7x128xf32>
    %c3_201 = arith.constant 3 : index
    %c1_202 = arith.constant 1 : index
    %c1_203 = arith.constant 1 : index
    %c0_204 = arith.constant 0 : index
    %303 = vector.load %arg2[%c3_201, %c1_202, %c1_203, %c0_204] : memref<4x5x5x128xf32, #tpu.memory_space<vmem>>, vector<1x1x1x128xf32>
    %304 = vector.shape_cast %303 : vector<1x1x1x128xf32> to vector<128xf32>
    %305 = vector.shape_cast %304 : vector<128xf32> to vector<1x1x128xf32>
    %306 = vector.broadcast %305 : vector<1x1x128xf32> to vector<7x7x128xf32>
    %307 = arith.mulf %296, %306 : vector<7x7x128xf32>
    %308 = arith.addf %295, %307 : vector<7x7x128xf32>
    %309 = vector.extract_strided_slice %217 {offsets = [3, 0, 0], sizes = [7, 7, 128], strides = [1, 1, 1]} : vector<12x7x128xf32> to vector<7x7x128xf32>
    %c2_205 = arith.constant 2 : index
    %c2_206 = arith.constant 2 : index
    %c2_207 = arith.constant 2 : index
    %c0_208 = arith.constant 0 : index
    %310 = vector.load %arg2[%c2_205, %c2_206, %c2_207, %c0_208] : memref<4x5x5x128xf32, #tpu.memory_space<vmem>>, vector<1x1x1x128xf32>
    %311 = vector.shape_cast %310 : vector<1x1x1x128xf32> to vector<128xf32>
    %312 = vector.shape_cast %311 : vector<128xf32> to vector<1x1x128xf32>
    %313 = vector.broadcast %312 : vector<1x1x128xf32> to vector<7x7x128xf32>
    %314 = arith.mulf %309, %313 : vector<7x7x128xf32>
    %315 = arith.addf %302, %314 : vector<7x7x128xf32>
    %c3_209 = arith.constant 3 : index
    %c2_210 = arith.constant 2 : index
    %c1_211 = arith.constant 1 : index
    %c0_212 = arith.constant 0 : index
    %316 = vector.load %arg2[%c3_209, %c2_210, %c1_211, %c0_212] : memref<4x5x5x128xf32, #tpu.memory_space<vmem>>, vector<1x1x1x128xf32>
    %317 = vector.shape_cast %316 : vector<1x1x1x128xf32> to vector<128xf32>
    %318 = vector.shape_cast %317 : vector<128xf32> to vector<1x1x128xf32>
    %319 = vector.broadcast %318 : vector<1x1x128xf32> to vector<7x7x128xf32>
    %320 = arith.mulf %309, %319 : vector<7x7x128xf32>
    %321 = arith.addf %308, %320 : vector<7x7x128xf32>
    %322 = vector.extract_strided_slice %217 {offsets = [4, 0, 0], sizes = [7, 7, 128], strides = [1, 1, 1]} : vector<12x7x128xf32> to vector<7x7x128xf32>
    %c2_213 = arith.constant 2 : index
    %c3_214 = arith.constant 3 : index
    %c2_215 = arith.constant 2 : index
    %c0_216 = arith.constant 0 : index
    %323 = vector.load %arg2[%c2_213, %c3_214, %c2_215, %c0_216] : memref<4x5x5x128xf32, #tpu.memory_space<vmem>>, vector<1x1x1x128xf32>
    %324 = vector.shape_cast %323 : vector<1x1x1x128xf32> to vector<128xf32>
    %325 = vector.shape_cast %324 : vector<128xf32> to vector<1x1x128xf32>
    %326 = vector.broadcast %325 : vector<1x1x128xf32> to vector<7x7x128xf32>
    %327 = arith.mulf %322, %326 : vector<7x7x128xf32>
    %328 = arith.addf %315, %327 : vector<7x7x128xf32>
    %c3_217 = arith.constant 3 : index
    %c3_218 = arith.constant 3 : index
    %c1_219 = arith.constant 1 : index
    %c0_220 = arith.constant 0 : index
    %329 = vector.load %arg2[%c3_217, %c3_218, %c1_219, %c0_220] : memref<4x5x5x128xf32, #tpu.memory_space<vmem>>, vector<1x1x1x128xf32>
    %330 = vector.shape_cast %329 : vector<1x1x1x128xf32> to vector<128xf32>
    %331 = vector.shape_cast %330 : vector<128xf32> to vector<1x1x128xf32>
    %332 = vector.broadcast %331 : vector<1x1x128xf32> to vector<7x7x128xf32>
    %333 = arith.mulf %322, %332 : vector<7x7x128xf32>
    %334 = arith.addf %321, %333 : vector<7x7x128xf32>
    %335 = vector.extract_strided_slice %217 {offsets = [5, 0, 0], sizes = [7, 7, 128], strides = [1, 1, 1]} : vector<12x7x128xf32> to vector<7x7x128xf32>
    %c2_221 = arith.constant 2 : index
    %c4_222 = arith.constant 4 : index
    %c2_223 = arith.constant 2 : index
    %c0_224 = arith.constant 0 : index
    %336 = vector.load %arg2[%c2_221, %c4_222, %c2_223, %c0_224] : memref<4x5x5x128xf32, #tpu.memory_space<vmem>>, vector<1x1x1x128xf32>
    %337 = vector.shape_cast %336 : vector<1x1x1x128xf32> to vector<128xf32>
    %338 = vector.shape_cast %337 : vector<128xf32> to vector<1x1x128xf32>
    %339 = vector.broadcast %338 : vector<1x1x128xf32> to vector<7x7x128xf32>
    %340 = arith.mulf %335, %339 : vector<7x7x128xf32>
    %341 = arith.addf %328, %340 : vector<7x7x128xf32>
    %c3_225 = arith.constant 3 : index
    %c4_226 = arith.constant 4 : index
    %c1_227 = arith.constant 1 : index
    %c0_228 = arith.constant 0 : index
    %342 = vector.load %arg2[%c3_225, %c4_226, %c1_227, %c0_228] : memref<4x5x5x128xf32, #tpu.memory_space<vmem>>, vector<1x1x1x128xf32>
    %343 = vector.shape_cast %342 : vector<1x1x1x128xf32> to vector<128xf32>
    %344 = vector.shape_cast %343 : vector<128xf32> to vector<1x1x128xf32>
    %345 = vector.broadcast %344 : vector<1x1x128xf32> to vector<7x7x128xf32>
    %346 = arith.mulf %335, %345 : vector<7x7x128xf32>
    %347 = arith.addf %334, %346 : vector<7x7x128xf32>
    %c0_229 = arith.constant 0 : index
    %c3_230 = arith.constant 3 : index
    %c0_231 = arith.constant 0 : index
    %348 = vector.load %arg5[%c0_229, %c3_230, %c0_231] : memref<12x12x128xf32, #tpu.memory_space<vmem>>, vector<12x7x128xf32>
    %349 = vector.extract_strided_slice %348 {offsets = [0, 0, 0], sizes = [7, 7, 128], strides = [1, 1, 1]} : vector<12x7x128xf32> to vector<7x7x128xf32>
    %c0_232 = arith.constant 0 : index
    %c0_233 = arith.constant 0 : index
    %c3_234 = arith.constant 3 : index
    %c0_235 = arith.constant 0 : index
    %350 = vector.load %arg2[%c0_232, %c0_233, %c3_234, %c0_235] : memref<4x5x5x128xf32, #tpu.memory_space<vmem>>, vector<1x1x1x128xf32>
    %351 = vector.shape_cast %350 : vector<1x1x1x128xf32> to vector<128xf32>
    %352 = vector.shape_cast %351 : vector<128xf32> to vector<1x1x128xf32>
    %353 = vector.broadcast %352 : vector<1x1x128xf32> to vector<7x7x128xf32>
    %354 = arith.mulf %349, %353 : vector<7x7x128xf32>
    %355 = arith.addf %276, %354 : vector<7x7x128xf32>
    %c1_236 = arith.constant 1 : index
    %c0_237 = arith.constant 0 : index
    %c2_238 = arith.constant 2 : index
    %c0_239 = arith.constant 0 : index
    %356 = vector.load %arg2[%c1_236, %c0_237, %c2_238, %c0_239] : memref<4x5x5x128xf32, #tpu.memory_space<vmem>>, vector<1x1x1x128xf32>
    %357 = vector.shape_cast %356 : vector<1x1x1x128xf32> to vector<128xf32>
    %358 = vector.shape_cast %357 : vector<128xf32> to vector<1x1x128xf32>
    %359 = vector.broadcast %358 : vector<1x1x128xf32> to vector<7x7x128xf32>
    %360 = arith.mulf %349, %359 : vector<7x7x128xf32>
    %361 = arith.addf %282, %360 : vector<7x7x128xf32>
    %362 = vector.extract_strided_slice %348 {offsets = [1, 0, 0], sizes = [7, 7, 128], strides = [1, 1, 1]} : vector<12x7x128xf32> to vector<7x7x128xf32>
    %c0_240 = arith.constant 0 : index
    %c1_241 = arith.constant 1 : index
    %c3_242 = arith.constant 3 : index
    %c0_243 = arith.constant 0 : index
    %363 = vector.load %arg2[%c0_240, %c1_241, %c3_242, %c0_243] : memref<4x5x5x128xf32, #tpu.memory_space<vmem>>, vector<1x1x1x128xf32>
    %364 = vector.shape_cast %363 : vector<1x1x1x128xf32> to vector<128xf32>
    %365 = vector.shape_cast %364 : vector<128xf32> to vector<1x1x128xf32>
    %366 = vector.broadcast %365 : vector<1x1x128xf32> to vector<7x7x128xf32>
    %367 = arith.mulf %362, %366 : vector<7x7x128xf32>
    %368 = arith.addf %355, %367 : vector<7x7x128xf32>
    %c1_244 = arith.constant 1 : index
    %c1_245 = arith.constant 1 : index
    %c2_246 = arith.constant 2 : index
    %c0_247 = arith.constant 0 : index
    %369 = vector.load %arg2[%c1_244, %c1_245, %c2_246, %c0_247] : memref<4x5x5x128xf32, #tpu.memory_space<vmem>>, vector<1x1x1x128xf32>
    %370 = vector.shape_cast %369 : vector<1x1x1x128xf32> to vector<128xf32>
    %371 = vector.shape_cast %370 : vector<128xf32> to vector<1x1x128xf32>
    %372 = vector.broadcast %371 : vector<1x1x128xf32> to vector<7x7x128xf32>
    %373 = arith.mulf %362, %372 : vector<7x7x128xf32>
    %374 = arith.addf %361, %373 : vector<7x7x128xf32>
    %375 = vector.extract_strided_slice %348 {offsets = [2, 0, 0], sizes = [7, 7, 128], strides = [1, 1, 1]} : vector<12x7x128xf32> to vector<7x7x128xf32>
    %c0_248 = arith.constant 0 : index
    %c2_249 = arith.constant 2 : index
    %c3_250 = arith.constant 3 : index
    %c0_251 = arith.constant 0 : index
    %376 = vector.load %arg2[%c0_248, %c2_249, %c3_250, %c0_251] : memref<4x5x5x128xf32, #tpu.memory_space<vmem>>, vector<1x1x1x128xf32>
    %377 = vector.shape_cast %376 : vector<1x1x1x128xf32> to vector<128xf32>
    %378 = vector.shape_cast %377 : vector<128xf32> to vector<1x1x128xf32>
    %379 = vector.broadcast %378 : vector<1x1x128xf32> to vector<7x7x128xf32>
    %380 = arith.mulf %375, %379 : vector<7x7x128xf32>
    %381 = arith.addf %368, %380 : vector<7x7x128xf32>
    %c1_252 = arith.constant 1 : index
    %c2_253 = arith.constant 2 : index
    %c2_254 = arith.constant 2 : index
    %c0_255 = arith.constant 0 : index
    %382 = vector.load %arg2[%c1_252, %c2_253, %c2_254, %c0_255] : memref<4x5x5x128xf32, #tpu.memory_space<vmem>>, vector<1x1x1x128xf32>
    %383 = vector.shape_cast %382 : vector<1x1x1x128xf32> to vector<128xf32>
    %384 = vector.shape_cast %383 : vector<128xf32> to vector<1x1x128xf32>
    %385 = vector.broadcast %384 : vector<1x1x128xf32> to vector<7x7x128xf32>
    %386 = arith.mulf %375, %385 : vector<7x7x128xf32>
    %387 = arith.addf %374, %386 : vector<7x7x128xf32>
    %388 = vector.extract_strided_slice %348 {offsets = [3, 0, 0], sizes = [7, 7, 128], strides = [1, 1, 1]} : vector<12x7x128xf32> to vector<7x7x128xf32>
    %c0_256 = arith.constant 0 : index
    %c3_257 = arith.constant 3 : index
    %c3_258 = arith.constant 3 : index
    %c0_259 = arith.constant 0 : index
    %389 = vector.load %arg2[%c0_256, %c3_257, %c3_258, %c0_259] : memref<4x5x5x128xf32, #tpu.memory_space<vmem>>, vector<1x1x1x128xf32>
    %390 = vector.shape_cast %389 : vector<1x1x1x128xf32> to vector<128xf32>
    %391 = vector.shape_cast %390 : vector<128xf32> to vector<1x1x128xf32>
    %392 = vector.broadcast %391 : vector<1x1x128xf32> to vector<7x7x128xf32>
    %393 = arith.mulf %388, %392 : vector<7x7x128xf32>
    %394 = arith.addf %381, %393 : vector<7x7x128xf32>
    %c1_260 = arith.constant 1 : index
    %c3_261 = arith.constant 3 : index
    %c2_262 = arith.constant 2 : index
    %c0_263 = arith.constant 0 : index
    %395 = vector.load %arg2[%c1_260, %c3_261, %c2_262, %c0_263] : memref<4x5x5x128xf32, #tpu.memory_space<vmem>>, vector<1x1x1x128xf32>
    %396 = vector.shape_cast %395 : vector<1x1x1x128xf32> to vector<128xf32>
    %397 = vector.shape_cast %396 : vector<128xf32> to vector<1x1x128xf32>
    %398 = vector.broadcast %397 : vector<1x1x128xf32> to vector<7x7x128xf32>
    %399 = arith.mulf %388, %398 : vector<7x7x128xf32>
    %400 = arith.addf %387, %399 : vector<7x7x128xf32>
    %401 = vector.extract_strided_slice %348 {offsets = [4, 0, 0], sizes = [7, 7, 128], strides = [1, 1, 1]} : vector<12x7x128xf32> to vector<7x7x128xf32>
    %c0_264 = arith.constant 0 : index
    %c4_265 = arith.constant 4 : index
    %c3_266 = arith.constant 3 : index
    %c0_267 = arith.constant 0 : index
    %402 = vector.load %arg2[%c0_264, %c4_265, %c3_266, %c0_267] : memref<4x5x5x128xf32, #tpu.memory_space<vmem>>, vector<1x1x1x128xf32>
    %403 = vector.shape_cast %402 : vector<1x1x1x128xf32> to vector<128xf32>
    %404 = vector.shape_cast %403 : vector<128xf32> to vector<1x1x128xf32>
    %405 = vector.broadcast %404 : vector<1x1x128xf32> to vector<7x7x128xf32>
    %406 = arith.mulf %401, %405 : vector<7x7x128xf32>
    %407 = arith.addf %394, %406 : vector<7x7x128xf32>
    %c1_268 = arith.constant 1 : index
    %c4_269 = arith.constant 4 : index
    %c2_270 = arith.constant 2 : index
    %c0_271 = arith.constant 0 : index
    %408 = vector.load %arg2[%c1_268, %c4_269, %c2_270, %c0_271] : memref<4x5x5x128xf32, #tpu.memory_space<vmem>>, vector<1x1x1x128xf32>
    %409 = vector.shape_cast %408 : vector<1x1x1x128xf32> to vector<128xf32>
    %410 = vector.shape_cast %409 : vector<128xf32> to vector<1x1x128xf32>
    %411 = vector.broadcast %410 : vector<1x1x128xf32> to vector<7x7x128xf32>
    %412 = arith.mulf %401, %411 : vector<7x7x128xf32>
    %413 = arith.addf %400, %412 : vector<7x7x128xf32>
    %414 = vector.extract_strided_slice %348 {offsets = [1, 0, 0], sizes = [7, 7, 128], strides = [1, 1, 1]} : vector<12x7x128xf32> to vector<7x7x128xf32>
    %c2_272 = arith.constant 2 : index
    %c0_273 = arith.constant 0 : index
    %c3_274 = arith.constant 3 : index
    %c0_275 = arith.constant 0 : index
    %415 = vector.load %arg2[%c2_272, %c0_273, %c3_274, %c0_275] : memref<4x5x5x128xf32, #tpu.memory_space<vmem>>, vector<1x1x1x128xf32>
    %416 = vector.shape_cast %415 : vector<1x1x1x128xf32> to vector<128xf32>
    %417 = vector.shape_cast %416 : vector<128xf32> to vector<1x1x128xf32>
    %418 = vector.broadcast %417 : vector<1x1x128xf32> to vector<7x7x128xf32>
    %419 = arith.mulf %414, %418 : vector<7x7x128xf32>
    %420 = arith.addf %341, %419 : vector<7x7x128xf32>
    %c3_276 = arith.constant 3 : index
    %c0_277 = arith.constant 0 : index
    %c2_278 = arith.constant 2 : index
    %c0_279 = arith.constant 0 : index
    %421 = vector.load %arg2[%c3_276, %c0_277, %c2_278, %c0_279] : memref<4x5x5x128xf32, #tpu.memory_space<vmem>>, vector<1x1x1x128xf32>
    %422 = vector.shape_cast %421 : vector<1x1x1x128xf32> to vector<128xf32>
    %423 = vector.shape_cast %422 : vector<128xf32> to vector<1x1x128xf32>
    %424 = vector.broadcast %423 : vector<1x1x128xf32> to vector<7x7x128xf32>
    %425 = arith.mulf %414, %424 : vector<7x7x128xf32>
    %426 = arith.addf %347, %425 : vector<7x7x128xf32>
    %427 = vector.extract_strided_slice %348 {offsets = [2, 0, 0], sizes = [7, 7, 128], strides = [1, 1, 1]} : vector<12x7x128xf32> to vector<7x7x128xf32>
    %c2_280 = arith.constant 2 : index
    %c1_281 = arith.constant 1 : index
    %c3_282 = arith.constant 3 : index
    %c0_283 = arith.constant 0 : index
    %428 = vector.load %arg2[%c2_280, %c1_281, %c3_282, %c0_283] : memref<4x5x5x128xf32, #tpu.memory_space<vmem>>, vector<1x1x1x128xf32>
    %429 = vector.shape_cast %428 : vector<1x1x1x128xf32> to vector<128xf32>
    %430 = vector.shape_cast %429 : vector<128xf32> to vector<1x1x128xf32>
    %431 = vector.broadcast %430 : vector<1x1x128xf32> to vector<7x7x128xf32>
    %432 = arith.mulf %427, %431 : vector<7x7x128xf32>
    %433 = arith.addf %420, %432 : vector<7x7x128xf32>
    %c3_284 = arith.constant 3 : index
    %c1_285 = arith.constant 1 : index
    %c2_286 = arith.constant 2 : index
    %c0_287 = arith.constant 0 : index
    %434 = vector.load %arg2[%c3_284, %c1_285, %c2_286, %c0_287] : memref<4x5x5x128xf32, #tpu.memory_space<vmem>>, vector<1x1x1x128xf32>
    %435 = vector.shape_cast %434 : vector<1x1x1x128xf32> to vector<128xf32>
    %436 = vector.shape_cast %435 : vector<128xf32> to vector<1x1x128xf32>
    %437 = vector.broadcast %436 : vector<1x1x128xf32> to vector<7x7x128xf32>
    %438 = arith.mulf %427, %437 : vector<7x7x128xf32>
    %439 = arith.addf %426, %438 : vector<7x7x128xf32>
    %440 = vector.extract_strided_slice %348 {offsets = [3, 0, 0], sizes = [7, 7, 128], strides = [1, 1, 1]} : vector<12x7x128xf32> to vector<7x7x128xf32>
    %c2_288 = arith.constant 2 : index
    %c2_289 = arith.constant 2 : index
    %c3_290 = arith.constant 3 : index
    %c0_291 = arith.constant 0 : index
    %441 = vector.load %arg2[%c2_288, %c2_289, %c3_290, %c0_291] : memref<4x5x5x128xf32, #tpu.memory_space<vmem>>, vector<1x1x1x128xf32>
    %442 = vector.shape_cast %441 : vector<1x1x1x128xf32> to vector<128xf32>
    %443 = vector.shape_cast %442 : vector<128xf32> to vector<1x1x128xf32>
    %444 = vector.broadcast %443 : vector<1x1x128xf32> to vector<7x7x128xf32>
    %445 = arith.mulf %440, %444 : vector<7x7x128xf32>
    %446 = arith.addf %433, %445 : vector<7x7x128xf32>
    %c3_292 = arith.constant 3 : index
    %c2_293 = arith.constant 2 : index
    %c2_294 = arith.constant 2 : index
    %c0_295 = arith.constant 0 : index
    %447 = vector.load %arg2[%c3_292, %c2_293, %c2_294, %c0_295] : memref<4x5x5x128xf32, #tpu.memory_space<vmem>>, vector<1x1x1x128xf32>
    %448 = vector.shape_cast %447 : vector<1x1x1x128xf32> to vector<128xf32>
    %449 = vector.shape_cast %448 : vector<128xf32> to vector<1x1x128xf32>
    %450 = vector.broadcast %449 : vector<1x1x128xf32> to vector<7x7x128xf32>
    %451 = arith.mulf %440, %450 : vector<7x7x128xf32>
    %452 = arith.addf %439, %451 : vector<7x7x128xf32>
    %453 = vector.extract_strided_slice %348 {offsets = [4, 0, 0], sizes = [7, 7, 128], strides = [1, 1, 1]} : vector<12x7x128xf32> to vector<7x7x128xf32>
    %c2_296 = arith.constant 2 : index
    %c3_297 = arith.constant 3 : index
    %c3_298 = arith.constant 3 : index
    %c0_299 = arith.constant 0 : index
    %454 = vector.load %arg2[%c2_296, %c3_297, %c3_298, %c0_299] : memref<4x5x5x128xf32, #tpu.memory_space<vmem>>, vector<1x1x1x128xf32>
    %455 = vector.shape_cast %454 : vector<1x1x1x128xf32> to vector<128xf32>
    %456 = vector.shape_cast %455 : vector<128xf32> to vector<1x1x128xf32>
    %457 = vector.broadcast %456 : vector<1x1x128xf32> to vector<7x7x128xf32>
    %458 = arith.mulf %453, %457 : vector<7x7x128xf32>
    %459 = arith.addf %446, %458 : vector<7x7x128xf32>
    %c3_300 = arith.constant 3 : index
    %c3_301 = arith.constant 3 : index
    %c2_302 = arith.constant 2 : index
    %c0_303 = arith.constant 0 : index
    %460 = vector.load %arg2[%c3_300, %c3_301, %c2_302, %c0_303] : memref<4x5x5x128xf32, #tpu.memory_space<vmem>>, vector<1x1x1x128xf32>
    %461 = vector.shape_cast %460 : vector<1x1x1x128xf32> to vector<128xf32>
    %462 = vector.shape_cast %461 : vector<128xf32> to vector<1x1x128xf32>
    %463 = vector.broadcast %462 : vector<1x1x128xf32> to vector<7x7x128xf32>
    %464 = arith.mulf %453, %463 : vector<7x7x128xf32>
    %465 = arith.addf %452, %464 : vector<7x7x128xf32>
    %466 = vector.extract_strided_slice %348 {offsets = [5, 0, 0], sizes = [7, 7, 128], strides = [1, 1, 1]} : vector<12x7x128xf32> to vector<7x7x128xf32>
    %c2_304 = arith.constant 2 : index
    %c4_305 = arith.constant 4 : index
    %c3_306 = arith.constant 3 : index
    %c0_307 = arith.constant 0 : index
    %467 = vector.load %arg2[%c2_304, %c4_305, %c3_306, %c0_307] : memref<4x5x5x128xf32, #tpu.memory_space<vmem>>, vector<1x1x1x128xf32>
    %468 = vector.shape_cast %467 : vector<1x1x1x128xf32> to vector<128xf32>
    %469 = vector.shape_cast %468 : vector<128xf32> to vector<1x1x128xf32>
    %470 = vector.broadcast %469 : vector<1x1x128xf32> to vector<7x7x128xf32>
    %471 = arith.mulf %466, %470 : vector<7x7x128xf32>
    %472 = arith.addf %459, %471 : vector<7x7x128xf32>
    %c3_308 = arith.constant 3 : index
    %c4_309 = arith.constant 4 : index
    %c2_310 = arith.constant 2 : index
    %c0_311 = arith.constant 0 : index
    %473 = vector.load %arg2[%c3_308, %c4_309, %c2_310, %c0_311] : memref<4x5x5x128xf32, #tpu.memory_space<vmem>>, vector<1x1x1x128xf32>
    %474 = vector.shape_cast %473 : vector<1x1x1x128xf32> to vector<128xf32>
    %475 = vector.shape_cast %474 : vector<128xf32> to vector<1x1x128xf32>
    %476 = vector.broadcast %475 : vector<1x1x128xf32> to vector<7x7x128xf32>
    %477 = arith.mulf %466, %476 : vector<7x7x128xf32>
    %478 = arith.addf %465, %477 : vector<7x7x128xf32>
    %c0_312 = arith.constant 0 : index
    %c4_313 = arith.constant 4 : index
    %c0_314 = arith.constant 0 : index
    %479 = vector.load %arg5[%c0_312, %c4_313, %c0_314] : memref<12x12x128xf32, #tpu.memory_space<vmem>>, vector<12x7x128xf32>
    %480 = vector.extract_strided_slice %479 {offsets = [0, 0, 0], sizes = [7, 7, 128], strides = [1, 1, 1]} : vector<12x7x128xf32> to vector<7x7x128xf32>
    %c0_315 = arith.constant 0 : index
    %c0_316 = arith.constant 0 : index
    %c4_317 = arith.constant 4 : index
    %c0_318 = arith.constant 0 : index
    %481 = vector.load %arg2[%c0_315, %c0_316, %c4_317, %c0_318] : memref<4x5x5x128xf32, #tpu.memory_space<vmem>>, vector<1x1x1x128xf32>
    %482 = vector.shape_cast %481 : vector<1x1x1x128xf32> to vector<128xf32>
    %483 = vector.shape_cast %482 : vector<128xf32> to vector<1x1x128xf32>
    %484 = vector.broadcast %483 : vector<1x1x128xf32> to vector<7x7x128xf32>
    %485 = arith.mulf %480, %484 : vector<7x7x128xf32>
    %486 = arith.addf %407, %485 : vector<7x7x128xf32>
    %c1_319 = arith.constant 1 : index
    %c0_320 = arith.constant 0 : index
    %c3_321 = arith.constant 3 : index
    %c0_322 = arith.constant 0 : index
    %487 = vector.load %arg2[%c1_319, %c0_320, %c3_321, %c0_322] : memref<4x5x5x128xf32, #tpu.memory_space<vmem>>, vector<1x1x1x128xf32>
    %488 = vector.shape_cast %487 : vector<1x1x1x128xf32> to vector<128xf32>
    %489 = vector.shape_cast %488 : vector<128xf32> to vector<1x1x128xf32>
    %490 = vector.broadcast %489 : vector<1x1x128xf32> to vector<7x7x128xf32>
    %491 = arith.mulf %480, %490 : vector<7x7x128xf32>
    %492 = arith.addf %413, %491 : vector<7x7x128xf32>
    %493 = vector.extract_strided_slice %479 {offsets = [1, 0, 0], sizes = [7, 7, 128], strides = [1, 1, 1]} : vector<12x7x128xf32> to vector<7x7x128xf32>
    %c0_323 = arith.constant 0 : index
    %c1_324 = arith.constant 1 : index
    %c4_325 = arith.constant 4 : index
    %c0_326 = arith.constant 0 : index
    %494 = vector.load %arg2[%c0_323, %c1_324, %c4_325, %c0_326] : memref<4x5x5x128xf32, #tpu.memory_space<vmem>>, vector<1x1x1x128xf32>
    %495 = vector.shape_cast %494 : vector<1x1x1x128xf32> to vector<128xf32>
    %496 = vector.shape_cast %495 : vector<128xf32> to vector<1x1x128xf32>
    %497 = vector.broadcast %496 : vector<1x1x128xf32> to vector<7x7x128xf32>
    %498 = arith.mulf %493, %497 : vector<7x7x128xf32>
    %499 = arith.addf %486, %498 : vector<7x7x128xf32>
    %c1_327 = arith.constant 1 : index
    %c1_328 = arith.constant 1 : index
    %c3_329 = arith.constant 3 : index
    %c0_330 = arith.constant 0 : index
    %500 = vector.load %arg2[%c1_327, %c1_328, %c3_329, %c0_330] : memref<4x5x5x128xf32, #tpu.memory_space<vmem>>, vector<1x1x1x128xf32>
    %501 = vector.shape_cast %500 : vector<1x1x1x128xf32> to vector<128xf32>
    %502 = vector.shape_cast %501 : vector<128xf32> to vector<1x1x128xf32>
    %503 = vector.broadcast %502 : vector<1x1x128xf32> to vector<7x7x128xf32>
    %504 = arith.mulf %493, %503 : vector<7x7x128xf32>
    %505 = arith.addf %492, %504 : vector<7x7x128xf32>
    %506 = vector.extract_strided_slice %479 {offsets = [2, 0, 0], sizes = [7, 7, 128], strides = [1, 1, 1]} : vector<12x7x128xf32> to vector<7x7x128xf32>
    %c0_331 = arith.constant 0 : index
    %c2_332 = arith.constant 2 : index
    %c4_333 = arith.constant 4 : index
    %c0_334 = arith.constant 0 : index
    %507 = vector.load %arg2[%c0_331, %c2_332, %c4_333, %c0_334] : memref<4x5x5x128xf32, #tpu.memory_space<vmem>>, vector<1x1x1x128xf32>
    %508 = vector.shape_cast %507 : vector<1x1x1x128xf32> to vector<128xf32>
    %509 = vector.shape_cast %508 : vector<128xf32> to vector<1x1x128xf32>
    %510 = vector.broadcast %509 : vector<1x1x128xf32> to vector<7x7x128xf32>
    %511 = arith.mulf %506, %510 : vector<7x7x128xf32>
    %512 = arith.addf %499, %511 : vector<7x7x128xf32>
    %c1_335 = arith.constant 1 : index
    %c2_336 = arith.constant 2 : index
    %c3_337 = arith.constant 3 : index
    %c0_338 = arith.constant 0 : index
    %513 = vector.load %arg2[%c1_335, %c2_336, %c3_337, %c0_338] : memref<4x5x5x128xf32, #tpu.memory_space<vmem>>, vector<1x1x1x128xf32>
    %514 = vector.shape_cast %513 : vector<1x1x1x128xf32> to vector<128xf32>
    %515 = vector.shape_cast %514 : vector<128xf32> to vector<1x1x128xf32>
    %516 = vector.broadcast %515 : vector<1x1x128xf32> to vector<7x7x128xf32>
    %517 = arith.mulf %506, %516 : vector<7x7x128xf32>
    %518 = arith.addf %505, %517 : vector<7x7x128xf32>
    %519 = vector.extract_strided_slice %479 {offsets = [3, 0, 0], sizes = [7, 7, 128], strides = [1, 1, 1]} : vector<12x7x128xf32> to vector<7x7x128xf32>
    %c0_339 = arith.constant 0 : index
    %c3_340 = arith.constant 3 : index
    %c4_341 = arith.constant 4 : index
    %c0_342 = arith.constant 0 : index
    %520 = vector.load %arg2[%c0_339, %c3_340, %c4_341, %c0_342] : memref<4x5x5x128xf32, #tpu.memory_space<vmem>>, vector<1x1x1x128xf32>
    %521 = vector.shape_cast %520 : vector<1x1x1x128xf32> to vector<128xf32>
    %522 = vector.shape_cast %521 : vector<128xf32> to vector<1x1x128xf32>
    %523 = vector.broadcast %522 : vector<1x1x128xf32> to vector<7x7x128xf32>
    %524 = arith.mulf %519, %523 : vector<7x7x128xf32>
    %525 = arith.addf %512, %524 : vector<7x7x128xf32>
    %c1_343 = arith.constant 1 : index
    %c3_344 = arith.constant 3 : index
    %c3_345 = arith.constant 3 : index
    %c0_346 = arith.constant 0 : index
    %526 = vector.load %arg2[%c1_343, %c3_344, %c3_345, %c0_346] : memref<4x5x5x128xf32, #tpu.memory_space<vmem>>, vector<1x1x1x128xf32>
    %527 = vector.shape_cast %526 : vector<1x1x1x128xf32> to vector<128xf32>
    %528 = vector.shape_cast %527 : vector<128xf32> to vector<1x1x128xf32>
    %529 = vector.broadcast %528 : vector<1x1x128xf32> to vector<7x7x128xf32>
    %530 = arith.mulf %519, %529 : vector<7x7x128xf32>
    %531 = arith.addf %518, %530 : vector<7x7x128xf32>
    %532 = vector.extract_strided_slice %479 {offsets = [4, 0, 0], sizes = [7, 7, 128], strides = [1, 1, 1]} : vector<12x7x128xf32> to vector<7x7x128xf32>
    %c0_347 = arith.constant 0 : index
    %c4_348 = arith.constant 4 : index
    %c4_349 = arith.constant 4 : index
    %c0_350 = arith.constant 0 : index
    %533 = vector.load %arg2[%c0_347, %c4_348, %c4_349, %c0_350] : memref<4x5x5x128xf32, #tpu.memory_space<vmem>>, vector<1x1x1x128xf32>
    %534 = vector.shape_cast %533 : vector<1x1x1x128xf32> to vector<128xf32>
    %535 = vector.shape_cast %534 : vector<128xf32> to vector<1x1x128xf32>
    %536 = vector.broadcast %535 : vector<1x1x128xf32> to vector<7x7x128xf32>
    %537 = arith.mulf %532, %536 : vector<7x7x128xf32>
    %538 = arith.addf %525, %537 : vector<7x7x128xf32>
    %c1_351 = arith.constant 1 : index
    %c4_352 = arith.constant 4 : index
    %c3_353 = arith.constant 3 : index
    %c0_354 = arith.constant 0 : index
    %539 = vector.load %arg2[%c1_351, %c4_352, %c3_353, %c0_354] : memref<4x5x5x128xf32, #tpu.memory_space<vmem>>, vector<1x1x1x128xf32>
    %540 = vector.shape_cast %539 : vector<1x1x1x128xf32> to vector<128xf32>
    %541 = vector.shape_cast %540 : vector<128xf32> to vector<1x1x128xf32>
    %542 = vector.broadcast %541 : vector<1x1x128xf32> to vector<7x7x128xf32>
    %543 = arith.mulf %532, %542 : vector<7x7x128xf32>
    %544 = arith.addf %531, %543 : vector<7x7x128xf32>
    %545 = vector.extract_strided_slice %479 {offsets = [1, 0, 0], sizes = [7, 7, 128], strides = [1, 1, 1]} : vector<12x7x128xf32> to vector<7x7x128xf32>
    %c2_355 = arith.constant 2 : index
    %c0_356 = arith.constant 0 : index
    %c4_357 = arith.constant 4 : index
    %c0_358 = arith.constant 0 : index
    %546 = vector.load %arg2[%c2_355, %c0_356, %c4_357, %c0_358] : memref<4x5x5x128xf32, #tpu.memory_space<vmem>>, vector<1x1x1x128xf32>
    %547 = vector.shape_cast %546 : vector<1x1x1x128xf32> to vector<128xf32>
    %548 = vector.shape_cast %547 : vector<128xf32> to vector<1x1x128xf32>
    %549 = vector.broadcast %548 : vector<1x1x128xf32> to vector<7x7x128xf32>
    %550 = arith.mulf %545, %549 : vector<7x7x128xf32>
    %551 = arith.addf %472, %550 : vector<7x7x128xf32>
    %c3_359 = arith.constant 3 : index
    %c0_360 = arith.constant 0 : index
    %c3_361 = arith.constant 3 : index
    %c0_362 = arith.constant 0 : index
    %552 = vector.load %arg2[%c3_359, %c0_360, %c3_361, %c0_362] : memref<4x5x5x128xf32, #tpu.memory_space<vmem>>, vector<1x1x1x128xf32>
    %553 = vector.shape_cast %552 : vector<1x1x1x128xf32> to vector<128xf32>
    %554 = vector.shape_cast %553 : vector<128xf32> to vector<1x1x128xf32>
    %555 = vector.broadcast %554 : vector<1x1x128xf32> to vector<7x7x128xf32>
    %556 = arith.mulf %545, %555 : vector<7x7x128xf32>
    %557 = arith.addf %478, %556 : vector<7x7x128xf32>
    %558 = vector.extract_strided_slice %479 {offsets = [2, 0, 0], sizes = [7, 7, 128], strides = [1, 1, 1]} : vector<12x7x128xf32> to vector<7x7x128xf32>
    %c2_363 = arith.constant 2 : index
    %c1_364 = arith.constant 1 : index
    %c4_365 = arith.constant 4 : index
    %c0_366 = arith.constant 0 : index
    %559 = vector.load %arg2[%c2_363, %c1_364, %c4_365, %c0_366] : memref<4x5x5x128xf32, #tpu.memory_space<vmem>>, vector<1x1x1x128xf32>
    %560 = vector.shape_cast %559 : vector<1x1x1x128xf32> to vector<128xf32>
    %561 = vector.shape_cast %560 : vector<128xf32> to vector<1x1x128xf32>
    %562 = vector.broadcast %561 : vector<1x1x128xf32> to vector<7x7x128xf32>
    %563 = arith.mulf %558, %562 : vector<7x7x128xf32>
    %564 = arith.addf %551, %563 : vector<7x7x128xf32>
    %c3_367 = arith.constant 3 : index
    %c1_368 = arith.constant 1 : index
    %c3_369 = arith.constant 3 : index
    %c0_370 = arith.constant 0 : index
    %565 = vector.load %arg2[%c3_367, %c1_368, %c3_369, %c0_370] : memref<4x5x5x128xf32, #tpu.memory_space<vmem>>, vector<1x1x1x128xf32>
    %566 = vector.shape_cast %565 : vector<1x1x1x128xf32> to vector<128xf32>
    %567 = vector.shape_cast %566 : vector<128xf32> to vector<1x1x128xf32>
    %568 = vector.broadcast %567 : vector<1x1x128xf32> to vector<7x7x128xf32>
    %569 = arith.mulf %558, %568 : vector<7x7x128xf32>
    %570 = arith.addf %557, %569 : vector<7x7x128xf32>
    %571 = vector.extract_strided_slice %479 {offsets = [3, 0, 0], sizes = [7, 7, 128], strides = [1, 1, 1]} : vector<12x7x128xf32> to vector<7x7x128xf32>
    %c2_371 = arith.constant 2 : index
    %c2_372 = arith.constant 2 : index
    %c4_373 = arith.constant 4 : index
    %c0_374 = arith.constant 0 : index
    %572 = vector.load %arg2[%c2_371, %c2_372, %c4_373, %c0_374] : memref<4x5x5x128xf32, #tpu.memory_space<vmem>>, vector<1x1x1x128xf32>
    %573 = vector.shape_cast %572 : vector<1x1x1x128xf32> to vector<128xf32>
    %574 = vector.shape_cast %573 : vector<128xf32> to vector<1x1x128xf32>
    %575 = vector.broadcast %574 : vector<1x1x128xf32> to vector<7x7x128xf32>
    %576 = arith.mulf %571, %575 : vector<7x7x128xf32>
    %577 = arith.addf %564, %576 : vector<7x7x128xf32>
    %c3_375 = arith.constant 3 : index
    %c2_376 = arith.constant 2 : index
    %c3_377 = arith.constant 3 : index
    %c0_378 = arith.constant 0 : index
    %578 = vector.load %arg2[%c3_375, %c2_376, %c3_377, %c0_378] : memref<4x5x5x128xf32, #tpu.memory_space<vmem>>, vector<1x1x1x128xf32>
    %579 = vector.shape_cast %578 : vector<1x1x1x128xf32> to vector<128xf32>
    %580 = vector.shape_cast %579 : vector<128xf32> to vector<1x1x128xf32>
    %581 = vector.broadcast %580 : vector<1x1x128xf32> to vector<7x7x128xf32>
    %582 = arith.mulf %571, %581 : vector<7x7x128xf32>
    %583 = arith.addf %570, %582 : vector<7x7x128xf32>
    %584 = vector.extract_strided_slice %479 {offsets = [4, 0, 0], sizes = [7, 7, 128], strides = [1, 1, 1]} : vector<12x7x128xf32> to vector<7x7x128xf32>
    %c2_379 = arith.constant 2 : index
    %c3_380 = arith.constant 3 : index
    %c4_381 = arith.constant 4 : index
    %c0_382 = arith.constant 0 : index
    %585 = vector.load %arg2[%c2_379, %c3_380, %c4_381, %c0_382] : memref<4x5x5x128xf32, #tpu.memory_space<vmem>>, vector<1x1x1x128xf32>
    %586 = vector.shape_cast %585 : vector<1x1x1x128xf32> to vector<128xf32>
    %587 = vector.shape_cast %586 : vector<128xf32> to vector<1x1x128xf32>
    %588 = vector.broadcast %587 : vector<1x1x128xf32> to vector<7x7x128xf32>
    %589 = arith.mulf %584, %588 : vector<7x7x128xf32>
    %590 = arith.addf %577, %589 : vector<7x7x128xf32>
    %c3_383 = arith.constant 3 : index
    %c3_384 = arith.constant 3 : index
    %c3_385 = arith.constant 3 : index
    %c0_386 = arith.constant 0 : index
    %591 = vector.load %arg2[%c3_383, %c3_384, %c3_385, %c0_386] : memref<4x5x5x128xf32, #tpu.memory_space<vmem>>, vector<1x1x1x128xf32>
    %592 = vector.shape_cast %591 : vector<1x1x1x128xf32> to vector<128xf32>
    %593 = vector.shape_cast %592 : vector<128xf32> to vector<1x1x128xf32>
    %594 = vector.broadcast %593 : vector<1x1x128xf32> to vector<7x7x128xf32>
    %595 = arith.mulf %584, %594 : vector<7x7x128xf32>
    %596 = arith.addf %583, %595 : vector<7x7x128xf32>
    %597 = vector.extract_strided_slice %479 {offsets = [5, 0, 0], sizes = [7, 7, 128], strides = [1, 1, 1]} : vector<12x7x128xf32> to vector<7x7x128xf32>
    %c2_387 = arith.constant 2 : index
    %c4_388 = arith.constant 4 : index
    %c4_389 = arith.constant 4 : index
    %c0_390 = arith.constant 0 : index
    %598 = vector.load %arg2[%c2_387, %c4_388, %c4_389, %c0_390] : memref<4x5x5x128xf32, #tpu.memory_space<vmem>>, vector<1x1x1x128xf32>
    %599 = vector.shape_cast %598 : vector<1x1x1x128xf32> to vector<128xf32>
    %600 = vector.shape_cast %599 : vector<128xf32> to vector<1x1x128xf32>
    %601 = vector.broadcast %600 : vector<1x1x128xf32> to vector<7x7x128xf32>
    %602 = arith.mulf %597, %601 : vector<7x7x128xf32>
    %603 = arith.addf %590, %602 : vector<7x7x128xf32>
    %c3_391 = arith.constant 3 : index
    %c4_392 = arith.constant 4 : index
    %c3_393 = arith.constant 3 : index
    %c0_394 = arith.constant 0 : index
    %604 = vector.load %arg2[%c3_391, %c4_392, %c3_393, %c0_394] : memref<4x5x5x128xf32, #tpu.memory_space<vmem>>, vector<1x1x1x128xf32>
    %605 = vector.shape_cast %604 : vector<1x1x1x128xf32> to vector<128xf32>
    %606 = vector.shape_cast %605 : vector<128xf32> to vector<1x1x128xf32>
    %607 = vector.broadcast %606 : vector<1x1x128xf32> to vector<7x7x128xf32>
    %608 = arith.mulf %597, %607 : vector<7x7x128xf32>
    %609 = arith.addf %596, %608 : vector<7x7x128xf32>
    %c0_395 = arith.constant 0 : index
    %c5 = arith.constant 5 : index
    %c0_396 = arith.constant 0 : index
    %610 = vector.load %arg5[%c0_395, %c5, %c0_396] : memref<12x12x128xf32, #tpu.memory_space<vmem>>, vector<12x7x128xf32>
    %611 = vector.extract_strided_slice %610 {offsets = [0, 0, 0], sizes = [7, 7, 128], strides = [1, 1, 1]} : vector<12x7x128xf32> to vector<7x7x128xf32>
    %c1_397 = arith.constant 1 : index
    %c0_398 = arith.constant 0 : index
    %c4_399 = arith.constant 4 : index
    %c0_400 = arith.constant 0 : index
    %612 = vector.load %arg2[%c1_397, %c0_398, %c4_399, %c0_400] : memref<4x5x5x128xf32, #tpu.memory_space<vmem>>, vector<1x1x1x128xf32>
    %613 = vector.shape_cast %612 : vector<1x1x1x128xf32> to vector<128xf32>
    %614 = vector.shape_cast %613 : vector<128xf32> to vector<1x1x128xf32>
    %615 = vector.broadcast %614 : vector<1x1x128xf32> to vector<7x7x128xf32>
    %616 = arith.mulf %611, %615 : vector<7x7x128xf32>
    %617 = arith.addf %544, %616 : vector<7x7x128xf32>
    %618 = vector.extract_strided_slice %610 {offsets = [1, 0, 0], sizes = [7, 7, 128], strides = [1, 1, 1]} : vector<12x7x128xf32> to vector<7x7x128xf32>
    %c1_401 = arith.constant 1 : index
    %c1_402 = arith.constant 1 : index
    %c4_403 = arith.constant 4 : index
    %c0_404 = arith.constant 0 : index
    %619 = vector.load %arg2[%c1_401, %c1_402, %c4_403, %c0_404] : memref<4x5x5x128xf32, #tpu.memory_space<vmem>>, vector<1x1x1x128xf32>
    %620 = vector.shape_cast %619 : vector<1x1x1x128xf32> to vector<128xf32>
    %621 = vector.shape_cast %620 : vector<128xf32> to vector<1x1x128xf32>
    %622 = vector.broadcast %621 : vector<1x1x128xf32> to vector<7x7x128xf32>
    %623 = arith.mulf %618, %622 : vector<7x7x128xf32>
    %624 = arith.addf %617, %623 : vector<7x7x128xf32>
    %625 = vector.extract_strided_slice %610 {offsets = [2, 0, 0], sizes = [7, 7, 128], strides = [1, 1, 1]} : vector<12x7x128xf32> to vector<7x7x128xf32>
    %c1_405 = arith.constant 1 : index
    %c2_406 = arith.constant 2 : index
    %c4_407 = arith.constant 4 : index
    %c0_408 = arith.constant 0 : index
    %626 = vector.load %arg2[%c1_405, %c2_406, %c4_407, %c0_408] : memref<4x5x5x128xf32, #tpu.memory_space<vmem>>, vector<1x1x1x128xf32>
    %627 = vector.shape_cast %626 : vector<1x1x1x128xf32> to vector<128xf32>
    %628 = vector.shape_cast %627 : vector<128xf32> to vector<1x1x128xf32>
    %629 = vector.broadcast %628 : vector<1x1x128xf32> to vector<7x7x128xf32>
    %630 = arith.mulf %625, %629 : vector<7x7x128xf32>
    %631 = arith.addf %624, %630 : vector<7x7x128xf32>
    %632 = vector.extract_strided_slice %610 {offsets = [3, 0, 0], sizes = [7, 7, 128], strides = [1, 1, 1]} : vector<12x7x128xf32> to vector<7x7x128xf32>
    %c1_409 = arith.constant 1 : index
    %c3_410 = arith.constant 3 : index
    %c4_411 = arith.constant 4 : index
    %c0_412 = arith.constant 0 : index
    %633 = vector.load %arg2[%c1_409, %c3_410, %c4_411, %c0_412] : memref<4x5x5x128xf32, #tpu.memory_space<vmem>>, vector<1x1x1x128xf32>
    %634 = vector.shape_cast %633 : vector<1x1x1x128xf32> to vector<128xf32>
    %635 = vector.shape_cast %634 : vector<128xf32> to vector<1x1x128xf32>
    %636 = vector.broadcast %635 : vector<1x1x128xf32> to vector<7x7x128xf32>
    %637 = arith.mulf %632, %636 : vector<7x7x128xf32>
    %638 = arith.addf %631, %637 : vector<7x7x128xf32>
    %639 = vector.extract_strided_slice %610 {offsets = [4, 0, 0], sizes = [7, 7, 128], strides = [1, 1, 1]} : vector<12x7x128xf32> to vector<7x7x128xf32>
    %c1_413 = arith.constant 1 : index
    %c4_414 = arith.constant 4 : index
    %c4_415 = arith.constant 4 : index
    %c0_416 = arith.constant 0 : index
    %640 = vector.load %arg2[%c1_413, %c4_414, %c4_415, %c0_416] : memref<4x5x5x128xf32, #tpu.memory_space<vmem>>, vector<1x1x1x128xf32>
    %641 = vector.shape_cast %640 : vector<1x1x1x128xf32> to vector<128xf32>
    %642 = vector.shape_cast %641 : vector<128xf32> to vector<1x1x128xf32>
    %643 = vector.broadcast %642 : vector<1x1x128xf32> to vector<7x7x128xf32>
    %644 = arith.mulf %639, %643 : vector<7x7x128xf32>
    %645 = arith.addf %638, %644 : vector<7x7x128xf32>
    %646 = vector.extract_strided_slice %610 {offsets = [1, 0, 0], sizes = [7, 7, 128], strides = [1, 1, 1]} : vector<12x7x128xf32> to vector<7x7x128xf32>
    %c3_417 = arith.constant 3 : index
    %c0_418 = arith.constant 0 : index
    %c4_419 = arith.constant 4 : index
    %c0_420 = arith.constant 0 : index
    %647 = vector.load %arg2[%c3_417, %c0_418, %c4_419, %c0_420] : memref<4x5x5x128xf32, #tpu.memory_space<vmem>>, vector<1x1x1x128xf32>
    %648 = vector.shape_cast %647 : vector<1x1x1x128xf32> to vector<128xf32>
    %649 = vector.shape_cast %648 : vector<128xf32> to vector<1x1x128xf32>
    %650 = vector.broadcast %649 : vector<1x1x128xf32> to vector<7x7x128xf32>
    %651 = arith.mulf %646, %650 : vector<7x7x128xf32>
    %652 = arith.addf %609, %651 : vector<7x7x128xf32>
    %653 = vector.extract_strided_slice %610 {offsets = [2, 0, 0], sizes = [7, 7, 128], strides = [1, 1, 1]} : vector<12x7x128xf32> to vector<7x7x128xf32>
    %c3_421 = arith.constant 3 : index
    %c1_422 = arith.constant 1 : index
    %c4_423 = arith.constant 4 : index
    %c0_424 = arith.constant 0 : index
    %654 = vector.load %arg2[%c3_421, %c1_422, %c4_423, %c0_424] : memref<4x5x5x128xf32, #tpu.memory_space<vmem>>, vector<1x1x1x128xf32>
    %655 = vector.shape_cast %654 : vector<1x1x1x128xf32> to vector<128xf32>
    %656 = vector.shape_cast %655 : vector<128xf32> to vector<1x1x128xf32>
    %657 = vector.broadcast %656 : vector<1x1x128xf32> to vector<7x7x128xf32>
    %658 = arith.mulf %653, %657 : vector<7x7x128xf32>
    %659 = arith.addf %652, %658 : vector<7x7x128xf32>
    %660 = vector.extract_strided_slice %610 {offsets = [3, 0, 0], sizes = [7, 7, 128], strides = [1, 1, 1]} : vector<12x7x128xf32> to vector<7x7x128xf32>
    %c3_425 = arith.constant 3 : index
    %c2_426 = arith.constant 2 : index
    %c4_427 = arith.constant 4 : index
    %c0_428 = arith.constant 0 : index
    %661 = vector.load %arg2[%c3_425, %c2_426, %c4_427, %c0_428] : memref<4x5x5x128xf32, #tpu.memory_space<vmem>>, vector<1x1x1x128xf32>
    %662 = vector.shape_cast %661 : vector<1x1x1x128xf32> to vector<128xf32>
    %663 = vector.shape_cast %662 : vector<128xf32> to vector<1x1x128xf32>
    %664 = vector.broadcast %663 : vector<1x1x128xf32> to vector<7x7x128xf32>
    %665 = arith.mulf %660, %664 : vector<7x7x128xf32>
    %666 = arith.addf %659, %665 : vector<7x7x128xf32>
    %667 = vector.extract_strided_slice %610 {offsets = [4, 0, 0], sizes = [7, 7, 128], strides = [1, 1, 1]} : vector<12x7x128xf32> to vector<7x7x128xf32>
    %c3_429 = arith.constant 3 : index
    %c3_430 = arith.constant 3 : index
    %c4_431 = arith.constant 4 : index
    %c0_432 = arith.constant 0 : index
    %668 = vector.load %arg2[%c3_429, %c3_430, %c4_431, %c0_432] : memref<4x5x5x128xf32, #tpu.memory_space<vmem>>, vector<1x1x1x128xf32>
    %669 = vector.shape_cast %668 : vector<1x1x1x128xf32> to vector<128xf32>
    %670 = vector.shape_cast %669 : vector<128xf32> to vector<1x1x128xf32>
    %671 = vector.broadcast %670 : vector<1x1x128xf32> to vector<7x7x128xf32>
    %672 = arith.mulf %667, %671 : vector<7x7x128xf32>
    %673 = arith.addf %666, %672 : vector<7x7x128xf32>
    %674 = vector.extract_strided_slice %610 {offsets = [5, 0, 0], sizes = [7, 7, 128], strides = [1, 1, 1]} : vector<12x7x128xf32> to vector<7x7x128xf32>
    %c3_433 = arith.constant 3 : index
    %c4_434 = arith.constant 4 : index
    %c4_435 = arith.constant 4 : index
    %c0_436 = arith.constant 0 : index
    %675 = vector.load %arg2[%c3_433, %c4_434, %c4_435, %c0_436] : memref<4x5x5x128xf32, #tpu.memory_space<vmem>>, vector<1x1x1x128xf32>
    %676 = vector.shape_cast %675 : vector<1x1x1x128xf32> to vector<128xf32>
    %677 = vector.shape_cast %676 : vector<128xf32> to vector<1x1x128xf32>
    %678 = vector.broadcast %677 : vector<1x1x128xf32> to vector<7x7x128xf32>
    %679 = arith.mulf %674, %678 : vector<7x7x128xf32>
    %680 = arith.addf %673, %679 : vector<7x7x128xf32>
    %681 = vector.shape_cast %7 : vector<128xf32> to vector<1x1x128xf32>
    %682 = vector.broadcast %681 : vector<1x1x128xf32> to vector<7x7x128xf32>
    %683 = arith.addf %538, %682 : vector<7x7x128xf32>
    %cst_437 = arith.constant 0.000000e+00 : f32
    %cst_438 = arith.constant 6.000000e+00 : f32
    %684 = vector.broadcast %cst_437 : f32 to vector<7x7x128xf32>
    %685 = arith.maximumf %684, %683 : vector<7x7x128xf32>
    %686 = vector.broadcast %cst_438 : f32 to vector<7x7x128xf32>
    %687 = arith.minimumf %686, %685 : vector<7x7x128xf32>
    %cst_439 = arith.constant 0.166666672 : f32
    %688 = vector.broadcast %cst_439 : f32 to vector<7x7x128xf32>
    %689 = arith.mulf %687, %688 : vector<7x7x128xf32>
    %690 = vector.extract_strided_slice %689 {offsets = [0, 0, 0], sizes = [1, 7, 128], strides = [1, 1, 1]} : vector<7x7x128xf32> to vector<1x7x128xf32>
    %691 = vector.shape_cast %690 : vector<1x7x128xf32> to vector<7x128xf32>
    %c0_440 = arith.constant 0 : index
    %c0_441 = arith.constant 0 : index
    %c0_442 = arith.constant 0 : index
    %c0_443 = arith.constant 0 : index
    %c0_444 = arith.constant 0 : index
    %692 = vector.load %arg4[%c0_440, %c0_441, %c0_442, %c0_443, %c0_444] : memref<1x14x2x7x128xf32, #tpu.memory_space<vmem>>, vector<1x1x1x7x128xf32>
    %693 = vector.shape_cast %692 : vector<1x1x1x7x128xf32> to vector<7x128xf32>
    %694 = vector.shape_cast %691 : vector<7x128xf32> to vector<1x1x1x7x128xf32>
    tpu.vector_store %arg4[%c0_440, %c0_441, %c0_442, %c0_443, %c0_444], %694 {strides = array<i32>} : memref<1x14x2x7x128xf32, #tpu.memory_space<vmem>>, vector<1x1x1x7x128xf32>,
    %695 = vector.extract_strided_slice %689 {offsets = [1, 0, 0], sizes = [1, 7, 128], strides = [1, 1, 1]} : vector<7x7x128xf32> to vector<1x7x128xf32>
    %696 = vector.shape_cast %695 : vector<1x7x128xf32> to vector<7x128xf32>
    %c0_445 = arith.constant 0 : index
    %c2_446 = arith.constant 2 : index
    %c0_447 = arith.constant 0 : index
    %c0_448 = arith.constant 0 : index
    %c0_449 = arith.constant 0 : index
    %697 = vector.load %arg4[%c0_445, %c2_446, %c0_447, %c0_448, %c0_449] : memref<1x14x2x7x128xf32, #tpu.memory_space<vmem>>, vector<1x1x1x7x128xf32>
    %698 = vector.shape_cast %697 : vector<1x1x1x7x128xf32> to vector<7x128xf32>
    %699 = vector.shape_cast %696 : vector<7x128xf32> to vector<1x1x1x7x128xf32>
    tpu.vector_store %arg4[%c0_445, %c2_446, %c0_447, %c0_448, %c0_449], %699 {strides = array<i32>} : memref<1x14x2x7x128xf32, #tpu.memory_space<vmem>>, vector<1x1x1x7x128xf32>,
    %700 = vector.extract_strided_slice %689 {offsets = [2, 0, 0], sizes = [1, 7, 128], strides = [1, 1, 1]} : vector<7x7x128xf32> to vector<1x7x128xf32>
    %701 = vector.shape_cast %700 : vector<1x7x128xf32> to vector<7x128xf32>
    %c0_450 = arith.constant 0 : index
    %c4_451 = arith.constant 4 : index
    %c0_452 = arith.constant 0 : index
    %c0_453 = arith.constant 0 : index
    %c0_454 = arith.constant 0 : index
    %702 = vector.load %arg4[%c0_450, %c4_451, %c0_452, %c0_453, %c0_454] : memref<1x14x2x7x128xf32, #tpu.memory_space<vmem>>, vector<1x1x1x7x128xf32>
    %703 = vector.shape_cast %702 : vector<1x1x1x7x128xf32> to vector<7x128xf32>
    %704 = vector.shape_cast %701 : vector<7x128xf32> to vector<1x1x1x7x128xf32>
    tpu.vector_store %arg4[%c0_450, %c4_451, %c0_452, %c0_453, %c0_454], %704 {strides = array<i32>} : memref<1x14x2x7x128xf32, #tpu.memory_space<vmem>>, vector<1x1x1x7x128xf32>,
    %705 = vector.extract_strided_slice %689 {offsets = [3, 0, 0], sizes = [1, 7, 128], strides = [1, 1, 1]} : vector<7x7x128xf32> to vector<1x7x128xf32>
    %706 = vector.shape_cast %705 : vector<1x7x128xf32> to vector<7x128xf32>
    %c0_455 = arith.constant 0 : index
    %c6 = arith.constant 6 : index
    %c0_456 = arith.constant 0 : index
    %c0_457 = arith.constant 0 : index
    %c0_458 = arith.constant 0 : index
    %707 = vector.load %arg4[%c0_455, %c6, %c0_456, %c0_457, %c0_458] : memref<1x14x2x7x128xf32, #tpu.memory_space<vmem>>, vector<1x1x1x7x128xf32>
    %708 = vector.shape_cast %707 : vector<1x1x1x7x128xf32> to vector<7x128xf32>
    %709 = vector.shape_cast %706 : vector<7x128xf32> to vector<1x1x1x7x128xf32>
    tpu.vector_store %arg4[%c0_455, %c6, %c0_456, %c0_457, %c0_458], %709 {strides = array<i32>} : memref<1x14x2x7x128xf32, #tpu.memory_space<vmem>>, vector<1x1x1x7x128xf32>,
    %710 = vector.extract_strided_slice %689 {offsets = [4, 0, 0], sizes = [1, 7, 128], strides = [1, 1, 1]} : vector<7x7x128xf32> to vector<1x7x128xf32>
    %711 = vector.shape_cast %710 : vector<1x7x128xf32> to vector<7x128xf32>
    %c0_459 = arith.constant 0 : index
    %c8 = arith.constant 8 : index
    %c0_460 = arith.constant 0 : index
    %c0_461 = arith.constant 0 : index
    %c0_462 = arith.constant 0 : index
    %712 = vector.load %arg4[%c0_459, %c8, %c0_460, %c0_461, %c0_462] : memref<1x14x2x7x128xf32, #tpu.memory_space<vmem>>, vector<1x1x1x7x128xf32>
    %713 = vector.shape_cast %712 : vector<1x1x1x7x128xf32> to vector<7x128xf32>
    %714 = vector.shape_cast %711 : vector<7x128xf32> to vector<1x1x1x7x128xf32>
    tpu.vector_store %arg4[%c0_459, %c8, %c0_460, %c0_461, %c0_462], %714 {strides = array<i32>} : memref<1x14x2x7x128xf32, #tpu.memory_space<vmem>>, vector<1x1x1x7x128xf32>,
    %715 = vector.extract_strided_slice %689 {offsets = [5, 0, 0], sizes = [1, 7, 128], strides = [1, 1, 1]} : vector<7x7x128xf32> to vector<1x7x128xf32>
    %716 = vector.shape_cast %715 : vector<1x7x128xf32> to vector<7x128xf32>
    %c0_463 = arith.constant 0 : index
    %c10_464 = arith.constant 10 : index
    %c0_465 = arith.constant 0 : index
    %c0_466 = arith.constant 0 : index
    %c0_467 = arith.constant 0 : index
    %717 = vector.load %arg4[%c0_463, %c10_464, %c0_465, %c0_466, %c0_467] : memref<1x14x2x7x128xf32, #tpu.memory_space<vmem>>, vector<1x1x1x7x128xf32>
    %718 = vector.shape_cast %717 : vector<1x1x1x7x128xf32> to vector<7x128xf32>
    %719 = vector.shape_cast %716 : vector<7x128xf32> to vector<1x1x1x7x128xf32>
    tpu.vector_store %arg4[%c0_463, %c10_464, %c0_465, %c0_466, %c0_467], %719 {strides = array<i32>} : memref<1x14x2x7x128xf32, #tpu.memory_space<vmem>>, vector<1x1x1x7x128xf32>,
    %720 = vector.extract_strided_slice %689 {offsets = [6, 0, 0], sizes = [1, 7, 128], strides = [1, 1, 1]} : vector<7x7x128xf32> to vector<1x7x128xf32>
    %721 = vector.shape_cast %720 : vector<1x7x128xf32> to vector<7x128xf32>
    %c0_468 = arith.constant 0 : index
    %c12 = arith.constant 12 : index
    %c0_469 = arith.constant 0 : index
    %c0_470 = arith.constant 0 : index
    %c0_471 = arith.constant 0 : index
    %722 = vector.load %arg4[%c0_468, %c12, %c0_469, %c0_470, %c0_471] : memref<1x14x2x7x128xf32, #tpu.memory_space<vmem>>, vector<1x1x1x7x128xf32>
    %723 = vector.shape_cast %722 : vector<1x1x1x7x128xf32> to vector<7x128xf32>
    %724 = vector.shape_cast %721 : vector<7x128xf32> to vector<1x1x1x7x128xf32>
    tpu.vector_store %arg4[%c0_468, %c12, %c0_469, %c0_470, %c0_471], %724 {strides = array<i32>} : memref<1x14x2x7x128xf32, #tpu.memory_space<vmem>>, vector<1x1x1x7x128xf32>,
    %725 = vector.shape_cast %7 : vector<128xf32> to vector<1x1x128xf32>
    %726 = vector.broadcast %725 : vector<1x1x128xf32> to vector<7x7x128xf32>
    %727 = arith.addf %645, %726 : vector<7x7x128xf32>
    %cst_472 = arith.constant 0.000000e+00 : f32
    %cst_473 = arith.constant 6.000000e+00 : f32
    %728 = vector.broadcast %cst_472 : f32 to vector<7x7x128xf32>
    %729 = arith.maximumf %728, %727 : vector<7x7x128xf32>
    %730 = vector.broadcast %cst_473 : f32 to vector<7x7x128xf32>
    %731 = arith.minimumf %730, %729 : vector<7x7x128xf32>
    %cst_474 = arith.constant 0.166666672 : f32
    %732 = vector.broadcast %cst_474 : f32 to vector<7x7x128xf32>
    %733 = arith.mulf %731, %732 : vector<7x7x128xf32>
    %734 = vector.extract_strided_slice %733 {offsets = [0, 0, 0], sizes = [1, 7, 128], strides = [1, 1, 1]} : vector<7x7x128xf32> to vector<1x7x128xf32>
    %735 = vector.shape_cast %734 : vector<1x7x128xf32> to vector<7x128xf32>
    %c0_475 = arith.constant 0 : index
    %c0_476 = arith.constant 0 : index
    %c1_477 = arith.constant 1 : index
    %c0_478 = arith.constant 0 : index
    %c0_479 = arith.constant 0 : index
    %736 = vector.load %arg4[%c0_475, %c0_476, %c1_477, %c0_478, %c0_479] : memref<1x14x2x7x128xf32, #tpu.memory_space<vmem>>, vector<1x1x1x7x128xf32>
    %737 = vector.shape_cast %736 : vector<1x1x1x7x128xf32> to vector<7x128xf32>
    %738 = vector.shape_cast %735 : vector<7x128xf32> to vector<1x1x1x7x128xf32>
    tpu.vector_store %arg4[%c0_475, %c0_476, %c1_477, %c0_478, %c0_479], %738 {strides = array<i32>} : memref<1x14x2x7x128xf32, #tpu.memory_space<vmem>>, vector<1x1x1x7x128xf32>,
    %739 = vector.extract_strided_slice %733 {offsets = [1, 0, 0], sizes = [1, 7, 128], strides = [1, 1, 1]} : vector<7x7x128xf32> to vector<1x7x128xf32>
    %740 = vector.shape_cast %739 : vector<1x7x128xf32> to vector<7x128xf32>
    %c0_480 = arith.constant 0 : index
    %c2_481 = arith.constant 2 : index
    %c1_482 = arith.constant 1 : index
    %c0_483 = arith.constant 0 : index
    %c0_484 = arith.constant 0 : index
    %741 = vector.load %arg4[%c0_480, %c2_481, %c1_482, %c0_483, %c0_484] : memref<1x14x2x7x128xf32, #tpu.memory_space<vmem>>, vector<1x1x1x7x128xf32>
    %742 = vector.shape_cast %741 : vector<1x1x1x7x128xf32> to vector<7x128xf32>
    %743 = vector.shape_cast %740 : vector<7x128xf32> to vector<1x1x1x7x128xf32>
    tpu.vector_store %arg4[%c0_480, %c2_481, %c1_482, %c0_483, %c0_484], %743 {strides = array<i32>} : memref<1x14x2x7x128xf32, #tpu.memory_space<vmem>>, vector<1x1x1x7x128xf32>,
    %744 = vector.extract_strided_slice %733 {offsets = [2, 0, 0], sizes = [1, 7, 128], strides = [1, 1, 1]} : vector<7x7x128xf32> to vector<1x7x128xf32>
    %745 = vector.shape_cast %744 : vector<1x7x128xf32> to vector<7x128xf32>
    %c0_485 = arith.constant 0 : index
    %c4_486 = arith.constant 4 : index
    %c1_487 = arith.constant 1 : index
    %c0_488 = arith.constant 0 : index
    %c0_489 = arith.constant 0 : index
    %746 = vector.load %arg4[%c0_485, %c4_486, %c1_487, %c0_488, %c0_489] : memref<1x14x2x7x128xf32, #tpu.memory_space<vmem>>, vector<1x1x1x7x128xf32>
    %747 = vector.shape_cast %746 : vector<1x1x1x7x128xf32> to vector<7x128xf32>
    %748 = vector.shape_cast %745 : vector<7x128xf32> to vector<1x1x1x7x128xf32>
    tpu.vector_store %arg4[%c0_485, %c4_486, %c1_487, %c0_488, %c0_489], %748 {strides = array<i32>} : memref<1x14x2x7x128xf32, #tpu.memory_space<vmem>>, vector<1x1x1x7x128xf32>,
    %749 = vector.extract_strided_slice %733 {offsets = [3, 0, 0], sizes = [1, 7, 128], strides = [1, 1, 1]} : vector<7x7x128xf32> to vector<1x7x128xf32>
    %750 = vector.shape_cast %749 : vector<1x7x128xf32> to vector<7x128xf32>
    %c0_490 = arith.constant 0 : index
    %c6_491 = arith.constant 6 : index
    %c1_492 = arith.constant 1 : index
    %c0_493 = arith.constant 0 : index
    %c0_494 = arith.constant 0 : index
    %751 = vector.load %arg4[%c0_490, %c6_491, %c1_492, %c0_493, %c0_494] : memref<1x14x2x7x128xf32, #tpu.memory_space<vmem>>, vector<1x1x1x7x128xf32>
    %752 = vector.shape_cast %751 : vector<1x1x1x7x128xf32> to vector<7x128xf32>
    %753 = vector.shape_cast %750 : vector<7x128xf32> to vector<1x1x1x7x128xf32>
    tpu.vector_store %arg4[%c0_490, %c6_491, %c1_492, %c0_493, %c0_494], %753 {strides = array<i32>} : memref<1x14x2x7x128xf32, #tpu.memory_space<vmem>>, vector<1x1x1x7x128xf32>,
    %754 = vector.extract_strided_slice %733 {offsets = [4, 0, 0], sizes = [1, 7, 128], strides = [1, 1, 1]} : vector<7x7x128xf32> to vector<1x7x128xf32>
    %755 = vector.shape_cast %754 : vector<1x7x128xf32> to vector<7x128xf32>
    %c0_495 = arith.constant 0 : index
    %c8_496 = arith.constant 8 : index
    %c1_497 = arith.constant 1 : index
    %c0_498 = arith.constant 0 : index
    %c0_499 = arith.constant 0 : index
    %756 = vector.load %arg4[%c0_495, %c8_496, %c1_497, %c0_498, %c0_499] : memref<1x14x2x7x128xf32, #tpu.memory_space<vmem>>, vector<1x1x1x7x128xf32>
    %757 = vector.shape_cast %756 : vector<1x1x1x7x128xf32> to vector<7x128xf32>
    %758 = vector.shape_cast %755 : vector<7x128xf32> to vector<1x1x1x7x128xf32>
    tpu.vector_store %arg4[%c0_495, %c8_496, %c1_497, %c0_498, %c0_499], %758 {strides = array<i32>} : memref<1x14x2x7x128xf32, #tpu.memory_space<vmem>>, vector<1x1x1x7x128xf32>,
    %759 = vector.extract_strided_slice %733 {offsets = [5, 0, 0], sizes = [1, 7, 128], strides = [1, 1, 1]} : vector<7x7x128xf32> to vector<1x7x128xf32>
    %760 = vector.shape_cast %759 : vector<1x7x128xf32> to vector<7x128xf32>
    %c0_500 = arith.constant 0 : index
    %c10_501 = arith.constant 10 : index
    %c1_502 = arith.constant 1 : index
    %c0_503 = arith.constant 0 : index
    %c0_504 = arith.constant 0 : index
    %761 = vector.load %arg4[%c0_500, %c10_501, %c1_502, %c0_503, %c0_504] : memref<1x14x2x7x128xf32, #tpu.memory_space<vmem>>, vector<1x1x1x7x128xf32>
    %762 = vector.shape_cast %761 : vector<1x1x1x7x128xf32> to vector<7x128xf32>
    %763 = vector.shape_cast %760 : vector<7x128xf32> to vector<1x1x1x7x128xf32>
    tpu.vector_store %arg4[%c0_500, %c10_501, %c1_502, %c0_503, %c0_504], %763 {strides = array<i32>} : memref<1x14x2x7x128xf32, #tpu.memory_space<vmem>>, vector<1x1x1x7x128xf32>,
    %764 = vector.extract_strided_slice %733 {offsets = [6, 0, 0], sizes = [1, 7, 128], strides = [1, 1, 1]} : vector<7x7x128xf32> to vector<1x7x128xf32>
    %765 = vector.shape_cast %764 : vector<1x7x128xf32> to vector<7x128xf32>
    %c0_505 = arith.constant 0 : index
    %c12_506 = arith.constant 12 : index
    %c1_507 = arith.constant 1 : index
    %c0_508 = arith.constant 0 : index
    %c0_509 = arith.constant 0 : index
    %766 = vector.load %arg4[%c0_505, %c12_506, %c1_507, %c0_508, %c0_509] : memref<1x14x2x7x128xf32, #tpu.memory_space<vmem>>, vector<1x1x1x7x128xf32>
    %767 = vector.shape_cast %766 : vector<1x1x1x7x128xf32> to vector<7x128xf32>
    %768 = vector.shape_cast %765 : vector<7x128xf32> to vector<1x1x1x7x128xf32>
    tpu.vector_store %arg4[%c0_505, %c12_506, %c1_507, %c0_508, %c0_509], %768 {strides = array<i32>} : memref<1x14x2x7x128xf32, #tpu.memory_space<vmem>>, vector<1x1x1x7x128xf32>,
    %769 = vector.shape_cast %7 : vector<128xf32> to vector<1x1x128xf32>
    %770 = vector.broadcast %769 : vector<1x1x128xf32> to vector<7x7x128xf32>
    %771 = arith.addf %603, %770 : vector<7x7x128xf32>
    %cst_510 = arith.constant 0.000000e+00 : f32
    %cst_511 = arith.constant 6.000000e+00 : f32
    %772 = vector.broadcast %cst_510 : f32 to vector<7x7x128xf32>
    %773 = arith.maximumf %772, %771 : vector<7x7x128xf32>
    %774 = vector.broadcast %cst_511 : f32 to vector<7x7x128xf32>
    %775 = arith.minimumf %774, %773 : vector<7x7x128xf32>
    %cst_512 = arith.constant 0.166666672 : f32
    %776 = vector.broadcast %cst_512 : f32 to vector<7x7x128xf32>
    %777 = arith.mulf %775, %776 : vector<7x7x128xf32>
    %778 = vector.extract_strided_slice %777 {offsets = [0, 0, 0], sizes = [1, 7, 128], strides = [1, 1, 1]} : vector<7x7x128xf32> to vector<1x7x128xf32>
    %779 = vector.shape_cast %778 : vector<1x7x128xf32> to vector<7x128xf32>
    %c0_513 = arith.constant 0 : index
    %c1_514 = arith.constant 1 : index
    %c0_515 = arith.constant 0 : index
    %c0_516 = arith.constant 0 : index
    %c0_517 = arith.constant 0 : index
    %780 = vector.load %arg4[%c0_513, %c1_514, %c0_515, %c0_516, %c0_517] : memref<1x14x2x7x128xf32, #tpu.memory_space<vmem>>, vector<1x1x1x7x128xf32>
    %781 = vector.shape_cast %780 : vector<1x1x1x7x128xf32> to vector<7x128xf32>
    %782 = vector.shape_cast %779 : vector<7x128xf32> to vector<1x1x1x7x128xf32>
    tpu.vector_store %arg4[%c0_513, %c1_514, %c0_515, %c0_516, %c0_517], %782 {strides = array<i32>} : memref<1x14x2x7x128xf32, #tpu.memory_space<vmem>>, vector<1x1x1x7x128xf32>,
    %783 = vector.extract_strided_slice %777 {offsets = [1, 0, 0], sizes = [1, 7, 128], strides = [1, 1, 1]} : vector<7x7x128xf32> to vector<1x7x128xf32>
    %784 = vector.shape_cast %783 : vector<1x7x128xf32> to vector<7x128xf32>
    %c0_518 = arith.constant 0 : index
    %c3_519 = arith.constant 3 : index
    %c0_520 = arith.constant 0 : index
    %c0_521 = arith.constant 0 : index
    %c0_522 = arith.constant 0 : index
    %785 = vector.load %arg4[%c0_518, %c3_519, %c0_520, %c0_521, %c0_522] : memref<1x14x2x7x128xf32, #tpu.memory_space<vmem>>, vector<1x1x1x7x128xf32>
    %786 = vector.shape_cast %785 : vector<1x1x1x7x128xf32> to vector<7x128xf32>
    %787 = vector.shape_cast %784 : vector<7x128xf32> to vector<1x1x1x7x128xf32>
    tpu.vector_store %arg4[%c0_518, %c3_519, %c0_520, %c0_521, %c0_522], %787 {strides = array<i32>} : memref<1x14x2x7x128xf32, #tpu.memory_space<vmem>>, vector<1x1x1x7x128xf32>,
    %788 = vector.extract_strided_slice %777 {offsets = [2, 0, 0], sizes = [1, 7, 128], strides = [1, 1, 1]} : vector<7x7x128xf32> to vector<1x7x128xf32>
    %789 = vector.shape_cast %788 : vector<1x7x128xf32> to vector<7x128xf32>
    %c0_523 = arith.constant 0 : index
    %c5_524 = arith.constant 5 : index
    %c0_525 = arith.constant 0 : index
    %c0_526 = arith.constant 0 : index
    %c0_527 = arith.constant 0 : index
    %790 = vector.load %arg4[%c0_523, %c5_524, %c0_525, %c0_526, %c0_527] : memref<1x14x2x7x128xf32, #tpu.memory_space<vmem>>, vector<1x1x1x7x128xf32>
    %791 = vector.shape_cast %790 : vector<1x1x1x7x128xf32> to vector<7x128xf32>
    %792 = vector.shape_cast %789 : vector<7x128xf32> to vector<1x1x1x7x128xf32>
    tpu.vector_store %arg4[%c0_523, %c5_524, %c0_525, %c0_526, %c0_527], %792 {strides = array<i32>} : memref<1x14x2x7x128xf32, #tpu.memory_space<vmem>>, vector<1x1x1x7x128xf32>,
    %793 = vector.extract_strided_slice %777 {offsets = [3, 0, 0], sizes = [1, 7, 128], strides = [1, 1, 1]} : vector<7x7x128xf32> to vector<1x7x128xf32>
    %794 = vector.shape_cast %793 : vector<1x7x128xf32> to vector<7x128xf32>
    %c0_528 = arith.constant 0 : index
    %c7 = arith.constant 7 : index
    %c0_529 = arith.constant 0 : index
    %c0_530 = arith.constant 0 : index
    %c0_531 = arith.constant 0 : index
    %795 = vector.load %arg4[%c0_528, %c7, %c0_529, %c0_530, %c0_531] : memref<1x14x2x7x128xf32, #tpu.memory_space<vmem>>, vector<1x1x1x7x128xf32>
    %796 = vector.shape_cast %795 : vector<1x1x1x7x128xf32> to vector<7x128xf32>
    %797 = vector.shape_cast %794 : vector<7x128xf32> to vector<1x1x1x7x128xf32>
    tpu.vector_store %arg4[%c0_528, %c7, %c0_529, %c0_530, %c0_531], %797 {strides = array<i32>} : memref<1x14x2x7x128xf32, #tpu.memory_space<vmem>>, vector<1x1x1x7x128xf32>,
    %798 = vector.extract_strided_slice %777 {offsets = [4, 0, 0], sizes = [1, 7, 128], strides = [1, 1, 1]} : vector<7x7x128xf32> to vector<1x7x128xf32>
    %799 = vector.shape_cast %798 : vector<1x7x128xf32> to vector<7x128xf32>
    %c0_532 = arith.constant 0 : index
    %c9 = arith.constant 9 : index
    %c0_533 = arith.constant 0 : index
    %c0_534 = arith.constant 0 : index
    %c0_535 = arith.constant 0 : index
    %800 = vector.load %arg4[%c0_532, %c9, %c0_533, %c0_534, %c0_535] : memref<1x14x2x7x128xf32, #tpu.memory_space<vmem>>, vector<1x1x1x7x128xf32>
    %801 = vector.shape_cast %800 : vector<1x1x1x7x128xf32> to vector<7x128xf32>
    %802 = vector.shape_cast %799 : vector<7x128xf32> to vector<1x1x1x7x128xf32>
    tpu.vector_store %arg4[%c0_532, %c9, %c0_533, %c0_534, %c0_535], %802 {strides = array<i32>} : memref<1x14x2x7x128xf32, #tpu.memory_space<vmem>>, vector<1x1x1x7x128xf32>,
    %803 = vector.extract_strided_slice %777 {offsets = [5, 0, 0], sizes = [1, 7, 128], strides = [1, 1, 1]} : vector<7x7x128xf32> to vector<1x7x128xf32>
    %804 = vector.shape_cast %803 : vector<1x7x128xf32> to vector<7x128xf32>
    %c0_536 = arith.constant 0 : index
    %c11 = arith.constant 11 : index
    %c0_537 = arith.constant 0 : index
    %c0_538 = arith.constant 0 : index
    %c0_539 = arith.constant 0 : index
    %805 = vector.load %arg4[%c0_536, %c11, %c0_537, %c0_538, %c0_539] : memref<1x14x2x7x128xf32, #tpu.memory_space<vmem>>, vector<1x1x1x7x128xf32>
    %806 = vector.shape_cast %805 : vector<1x1x1x7x128xf32> to vector<7x128xf32>
    %807 = vector.shape_cast %804 : vector<7x128xf32> to vector<1x1x1x7x128xf32>
    tpu.vector_store %arg4[%c0_536, %c11, %c0_537, %c0_538, %c0_539], %807 {strides = array<i32>} : memref<1x14x2x7x128xf32, #tpu.memory_space<vmem>>, vector<1x1x1x7x128xf32>,
    %808 = vector.extract_strided_slice %777 {offsets = [6, 0, 0], sizes = [1, 7, 128], strides = [1, 1, 1]} : vector<7x7x128xf32> to vector<1x7x128xf32>
    %809 = vector.shape_cast %808 : vector<1x7x128xf32> to vector<7x128xf32>
    %c0_540 = arith.constant 0 : index
    %c13 = arith.constant 13 : index
    %c0_541 = arith.constant 0 : index
    %c0_542 = arith.constant 0 : index
    %c0_543 = arith.constant 0 : index
    %810 = vector.load %arg4[%c0_540, %c13, %c0_541, %c0_542, %c0_543] : memref<1x14x2x7x128xf32, #tpu.memory_space<vmem>>, vector<1x1x1x7x128xf32>
    %811 = vector.shape_cast %810 : vector<1x1x1x7x128xf32> to vector<7x128xf32>
    %812 = vector.shape_cast %809 : vector<7x128xf32> to vector<1x1x1x7x128xf32>
    tpu.vector_store %arg4[%c0_540, %c13, %c0_541, %c0_542, %c0_543], %812 {strides = array<i32>} : memref<1x14x2x7x128xf32, #tpu.memory_space<vmem>>, vector<1x1x1x7x128xf32>,
    %813 = vector.shape_cast %7 : vector<128xf32> to vector<1x1x128xf32>
    %814 = vector.broadcast %813 : vector<1x1x128xf32> to vector<7x7x128xf32>
    %815 = arith.addf %680, %814 : vector<7x7x128xf32>
    %cst_544 = arith.constant 0.000000e+00 : f32
    %cst_545 = arith.constant 6.000000e+00 : f32
    %816 = vector.broadcast %cst_544 : f32 to vector<7x7x128xf32>
    %817 = arith.maximumf %816, %815 : vector<7x7x128xf32>
    %818 = vector.broadcast %cst_545 : f32 to vector<7x7x128xf32>
    %819 = arith.minimumf %818, %817 : vector<7x7x128xf32>
    %cst_546 = arith.constant 0.166666672 : f32
    %820 = vector.broadcast %cst_546 : f32 to vector<7x7x128xf32>
    %821 = arith.mulf %819, %820 : vector<7x7x128xf32>
    %822 = vector.extract_strided_slice %821 {offsets = [0, 0, 0], sizes = [1, 7, 128], strides = [1, 1, 1]} : vector<7x7x128xf32> to vector<1x7x128xf32>
    %823 = vector.shape_cast %822 : vector<1x7x128xf32> to vector<7x128xf32>
    %c0_547 = arith.constant 0 : index
    %c1_548 = arith.constant 1 : index
    %c1_549 = arith.constant 1 : index
    %c0_550 = arith.constant 0 : index
    %c0_551 = arith.constant 0 : index
    %824 = vector.load %arg4[%c0_547, %c1_548, %c1_549, %c0_550, %c0_551] : memref<1x14x2x7x128xf32, #tpu.memory_space<vmem>>, vector<1x1x1x7x128xf32>
    %825 = vector.shape_cast %824 : vector<1x1x1x7x128xf32> to vector<7x128xf32>
    %826 = vector.shape_cast %823 : vector<7x128xf32> to vector<1x1x1x7x128xf32>
    tpu.vector_store %arg4[%c0_547, %c1_548, %c1_549, %c0_550, %c0_551], %826 {strides = array<i32>} : memref<1x14x2x7x128xf32, #tpu.memory_space<vmem>>, vector<1x1x1x7x128xf32>,
    %827 = vector.extract_strided_slice %821 {offsets = [1, 0, 0], sizes = [1, 7, 128], strides = [1, 1, 1]} : vector<7x7x128xf32> to vector<1x7x128xf32>
    %828 = vector.shape_cast %827 : vector<1x7x128xf32> to vector<7x128xf32>
    %c0_552 = arith.constant 0 : index
    %c3_553 = arith.constant 3 : index
    %c1_554 = arith.constant 1 : index
    %c0_555 = arith.constant 0 : index
    %c0_556 = arith.constant 0 : index
    %829 = vector.load %arg4[%c0_552, %c3_553, %c1_554, %c0_555, %c0_556] : memref<1x14x2x7x128xf32, #tpu.memory_space<vmem>>, vector<1x1x1x7x128xf32>
    %830 = vector.shape_cast %829 : vector<1x1x1x7x128xf32> to vector<7x128xf32>
    %831 = vector.shape_cast %828 : vector<7x128xf32> to vector<1x1x1x7x128xf32>
    tpu.vector_store %arg4[%c0_552, %c3_553, %c1_554, %c0_555, %c0_556], %831 {strides = array<i32>} : memref<1x14x2x7x128xf32, #tpu.memory_space<vmem>>, vector<1x1x1x7x128xf32>,
    %832 = vector.extract_strided_slice %821 {offsets = [2, 0, 0], sizes = [1, 7, 128], strides = [1, 1, 1]} : vector<7x7x128xf32> to vector<1x7x128xf32>
    %833 = vector.shape_cast %832 : vector<1x7x128xf32> to vector<7x128xf32>
    %c0_557 = arith.constant 0 : index
    %c5_558 = arith.constant 5 : index
    %c1_559 = arith.constant 1 : index
    %c0_560 = arith.constant 0 : index
    %c0_561 = arith.constant 0 : index
    %834 = vector.load %arg4[%c0_557, %c5_558, %c1_559, %c0_560, %c0_561] : memref<1x14x2x7x128xf32, #tpu.memory_space<vmem>>, vector<1x1x1x7x128xf32>
    %835 = vector.shape_cast %834 : vector<1x1x1x7x128xf32> to vector<7x128xf32>
    %836 = vector.shape_cast %833 : vector<7x128xf32> to vector<1x1x1x7x128xf32>
    tpu.vector_store %arg4[%c0_557, %c5_558, %c1_559, %c0_560, %c0_561], %836 {strides = array<i32>} : memref<1x14x2x7x128xf32, #tpu.memory_space<vmem>>, vector<1x1x1x7x128xf32>,
    %837 = vector.extract_strided_slice %821 {offsets = [3, 0, 0], sizes = [1, 7, 128], strides = [1, 1, 1]} : vector<7x7x128xf32> to vector<1x7x128xf32>
    %838 = vector.shape_cast %837 : vector<1x7x128xf32> to vector<7x128xf32>
    %c0_562 = arith.constant 0 : index
    %c7_563 = arith.constant 7 : index
    %c1_564 = arith.constant 1 : index
    %c0_565 = arith.constant 0 : index
    %c0_566 = arith.constant 0 : index
    %839 = vector.load %arg4[%c0_562, %c7_563, %c1_564, %c0_565, %c0_566] : memref<1x14x2x7x128xf32, #tpu.memory_space<vmem>>, vector<1x1x1x7x128xf32>
    %840 = vector.shape_cast %839 : vector<1x1x1x7x128xf32> to vector<7x128xf32>
    %841 = vector.shape_cast %838 : vector<7x128xf32> to vector<1x1x1x7x128xf32>
    tpu.vector_store %arg4[%c0_562, %c7_563, %c1_564, %c0_565, %c0_566], %841 {strides = array<i32>} : memref<1x14x2x7x128xf32, #tpu.memory_space<vmem>>, vector<1x1x1x7x128xf32>,
    %842 = vector.extract_strided_slice %821 {offsets = [4, 0, 0], sizes = [1, 7, 128], strides = [1, 1, 1]} : vector<7x7x128xf32> to vector<1x7x128xf32>
    %843 = vector.shape_cast %842 : vector<1x7x128xf32> to vector<7x128xf32>
    %c0_567 = arith.constant 0 : index
    %c9_568 = arith.constant 9 : index
    %c1_569 = arith.constant 1 : index
    %c0_570 = arith.constant 0 : index
    %c0_571 = arith.constant 0 : index
    %844 = vector.load %arg4[%c0_567, %c9_568, %c1_569, %c0_570, %c0_571] : memref<1x14x2x7x128xf32, #tpu.memory_space<vmem>>, vector<1x1x1x7x128xf32>
    %845 = vector.shape_cast %844 : vector<1x1x1x7x128xf32> to vector<7x128xf32>
    %846 = vector.shape_cast %843 : vector<7x128xf32> to vector<1x1x1x7x128xf32>
    tpu.vector_store %arg4[%c0_567, %c9_568, %c1_569, %c0_570, %c0_571], %846 {strides = array<i32>} : memref<1x14x2x7x128xf32, #tpu.memory_space<vmem>>, vector<1x1x1x7x128xf32>,
    %847 = vector.extract_strided_slice %821 {offsets = [5, 0, 0], sizes = [1, 7, 128], strides = [1, 1, 1]} : vector<7x7x128xf32> to vector<1x7x128xf32>
    %848 = vector.shape_cast %847 : vector<1x7x128xf32> to vector<7x128xf32>
    %c0_572 = arith.constant 0 : index
    %c11_573 = arith.constant 11 : index
    %c1_574 = arith.constant 1 : index
    %c0_575 = arith.constant 0 : index
    %c0_576 = arith.constant 0 : index
    %849 = vector.load %arg4[%c0_572, %c11_573, %c1_574, %c0_575, %c0_576] : memref<1x14x2x7x128xf32, #tpu.memory_space<vmem>>, vector<1x1x1x7x128xf32>
    %850 = vector.shape_cast %849 : vector<1x1x1x7x128xf32> to vector<7x128xf32>
    %851 = vector.shape_cast %848 : vector<7x128xf32> to vector<1x1x1x7x128xf32>
    tpu.vector_store %arg4[%c0_572, %c11_573, %c1_574, %c0_575, %c0_576], %851 {strides = array<i32>} : memref<1x14x2x7x128xf32, #tpu.memory_space<vmem>>, vector<1x1x1x7x128xf32>,
    %852 = vector.extract_strided_slice %821 {offsets = [6, 0, 0], sizes = [1, 7, 128], strides = [1, 1, 1]} : vector<7x7x128xf32> to vector<1x7x128xf32>
    %853 = vector.shape_cast %852 : vector<1x7x128xf32> to vector<7x128xf32>
    %c0_577 = arith.constant 0 : index
    %c13_578 = arith.constant 13 : index
    %c1_579 = arith.constant 1 : index
    %c0_580 = arith.constant 0 : index
    %c0_581 = arith.constant 0 : index
    %854 = vector.load %arg4[%c0_577, %c13_578, %c1_579, %c0_580, %c0_581] : memref<1x14x2x7x128xf32, #tpu.memory_space<vmem>>, vector<1x1x1x7x128xf32>
    %855 = vector.shape_cast %854 : vector<1x1x1x7x128xf32> to vector<7x128xf32>
    %856 = vector.shape_cast %853 : vector<7x128xf32> to vector<1x1x1x7x128xf32>
    tpu.vector_store %arg4[%c0_577, %c13_578, %c1_579, %c0_580, %c0_581], %856 {strides = array<i32>} : memref<1x14x2x7x128xf32, #tpu.memory_space<vmem>>, vector<1x1x1x7x128xf32>,
    return
  }
  func.func @transform_0(%arg0: i32) -> (i32, i32, i32, i32) {
    %c0_i32 = arith.constant 0 : i32
    %c0_i32_0 = arith.constant 0 : i32
    %c0_i32_1 = arith.constant 0 : i32
    %c0_i32_2 = arith.constant 0 : i32
    return %arg0, %c0_i32, %c0_i32_0, %c0_i32_1 : i32, i32, i32, i32
  }
  func.func @transform_1(%arg0: i32) -> (i32, i32, i32, i32) {
    %c0_i32 = arith.constant 0 : i32
    %c0_i32_0 = arith.constant 0 : i32
    %c0_i32_1 = arith.constant 0 : i32
    %c0_i32_2 = arith.constant 0 : i32
    %c0_i32_3 = arith.constant 0 : i32
    return %c0_i32, %c0_i32_0, %c0_i32_1, %c0_i32_2 : i32, i32, i32, i32
  }
  func.func @transform_2(%arg0: i32) -> (i32, i32) {
    %c0_i32 = arith.constant 0 : i32
    %c0_i32_0 = arith.constant 0 : i32
    %c0_i32_1 = arith.constant 0 : i32
    return %c0_i32, %c0_i32_0 : i32, i32
  }
  func.func @transform_3(%arg0: i32) -> (i32, i32, i32, i32, i32) {
    %c0_i32 = arith.constant 0 : i32
    %c0_i32_0 = arith.constant 0 : i32
    %c0_i32_1 = arith.constant 0 : i32
    %c0_i32_2 = arith.constant 0 : i32
    %c0_i32_3 = arith.constant 0 : i32
    return %arg0, %c0_i32, %c0_i32_0, %c0_i32_1, %c0_i32_2 : i32, i32, i32, i32, i32
  }
}

</mosaic_0001>

<bundles_post_ra>
// kernel: tile.18
= control target key start
LH: loop header
LB: loop body
LE: loop exit
PB: predicated region body
PF: predicated region fallthrough
CT: control target
= control target key end

     0   :  { %s22_s0 = inlined_call_operand.vmem [shape: f32[32], index: 0, kind: input, shape index: {}]   ;;  %s23_s1 = inlined_call_operand.vmem [shape: f32[4,32], index: 1, kind: output, shape index: {}]  }
   0x1   :  { %v4_v0 = vld [vmem:[%s22_s0] ss:$0 sm:$0xff] }
   0x2   :  { %5 = vst [vmem:[%s23_s1] sm:$0xf] %v4_v0 }

// kernel: tile.19
= control target key start
LH: loop header
LB: loop body
LE: loop exit
PB: predicated region body
PF: predicated region fallthrough
CT: control target
= control target key end

     0   :  { %vm7_vm0 = vcmask 261120   ;;  %s37_s8 = smov 32   ;;  %s38_s9 = smov 64   ;;  %vm13_vm1 = vcmask 1048320   ;;  %vm19_vm2 = vcmask 785920   ;;  %vm25_vm3 = vcmask 523520   ;;  %s55_s0 = inlined_call_operand.vmem [shape: f32[4,32], index: 0, kind: input, shape index: {}]   ;;  %s56_s1 = inlined_call_operand.vmem [shape: f32[1,128], index: 1, kind: output, shape index: {}]  }
   0x1   :  { %v4_v0 = vld [vmem:[%s55_s0] sm:$0xf]  ;;  %s36_s0 = smov 96  }
   0x2   :  { %5 = vst [vmem:[#allocation1] sm:$0xf] %v4_v0 }
   0x9   :  { %v10_v1 = vld [vmem:[#allocation1 + $0x3] sm:$0x1]   ;;  %v22_v2 = vld [vmem:[#allocation1 + $0x1] sm:$0x1]   ;;  %v6_v3 = vld [vmem:[#allocation1] sm:$0x1]  }
   0xa   :  { %11 = vrot.lane.b32.xlu0 %v10_v1, %s36_s0  ;;  %23 = vrot.lane.b32.xlu1 %v22_v2, %s37_s8  ;;  %v16_v4 = vld [vmem:[#allocation1 + $0x2] sm:$0x1]   ;;  %8 = vst.msk [vmem:[#allocation0] sm:$0x1] %vm7_vm0, %v6_v3  }
   0xe   :  { %17 = vrot.lane.b32.xlu0 %v16_v4, %s38_s9 }
  0x7c   :  { %v12_v5 = vpop.permute.xlu0 %11   ;;  %v24_v6 = vpop.permute.xlu1 %23  }
  0x7d   :  { %14 = vst.msk [vmem:[#allocation0] sm:$0x1] %vm13_vm1, %v12_v5  }
  0x80   :  { %v18_v7 = vpop.permute.xlu0 %17  }
  0x81   :  { %20 = vst.msk [vmem:[#allocation0] sm:$0x1] %vm19_vm2, %v18_v7  }
  0x82   :  { %26 = vst.msk [vmem:[#allocation0] sm:$0x1] %vm25_vm3, %v24_v6  }
  0x89   :  { %v30_v8 = vld [vmem:[#allocation0] sm:$0x1] }
  0x8a   :  { %32 = vst [vmem:[%s56_s1] sm:$0x1] %v30_v8 }

// kernel: tile.14
= control target key start
LH: loop header
LB: loop body
LE: loop exit
PB: predicated region body
PF: predicated region fallthrough
CT: control target
= control target key end

     0   :  { %vm502_vm0 = vcmask 1047556   ;;  %s1516_s10 = smov 96   ;;  %vm504_vm1 = vcmask 261120   ;;  %vm642_vm2 = vcmask 1048320   ;;  %vm804_vm3 = vcmask 785920   ;;  %s2091_s0 = inlined_call_operand.vmem [shape: f32[4,5,5,4,32], index: 0, kind: input, shape index: {}]   ;;  %s2092_s1 = inlined_call_operand.vmem [shape: f32[4,5,5,128], index: 1, kind: output, shape index: {}]  }
   0x1   :  { %v1482_v0 = vld [vmem:[%s2091_s0 + $0x1c] sm:$0xf]  ;;  %v1483_v1 = vld [vmem:[%s2091_s0 + $0x18] sm:$0xf]  ;;  %v1484_v2 = vld [vmem:[%s2091_s0 + $0x14] sm:$0xf] }
   0x2   :  { %468 = vst [vmem:[#allocation1 + $0x38] sm:$0xf] %v1482_v0  ;;  %473 = vst [vmem:[#allocation1 + $0x30] sm:$0xf] %v1483_v1  ;;  %v1485_v3 = vld [vmem:[%s2091_s0 + $0x10] sm:$0xf] }
   0x3   :  { %478 = vst [vmem:[#allocation1 + $0x28] sm:$0xf] %v1484_v2  ;;  %v1486_v4 = vld [vmem:[%s2091_s0 + $0xc] sm:$0xf]  ;;  %v1487_v5 = vld [vmem:[%s2091_s0 + $0x8] sm:$0xf] }
   0x4   :  { %483 = vst [vmem:[#allocation1 + $0x20] sm:$0xf] %v1485_v3  ;;  %488 = vst [vmem:[#allocation1 + $0x18] sm:$0xf] %v1486_v4  ;;  %v1488_v6 = vld [vmem:[%s2091_s0 + $0x4] sm:$0xf] }
   0x5   :  { %493 = vst [vmem:[#allocation1 + $0x10] sm:$0xf] %v1487_v5  ;;  %v498_v7 = vld [vmem:[%s2091_s0] sm:$0xf]  ;;  %497 = vst [vmem:[#allocation1 + $0x8] sm:$0xf] %v1488_v6 }
   0x6   :  { %499 = vst [vmem:[#allocation1] sm:$0xf] %v498_v7  ;;  %v1466_v8 = vld [vmem:[%s2091_s0 + $0x5c] sm:$0xf]  ;;  %v1467_v9 = vld [vmem:[%s2091_s0 + $0x58] sm:$0xf] }
   0x7   :  { %v1468_v10 = vld [vmem:[%s2091_s0 + $0x54] sm:$0xf]  ;;  %388 = vst [vmem:[#allocation1 + $0xb8] sm:$0xf] %v1466_v8  ;;  %393 = vst [vmem:[#allocation1 + $0xb0] sm:$0xf] %v1467_v9 }
   0x8   :  { %398 = vst [vmem:[#allocation1 + $0xa8] sm:$0xf] %v1468_v10  ;;  %v1469_v11 = vld [vmem:[%s2091_s0 + $0x50] sm:$0xf]  ;;  %v1470_v12 = vld [vmem:[%s2091_s0 + $0x4c] sm:$0xf] }
   0x9   :  { %v1471_v13 = vld [vmem:[%s2091_s0 + $0x48] sm:$0xf]  ;;  %403 = vst [vmem:[#allocation1 + $0xa0] sm:$0xf] %v1469_v11  ;;  %408 = vst [vmem:[#allocation1 + $0x98] sm:$0xf] %v1470_v12 }
   0xa   :  { %413 = vst [vmem:[#allocation1 + $0x90] sm:$0xf] %v1471_v13  ;;  %v1472_v14 = vld [vmem:[%s2091_s0 + $0x44] sm:$0xf]  ;;  %v1473_v15 = vld [vmem:[%s2091_s0 + $0x40] sm:$0xf] }
   0xb   :  { %v1450_v16 = vld [vmem:[%s2091_s0 + $0x9c] sm:$0xf]  ;;  %418 = vst [vmem:[#allocation1 + $0x88] sm:$0xf] %v1472_v14  ;;  %423 = vst [vmem:[#allocation1 + $0x80] sm:$0xf] %v1473_v15 }
   0xc   :  { %308 = vst [vmem:[#allocation1 + $0x138] sm:$0xf] %v1450_v16  ;;  %v1451_v17 = vld [vmem:[%s2091_s0 + $0x98] sm:$0xf]  ;;  %v1452_v18 = vld [vmem:[%s2091_s0 + $0x94] sm:$0xf] }
   0xd   :  { %v1453_v19 = vld [vmem:[%s2091_s0 + $0x90] sm:$0xf]  ;;  %313 = vst [vmem:[#allocation1 + $0x130] sm:$0xf] %v1451_v17  ;;  %318 = vst [vmem:[#allocation1 + $0x128] sm:$0xf] %v1452_v18 }
   0xe   :  { %323 = vst [vmem:[#allocation1 + $0x120] sm:$0xf] %v1453_v19  ;;  %v1454_v20 = vld [vmem:[%s2091_s0 + $0x8c] sm:$0xf]  ;;  %v1455_v21 = vld [vmem:[%s2091_s0 + $0x88] sm:$0xf] }
   0xf   :  { %v1456_v22 = vld [vmem:[%s2091_s0 + $0x84] sm:$0xf]  ;;  %328 = vst [vmem:[#allocation1 + $0x118] sm:$0xf] %v1454_v20  ;;  %333 = vst [vmem:[#allocation1 + $0x110] sm:$0xf] %v1455_v21 }
  0x10   :  { %338 = vst [vmem:[#allocation1 + $0x108] sm:$0xf] %v1456_v22  ;;  %v1457_v23 = vld [vmem:[%s2091_s0 + $0x80] sm:$0xf]  ;;  %v1434_v24 = vld [vmem:[%s2091_s0 + $0xdc] sm:$0xf] }
  0x11   :  { %v1435_v25 = vld [vmem:[%s2091_s0 + $0xd8] sm:$0xf]  ;;  %343 = vst [vmem:[#allocation1 + $0x100] sm:$0xf] %v1457_v23  ;;  %228 = vst [vmem:[#allocation1 + $0x1b8] sm:$0xf] %v1434_v24 }
  0x12   :  { %v637_v26 = vld [vmem:[#allocation1 + $0x3] ss:$8 sm:$0xf0]   ;;  %233 = vst [vmem:[#allocation1 + $0x1b0] sm:$0xf] %v1435_v25  ;;  %vm966_vm4 = vcmask 523520  }
  0x13   :  { %v1436_v27 = vld [vmem:[%s2091_s0 + $0xd4] sm:$0xf]  ;;  %v635_v28 = vld [vmem:[#allocation1 + $0x3] ss:$8 sm:$0xf]  }
  0x14   :  { %238 = vst [vmem:[#allocation1 + $0x1a8] sm:$0xf] %v1436_v27  ;;  %v1437_v29 = vld [vmem:[%s2091_s0 + $0xd0] sm:$0xf]  ;;  %v639_v30 = vsel %vm502_vm0, %v637_v26, %v635_v28  ;;  %v1438_v31 = vld [vmem:[%s2091_s0 + $0xcc] sm:$0xf] }
  0x15   :  { %243 = vst [vmem:[#allocation1 + $0x1a0] sm:$0xf] %v1437_v29  ;;  %v1439_v32 = vld [vmem:[%s2091_s0 + $0xc8] sm:$0xf]  ;;  %v1440_v33 = vld [vmem:[%s2091_s0 + $0xc4] sm:$0xf]  ;;  %640 = vrot.lane.b32.xlu0 %v639_v30, %s1516_s10 }
  0x16   :  { %v649_v34 = vld [vmem:[#allocation1 + $0x83] ss:$8 sm:$0xf0]   ;;  %248 = vst [vmem:[#allocation1 + $0x198] sm:$0xf] %v1438_v31 }
  0x17   :  { %253 = vst [vmem:[#allocation1 + $0x190] sm:$0xf] %v1439_v32  ;;  %258 = vst [vmem:[#allocation1 + $0x188] sm:$0xf] %v1440_v33  ;;  %v1441_v35 = vld [vmem:[%s2091_s0 + $0xc0] sm:$0xf] }
  0x18   :  { %v647_v36 = vld [vmem:[#allocation1 + $0x83] ss:$8 sm:$0xf]   ;;  %263 = vst [vmem:[#allocation1 + $0x180] sm:$0xf] %v1441_v35 }
  0x19   :  { %v1418_v37 = vld [vmem:[%s2091_s0 + $0x11c] sm:$0xf]  ;;  %v651_v38 = vsel %vm502_vm0, %v649_v34, %v647_v36  ;;  %v662_v39 = vld [vmem:[#allocation1 + $0x103] ss:$8 sm:$0xf0]  }
  0x1a   :  { %148 = vst [vmem:[#allocation1 + $0x238] sm:$0xf] %v1418_v37  ;;  %v1419_v40 = vld [vmem:[%s2091_s0 + $0x118] sm:$0xf]  ;;  %v1420_v41 = vld [vmem:[%s2091_s0 + $0x114] sm:$0xf]  ;;  %652 = vrot.lane.b32.xlu0 %v651_v38, %s1516_s10 }
  0x1b   :  { %153 = vst [vmem:[#allocation1 + $0x230] sm:$0xf] %v1419_v40  ;;  %v1421_v42 = vld [vmem:[%s2091_s0 + $0x110] sm:$0xf]  ;;  %v1422_v43 = vld [vmem:[%s2091_s0 + $0x10c] sm:$0xf] }
  0x1c   :  { %v660_v44 = vld [vmem:[#allocation1 + $0x103] ss:$8 sm:$0xf]   ;;  %158 = vst [vmem:[#allocation1 + $0x228] sm:$0xf] %v1420_v41 }
  0x1d   :  { %163 = vst [vmem:[#allocation1 + $0x220] sm:$0xf] %v1421_v42  ;;  %168 = vst [vmem:[#allocation1 + $0x218] sm:$0xf] %v1422_v43  ;;  %v1423_v45 = vld [vmem:[%s2091_s0 + $0x108] sm:$0xf]  ;;  %v664_v46 = vsel %vm502_vm0, %v662_v39, %v660_v44 }
  0x1e   :  { %173 = vst [vmem:[#allocation1 + $0x210] sm:$0xf] %v1423_v45  ;;  %v1424_v47 = vld [vmem:[%s2091_s0 + $0x104] sm:$0xf]  ;;  %v1425_v48 = vld [vmem:[%s2091_s0 + $0x100] sm:$0xf]  ;;  %665 = vrot.lane.b32.xlu1 %v664_v46, %s1516_s10 }
  0x1f   :  { %v1402_v49 = vld [vmem:[%s2091_s0 + $0x15c] sm:$0xf]  ;;  %v675_v50 = vld [vmem:[#allocation1 + $0x183] ss:$8 sm:$0xf0]  }
  0x20   :  { %178 = vst [vmem:[#allocation1 + $0x208] sm:$0xf] %v1424_v47  ;;  %183 = vst [vmem:[#allocation1 + $0x200] sm:$0xf] %v1425_v48  ;;  %v1403_v51 = vld [vmem:[%s2091_s0 + $0x158] sm:$0xf] }
  0x21   :  { %68 = vst [vmem:[#allocation1 + $0x2b8] sm:$0xf] %v1402_v49  ;;  %73 = vst [vmem:[#allocation1 + $0x2b0] sm:$0xf] %v1403_v51  ;;  %v1404_v52 = vld [vmem:[%s2091_s0 + $0x154] sm:$0xf] }
  0x22   :  { %v1405_v53 = vld [vmem:[%s2091_s0 + $0x150] sm:$0xf]  ;;  %v1406_v54 = vld [vmem:[%s2091_s0 + $0x14c] sm:$0xf]  ;;  %78 = vst [vmem:[#allocation1 + $0x2a8] sm:$0xf] %v1404_v52 }
  0x23   :  { %v673_v55 = vld [vmem:[#allocation1 + $0x183] ss:$8 sm:$0xf]   ;;  %83 = vst [vmem:[#allocation1 + $0x2a0] sm:$0xf] %v1405_v53 }
  0x24   :  { %88 = vst [vmem:[#allocation1 + $0x298] sm:$0xf] %v1406_v54  ;;  %v1407_v56 = vld [vmem:[%s2091_s0 + $0x148] sm:$0xf]  ;;  %v677_v57 = vsel %vm502_vm0, %v675_v50, %v673_v55  ;;  %v1408_v58 = vld [vmem:[%s2091_s0 + $0x144] sm:$0xf] }
  0x25   :  { %93 = vst [vmem:[#allocation1 + $0x290] sm:$0xf] %v1407_v56  ;;  %v1409_v59 = vld [vmem:[%s2091_s0 + $0x140] sm:$0xf]  ;;  %v1390_v60 = vld [vmem:[%s2091_s0 + $0x18c] sm:$0xf]  ;;  %678 = vrot.lane.b32.xlu1 %v677_v57, %s1516_s10 }
  0x26   :  { %98 = vst [vmem:[#allocation1 + $0x288] sm:$0xf] %v1408_v58  ;;  %103 = vst [vmem:[#allocation1 + $0x280] sm:$0xf] %v1409_v59  ;;  %v1391_v61 = vld [vmem:[%s2091_s0 + $0x188] sm:$0xf] }
  0x27   :  { %8 = vst [vmem:[#allocation1 + $0x318] sm:$0xf] %v1390_v60  ;;  %v1392_v62 = vld [vmem:[%s2091_s0 + $0x184] sm:$0xf]  ;;  %v1393_v63 = vld [vmem:[%s2091_s0 + $0x180] sm:$0xf] }
  0x28   :  { %v688_v0 = vld [vmem:[#allocation1 + $0x203] ss:$8 sm:$0xf0]   ;;  %13 = vst [vmem:[#allocation1 + $0x310] sm:$0xf] %v1391_v61 }
  0x29   :  { %18 = vst [vmem:[#allocation1 + $0x308] sm:$0xf] %v1392_v62  ;;  %23 = vst [vmem:[#allocation1 + $0x300] sm:$0xf] %v1393_v63  ;;  %v1478_v1 = vld [vmem:[%s2091_s0 + $0x2c] sm:$0xf] }
  0x2a   :  { %448 = vst [vmem:[#allocation1 + $0x58] sm:$0xf] %v1478_v1  ;;  %v1479_v2 = vld [vmem:[%s2091_s0 + $0x28] sm:$0xf]  ;;  %v1480_v3 = vld [vmem:[%s2091_s0 + $0x24] sm:$0xf] }
  0x2b   :  { %v1481_v4 = vld [vmem:[%s2091_s0 + $0x20] sm:$0xf]  ;;  %453 = vst [vmem:[#allocation1 + $0x50] sm:$0xf] %v1479_v2  ;;  %458 = vst [vmem:[#allocation1 + $0x48] sm:$0xf] %v1480_v3 }
  0x2c   :  { %v686_v5 = vld [vmem:[#allocation1 + $0x203] ss:$8 sm:$0xf]   ;;  %463 = vst [vmem:[#allocation1 + $0x40] sm:$0xf] %v1481_v4 }
  0x2d   :  { %v1462_v6 = vld [vmem:[%s2091_s0 + $0x6c] sm:$0xf]  ;;  %v690_v7 = vsel %vm502_vm0, %v688_v0, %v686_v5  ;;  %v1463_v8 = vld [vmem:[%s2091_s0 + $0x68] sm:$0xf]  ;;  %v1464_v9 = vld [vmem:[%s2091_s0 + $0x64] sm:$0xf] }
  0x2e   :  { %368 = vst [vmem:[#allocation1 + $0xd8] sm:$0xf] %v1462_v6  ;;  %v1465_v10 = vld [vmem:[%s2091_s0 + $0x60] sm:$0xf]  ;;  %691 = vrot.lane.b32.xlu0 %v690_v7, %s1516_s10  ;;  %373 = vst [vmem:[#allocation1 + $0xd0] sm:$0xf] %v1463_v8 }
  0x2f   :  { %v701_v11 = vld [vmem:[#allocation1 + $0x283] ss:$8 sm:$0xf0]   ;;  %378 = vst [vmem:[#allocation1 + $0xc8] sm:$0xf] %v1464_v9 }
  0x30   :  { %383 = vst [vmem:[#allocation1 + $0xc0] sm:$0xf] %v1465_v10  ;;  %v1474_v12 = vld [vmem:[%s2091_s0 + $0x3c] sm:$0xf]  ;;  %v1475_v13 = vld [vmem:[%s2091_s0 + $0x38] sm:$0xf] }
  0x31   :  { %428 = vst [vmem:[#allocation1 + $0x78] sm:$0xf] %v1474_v12  ;;  %v1476_v14 = vld [vmem:[%s2091_s0 + $0x34] sm:$0xf]  ;;  %v1477_v15 = vld [vmem:[%s2091_s0 + $0x30] sm:$0xf] }
  0x32   :  { %v699_v16 = vld [vmem:[#allocation1 + $0x283] ss:$8 sm:$0xf]   ;;  %433 = vst [vmem:[#allocation1 + $0x70] sm:$0xf] %v1475_v13 }
  0x33   :  { %438 = vst [vmem:[#allocation1 + $0x68] sm:$0xf] %v1476_v14  ;;  %443 = vst [vmem:[#allocation1 + $0x60] sm:$0xf] %v1477_v15  ;;  %v1446_v17 = vld [vmem:[%s2091_s0 + $0xac] sm:$0xf]  ;;  %v703_v18 = vsel %vm502_vm0, %v701_v11, %v699_v16 }
  0x34   :  { %v712_v19 = vld [vmem:[#allocation1 + $0x303] ss:$8 sm:$0xf]   ;;  %288 = vst [vmem:[#allocation1 + $0x158] sm:$0xf] %v1446_v17  ;;  %704 = vrot.lane.b32.xlu1 %v703_v18, %s1516_s10 }
  0x35   :  { %v1447_v20 = vld [vmem:[%s2091_s0 + $0xa8] sm:$0xf]  ;;  %v1448_v21 = vld [vmem:[%s2091_s0 + $0xa4] sm:$0xf]  ;;  %v1449_v22 = vld [vmem:[%s2091_s0 + $0xa0] sm:$0xf] }
  0x36   :  { %293 = vst [vmem:[#allocation1 + $0x150] sm:$0xf] %v1447_v20  ;;  %v1458_v23 = vld [vmem:[%s2091_s0 + $0x7c] sm:$0xf]  ;;  %298 = vst [vmem:[#allocation1 + $0x148] sm:$0xf] %v1448_v21 }
  0x37   :  { %v714_v24 = vld [vmem:[#allocation1 + $0x23] ss:$8 sm:$0xf0]   ;;  %303 = vst [vmem:[#allocation1 + $0x140] sm:$0xf] %v1449_v22 }
  0x38   :  { %348 = vst [vmem:[#allocation1 + $0xf8] sm:$0xf] %v1458_v23  ;;  %v1459_v25 = vld [vmem:[%s2091_s0 + $0x78] sm:$0xf]  ;;  %v716_v26 = vsel %vm502_vm0, %v714_v24, %v712_v19  ;;  %v1460_v27 = vld [vmem:[%s2091_s0 + $0x74] sm:$0xf] }
  0x39   :  { %353 = vst [vmem:[#allocation1 + $0xf0] sm:$0xf] %v1459_v25  ;;  %v1461_v28 = vld [vmem:[%s2091_s0 + $0x70] sm:$0xf]  ;;  %v1430_v29 = vld [vmem:[%s2091_s0 + $0xec] sm:$0xf]  ;;  %717 = vrot.lane.b32.xlu0 %v716_v26, %s1516_s10 }
  0x3a   :  { %v725_v30 = vld [vmem:[#allocation1 + $0xc3] ss:$8 sm:$0xf]   ;;  %358 = vst [vmem:[#allocation1 + $0xe8] sm:$0xf] %v1460_v27 }
  0x3b   :  { %363 = vst [vmem:[#allocation1 + $0xe0] sm:$0xf] %v1461_v28  ;;  %208 = vst [vmem:[#allocation1 + $0x1d8] sm:$0xf] %v1430_v29  ;;  %v1431_v31 = vld [vmem:[%s2091_s0 + $0xe8] sm:$0xf] }
  0x3c   :  { %213 = vst [vmem:[#allocation1 + $0x1d0] sm:$0xf] %v1431_v31  ;;  %v1432_v32 = vld [vmem:[%s2091_s0 + $0xe4] sm:$0xf]  ;;  %v1433_v33 = vld [vmem:[%s2091_s0 + $0xe0] sm:$0xf] }
  0x3d   :  { %v1442_v34 = vld [vmem:[%s2091_s0 + $0xbc] sm:$0xf]  ;;  %v727_v35 = vld [vmem:[#allocation1 + $0x43] ss:$8 sm:$0xf0]  }
  0x3e   :  { %218 = vst [vmem:[#allocation1 + $0x1c8] sm:$0xf] %v1432_v32  ;;  %223 = vst [vmem:[#allocation1 + $0x1c0] sm:$0xf] %v1433_v33  ;;  %v1443_v36 = vld [vmem:[%s2091_s0 + $0xb8] sm:$0xf]  ;;  %v729_v37 = vsel %vm502_vm0, %v727_v35, %v725_v30 }
  0x3f   :  { %268 = vst [vmem:[#allocation1 + $0x178] sm:$0xf] %v1442_v34  ;;  %273 = vst [vmem:[#allocation1 + $0x170] sm:$0xf] %v1443_v36  ;;  %v1444_v38 = vld [vmem:[%s2091_s0 + $0xb4] sm:$0xf]  ;;  %730 = vrot.lane.b32.xlu1 %v729_v37, %s1516_s10 }
  0x40   :  { %v1445_v39 = vld [vmem:[%s2091_s0 + $0xb0] sm:$0xf]  ;;  %v1414_v40 = vld [vmem:[%s2091_s0 + $0x12c] sm:$0xf]  ;;  %278 = vst [vmem:[#allocation1 + $0x168] sm:$0xf] %v1444_v38 }
  0x41   :  { %283 = vst [vmem:[#allocation1 + $0x160] sm:$0xf] %v1445_v39  ;;  %128 = vst [vmem:[#allocation1 + $0x258] sm:$0xf] %v1414_v40  ;;  %v1415_v41 = vld [vmem:[%s2091_s0 + $0x128] sm:$0xf] }
  0x42   :  { %v1416_v42 = vld [vmem:[%s2091_s0 + $0x124] sm:$0xf]  ;;  %v1417_v43 = vld [vmem:[%s2091_s0 + $0x120] sm:$0xf]  ;;  %133 = vst [vmem:[#allocation1 + $0x250] sm:$0xf] %v1415_v41 }
  0x43   :  { %v738_v44 = vld [vmem:[#allocation1 + $0x143] ss:$8 sm:$0xf]   ;;  %138 = vst [vmem:[#allocation1 + $0x248] sm:$0xf] %v1416_v42 }
  0x44   :  { %143 = vst [vmem:[#allocation1 + $0x240] sm:$0xf] %v1417_v43  ;;  %v1426_v45 = vld [vmem:[%s2091_s0 + $0xfc] sm:$0xf]  ;;  %v1427_v46 = vld [vmem:[%s2091_s0 + $0xf8] sm:$0xf] }
  0x45   :  { %188 = vst [vmem:[#allocation1 + $0x1f8] sm:$0xf] %v1426_v45  ;;  %v1428_v47 = vld [vmem:[%s2091_s0 + $0xf4] sm:$0xf]  ;;  %v1429_v48 = vld [vmem:[%s2091_s0 + $0xf0] sm:$0xf] }
  0x46   :  { %v740_v49 = vld [vmem:[#allocation1 + $0xc3] ss:$8 sm:$0xf0]   ;;  %193 = vst [vmem:[#allocation1 + $0x1f0] sm:$0xf] %v1427_v46 }
  0x47   :  { %198 = vst [vmem:[#allocation1 + $0x1e8] sm:$0xf] %v1428_v47  ;;  %203 = vst [vmem:[#allocation1 + $0x1e0] sm:$0xf] %v1429_v48  ;;  %v1398_v50 = vld [vmem:[%s2091_s0 + $0x16c] sm:$0xf]  ;;  %v742_v51 = vsel %vm502_vm0, %v740_v49, %v738_v44 }
  0x48   :  { %48 = vst [vmem:[#allocation1 + $0x2d8] sm:$0xf] %v1398_v50  ;;  %v1399_v52 = vld [vmem:[%s2091_s0 + $0x168] sm:$0xf]  ;;  %v1400_v53 = vld [vmem:[%s2091_s0 + $0x164] sm:$0xf]  ;;  %743 = vrot.lane.b32.xlu0 %v742_v51, %s1516_s10 }
  0x49   :  { %v1401_v54 = vld [vmem:[%s2091_s0 + $0x160] sm:$0xf]  ;;  %53 = vst [vmem:[#allocation1 + $0x2d0] sm:$0xf] %v1399_v52  ;;  %58 = vst [vmem:[#allocation1 + $0x2c8] sm:$0xf] %v1400_v53 }
  0x4a   :  { %v751_v55 = vld [vmem:[#allocation1 + $0x1c3] ss:$8 sm:$0xf]   ;;  %63 = vst [vmem:[#allocation1 + $0x2c0] sm:$0xf] %v1401_v54 }
  0x4b   :  { %v1410_v56 = vld [vmem:[%s2091_s0 + $0x13c] sm:$0xf]  ;;  %v1411_v57 = vld [vmem:[%s2091_s0 + $0x138] sm:$0xf]  ;;  %v1412_v58 = vld [vmem:[%s2091_s0 + $0x134] sm:$0xf] }
  0x4c   :  { %108 = vst [vmem:[#allocation1 + $0x278] sm:$0xf] %v1410_v56  ;;  %v1413_v59 = vld [vmem:[%s2091_s0 + $0x130] sm:$0xf]  ;;  %113 = vst [vmem:[#allocation1 + $0x270] sm:$0xf] %v1411_v57 }
  0x4d   :  { %v753_v60 = vld [vmem:[#allocation1 + $0x143] ss:$8 sm:$0xf0]   ;;  %118 = vst [vmem:[#allocation1 + $0x268] sm:$0xf] %v1412_v58 }
  0x4e   :  { %123 = vst [vmem:[#allocation1 + $0x260] sm:$0xf] %v1413_v59  ;;  %v1394_v61 = vld [vmem:[%s2091_s0 + $0x17c] sm:$0xf]  ;;  %v755_v62 = vsel %vm502_vm0, %v753_v60, %v751_v55  ;;  %v1395_v0 = vld [vmem:[%s2091_s0 + $0x178] sm:$0xf] }
  0x4f   :  { %v764_v63 = vld [vmem:[#allocation1 + $0x243] ss:$8 sm:$0xf]   ;;  %28 = vst [vmem:[#allocation1 + $0x2f8] sm:$0xf] %v1394_v61  ;;  %756 = vrot.lane.b32.xlu1 %v755_v62, %s1516_s10 }
  0x50   :  { %33 = vst [vmem:[#allocation1 + $0x2f0] sm:$0xf] %v1395_v0  ;;  %v1396_v1 = vld [vmem:[%s2091_s0 + $0x174] sm:$0xf]  ;;  %v1397_v2 = vld [vmem:[%s2091_s0 + $0x170] sm:$0xf] }
  0x51   :  { %v766_v3 = vld [vmem:[#allocation1 + $0x1c3] ss:$8 sm:$0xf0]   ;;  %38 = vst [vmem:[#allocation1 + $0x2e8] sm:$0xf] %v1396_v1  ;;  %s1517_s0 = smov 64  }
  0x52   :  { %43 = vst [vmem:[#allocation1 + $0x2e0] sm:$0xf] %v1397_v2  ;;  %v768_v4 = vsel %vm502_vm0, %v766_v3, %v764_v63  ;;  %v777_v5 = vld [vmem:[#allocation1 + $0x2c3] ss:$8 sm:$0xf]  }
  0x53   :  { %769 = vrot.lane.b32.xlu0 %v768_v4, %s1516_s10  ;;  %v797_v6 = vld [vmem:[#allocation1 + $0x2] ss:$8 sm:$0xf]   ;;  %v500_v44 = vld [vmem:[#allocation1] ss:$8 sm:$0xf]  }
  0x54   :  { %v799_v8 = vld [vmem:[#allocation1 + $0x2] ss:$8 sm:$0xf0]   ;;  %v501_v45 = vld [vmem:[#allocation1] ss:$8 sm:$0xf0]  }
  0x55   :  { %v779_v7 = vld [vmem:[#allocation1 + $0x243] ss:$8 sm:$0xf0]   ;;  %v809_v10 = vld [vmem:[#allocation1 + $0x82] ss:$8 sm:$0xf]   ;;  %v801_v13 = vsel %vm502_vm0, %v799_v8, %v797_v6  ;;  %v503_v48 = vsel %vm502_vm0, %v501_v45, %v500_v44 }
  0x56   :  { %v781_v9 = vsel %vm502_vm0, %v779_v7, %v777_v5  ;;  %v811_v11 = vld [vmem:[#allocation1 + $0x82] ss:$8 sm:$0xf0]   ;;  %v959_v46 = vld [vmem:[#allocation1 + $0x1] ss:$8 sm:$0xf]  }
  0x57   :  { %782 = vrot.lane.b32.xlu1 %v781_v9, %s1516_s10  ;;  %v822_v14 = vld [vmem:[#allocation1 + $0x102] ss:$8 sm:$0xf]   ;;  %v813_v16 = vsel %vm502_vm0, %v811_v11, %v809_v10  ;;  %v961_v47 = vld [vmem:[#allocation1 + $0x1] ss:$8 sm:$0xf0]  }
  0x58   :  { %v824_v15 = vld [vmem:[#allocation1 + $0x102] ss:$8 sm:$0xf0]   ;;  %v520_v49 = vld [vmem:[#allocation1 + $0x80] ss:$8 sm:$0xf]   ;;  %v963_v5 = vsel %vm502_vm0, %v961_v47, %v959_v46 }
  0x59   :  { %v790_v12 = vld [vmem:[#allocation1 + $0x2e3] ss:$8 sm:$0xf]   ;;  %v835_v17 = vld [vmem:[#allocation1 + $0x182] ss:$8 sm:$0xf]   ;;  %v826_v19 = vsel %vm502_vm0, %v824_v15, %v822_v14 }
  0x5a   :  { %791 = vrot.lane.b32.xlu0 %v790_v12, %s1516_s10  ;;  %v837_v18 = vld [vmem:[#allocation1 + $0x182] ss:$8 sm:$0xf0]   ;;  %v522_v50 = vld [vmem:[#allocation1 + $0x80] ss:$8 sm:$0xf0]  }
  0x5b   :  { %802 = vrot.lane.b32.xlu1 %v801_v13, %s1517_s0  ;;  %v848_v20 = vld [vmem:[#allocation1 + $0x202] ss:$8 sm:$0xf]   ;;  %v839_v22 = vsel %vm502_vm0, %v837_v18, %v835_v17  ;;  %505 = vst.msk [vmem:[#allocation0] sm:$0xf] %vm504_vm1, %v503_v48   ;;  %v524_v53 = vsel %vm502_vm0, %v522_v50, %v520_v49  ;;  %s1518_s10 = smov 32  }
  0x5c   :  { %v850_v21 = vld [vmem:[#allocation1 + $0x202] ss:$8 sm:$0xf0]   ;;  %507 = vst.msk [vmem:[#allocation0 + $0x4] sm:$0xf0] %vm504_vm1, %v503_v48  }
  0x5d   :  { %v861_v23 = vld [vmem:[#allocation1 + $0x282] ss:$8 sm:$0xf]   ;;  %v852_v25 = vsel %vm502_vm0, %v850_v21, %v848_v20  ;;  %v542_v54 = vld [vmem:[#allocation1 + $0x100] ss:$8 sm:$0xf]  }
  0x5e   :  { %814 = vrot.lane.b32.xlu0 %v813_v16, %s1517_s0  ;;  %v863_v24 = vld [vmem:[#allocation1 + $0x282] ss:$8 sm:$0xf0]   ;;  %v544_v55 = vld [vmem:[#allocation1 + $0x100] ss:$8 sm:$0xf0]  }
  0x5f   :  { %827 = vrot.lane.b32.xlu1 %v826_v19, %s1517_s0  ;;  %v874_v26 = vld [vmem:[#allocation1 + $0x302] ss:$8 sm:$0xf]   ;;  %v865_v28 = vsel %vm502_vm0, %v863_v24, %v861_v23  ;;  %v971_v56 = vld [vmem:[#allocation1 + $0x81] ss:$8 sm:$0xf]   ;;  %v546_v58 = vsel %vm502_vm0, %v544_v55, %v542_v54 }
  0x60   :  { %v876_v27 = vld [vmem:[#allocation1 + $0x22] ss:$8 sm:$0xf0]   ;;  %v973_v57 = vld [vmem:[#allocation1 + $0x81] ss:$8 sm:$0xf0]  }
  0x61   :  { %v887_v29 = vld [vmem:[#allocation1 + $0xc2] ss:$8 sm:$0xf]   ;;  %v878_v31 = vsel %vm502_vm0, %v876_v27, %v874_v26  ;;  %527 = vst.msk [vmem:[#allocation0 + $0x20] sm:$0xf] %vm504_vm1, %v524_v53   ;;  %v975_v14 = vsel %vm502_vm0, %v973_v57, %v971_v56 }
  0x62   :  { %840 = vrot.lane.b32.xlu0 %v839_v22, %s1517_s0  ;;  %v889_v30 = vld [vmem:[#allocation1 + $0x42] ss:$8 sm:$0xf0]   ;;  %529 = vst.msk [vmem:[#allocation0 + $0x24] sm:$0xf0] %vm504_vm1, %v524_v53  }
  0x63   :  { %853 = vrot.lane.b32.xlu1 %v852_v25, %s1517_s0  ;;  %v900_v32 = vld [vmem:[#allocation1 + $0x142] ss:$8 sm:$0xf]   ;;  %v891_v34 = vsel %vm502_vm0, %v889_v30, %v887_v29  ;;  %v564_v59 = vld [vmem:[#allocation1 + $0x180] ss:$8 sm:$0xf]  }
  0x64   :  { %v902_v33 = vld [vmem:[#allocation1 + $0xc2] ss:$8 sm:$0xf0]   ;;  %v566_v60 = vld [vmem:[#allocation1 + $0x180] ss:$8 sm:$0xf0]  }
  0x65   :  { %v913_v35 = vld [vmem:[#allocation1 + $0x1c2] ss:$8 sm:$0xf]   ;;  %v904_v37 = vsel %vm502_vm0, %v902_v33, %v900_v32  ;;  %549 = vst.msk [vmem:[#allocation0 + $0x40] sm:$0xf] %vm504_vm1, %v546_v58   ;;  %v568_v61 = vsel %vm502_vm0, %v566_v60, %v564_v59 }
  0x66   :  { %866 = vrot.lane.b32.xlu0 %v865_v28, %s1517_s0  ;;  %v915_v36 = vld [vmem:[#allocation1 + $0x142] ss:$8 sm:$0xf0]   ;;  %551 = vst.msk [vmem:[#allocation0 + $0x44] sm:$0xf0] %vm504_vm1, %v546_v58  }
  0x67   :  { %879 = vrot.lane.b32.xlu1 %v878_v31, %s1517_s0  ;;  %v926_v38 = vld [vmem:[#allocation1 + $0x242] ss:$8 sm:$0xf]   ;;  %v917_v40 = vsel %vm502_vm0, %v915_v36, %v913_v35  ;;  %v586_v62 = vld [vmem:[#allocation1 + $0x200] ss:$8 sm:$0xf]  }
  0x68   :  { %v928_v39 = vld [vmem:[#allocation1 + $0x1c2] ss:$8 sm:$0xf0]   ;;  %v588_v63 = vld [vmem:[#allocation1 + $0x200] ss:$8 sm:$0xf0]  }
  0x69   :  { %v939_v41 = vld [vmem:[#allocation1 + $0x2c2] ss:$8 sm:$0xf]   ;;  %v930_v43 = vsel %vm502_vm0, %v928_v39, %v926_v38  ;;  %v984_v0 = vld [vmem:[#allocation1 + $0x101] ss:$8 sm:$0xf]   ;;  %v590_v2 = vsel %vm502_vm0, %v588_v63, %v586_v62 }
  0x6a   :  { %892 = vrot.lane.b32.xlu0 %v891_v34, %s1517_s0  ;;  %v941_v42 = vld [vmem:[#allocation1 + $0x242] ss:$8 sm:$0xf0]   ;;  %v986_v1 = vld [vmem:[#allocation1 + $0x101] ss:$8 sm:$0xf0]  }
  0x6b   :  { %905 = vrot.lane.b32.xlu1 %v904_v37, %s1517_s0  ;;  %v943_v51 = vsel %vm502_vm0, %v941_v42, %v939_v41  ;;  %v952_v52 = vld [vmem:[#allocation1 + $0x2e2] ss:$8 sm:$0xf]   ;;  %571 = vst.msk [vmem:[#allocation0 + $0x60] sm:$0xf] %vm504_vm1, %v568_v61   ;;  %v988_v22 = vsel %vm502_vm0, %v986_v1, %v984_v0 }
  0x6c   :  { %573 = vst.msk [vmem:[#allocation0 + $0x64] sm:$0xf0] %vm504_vm1, %v568_v61   ;;  %v608_v3 = vld [vmem:[#allocation1 + $0x280] ss:$8 sm:$0xf]  }
  0x6d   :  { %v610_v4 = vld [vmem:[#allocation1 + $0x280] ss:$8 sm:$0xf0]   ;;  %593 = vst.msk [vmem:[#allocation0 + $0x80] sm:$0xf] %vm504_vm1, %v590_v2  }
  0x6e   :  { %918 = vrot.lane.b32.xlu0 %v917_v40, %s1517_s0  ;;  %595 = vst.msk [vmem:[#allocation0 + $0x84] sm:$0xf0] %vm504_vm1, %v590_v2   ;;  %v612_v6 = vsel %vm502_vm0, %v610_v4, %v608_v3  ;;  %v509_v7 = vld [vmem:[#allocation1 + $0x40] ss:$8 sm:$0xf]  }
  0x6f   :  { %931 = vrot.lane.b32.xlu1 %v930_v43, %s1517_s0  ;;  %v511_v8 = vld [vmem:[#allocation1 + $0x40] ss:$8 sm:$0xf0]   ;;  %v997_v9 = vld [vmem:[#allocation1 + $0x181] ss:$8 sm:$0xf]  }
  0x70   :  { %v999_v10 = vld [vmem:[#allocation1 + $0x181] ss:$8 sm:$0xf0]   ;;  %615 = vst.msk [vmem:[#allocation0 + $0xa0] sm:$0xf] %vm504_vm1, %v612_v6   ;;  %v513_v11 = vsel %vm502_vm0, %v511_v8, %v509_v7 }
  0x71   :  { %617 = vst.msk [vmem:[#allocation0 + $0xa4] sm:$0xf0] %vm504_vm1, %v612_v6   ;;  %v630_v12 = vld [vmem:[#allocation1 + $0x300] ss:$8 sm:$0xf]   ;;  %v1001_v29 = vsel %vm502_vm0, %v999_v10, %v997_v9 }
  0x72   :  { %944 = vrot.lane.b32.xlu0 %v943_v51, %s1517_s0  ;;  %v531_v13 = vld [vmem:[#allocation1 + $0xc0] ss:$8 sm:$0xf]   ;;  %516 = vst.msk [vmem:[#allocation0 + $0x10] sm:$0xf] %vm504_vm1, %v513_v11  }
  0x73   :  { %953 = vrot.lane.b32.xlu1 %v952_v52, %s1517_s0  ;;  %633 = vst.msk [vmem:[#allocation0 + $0xc0] sm:$0xf] %vm504_vm1, %v630_v12   ;;  %518 = vst.msk [vmem:[#allocation0 + $0x14] sm:$0xf0] %vm504_vm1, %v513_v11  }
  0x74   :  { %v533_v15 = vld [vmem:[#allocation1 + $0xc0] ss:$8 sm:$0xf0]   ;;  %v1010_v17 = vld [vmem:[#allocation1 + $0x201] ss:$8 sm:$0xf]  }
  0x75   :  { %v553_v16 = vld [vmem:[#allocation1 + $0x140] ss:$8 sm:$0xf]   ;;  %v1012_v18 = vld [vmem:[#allocation1 + $0x201] ss:$8 sm:$0xf0]   ;;  %v535_v19 = vsel %vm502_vm0, %v533_v15, %v531_v13 }
  0x76   :  { %964 = vrot.lane.b32.xlu0 %v963_v5, %s1518_s10  ;;  %v555_v20 = vld [vmem:[#allocation1 + $0x140] ss:$8 sm:$0xf0]   ;;  %538 = vst.msk [vmem:[#allocation0 + $0x30] sm:$0xf] %vm504_vm1, %v535_v19   ;;  %v1014_v35 = vsel %vm502_vm0, %v1012_v18, %v1010_v17 }
  0x77   :  { %v575_v21 = vld [vmem:[#allocation1 + $0x1c0] ss:$8 sm:$0xf]   ;;  %540 = vst.msk [vmem:[#allocation0 + $0x34] sm:$0xf0] %vm504_vm1, %v535_v19   ;;  %v557_v23 = vsel %vm502_vm0, %v555_v20, %v553_v16  ;;  %976 = vrot.lane.b32.xlu1 %v975_v14, %s1518_s10 }
  0x78   :  { %v577_v24 = vld [vmem:[#allocation1 + $0x1c0] ss:$8 sm:$0xf0]   ;;  %560 = vst.msk [vmem:[#allocation0 + $0x50] sm:$0xf] %vm504_vm1, %v557_v23  }
  0x79   :  { %v597_v25 = vld [vmem:[#allocation1 + $0x240] ss:$8 sm:$0xf]   ;;  %562 = vst.msk [vmem:[#allocation0 + $0x54] sm:$0xf0] %vm504_vm1, %v557_v23   ;;  %v579_v26 = vsel %vm502_vm0, %v577_v24, %v575_v21 }
  0x7a   :  { %v599_v27 = vld [vmem:[#allocation1 + $0x240] ss:$8 sm:$0xf0]   ;;  %582 = vst.msk [vmem:[#allocation0 + $0x70] sm:$0xf] %vm504_vm1, %v579_v26   ;;  %989 = vrot.lane.b32.xlu0 %v988_v22, %s1518_s10 }
  0x7b   :  { %v619_v28 = vld [vmem:[#allocation1 + $0x2c0] ss:$8 sm:$0xf]   ;;  %584 = vst.msk [vmem:[#allocation0 + $0x74] sm:$0xf0] %vm504_vm1, %v579_v26   ;;  %v601_v30 = vsel %vm502_vm0, %v599_v27, %v597_v25  ;;  %1002 = vrot.lane.b32.xlu1 %v1001_v29, %s1518_s10 }
  0x7c   :  { %v621_v31 = vld [vmem:[#allocation1 + $0x2c0] ss:$8 sm:$0xf0]   ;;  %v1023_v32 = vld [vmem:[#allocation1 + $0x281] ss:$8 sm:$0xf]  }
  0x7d   :  { %v1025_v33 = vld [vmem:[#allocation1 + $0x281] ss:$8 sm:$0xf0]   ;;  %604 = vst.msk [vmem:[#allocation0 + $0x90] sm:$0xf] %vm504_vm1, %v601_v30   ;;  %v623_v34 = vsel %vm502_vm0, %v621_v31, %v619_v28 }
  0x7e   :  { %606 = vst.msk [vmem:[#allocation0 + $0x94] sm:$0xf0] %vm504_vm1, %v601_v30   ;;  %626 = vst.msk [vmem:[#allocation0 + $0xb0] sm:$0xf] %vm504_vm1, %v623_v34   ;;  %v1027_v38 = vsel %vm502_vm0, %v1025_v33, %v1023_v32  ;;  %1015 = vrot.lane.b32.xlu0 %v1014_v35, %s1518_s10 }
  0x7f   :  { %628 = vst.msk [vmem:[#allocation0 + $0xb4] sm:$0xf0] %vm504_vm1, %v623_v34   ;;  %v1036_v36 = vld [vmem:[#allocation1 + $0x301] ss:$8 sm:$0xf]   ;;  %1028 = vrot.lane.b32.xlu1 %v1027_v38, %s1518_s10 }
  0x80   :  { %v1038_v37 = vld [vmem:[#allocation1 + $0x21] ss:$8 sm:$0xf0]  }
  0x81   :  { %v1049_v39 = vld [vmem:[#allocation1 + $0xc1] ss:$8 sm:$0xf]   ;;  %v1040_v41 = vsel %vm502_vm0, %v1038_v37, %v1036_v36 }
  0x82   :  { %v1051_v40 = vld [vmem:[#allocation1 + $0x41] ss:$8 sm:$0xf0]   ;;  %1041 = vrot.lane.b32.xlu0 %v1040_v41, %s1518_s10 }
  0x83   :  { %v1062_v42 = vld [vmem:[#allocation1 + $0x141] ss:$8 sm:$0xf]   ;;  %v1053_v44 = vsel %vm502_vm0, %v1051_v40, %v1049_v39 }
  0x84   :  { %v1064_v43 = vld [vmem:[#allocation1 + $0xc1] ss:$8 sm:$0xf0]   ;;  %1054 = vrot.lane.b32.xlu1 %v1053_v44, %s1518_s10 }
  0x85   :  { %v1075_v45 = vld [vmem:[#allocation1 + $0x1c1] ss:$8 sm:$0xf]   ;;  %v1066_v47 = vsel %vm502_vm0, %v1064_v43, %v1062_v42 }
  0x86   :  { %v1077_v46 = vld [vmem:[#allocation1 + $0x141] ss:$8 sm:$0xf0]   ;;  %1067 = vrot.lane.b32.xlu0 %v1066_v47, %s1518_s10 }
  0x87   :  { %v1088_v48 = vld [vmem:[#allocation1 + $0x241] ss:$8 sm:$0xf]   ;;  %v1079_v50 = vsel %vm502_vm0, %v1077_v46, %v1075_v45  ;;  %v641_v56 = vpop.permute.xlu0 %640  }
  0x88   :  { %v1090_v49 = vld [vmem:[#allocation1 + $0x1c1] ss:$8 sm:$0xf0]   ;;  %1080 = vrot.lane.b32.xlu1 %v1079_v50, %s1518_s10  ;;  %643 = vst.msk [vmem:[#allocation0] sm:$0xf] %vm642_vm2, %v641_v56  }
  0x89   :  { %v1101_v51 = vld [vmem:[#allocation1 + $0x2c1] ss:$8 sm:$0xf]   ;;  %v1092_v53 = vsel %vm502_vm0, %v1090_v49, %v1088_v48  ;;  %645 = vst.msk [vmem:[#allocation0 + $0x4] sm:$0xf0] %vm642_vm2, %v641_v56  }
  0x8a   :  { %v1103_v52 = vld [vmem:[#allocation1 + $0x241] ss:$8 sm:$0xf0]   ;;  %1093 = vrot.lane.b32.xlu0 %v1092_v53, %s1518_s10 }
  0x8b   :  { %v1105_v54 = vsel %vm502_vm0, %v1103_v52, %v1101_v51  ;;  %v1114_v55 = vld [vmem:[#allocation1 + $0x2e1] ss:$8 sm:$0xf]  }
  0x8c   :  { %1106 = vrot.lane.b32.xlu1 %v1105_v54, %s1518_s10  ;;  %v653_v57 = vpop.permute.xlu0 %652  }
  0x8d   :  { %656 = vst.msk [vmem:[#allocation0 + $0x20] sm:$0xf] %vm642_vm2, %v653_v57   ;;  %658 = vst.msk [vmem:[#allocation0 + $0x24] sm:$0xf0] %vm642_vm2, %v653_v57  }
  0x8e   :  { %1115 = vrot.lane.b32.xlu0 %v1114_v55, %s1518_s10 }
  0x90   :  { %v666_v58 = vpop.permute.xlu1 %665  }
  0x91   :  { %669 = vst.msk [vmem:[#allocation0 + $0x40] sm:$0xf] %vm642_vm2, %v666_v58   ;;  %671 = vst.msk [vmem:[#allocation0 + $0x44] sm:$0xf0] %vm642_vm2, %v666_v58  }
  0x97   :  { %v679_v59 = vpop.permute.xlu1 %678  }
  0x98   :  { %682 = vst.msk [vmem:[#allocation0 + $0x60] sm:$0xf] %vm642_vm2, %v679_v59   ;;  %684 = vst.msk [vmem:[#allocation0 + $0x64] sm:$0xf0] %vm642_vm2, %v679_v59  }
  0xa0   :  { %v692_v60 = vpop.permute.xlu0 %691  }
  0xa1   :  { %695 = vst.msk [vmem:[#allocation0 + $0x80] sm:$0xf] %vm642_vm2, %v692_v60   ;;  %697 = vst.msk [vmem:[#allocation0 + $0x84] sm:$0xf0] %vm642_vm2, %v692_v60  }
  0xa6   :  { %v705_v61 = vpop.permute.xlu1 %704  }
  0xa7   :  { %708 = vst.msk [vmem:[#allocation0 + $0xa0] sm:$0xf] %vm642_vm2, %v705_v61   ;;  %710 = vst.msk [vmem:[#allocation0 + $0xa4] sm:$0xf0] %vm642_vm2, %v705_v61  }
  0xab   :  { %v718_v62 = vpop.permute.xlu0 %717  }
  0xac   :  { %721 = vst.msk [vmem:[#allocation0 + $0xc0] sm:$0xf] %vm642_vm2, %v718_v62   ;;  %723 = vst.msk [vmem:[#allocation0 + $0xc] sm:$0xf0] %vm642_vm2, %v718_v62  }
  0xb1   :  { %v731_v63 = vpop.permute.xlu1 %730  }
  0xb2   :  { %734 = vst.msk [vmem:[#allocation0 + $0x30] sm:$0xf] %vm642_vm2, %v731_v63   ;;  %736 = vst.msk [vmem:[#allocation0 + $0x14] sm:$0xf0] %vm642_vm2, %v731_v63  }
  0xba   :  { %v744_v0 = vpop.permute.xlu0 %743  }
  0xbb   :  { %747 = vst.msk [vmem:[#allocation0 + $0x50] sm:$0xf] %vm642_vm2, %v744_v0   ;;  %749 = vst.msk [vmem:[#allocation0 + $0x34] sm:$0xf0] %vm642_vm2, %v744_v0  }
  0xc1   :  { %v757_v1 = vpop.permute.xlu1 %756  }
  0xc2   :  { %760 = vst.msk [vmem:[#allocation0 + $0x70] sm:$0xf] %vm642_vm2, %v757_v1   ;;  %762 = vst.msk [vmem:[#allocation0 + $0x54] sm:$0xf0] %vm642_vm2, %v757_v1  }
  0xc5   :  { %v770_v2 = vpop.permute.xlu0 %769  }
  0xc6   :  { %773 = vst.msk [vmem:[#allocation0 + $0x90] sm:$0xf] %vm642_vm2, %v770_v2   ;;  %775 = vst.msk [vmem:[#allocation0 + $0x74] sm:$0xf0] %vm642_vm2, %v770_v2  }
  0xc9   :  { %v783_v3 = vpop.permute.xlu1 %782  }
  0xca   :  { %786 = vst.msk [vmem:[#allocation0 + $0xb0] sm:$0xf] %vm642_vm2, %v783_v3   ;;  %788 = vst.msk [vmem:[#allocation0 + $0x94] sm:$0xf0] %vm642_vm2, %v783_v3  }
  0xcc   :  { %v792_v4 = vpop.permute.xlu0 %791  }
  0xcd   :  { %795 = vst.msk [vmem:[#allocation0 + $0xb8] sm:$0xf] %vm642_vm2, %v792_v4   ;;  %v803_v5 = vpop.permute.xlu1 %802  }
  0xce   :  { %805 = vst.msk [vmem:[#allocation0] sm:$0xf] %vm804_vm3, %v803_v5   ;;  %807 = vst.msk [vmem:[#allocation0 + $0x4] sm:$0xf0] %vm804_vm3, %v803_v5  }
  0xd0   :  { %v815_v6 = vpop.permute.xlu0 %814  }
  0xd1   :  { %818 = vst.msk [vmem:[#allocation0 + $0x20] sm:$0xf] %vm804_vm3, %v815_v6   ;;  %820 = vst.msk [vmem:[#allocation0 + $0x24] sm:$0xf0] %vm804_vm3, %v815_v6   ;;  %v828_v7 = vpop.permute.xlu1 %827  }
  0xd2   :  { %831 = vst.msk [vmem:[#allocation0 + $0x40] sm:$0xf] %vm804_vm3, %v828_v7   ;;  %833 = vst.msk [vmem:[#allocation0 + $0x44] sm:$0xf0] %vm804_vm3, %v828_v7  }
  0xd4   :  { %v841_v8 = vpop.permute.xlu0 %840  }
  0xd5   :  { %844 = vst.msk [vmem:[#allocation0 + $0x60] sm:$0xf] %vm804_vm3, %v841_v8   ;;  %846 = vst.msk [vmem:[#allocation0 + $0x64] sm:$0xf0] %vm804_vm3, %v841_v8   ;;  %v854_v9 = vpop.permute.xlu1 %853  }
  0xd6   :  { %857 = vst.msk [vmem:[#allocation0 + $0x80] sm:$0xf] %vm804_vm3, %v854_v9   ;;  %859 = vst.msk [vmem:[#allocation0 + $0x84] sm:$0xf0] %vm804_vm3, %v854_v9  }
  0xd8   :  { %v867_v10 = vpop.permute.xlu0 %866  }
  0xd9   :  { %870 = vst.msk [vmem:[#allocation0 + $0xa0] sm:$0xf] %vm804_vm3, %v867_v10   ;;  %872 = vst.msk [vmem:[#allocation0 + $0xa4] sm:$0xf0] %vm804_vm3, %v867_v10   ;;  %v880_v11 = vpop.permute.xlu1 %879  }
  0xda   :  { %883 = vst.msk [vmem:[#allocation0 + $0xc0] sm:$0xf] %vm804_vm3, %v880_v11   ;;  %885 = vst.msk [vmem:[#allocation0 + $0xc] sm:$0xf0] %vm804_vm3, %v880_v11  }
  0xdc   :  { %v893_v12 = vpop.permute.xlu0 %892  }
  0xdd   :  { %896 = vst.msk [vmem:[#allocation0 + $0x30] sm:$0xf] %vm804_vm3, %v893_v12   ;;  %898 = vst.msk [vmem:[#allocation0 + $0x14] sm:$0xf0] %vm804_vm3, %v893_v12   ;;  %v906_v13 = vpop.permute.xlu1 %905  }
  0xde   :  { %909 = vst.msk [vmem:[#allocation0 + $0x50] sm:$0xf] %vm804_vm3, %v906_v13   ;;  %911 = vst.msk [vmem:[#allocation0 + $0x34] sm:$0xf0] %vm804_vm3, %v906_v13  }
  0xe0   :  { %v919_v14 = vpop.permute.xlu0 %918  }
  0xe1   :  { %922 = vst.msk [vmem:[#allocation0 + $0x70] sm:$0xf] %vm804_vm3, %v919_v14   ;;  %924 = vst.msk [vmem:[#allocation0 + $0x54] sm:$0xf0] %vm804_vm3, %v919_v14   ;;  %v932_v15 = vpop.permute.xlu1 %931  }
  0xe2   :  { %935 = vst.msk [vmem:[#allocation0 + $0x90] sm:$0xf] %vm804_vm3, %v932_v15   ;;  %937 = vst.msk [vmem:[#allocation0 + $0x74] sm:$0xf0] %vm804_vm3, %v932_v15  }
  0xe4   :  { %v945_v16 = vpop.permute.xlu0 %944  }
  0xe5   :  { %948 = vst.msk [vmem:[#allocation0 + $0xb0] sm:$0xf] %vm804_vm3, %v945_v16   ;;  %950 = vst.msk [vmem:[#allocation0 + $0x94] sm:$0xf0] %vm804_vm3, %v945_v16   ;;  %v954_v17 = vpop.permute.xlu1 %953  }
  0xe6   :  { %957 = vst.msk [vmem:[#allocation0 + $0xb8] sm:$0xf] %vm804_vm3, %v954_v17  }
  0xe8   :  { %v965_v18 = vpop.permute.xlu0 %964  }
  0xe9   :  { %967 = vst.msk [vmem:[#allocation0] sm:$0xf] %vm966_vm4, %v965_v18   ;;  %969 = vst.msk [vmem:[#allocation0 + $0x4] sm:$0xf0] %vm966_vm4, %v965_v18   ;;  %v977_v19 = vpop.permute.xlu1 %976  }
  0xea   :  { %980 = vst.msk [vmem:[#allocation0 + $0x20] sm:$0xf] %vm966_vm4, %v977_v19   ;;  %982 = vst.msk [vmem:[#allocation0 + $0x24] sm:$0xf0] %vm966_vm4, %v977_v19  }
  0xec   :  { %v990_v20 = vpop.permute.xlu0 %989  }
  0xed   :  { %993 = vst.msk [vmem:[#allocation0 + $0x40] sm:$0xf] %vm966_vm4, %v990_v20   ;;  %995 = vst.msk [vmem:[#allocation0 + $0x44] sm:$0xf0] %vm966_vm4, %v990_v20   ;;  %v1003_v21 = vpop.permute.xlu1 %1002  }
  0xee   :  { %1006 = vst.msk [vmem:[#allocation0 + $0x60] sm:$0xf] %vm966_vm4, %v1003_v21   ;;  %1008 = vst.msk [vmem:[#allocation0 + $0x64] sm:$0xf0] %vm966_vm4, %v1003_v21  }
  0xf0   :  { %v1123_v22 = vld [vmem:[#allocation0] sm:$0xf]  ;;  %v1127_v23 = vld [vmem:[#allocation0 + $0x8] sm:$0xf]  ;;  %v1016_v24 = vpop.permute.xlu0 %1015  }
  0xf1   :  { %1125 = vst [vmem:[%s2092_s1] sm:$0xf] %v1123_v22  ;;  %1489 = vst [vmem:[%s2092_s1 + $0x4] sm:$0xf] %v1127_v23  ;;  %v1144_v25 = vld [vmem:[#allocation0 + $0x20] sm:$0xf]  ;;  %v1029_v27 = vpop.permute.xlu1 %1028  }
  0xf2   :  { %1019 = vst.msk [vmem:[#allocation0 + $0x80] sm:$0xf] %vm966_vm4, %v1016_v24   ;;  %1021 = vst.msk [vmem:[#allocation0 + $0x84] sm:$0xf0] %vm966_vm4, %v1016_v24   ;;  %v1150_v26 = vld [vmem:[#allocation0 + $0x28] sm:$0xf] }
  0xf3   :  { %1492 = vst [vmem:[%s2092_s1 + $0x10] sm:$0xf] %v1144_v25  ;;  %1493 = vst [vmem:[%s2092_s1 + $0x14] sm:$0xf] %v1150_v26 }
  0xf4   :  { %1032 = vst.msk [vmem:[#allocation0 + $0xa0] sm:$0xf] %vm966_vm4, %v1029_v27   ;;  %1034 = vst.msk [vmem:[#allocation0 + $0xa4] sm:$0xf0] %vm966_vm4, %v1029_v27   ;;  %v1168_v28 = vld [vmem:[#allocation0 + $0x40] sm:$0xf]  ;;  %v1042_v30 = vpop.permute.xlu0 %1041  }
  0xf5   :  { %v1174_v29 = vld [vmem:[#allocation0 + $0x48] sm:$0xf]  ;;  %1496 = vst [vmem:[%s2092_s1 + $0x20] sm:$0xf] %v1168_v28  ;;  %1045 = vst.msk [vmem:[#allocation0 + $0xc0] sm:$0xf] %vm966_vm4, %v1042_v30  }
  0xf6   :  { %1497 = vst [vmem:[%s2092_s1 + $0x24] sm:$0xf] %v1174_v29  ;;  %1047 = vst.msk [vmem:[#allocation0 + $0xc] sm:$0xf0] %vm966_vm4, %v1042_v30   ;;  %v1192_v31 = vld [vmem:[#allocation0 + $0x60] sm:$0xf]  ;;  %v1055_v33 = vpop.permute.xlu1 %1054  }
  0xf7   :  { %v1198_v32 = vld [vmem:[#allocation0 + $0x68] sm:$0xf]  ;;  %1500 = vst [vmem:[%s2092_s1 + $0x30] sm:$0xf] %v1192_v31  ;;  %1058 = vst.msk [vmem:[#allocation0 + $0x30] sm:$0xf] %vm966_vm4, %v1055_v33  }
  0xf8   :  { %1501 = vst [vmem:[%s2092_s1 + $0x34] sm:$0xf] %v1198_v32  ;;  %1060 = vst.msk [vmem:[#allocation0 + $0x14] sm:$0xf0] %vm966_vm4, %v1055_v33   ;;  %v1068_v36 = vpop.permute.xlu0 %1067  }
  0xf9   :  { %v1216_v34 = vld [vmem:[#allocation0 + $0x80] sm:$0xf]  ;;  %v1222_v35 = vld [vmem:[#allocation0 + $0x88] sm:$0xf]  ;;  %1071 = vst.msk [vmem:[#allocation0 + $0x50] sm:$0xf] %vm966_vm4, %v1068_v36  }
  0xfa   :  { %1504 = vst [vmem:[%s2092_s1 + $0x40] sm:$0xf] %v1216_v34  ;;  %1505 = vst [vmem:[%s2092_s1 + $0x44] sm:$0xf] %v1222_v35  ;;  %v1081_v39 = vpop.permute.xlu1 %1080  }
  0xfb   :  { %1073 = vst.msk [vmem:[#allocation0 + $0x34] sm:$0xf0] %vm966_vm4, %v1068_v36   ;;  %v1240_v37 = vld [vmem:[#allocation0 + $0xa0] sm:$0xf]  ;;  %v1246_v38 = vld [vmem:[#allocation0 + $0xa8] sm:$0xf] }
  0xfc   :  { %1508 = vst [vmem:[%s2092_s1 + $0x50] sm:$0xf] %v1240_v37  ;;  %1509 = vst [vmem:[%s2092_s1 + $0x54] sm:$0xf] %v1246_v38  ;;  %v1264_v41 = vld [vmem:[#allocation0 + $0xc0] sm:$0xf]  ;;  %v1094_v42 = vpop.permute.xlu0 %1093  }
  0xfd   :  { %1084 = vst.msk [vmem:[#allocation0 + $0x70] sm:$0xf] %vm966_vm4, %v1081_v39   ;;  %1086 = vst.msk [vmem:[#allocation0 + $0x54] sm:$0xf0] %vm966_vm4, %v1081_v39   ;;  %v1132_v40 = vld [vmem:[#allocation0 + $0x10] sm:$0xf] }
  0xfe   :  { %1490 = vst [vmem:[%s2092_s1 + $0x8] sm:$0xf] %v1132_v40  ;;  %1512 = vst [vmem:[%s2092_s1 + $0x60] sm:$0xf] %v1264_v41  ;;  %v1156_v44 = vld [vmem:[#allocation0 + $0x30] sm:$0xf]  ;;  %v1107_v45 = vpop.permute.xlu1 %1106  }
  0xff   :  { %1097 = vst.msk [vmem:[#allocation0 + $0x90] sm:$0xf] %vm966_vm4, %v1094_v42   ;;  %1099 = vst.msk [vmem:[#allocation0 + $0x74] sm:$0xf0] %vm966_vm4, %v1094_v42   ;;  %v1138_v43 = vld [vmem:[#allocation0 + $0x18] sm:$0xf] }
 0x100   :  { %1491 = vst [vmem:[%s2092_s1 + $0xc] sm:$0xf] %v1138_v43  ;;  %1494 = vst [vmem:[%s2092_s1 + $0x18] sm:$0xf] %v1156_v44  ;;  %v1180_v47 = vld [vmem:[#allocation0 + $0x50] sm:$0xf]  ;;  %v1116_v48 = vpop.permute.xlu0 %1115  }
 0x101   :  { %1110 = vst.msk [vmem:[#allocation0 + $0xb0] sm:$0xf] %vm966_vm4, %v1107_v45   ;;  %1112 = vst.msk [vmem:[#allocation0 + $0x94] sm:$0xf0] %vm966_vm4, %v1107_v45  }
 0x102   :  { %v1162_v46 = vld [vmem:[#allocation0 + $0x38] sm:$0xf]  ;;  %1498 = vst [vmem:[%s2092_s1 + $0x28] sm:$0xf] %v1180_v47  ;;  %1119 = vst.msk [vmem:[#allocation0 + $0xb8] sm:$0xf] %vm966_vm4, %v1116_v48  }
 0x103   :  { %1495 = vst [vmem:[%s2092_s1 + $0x1c] sm:$0xf] %v1162_v46 }
 0x104   :  { %v1186_v49 = vld [vmem:[#allocation0 + $0x58] sm:$0xf]  ;;  %v1204_v50 = vld [vmem:[#allocation0 + $0x70] sm:$0xf] }
 0x105   :  { %1499 = vst [vmem:[%s2092_s1 + $0x2c] sm:$0xf] %v1186_v49  ;;  %1502 = vst [vmem:[%s2092_s1 + $0x38] sm:$0xf] %v1204_v50 }
 0x106   :  { %v1210_v51 = vld [vmem:[#allocation0 + $0x78] sm:$0xf]  ;;  %v1228_v52 = vld [vmem:[#allocation0 + $0x90] sm:$0xf] }
 0x107   :  { %1503 = vst [vmem:[%s2092_s1 + $0x3c] sm:$0xf] %v1210_v51  ;;  %1506 = vst [vmem:[%s2092_s1 + $0x48] sm:$0xf] %v1228_v52 }
 0x108   :  { %v1234_v53 = vld [vmem:[#allocation0 + $0x98] sm:$0xf]  ;;  %v1252_v54 = vld [vmem:[#allocation0 + $0xb0] sm:$0xf] }
 0x109   :  { %1507 = vst [vmem:[%s2092_s1 + $0x4c] sm:$0xf] %v1234_v53  ;;  %1510 = vst [vmem:[%s2092_s1 + $0x58] sm:$0xf] %v1252_v54  ;;  %v1258_v55 = vld [vmem:[#allocation0 + $0xb8] sm:$0xf] }
 0x10a   :  { %1511 = vst [vmem:[%s2092_s1 + $0x5c] sm:$0xf] %v1258_v55 }

// kernel: model_forward.1
= control target key start
LH: loop header
LB: loop body
LE: loop exit
PB: predicated region body
PF: predicated region fallthrough
CT: control target
= control target key end

     0   :  { %s2826_s12 = smov 0   ;;  %s5988_s0 = inlined_call_operand.vmem [shape: f32[2,8,8,128], index: 0, kind: input, shape index: {}]   ;;  %s5989_s1 = inlined_call_operand.vmem [shape: f32[4,5,5,128], index: 1, kind: input, shape index: {}]   ;;  %s5990_s2 = inlined_call_operand.vmem [shape: f32[1,128], index: 2, kind: input, shape index: {}]   ;;  %s5991_s3 = inlined_call_operand.vmem [shape: f32[2,14,2,7,128], index: 3, kind: output, shape index: {}]  }
   0x1 LB: > { %s2433_s13 = sadd.s32 4294967295, %s2803_s12   ;;  %p2437_p0 = scmp.ge.s32.totalorder %s2803_s12, 1  ;;  %s2803_s12 = sphi %s2826_s12, %s13_s12  }
   0x2   : > { %p137_p1 = scmp.lt.s32.totalorder %s2803_s12, 3 }
   0x4   : > { %p138_p2 = pnand %p2437_p0, %p137_p1 }
   0x6   : > { %141 = sbr.rel (%p138_p2) target bundleno = 443 (0x1bb), region = 32 }
   0xd   : > { %v2805_v0 = vmov 0.0   ;;  %p161_p3 = scmp.lt.s32.totalorder %s2433_s13, 1  ;;  %v2843_v1 = vld [vmem:[%s5989_s1] ss:$0 sm:$0xff]  ;;  %v2848_v2 = vld [vmem:[%s5989_s1 + $0x8] ss:$0 sm:$0xff] }
   0xe   : > { %171 = vst [vmem:[#allocation2] sm:$0xff] %v2805_v0  ;;  %172 = vst [vmem:[#allocation2 + $0x8] sm:$0xf] %v2805_v0  ;;  %v2853_v4 = vld [vmem:[%s5989_s1 + $0x28] ss:$0 sm:$0xff] }
   0xf   : > { %173 = vst [vmem:[#allocation2 + $0x10] sm:$0xff] %v2805_v0  ;;  %174 = vst [vmem:[#allocation2 + $0x18] sm:$0xf] %v2805_v0  ;;  %s6815_s13 = smov (!%p161_p3, %s2433_s13), 1  ;;  %v2858_v5 = vld [vmem:[%s5989_s1 + $0x30] ss:$0 sm:$0xff] }
  0x10   : > { %176 = vst [vmem:[#allocation2 + $0xa0] sm:$0xff] %v2805_v0  ;;  %177 = vst [vmem:[#allocation2 + $0xa8] sm:$0xf] %v2805_v0  ;;  %s2666_s22 = sshll.u32 %s6815_s13, 6  ;;  %v2864_v7 = vld [vmem:[%s5989_s1 + $0x1] ss:$0 sm:$0xff] }
  0x11   : > { %178 = vst [vmem:[#allocation2 + $0xb0] sm:$0xff] %v2805_v0  ;;  %179 = vst [vmem:[#allocation2 + $0xb8] sm:$0xf] %v2805_v0  ;;  %v2869_v9 = vld [vmem:[%s5989_s1 + $0x50] ss:$0 sm:$0xff]  ;;  %s165_s29 = scalar_lea.vmem %s5988_s0, %s2666_s22  ;;  %s2667_s27 = smul.u32 224, %s6815_s13 }
  0x12   : > { %181 = vst [vmem:[#allocation2 + $0x20] sm:$0x3] %v2805_v0  ;;  %182 = vst [vmem:[#allocation2 + $0x30] sm:$0x3] %v2805_v0  ;;  %v2877_v11 = vld [vmem:[%s5989_s1 + $0x9] ss:$0 sm:$0xff] }
  0x13   : > { %183 = vst [vmem:[#allocation2 + $0x40] sm:$0x3] %v2805_v0  ;;  %184 = vst [vmem:[#allocation2 + $0x50] sm:$0x3] %v2805_v0  ;;  %v2882_v12 = vld [vmem:[%s5989_s1 + $0x51] ss:$0 sm:$0xff] }
  0x14   : > { %185 = vst [vmem:[#allocation2 + $0x60] sm:$0x3] %v2805_v0  ;;  %186 = vst [vmem:[#allocation2 + $0x70] sm:$0x3] %v2805_v0  ;;  %v198_v13 = vld [vmem:[%s165_s29] sm:$0xff]  ;;  %v199_v14 = vld [vmem:[%s165_s29 + $0x8] sm:$0xff] }
  0x15   : > { %187 = vst [vmem:[#allocation2 + $0x80] sm:$0x3] %v2805_v0  ;;  %188 = vst [vmem:[#allocation2 + $0x90] sm:$0x3] %v2805_v0  ;;  %v214_v3 = vld [vmem:[#allocation2] sm:$0x7f] }
  0x16   : > { %189 = vst [vmem:[#allocation2 + $0x2a] sm:$0x3] %v2805_v0  ;;  %190 = vst [vmem:[#allocation2 + $0x3a] sm:$0x3] %v2805_v0  ;;  %v425_v6 = vld [vmem:[#allocation2 + $0x1] sm:$0x7f]  ;;  %v231_v19 = vmul.f32 %v2843_v1, %v214_v3 }
  0x17   : > { %191 = vst [vmem:[#allocation2 + $0x4a] sm:$0x3] %v2805_v0  ;;  %192 = vst [vmem:[#allocation2 + $0x5a] sm:$0x3] %v2805_v0  ;;  %v215_v8 = vld [vmem:[#allocation2 + $0x10] sm:$0x7f]  ;;  %v462_v25 = vmul.f32 %v2853_v4, %v425_v6  ;;  %v2907_v30 = vmul.f32 %v2864_v7, %v425_v6 }
  0x18   : > { %193 = vst [vmem:[#allocation2 + $0x6a] sm:$0x3] %v2805_v0  ;;  %194 = vst [vmem:[#allocation2 + $0x7a] sm:$0x3] %v2805_v0  ;;  %v426_v10 = vld [vmem:[#allocation2 + $0x11] sm:$0x7f]  ;;  %v251_v20 = vmul.f32 %v2848_v2, %v215_v8  ;;  %v232_v31 = vmul.f32 %v2843_v1, %v215_v8  ;;  %v331_v32 = vmul.f32 %v2869_v9, %v215_v8 }
  0x19   : > { %195 = vst [vmem:[#allocation2 + $0x8a] sm:$0x3] %v2805_v0  ;;  %196 = vst [vmem:[#allocation2 + $0x9a] sm:$0x3] %v2805_v0  ;;  %v200_v15 = vld [vmem:[%s165_s29 + $0x10] sm:$0xff]  ;;  %v201_v16 = vld [vmem:[%s165_s29 + $0x18] sm:$0xff]  ;;  %v501_v26 = vmul.f32 %v2858_v5, %v426_v10  ;;  %v2912_v34 = vmul.f32 %v2864_v7, %v426_v10  ;;  %v2926_v40 = vmul.f32 %v2853_v4, %v426_v10 }
  0x1a   : > { %6236 = vst [vmem:[#allocation3_spill] sm:$0xff] %v2848_v2  ;;  %6237 = vst [vmem:[#allocation4_spill] sm:$0xff] %v2864_v7  ;;  %v202_v17 = vld [vmem:[%s165_s29 + $0x20] sm:$0xff]  ;;  %v203_v18 = vld [vmem:[%s165_s29 + $0x28] sm:$0xff]  ;;  %v2929_v41 = vmul.f32 %v2877_v11, %v426_v10  ;;  %v2936_v43 = vmul.f32 %v2882_v12, %v426_v10  ;;  %v258_v47 = vadd.f32 %v251_v20, %v231_v19 }
  0x1b   : > { %6238 = vst [vmem:[#allocation5_spill] sm:$0xff] %v2877_v11  ;;  %206 = vst [vmem:[#allocation2 + $0x22] sm:$0xff] %v198_v13  ;;  %v2886_v21 = vld [vmem:[#allocation2 + $0xa1] sm:$0x7f]  ;;  %v2891_v22 = vld [vmem:[%s5989_s1 + $0x48] ss:$0 sm:$0xff]  ;;  %v2960_v53 = vadd.f32 %v501_v26, %v462_v25 }
  0x1c   : > { %207 = vst [vmem:[#allocation2 + $0x32] sm:$0xff] %v199_v14  ;;  %208 = vst [vmem:[#allocation2 + $0x42] sm:$0xff] %v200_v15  ;;  %v204_v23 = vld [vmem:[%s165_s29 + $0x30] sm:$0xff]  ;;  %v205_v24 = vld [vmem:[%s165_s29 + $0x38] sm:$0xff]  ;;  %v2933_v42 = vmul.f32 %v2891_v22, %v2886_v21  ;;  %s3799_s29 = scalar_lea.vmem %s5991_s3, %s2667_s27 }
  0x1d   : > { %209 = vst [vmem:[#allocation2 + $0x52] sm:$0xff] %v201_v16  ;;  %210 = vst [vmem:[#allocation2 + $0x62] sm:$0xff] %v202_v17  ;;  %v2898_v27 = vld [vmem:[%s5989_s1 + $0x78] ss:$0 sm:$0xff]  ;;  %v2492_v28 = vld [vmem:[%s5989_s1 + $0x69] ss:$0 sm:$0xff] }
  0x1e   : > { %211 = vst [vmem:[#allocation2 + $0x72] sm:$0xff] %v203_v18  ;;  %v2494_v29 = vld [vmem:[%s5989_s1 + $0x90] ss:$0 sm:$0xff]  ;;  %212 = vst [vmem:[#allocation2 + $0x82] sm:$0xff] %v204_v23  ;;  %v436_v33 = vld [vmem:[#allocation2 + $0xb1] sm:$0x7f]  ;;  %v2942_v48 = vmul.f32 %v2898_v27, %v426_v10  ;;  %v2945_v49 = vmul.f32 %v2492_v28, %v2886_v21 }
  0x1f   : > { %213 = vst [vmem:[#allocation2 + $0x92] sm:$0xff] %v205_v24  ;;  %6239 = vst [vmem:[#allocation6_spill] sm:$0xff] %v2912_v34  ;;  %v2496_v35 = vld [vmem:[%s5989_s1 + $0x71] ss:$0 sm:$0xff]  ;;  %v2498_v36 = vld [vmem:[%s5989_s1 + $0x98] ss:$0 sm:$0xff]  ;;  %v2948_v50 = vmul.f32 %v2494_v29, %v2886_v21 }
  0x20   : > { %v827_v37 = vld [vmem:[#allocation2 + $0x2] sm:$0x7f]  ;;  %6241 = vst [vmem:[#allocation8_spill] sm:$0xff] %v2926_v40  ;;  %6242 = vst [vmem:[#allocation9_spill] sm:$0xff] %v2936_v43  ;;  %v828_v44 = vld [vmem:[#allocation2 + $0x12] sm:$0x7f]  ;;  %v2962_v54 = vmul.f32 %v2496_v35, %v436_v33  ;;  %v2964_v55 = vmul.f32 %v2498_v36, %v436_v33 }
  0x21   : > { %v2923_v38 = vld [vmem:[%s5989_s1 + $0x2] ss:$0 sm:$0xff]  ;;  %v2501_v45 = vld [vmem:[%s5989_s1 + $0x29] ss:$0 sm:$0xff]  ;;  %v225_v46 = vld [vmem:[#allocation2 + $0xb0] sm:$0x7f] }
  0x22   : > { %6240 = vst [vmem:[#allocation7_spill] sm:$0xff] %v2923_v38  ;;  %v224_v39 = vld [vmem:[#allocation2 + $0xa0] sm:$0x7f]  ;;  %6243 = vst [vmem:[#allocation10_spill] sm:$0xff] %v2942_v48  ;;  %v2953_v51 = vld [vmem:[%s5989_s1 + $0x10] ss:$0 sm:$0xff]  ;;  %v2967_v56 = vmul.f32 %v2923_v38, %v827_v37  ;;  %v2984_v61 = vmul.f32 %v2501_v45, %v827_v37  ;;  %v2986_v62 = vmul.f32 %v2501_v45, %v828_v44 }
  0x23   : > { %v2958_v52 = vld [vmem:[%s5989_s1 + $0x58] ss:$0 sm:$0xff]  ;;  %v2972_v57 = vld [vmem:[%s5989_s1 + $0x20] ss:$0 sm:$0xff]  ;;  %v2977_v58 = vld [vmem:[%s5989_s1 + $0x70] ss:$0 sm:$0xff]  ;;  %v3031_v26 = vmul.f32 %v2923_v38, %v828_v44 }
  0x24   : > { %6244 = vst [vmem:[#allocation11_spill] sm:$0xff] %v2967_v56  ;;  %v2982_v59 = vld [vmem:[%s5989_s1 + $0x68] ss:$0 sm:$0xff]  ;;  %6245 = vst [vmem:[#allocation12_spill] sm:$0xff] %v2986_v62  ;;  %v216_v63 = vld [vmem:[#allocation2 + $0x20] sm:$0x7f]  ;;  %v2989_v0 = vmul.f32 %v2972_v57, %v224_v39  ;;  %v2992_v3 = vmul.f32 %v2977_v58, %v224_v39  ;;  %v3010_v16 = vmul.f32 %v2977_v58, %v225_v46 }
  0x25   : > { %v837_v60 = vld [vmem:[#allocation2 + $0xa2] sm:$0x7f]  ;;  %v2997_v6 = vld [vmem:[%s5989_s1 + $0xa] ss:$0 sm:$0xff]  ;;  %v2505_v8 = vld [vmem:[%s5989_s1 + $0x31] ss:$0 sm:$0xff]  ;;  %v252_v10 = vmul.f32 %v2848_v2, %v216_v63  ;;  %v271_v13 = vmul.f32 %v2953_v51, %v216_v63  ;;  %v3013_v17 = vmul.f32 %v2982_v59, %v224_v39  ;;  %v332_v19 = vmul.f32 %v2869_v9, %v216_v63 }
  0x26   : > { %6246 = vst [vmem:[#allocation13_spill] sm:$0xff] %v2997_v6  ;;  %v217_v14 = vld [vmem:[#allocation2 + $0x30] sm:$0x7f]  ;;  %v3007_v15 = vld [vmem:[%s5989_s1 + $0x60] ss:$0 sm:$0xff]  ;;  %v351_v20 = vmul.f32 %v2958_v52, %v216_v63  ;;  %6248 = vst [vmem:[#allocation15_spill] sm:$0xff] %v3031_v26  ;;  %v233_v33 = vmul.f32 %v2843_v1, %v216_v63  ;;  %v3040_v36 = vmul.f32 %v2997_v6, %v828_v44 }
  0x27   : > { %v3018_v18 = vld [vmem:[%s5989_s1 + $0x21] ss:$0 sm:$0xff]  ;;  %v1219_v23 = vld [vmem:[#allocation2 + $0x3] sm:$0x7f]  ;;  %v2540_v25 = vld [vmem:[%s5989_s1 + $0x2a] ss:$0 sm:$0xff]  ;;  %v253_v35 = vmul.f32 %v2848_v2, %v217_v14  ;;  %v3042_v37 = vmul.f32 %v2505_v8, %v828_v44  ;;  %v259_v45 = vadd.f32 %v252_v10, %v232_v31  ;;  %v352_v63 = vmul.f32 %v2958_v52, %v217_v14 }
  0x28   : > { %v3025_v24 = vld [vmem:[%s5989_s1 + $0x3] ss:$0 sm:$0xff]  ;;  %v3035_v28 = vmul.f32 %v3018_v18, %v2886_v21  ;;  %v1220_v29 = vld [vmem:[#allocation2 + $0x13] sm:$0x7f]  ;;  %6250 = vst [vmem:[#allocation17_spill] sm:$0xff] %v3040_v36  ;;  %v358_v46 = vadd.f32 %v351_v20, %v331_v32  ;;  %v371_v48 = vmul.f32 %v3007_v15, %v217_v14  ;;  %v278_v31 = vadd.f32 %v271_v13, %v258_v47 }
  0x29   : > { %6247 = vst [vmem:[#allocation14_spill] sm:$0xff] %v3025_v24  ;;  %v3047_v39 = vld [vmem:[%s5989_s1 + $0xb] ss:$0 sm:$0xff]  ;;  %v3052_v21 = vld [vmem:[%s5989_s1 + $0x18] ss:$0 sm:$0xff]  ;;  %v3065_v32 = vmul.f32 %v3025_v24, %v1219_v23  ;;  %v3067_v10 = vmul.f32 %v2540_v25, %v1219_v23  ;;  %v272_v43 = vmul.f32 %v2953_v51, %v217_v14  ;;  %v3073_v62 = vadd.f32 %v352_v63, %v332_v19 }
  0x2a   : > { %6249 = vst [vmem:[#allocation16_spill] sm:$0xff] %v3035_v28  ;;  %6251 = vst [vmem:[#allocation18_spill] sm:$0xff] %v3047_v39  ;;  %v3059_v44 = vld [vmem:[%s5989_s1 + $0x22] ss:$0 sm:$0xff]  ;;  %v2544_v8 = vld [vmem:[%s5989_s1 + $0x32] ss:$0 sm:$0xff]  ;;  %v3075_v40 = vadd.f32 %v371_v48, %v358_v46  ;;  %v3080_v26 = vmul.f32 %v3047_v39, %v1220_v29  ;;  %v291_v47 = vmul.f32 %v3052_v21, %v217_v14 }
  0x2b   : > { %6252 = vst [vmem:[#allocation19_spill] sm:$0xff] %v3059_v44  ;;  %6253 = vst [vmem:[#allocation20_spill] sm:$0xff] %v3065_v32  ;;  %v3070_v20 = vmul.f32 %v3059_v44, %v837_v60  ;;  %v3077_v28 = vld [vmem:[#allocation2 + $0x40] sm:$0x7f]  ;;  %v3087_v38 = vmul.f32 %v2544_v8, %v1220_v29  ;;  %v3090_v60 = vmul.f32 %v3025_v24, %v1220_v29 }
  0x2c   : > { %6254 = vst [vmem:[#allocation21_spill] sm:$0xff] %v3067_v10  ;;  %6256 = vst [vmem:[#allocation23_spill] sm:$0xff] %v3073_v62  ;;  %v3083_v13 = vld [vmem:[#allocation2 + $0x60] sm:$0x7f]  ;;  %v3092_v19 = vmul.f32 %v2540_v25, %v1220_v29  ;;  %v3095_v48 = vmul.f32 %v2843_v1, %v217_v14  ;;  %v3097_v46 = vadd.f32 %v253_v35, %v233_v33  ;;  %v3112_v25 = vld [vmem:[#allocation2 + $0x51] sm:$0x7f] }
  0x2d   : > { %6255 = vst [vmem:[#allocation22_spill] sm:$0xff] %v3070_v20  ;;  %6257 = vst [vmem:[#allocation24_spill] sm:$0xff] %v3075_v40  ;;  %v3085_v23 = vld [vmem:[#allocation2 + $0x61] sm:$0x7f]  ;;  %v3099_v63 = vadd.f32 %v272_v43, %v259_v45  ;;  %v3102_v62 = vmul.f32 %v2869_v9, %v217_v14  ;;  %v3104_v40 = vld [vmem:[#allocation2 + $0x50] sm:$0x7f]  ;;  %v3106_v20 = vadd.f32 %v291_v47, %v278_v31 }
  0x2e   : > { %6258 = vst [vmem:[#allocation25_spill] sm:$0xff] %v3080_v26  ;;  %6259 = vst [vmem:[#allocation26_spill] sm:$0xff] %v3083_v13  ;;  %v3110_v8 = vmul.f32 %v2843_v1, %v3077_v28  ;;  %v237_v29 = vmul.f32 %v2843_v1, %v3083_v13  ;;  %v336_v43 = vmul.f32 %v2869_v9, %v3083_v13  ;;  %v3118_v33 = vld [vmem:[#allocation2 + $0x70] sm:$0x7f] }
  0x2f   : > { %6260 = vst [vmem:[#allocation27_spill] sm:$0xff] %v3085_v23  ;;  %6261 = vst [vmem:[#allocation28_spill] sm:$0xff] %v3087_v38  ;;  %v3120_v14 = vld [vmem:[#allocation2 + $0x71] sm:$0x7f]  ;;  %v3124_v35 = vmul.f32 %v2848_v2, %v3077_v28  ;;  %v468_v45 = vmul.f32 %v2853_v4, %v3085_v23  ;;  %v257_v31 = vmul.f32 %v2848_v2, %v3118_v33 }
  0x30   : > { %6262 = vst [vmem:[#allocation29_spill] sm:$0xff] %v3090_v60  ;;  %6263 = vst [vmem:[#allocation30_spill] sm:$0xff] %v3092_v19  ;;  %v356_v47 = vmul.f32 %v2958_v52, %v3118_v33  ;;  %v3136_v19 = vmul.f32 %v2869_v9, %v3077_v28  ;;  %v507_v60 = vmul.f32 %v2858_v5, %v3120_v14  ;;  %v3161_v5 = vld [vmem:[%s5989_s1 + $0x38] ss:$0 sm:$0xff] }
  0x31   : > { %6264 = vst [vmem:[#allocation31_spill] sm:$0xff] %v3095_v48  ;;  %6265 = vst [vmem:[#allocation32_spill] sm:$0xff] %v3097_v46  ;;  %v236_v4 = vmul.f32 %v2843_v1, %v3104_v40  ;;  %v335_v48 = vmul.f32 %v2869_v9, %v3104_v40  ;;  %v3152_v24 = vmul.f32 %v2864_v7, %v3112_v25  ;;  %v2486_v1 = vld [vmem:[%s5989_s1 + $0x80] ss:$0 sm:$0xff] }
  0x32   : > { %6266 = vst [vmem:[#allocation33_spill] sm:$0xff] %v3099_v63  ;;  %6267 = vst [vmem:[#allocation34_spill] sm:$0xff] %v3102_v62  ;;  %v3132_v62 = vld [vmem:[#allocation2 + $0x80] sm:$0x7f]  ;;  %v264_v26 = vadd.f32 %v257_v31, %v237_v29  ;;  %v363_v46 = vadd.f32 %v356_v47, %v336_v43  ;;  %v448_v38 = vmul.f32 %v2864_v7, %v3085_v23  ;;  %v223_v47 = vld [vmem:[#allocation2 + $0x90] sm:$0x7f] }
  0x33   : > { %6268 = vst [vmem:[#allocation35_spill] sm:$0xff] %v3104_v40  ;;  %6269 = vst [vmem:[#allocation36_spill] sm:$0xff] %v3110_v8  ;;  %v3140_v8 = vmul.f32 %v2958_v52, %v3077_v28  ;;  %v357_v32 = vmul.f32 %v2958_v52, %v3132_v62  ;;  %v277_v39 = vmul.f32 %v2953_v51, %v3132_v62 }
  0x34   : > { %6270 = vst [vmem:[#allocation37_spill] sm:$0xff] %v3112_v25  ;;  %6271 = vst [vmem:[#allocation38_spill] sm:$0xff] %v3118_v33  ;;  %v514_v34 = vadd.f32 %v507_v60, %v468_v45  ;;  %v355_v10 = vmul.f32 %v2958_v52, %v3083_v13  ;;  %v662_v29 = vmul.f32 %v2898_v27, %v3085_v23 }
  0x35   : > { %6272 = vst [vmem:[#allocation39_spill] sm:$0xff] %v3120_v14  ;;  %6273 = vst [vmem:[#allocation40_spill] sm:$0xff] %v3124_v35  ;;  %v256_v35 = vmul.f32 %v2848_v2, %v3083_v13  ;;  %v3168_v2 = vld [vmem:[#allocation2 + $0x81] sm:$0x7f]  ;;  %v663_v31 = vmul.f32 %v2898_v27, %v3120_v14  ;;  %v376_v43 = vmul.f32 %v3007_v15, %v3132_v62 }
  0x36   : > { %6274 = vst [vmem:[#allocation41_spill] sm:$0xff] %v3136_v19  ;;  %6275 = vst [vmem:[#allocation42_spill] sm:$0xff] %v3140_v8  ;;  %v3156_v19 = vmul.f32 %v2882_v12, %v3112_v25  ;;  %v337_v8 = vmul.f32 %v2869_v9, %v3118_v33  ;;  %v642_v9 = vmul.f32 %v2882_v12, %v3085_v23 }
  0x37   : > { %6276 = vst [vmem:[#allocation43_spill] sm:$0xff] %v3161_v5  ;;  %6277 = vst [vmem:[#allocation44_spill] sm:$0xff] %v3168_v2  ;;  %v546_v7 = vmul.f32 %v3161_v5, %v3168_v2  ;;  %v702_v60 = vmul.f32 %v2486_v1, %v3168_v2  ;;  %v284_v45 = vadd.f32 %v277_v39, %v264_v26 }
  0x38   : > { %v263_v52 = vadd.f32 %v256_v35, %v236_v4  ;;  %v3191_v13 = vmul.f32 %v2877_v11, %v3120_v14  ;;  %v364_v6 = vadd.f32 %v357_v32, %v337_v8  ;;  %v383_v23 = vadd.f32 %v376_v43, %v363_v46  ;;  %v3202_v32 = vld [vmem:[#allocation2 + $0x91] sm:$0x7f] }
  0x39   : > { %v276_v27 = vmul.f32 %v2953_v51, %v3118_v33  ;;  %v553_v25 = vadd.f32 %v546_v7, %v514_v34  ;;  %v297_v36 = vmul.f32 %v3052_v21, %v223_v47  ;;  %v362_v40 = vadd.f32 %v355_v10, %v335_v48  ;;  %6278 = vst [vmem:[#allocation45_spill] sm:$0xff] %v3202_v32  ;;  %v3209_v10 = vld [vmem:[%s5989_s1 + $0x40] ss:$0 sm:$0xff]  ;;  %v2490_v48 = vld [vmem:[%s5989_s1 + $0x88] ss:$0 sm:$0xff] }
  0x3a   : > { %v375_v63 = vmul.f32 %v3007_v15, %v3118_v33  ;;  %v296_v26 = vmul.f32 %v3052_v21, %v3132_v62  ;;  %v377_v39 = vmul.f32 %v3007_v15, %v223_v47  ;;  %v396_v35 = vmul.f32 %v2982_v59, %v223_v47  ;;  %6279 = vst [vmem:[#allocation46_spill] sm:$0xff] %v3209_v10  ;;  %v3509_v33 = vld [vmem:[#allocation2 + $0x45] sm:$0x7f] }
  0x3b   : > { %v283_v56 = vadd.f32 %v276_v27, %v263_v52  ;;  %v709_v46 = vadd.f32 %v702_v60, %v663_v31  ;;  %v395_v7 = vmul.f32 %v2982_v59, %v3132_v62  ;;  %v304_v34 = vadd.f32 %v297_v36, %v284_v45  ;;  %v2521_v59 = vld [vmem:[%s5989_s1 + $0x79] ss:$0 sm:$0xff]  ;;  %v3221_v36 = vld [vmem:[#allocation2 + $0x72] sm:$0x7f]  ;;  %6334 = vst [vmem:[#allocation101_spill] sm:$0xff] %v3509_v33 }
  0x3c   : > { %v382_v8 = vadd.f32 %v375_v63, %v362_v40  ;;  %v316_v4 = vmul.f32 %v2972_v57, %v223_v47  ;;  %v384_v43 = vadd.f32 %v377_v39, %v364_v6  ;;  %v403_v52 = vadd.f32 %v396_v35, %v383_v23  ;;  %v2484_v40 = vld [vmem:[%s5989_s1 + $0x59] ss:$0 sm:$0xff]  ;;  %6280 = vst [vmem:[#allocation47_spill] sm:$0xff] %v3221_v36 }
  0x3d   : > { %v303_v15 = vadd.f32 %v296_v26, %v283_v56  ;;  %v415_v31 = vmul.f32 %v2977_v58, %v223_v47  ;;  %v741_v60 = vmul.f32 %v2490_v48, %v3202_v32  ;;  %v324_v56 = vadd.f32 %v2989_v0, %v304_v34  ;;  %v3233_v47 = vld [vmem:[#allocation2 + $0x21] sm:$0x7f] }
  0x3e   : > { %v402_v63 = vadd.f32 %v395_v7, %v382_v8  ;;  %v643_v6 = vmul.f32 %v2882_v12, %v3120_v14  ;;  %v585_v23 = vmul.f32 %v3209_v10, %v3202_v32  ;;  %v404_v45 = vadd.f32 %v3013_v17, %v384_v43  ;;  %6281 = vst [vmem:[#allocation48_spill] sm:$0xff] %v3233_v47 }
  0x3f   : > { %v423_v27 = vadd.f32 %v2992_v3, %v403_v52  ;;  %v701_v26 = vmul.f32 %v2486_v1, %v3120_v14  ;;  %v323_v39 = vadd.f32 %v316_v4, %v303_v15  ;;  %v748_v8 = vadd.f32 %v741_v60, %v709_v46  ;;  %v2488_v46 = vld [vmem:[%s5989_s1 + $0x61] ss:$0 sm:$0xff]  ;;  %v3250_v15 = vld [vmem:[#allocation2 + $0x31] sm:$0x7f]  ;;  %v3288_v60 = vld [vmem:[%s5989_s1 + $0x39] ss:$0 sm:$0xff] }
  0x40   : > { %v422_v35 = vadd.f32 %v415_v31, %v402_v63  ;;  %v681_v7 = vmul.f32 %v2484_v40, %v3120_v14  ;;  %v1059_v0 = vmul.f32 %v2521_v59, %v3221_v36  ;;  %v424_v12 = vadd.f32 %v3010_v16, %v404_v45  ;;  %6284 = vst [vmem:[#allocation51_spill] sm:$0xff] %v3250_v15  ;;  %v3493_v36 = vld [vmem:[%s5989_s1 + $0x2c] ss:$0 sm:$0xff]  ;;  %v3507_v14 = vld [vmem:[#allocation2 + $0x35] sm:$0x7f] }
  0x41   : > { %v592_v34 = vadd.f32 %v585_v23, %v553_v25  ;;  %v3240_v48 = vmul.f32 %v2972_v57, %v3132_v62  ;;  %v3244_v3 = vmul.f32 %v2977_v58, %v3132_v62  ;;  %v455_v17 = vadd.f32 %v448_v38, %v324_v56  ;;  %6292 = vst [vmem:[#allocation59_spill] sm:$0xff] %v3288_v60  ;;  %v3293_v56 = vld [vmem:[%s5989_s1 + $0x1a] ss:$0 sm:$0xff] }
  0x42   : > { %v787_v1 = vadd.f32 %v2948_v50, %v748_v8  ;;  %v682_v16 = vmul.f32 %v2484_v40, %v3168_v2  ;;  %v649_v25 = vadd.f32 %v642_v9, %v423_v27  ;;  %v650_v4 = vadd.f32 %v643_v6, %v424_v12  ;;  %v3264_v50 = vld [vmem:[%s5989_s1 + $0x11] ss:$0 sm:$0xff]  ;;  %v3271_v9 = vld [vmem:[%s5989_s1 + $0x19] ss:$0 sm:$0xff]  ;;  %6293 = vst [vmem:[#allocation60_spill] sm:$0xff] %v3293_v56 }
  0x43   : > { %6282 = vst [vmem:[#allocation49_spill] sm:$0xff] %v3240_v48  ;;  %6283 = vst [vmem:[#allocation50_spill] sm:$0xff] %v3244_v3  ;;  %v311_v43 = vmul.f32 %v2972_v57, %v3077_v28  ;;  %v3255_v52 = vadd.f32 %v701_v26, %v662_v29  ;;  %v3258_v58 = vadd.f32 %v3152_v24, %v323_v39  ;;  %v3276_v24 = vld [vmem:[%s5989_s1 + $0x12] ss:$0 sm:$0xff]  ;;  %v3278_v29 = vld [vmem:[#allocation2 + $0x41] sm:$0x7f] }
  0x44   : > { %v721_v38 = vmul.f32 %v2488_v46, %v3202_v32  ;;  %6287 = vst [vmem:[#allocation54_spill] sm:$0xff] %v3264_v50  ;;  %v540_v62 = vmul.f32 %v3161_v5, %v3233_v47  ;;  %6288 = vst [vmem:[#allocation55_spill] sm:$0xff] %v3271_v9  ;;  %v3281_v40 = vadd.f32 %v2933_v42, %v592_v34  ;;  %v3298_v42 = vld [vmem:[%s5989_s1 + $0x41] ss:$0 sm:$0xff]  ;;  %v3300_v6 = vld [vmem:[#allocation2 + $0x22] sm:$0x7f] }
  0x45   : > { %6285 = vst [vmem:[#allocation52_spill] sm:$0xff] %v3255_v52  ;;  %6286 = vst [vmem:[#allocation53_spill] sm:$0xff] %v3258_v58  ;;  %v689_v59 = vadd.f32 %v682_v16, %v650_v4  ;;  %v826_v63 = vadd.f32 %v2964_v55, %v787_v1  ;;  %v318_v31 = vadd.f32 %v311_v43, %v3106_v20  ;;  %v3302_v55 = vld [vmem:[#allocation2 + $0x23] sm:$0x7f]  ;;  %v3321_v39 = vld [vmem:[%s5989_s1 + $0x13] ss:$0 sm:$0xff] }
  0x46   : > { %6289 = vst [vmem:[#allocation56_spill] sm:$0xff] %v3276_v24  ;;  %6290 = vst [vmem:[#allocation57_spill] sm:$0xff] %v3278_v29  ;;  %v3305_v20 = vadd.f32 %v3156_v19, %v422_v35  ;;  %v3308_v23 = vadd.f32 %v3191_v13, %v455_v17  ;;  %v547_v45 = vadd.f32 %v540_v62, %v2960_v53  ;;  %v3316_v26 = vld [vmem:[%s5989_s1 + $0x49] ss:$0 sm:$0xff]  ;;  %v3323_v19 = vld [vmem:[#allocation2 + $0x32] sm:$0x7f] }
  0x47   : > { %6291 = vst [vmem:[#allocation58_spill] sm:$0xff] %v3281_v40  ;;  %6294 = vst [vmem:[#allocation61_spill] sm:$0xff] %v3298_v42  ;;  %v579_v27 = vmul.f32 %v3209_v10, %v3250_v15  ;;  %v3325_v35 = vld [vmem:[#allocation2 + $0x33] sm:$0x7f]  ;;  %v3327_v13 = vld [vmem:[#allocation2 + $0x42] sm:$0x7f]  ;;  %v3329_v53 = vadd.f32 %v681_v7, %v649_v25  ;;  %v728_v8 = vadd.f32 %v721_v38, %v689_v59 }
  0x48   : > { %6295 = vst [vmem:[#allocation62_spill] sm:$0xff] %v3300_v6  ;;  %6296 = vst [vmem:[#allocation63_spill] sm:$0xff] %v3302_v55  ;;  %v449_v12 = vadd.f32 %v2907_v30, %v318_v31  ;;  %v520_v34 = vmul.f32 %v3264_v50, %v3233_v47  ;;  %v3337_v17 = vld [vmem:[%s5989_s1 + $0x3a] ss:$0 sm:$0xff]  ;;  %v3339_v1 = vld [vmem:[#allocation2 + $0x43] sm:$0x7f]  ;;  %v559_v46 = vmul.f32 %v3271_v9, %v3250_v15 }
  0x49   : > { %6297 = vst [vmem:[#allocation64_spill] sm:$0xff] %v3305_v20  ;;  %6298 = vst [vmem:[#allocation65_spill] sm:$0xff] %v3308_v23  ;;  %v586_v16 = vadd.f32 %v579_v27, %v547_v45  ;;  %v598_v7 = vmul.f32 %v3018_v18, %v3278_v29  ;;  %v618_v30 = vmul.f32 %v2891_v22, %v3278_v29  ;;  %v3350_v25 = vld [vmem:[%s5989_s1 + $0x1b] ss:$0 sm:$0xff]  ;;  %v3355_v4 = vld [vmem:[%s5989_s1 + $0x42] ss:$0 sm:$0xff] }
  0x4a   : > { %6299 = vst [vmem:[#allocation66_spill] sm:$0xff] %v3316_v26  ;;  %6300 = vst [vmem:[#allocation67_spill] sm:$0xff] %v3323_v19  ;;  %v767_v43 = vadd.f32 %v2945_v49, %v728_v8  ;;  %v3358_v38 = vadd.f32 %v1059_v0, %v826_v63  ;;  %v488_v62 = vadd.f32 %v2929_v41, %v449_v12  ;;  %v3368_v22 = vld [vmem:[%s5989_s1 + $0x23] ss:$0 sm:$0xff]  ;;  %v3373_v31 = vld [vmem:[%s5989_s1 + $0x4a] ss:$0 sm:$0xff] }
  0x4b   : > { %6301 = vst [vmem:[#allocation68_spill] sm:$0xff] %v3325_v35  ;;  %6302 = vst [vmem:[#allocation69_spill] sm:$0xff] %v3327_v13  ;;  %v3363_v59 = vmul.f32 %v3276_v24, %v3300_v6  ;;  %v1611_v45 = vld [vmem:[#allocation2 + $0x4] sm:$0x7f]  ;;  %v3377_v0 = vld [vmem:[#allocation2 + $0x34] sm:$0x7f]  ;;  %v625_v63 = vadd.f32 %v618_v30, %v586_v16  ;;  %v939_v27 = vmul.f32 %v3288_v60, %v3300_v6 }
  0x4c   : > { %6303 = vst [vmem:[#allocation70_spill] sm:$0xff] %v3329_v53  ;;  %6304 = vst [vmem:[#allocation71_spill] sm:$0xff] %v3337_v17  ;;  %v3375_v49 = vld [vmem:[#allocation2 + $0x24] sm:$0x7f]  ;;  %v3385_v8 = vmul.f32 %v3293_v56, %v3323_v19  ;;  %v977_v12 = vmul.f32 %v3298_v42, %v3323_v19  ;;  %v3389_v52 = vld [vmem:[#allocation2 + $0x14] sm:$0x7f]  ;;  %v527_v30 = vadd.f32 %v520_v34, %v488_v62 }
  0x4d   : > { %6305 = vst [vmem:[#allocation72_spill] sm:$0xff] %v3339_v1  ;;  %6306 = vst [vmem:[#allocation73_spill] sm:$0xff] %v3355_v4  ;;  %v3379_v41 = vld [vmem:[#allocation2 + $0x44] sm:$0x7f]  ;;  %v3399_v16 = vld [vmem:[%s5989_s1 + $0x2b] ss:$0 sm:$0xff]  ;;  %v3403_v53 = vmul.f32 %v3059_v44, %v3327_v13  ;;  %v1015_v20 = vmul.f32 %v3316_v26, %v3327_v13  ;;  %v3409_v3 = vmul.f32 %v3321_v39, %v3302_v55 }
  0x4e   : > { %6307 = vst [vmem:[#allocation74_spill] sm:$0xff] %v3358_v38  ;;  %6308 = vst [vmem:[#allocation75_spill] sm:$0xff] %v3373_v31  ;;  %v3394_v38 = vld [vmem:[%s5989_s1 + $0x4] ss:$0 sm:$0xff]  ;;  %v3414_v40 = vld [vmem:[%s5989_s1 + $0xc] ss:$0 sm:$0xff]  ;;  %v870_v26 = vadd.f32 %v2984_v61, %v625_v63  ;;  %v3429_v42 = vmul.f32 %v3337_v17, %v3302_v55  ;;  %v3433_v60 = vmul.f32 %v3350_v25, %v3325_v35 }
  0x4f   : > { %6309 = vst [vmem:[#allocation76_spill] sm:$0xff] %v3375_v49  ;;  %6310 = vst [vmem:[#allocation77_spill] sm:$0xff] %v3377_v0  ;;  %v3419_v34 = vld [vmem:[%s5989_s1 + $0x14] ss:$0 sm:$0xff]  ;;  %v3424_v62 = vld [vmem:[%s5989_s1 + $0x1c] ss:$0 sm:$0xff]  ;;  %v3437_v10 = vmul.f32 %v3355_v4, %v3325_v35  ;;  %v3455_v17 = vadd.f32 %v2962_v54, %v767_v43  ;;  %v566_v4 = vadd.f32 %v559_v46, %v527_v30 }
  0x50   : > { %6311 = vst [vmem:[#allocation78_spill] sm:$0xff] %v3389_v52  ;;  %6312 = vst [vmem:[#allocation79_spill] sm:$0xff] %v3399_v16  ;;  %v3442_v5 = vld [vmem:[%s5989_s1 + $0x24] ss:$0 sm:$0xff]  ;;  %v3447_v61 = vld [vmem:[%s5989_s1 + $0x33] ss:$0 sm:$0xff]  ;;  %v3459_v23 = vmul.f32 %v3368_v22, %v3339_v1  ;;  %v3463_v32 = vmul.f32 %v3373_v31, %v3339_v1  ;;  %v908_v46 = vadd.f32 %v3042_v37, %v870_v26 }
  0x51   : > { %6313 = vst [vmem:[#allocation80_spill] sm:$0xff] %v3409_v3  ;;  %6314 = vst [vmem:[#allocation81_spill] sm:$0xff] %v3424_v62  ;;  %v3452_v63 = vld [vmem:[%s5989_s1 + $0x3b] ss:$0 sm:$0xff]  ;;  %v3468_v58 = vld [vmem:[%s5989_s1 + $0x43] ss:$0 sm:$0xff]  ;;  %v3477_v43 = vmul.f32 %v3394_v38, %v1611_v45  ;;  %v3480_v30 = vmul.f32 %v3399_v16, %v1611_v45  ;;  %v605_v37 = vadd.f32 %v598_v7, %v566_v4 }
  0x52   : > { %6315 = vst [vmem:[#allocation82_spill] sm:$0xff] %v3433_v60  ;;  %6316 = vst [vmem:[#allocation83_spill] sm:$0xff] %v3442_v5  ;;  %v3473_v2 = vld [vmem:[%s5989_s1 + $0x4b] ss:$0 sm:$0xff]  ;;  %v3486_v31 = vld [vmem:[#allocation2 + $0x15] sm:$0x7f]  ;;  %v3497_v26 = vmul.f32 %v3419_v34, %v3375_v49  ;;  %v3501_v45 = vmul.f32 %v3424_v62, %v3377_v0  ;;  %v3505_v16 = vmul.f32 %v3442_v5, %v3379_v41 }
  0x53   : > { %6317 = vst [vmem:[#allocation84_spill] sm:$0xff] %v3447_v61  ;;  %6318 = vst [vmem:[#allocation85_spill] sm:$0xff] %v3452_v63  ;;  %v2003_v54 = vld [vmem:[#allocation2 + $0x5] sm:$0x7f]  ;;  %v3514_v7 = vld [vmem:[%s5989_s1 + $0x34] ss:$0 sm:$0xff]  ;;  %v946_v4 = vadd.f32 %v939_v27, %v908_v46  ;;  %v292_v46 = vmul.f32 %v3052_v21, %v3077_v28 }
  0x54   : > { %6319 = vst [vmem:[#allocation86_spill] sm:$0xff] %v3455_v17  ;;  %6320 = vst [vmem:[#allocation87_spill] sm:$0xff] %v3459_v23  ;;  %v3484_v17 = vmul.f32 %v3414_v40, %v3389_v52  ;;  %v3488_v48 = vld [vmem:[#allocation2 + $0x25] sm:$0x7f]  ;;  %v3537_v27 = vld [vmem:[%s5989_s1 + $0x4c] ss:$0 sm:$0xff]  ;;  %v3551_v23 = vmul.f32 %v3493_v36, %v2003_v54  ;;  %v3555_v60 = vmul.f32 %v3514_v7, %v3486_v31 }
  0x55   : > { %6321 = vst [vmem:[#allocation88_spill] sm:$0xff] %v3463_v32  ;;  %6322 = vst [vmem:[#allocation89_spill] sm:$0xff] %v3468_v58  ;;  %v6345_v32 = vld [vmem:[#allocation35_spill] sm:$0xff] }
  0x56   : > { %6323 = vst [vmem:[#allocation90_spill] sm:$0xff] %v3473_v2  ;;  %6324 = vst [vmem:[#allocation91_spill] sm:$0xff] %v3477_v43  ;;  %v3544_v43 = vmul.f32 %v3468_v58, %v3377_v0 }
  0x57   : > { %6325 = vst [vmem:[#allocation92_spill] sm:$0xff] %v3480_v30  ;;  %6326 = vst [vmem:[#allocation93_spill] sm:$0xff] %v3484_v17  ;;  %v3532_v17 = vld [vmem:[%s5989_s1 + $0x44] ss:$0 sm:$0xff]  ;;  %v6344_v30 = vld [vmem:[#allocation33_spill] sm:$0xff] }
  0x58   : > { %6327 = vst [vmem:[#allocation94_spill] sm:$0xff] %v3486_v31  ;;  %6328 = vst [vmem:[#allocation95_spill] sm:$0xff] %v3488_v48  ;;  %v299_v3 = vadd.f32 %v292_v46, %v6344_v30  ;;  %v3567_v54 = vmul.f32 %v3532_v17, %v3507_v14 }
  0x59   : > { %6329 = vst [vmem:[#allocation96_spill] sm:$0xff] %v3493_v36  ;;  %6330 = vst [vmem:[#allocation97_spill] sm:$0xff] %v3497_v26  ;;  %v3518_v26 = vmul.f32 %v3447_v61, %v3389_v52  ;;  %v921_v36 = vmul.f32 %v3276_v24, %v3323_v19 }
  0x5a   : > { %6331 = vst [vmem:[#allocation98_spill] sm:$0xff] %v3501_v45  ;;  %6332 = vst [vmem:[#allocation99_spill] sm:$0xff] %v3505_v16  ;;  %v3522_v45 = vmul.f32 %v3452_v63, %v3375_v49  ;;  %v3527_v16 = vld [vmem:[%s5989_s1 + $0x3c] ss:$0 sm:$0xff]  ;;  %v6341_v63 = vld [vmem:[#allocation11_spill] sm:$0xff] }
  0x5b   : > { %6333 = vst [vmem:[#allocation100_spill] sm:$0xff] %v3507_v14  ;;  %6335 = vst [vmem:[#allocation102_spill] sm:$0xff] %v3514_v7  ;;  %v851_v61 = vadd.f32 %v6341_v63, %v605_v37  ;;  %v312_v63 = vmul.f32 %v2972_v57, %v6345_v32  ;;  %v6346_v37 = vld [vmem:[#allocation17_spill] sm:$0xff]  ;;  %v482_v7 = vmul.f32 %v2877_v11, %v3233_v47 }
  0x5c   : > { %6336 = vst [vmem:[#allocation103_spill] sm:$0xff] %v3518_v26  ;;  %6337 = vst [vmem:[#allocation104_spill] sm:$0xff] %v3522_v45  ;;  %v3548_v45 = vmul.f32 %v3473_v2, %v3379_v41  ;;  %v984_v26 = vadd.f32 %v977_v12, %v946_v4  ;;  %v3571_v12 = vmul.f32 %v3537_v27, %v3509_v33  ;;  %v3573_v4 = vld [vmem:[#allocation2 + $0x52] sm:$0x7f] }
  0x5d   : > { %6338 = vst [vmem:[#allocation105_spill] sm:$0xff] %v3527_v16  ;;  %6339 = vst [vmem:[#allocation106_spill] sm:$0xff] %v3532_v17  ;;  %v889_v58 = vadd.f32 %v6346_v37, %v851_v61  ;;  %v319_v46 = vadd.f32 %v312_v63, %v299_v3  ;;  %v521_v61 = vmul.f32 %v3264_v50, %v3250_v15  ;;  %v6352_v3 = vld [vmem:[#allocation21_spill] sm:$0xff]  ;;  %v6354_v2 = vld [vmem:[#allocation18_spill] sm:$0xff] }
  0x5e   : > { %6340 = vst [vmem:[#allocation107_spill] sm:$0xff] %v3537_v27  ;;  %6342 = vst [vmem:[#allocation11_spill] sm:$0xff] %v3544_v43  ;;  %v3563_v43 = vmul.f32 %v3527_v16, %v3488_v48  ;;  %v1022_v30 = vadd.f32 %v1015_v20, %v984_v26  ;;  %v560_v17 = vmul.f32 %v3271_v9, %v3278_v29  ;;  %v6350_v16 = vld [vmem:[#allocation37_spill] sm:$0xff]  ;;  %v6353_v26 = vld [vmem:[#allocation6_spill] sm:$0xff] }
  0x5f   : > { %6343 = vst [vmem:[#allocation108_spill] sm:$0xff] %v3555_v60  ;;  %6348 = vst [vmem:[#allocation35_spill] sm:$0xff] %v3567_v54  ;;  %v927_v37 = vadd.f32 %v3363_v59, %v889_v58  ;;  %v599_v14 = vmul.f32 %v3018_v18, %v6350_v16  ;;  %v6351_v27 = vld [vmem:[#allocation13_spill] sm:$0xff]  ;;  %v450_v63 = vadd.f32 %v6353_v26, %v319_v46  ;;  %v6356_v46 = vld [vmem:[#allocation28_spill] sm:$0xff] }
  0x60   : > { %6347 = vst [vmem:[#allocation33_spill] sm:$0xff] %v3563_v43  ;;  %6349 = vst [vmem:[#allocation17_spill] sm:$0xff] %v3571_v12  ;;  %v883_v33 = vmul.f32 %v6351_v27, %v3300_v6  ;;  %v3586_v48 = vld [vmem:[#allocation2 + $0x53] sm:$0x7f]  ;;  %v1262_v20 = vadd.f32 %v6352_v3, %v1022_v30  ;;  %v3594_v58 = vmul.f32 %v3293_v56, %v3327_v13 }
  0x61   : > { %v965_v59 = vadd.f32 %v3385_v8, %v927_v37  ;;  %v3599_v31 = vmul.f32 %v3059_v44, %v3573_v4  ;;  %v3603_v12 = vmul.f32 %v6354_v2, %v3302_v55  ;;  %v273_v30 = vmul.f32 %v2953_v51, %v3077_v28  ;;  %v3616_v37 = vld [vmem:[#allocation2 + $0x54] sm:$0x7f]  ;;  %v6360_v28 = vld [vmem:[#allocation32_spill] sm:$0xff] }
  0x62   : > { %v1300_v3 = vadd.f32 %v6356_v46, %v1262_v20  ;;  %v489_v26 = vadd.f32 %v482_v7, %v450_v63  ;;  %v3610_v54 = vmul.f32 %v3321_v39, %v3325_v35  ;;  %v3614_v8 = vmul.f32 %v3350_v25, %v3339_v1 }
  0x63   : > { %6355 = vst [vmem:[#allocation21_spill] sm:$0xff] %v3603_v12  ;;  %v1003_v43 = vadd.f32 %v3403_v53, %v965_v59  ;;  %v3621_v12 = vmul.f32 %v3368_v22, %v3586_v48  ;;  %v280_v60 = vadd.f32 %v273_v30, %v6360_v28  ;;  %v293_v7 = vmul.f32 %v3052_v21, %v6345_v32  ;;  %v6363_v53 = vld [vmem:[#allocation20_spill] sm:$0xff]  ;;  %v6365_v28 = vld [vmem:[#allocation26_spill] sm:$0xff] }
  0x64   : > { %6357 = vst [vmem:[#allocation6_spill] sm:$0xff] %v3610_v54  ;;  %6358 = vst [vmem:[#allocation18_spill] sm:$0xff] %v3614_v8  ;;  %v1338_v20 = vadd.f32 %v3429_v42, %v1300_v3  ;;  %v528_v63 = vadd.f32 %v521_v61, %v489_v26  ;;  %v3629_v46 = vmul.f32 %v3394_v38, %v3389_v52 }
  0x65   : > { %6359 = vst [vmem:[#allocation28_spill] sm:$0xff] %v3621_v12  ;;  %v3633_v8 = vmul.f32 %v3414_v40, %v3375_v49  ;;  %v1243_v59 = vadd.f32 %v6363_v53, %v1003_v43  ;;  %v3638_v12 = vmul.f32 %v3419_v34, %v3377_v0  ;;  %v300_v30 = vadd.f32 %v293_v7, %v280_v60  ;;  %v6368_v43 = vld [vmem:[#allocation25_spill] sm:$0xff] }
  0x66   : > { %6361 = vst [vmem:[#allocation32_spill] sm:$0xff] %v3629_v46  ;;  %v313_v54 = vmul.f32 %v2972_v57, %v6365_v28  ;;  %v1376_v42 = vadd.f32 %v3437_v10, %v1338_v20  ;;  %v567_v61 = vadd.f32 %v560_v17, %v528_v63  ;;  %v3645_v3 = vmul.f32 %v3424_v62, %v3379_v41  ;;  %v6370_v10 = vld [vmem:[#allocation88_spill] sm:$0xff]  ;;  %v6375_v62 = vld [vmem:[#allocation15_spill] sm:$0xff] }
  0x67   : > { %6362 = vst [vmem:[#allocation109_spill] sm:$0xff] %v3633_v8  ;;  %6364 = vst [vmem:[#allocation20_spill] sm:$0xff] %v3638_v12  ;;  %v3649_v26 = vmul.f32 %v3442_v5, %v3616_v37  ;;  %v1281_v53 = vadd.f32 %v6368_v43, %v1243_v59  ;;  %v6369_v12 = vld [vmem:[#allocation4_spill] sm:$0xff]  ;;  %v483_v7 = vmul.f32 %v2877_v11, %v3250_v15 }
  0x68   : > { %6366 = vst [vmem:[#allocation26_spill] sm:$0xff] %v3645_v3  ;;  %v320_v52 = vadd.f32 %v313_v54, %v300_v30  ;;  %v444_v60 = vmul.f32 %v6369_v12, %v3233_v47  ;;  %v3656_v8 = vld [vmem:[#allocation2 + $0x62] sm:$0x7f]  ;;  %v1414_v17 = vadd.f32 %v6370_v10, %v1376_v42  ;;  %v606_v20 = vadd.f32 %v599_v14, %v567_v61  ;;  %v6376_v10 = vld [vmem:[#allocation82_spill] sm:$0xff] }
  0x69   : > { %6367 = vst [vmem:[#allocation110_spill] sm:$0xff] %v3649_v26  ;;  %v522_v63 = vmul.f32 %v3264_v50, %v3278_v29  ;;  %v561_v26 = vmul.f32 %v3271_v9, %v6350_v16  ;;  %v6371_v3 = vld [vmem:[#allocation80_spill] sm:$0xff]  ;;  %v6372_v30 = vld [vmem:[#allocation27_spill] sm:$0xff]  ;;  %v884_v14 = vmul.f32 %v6351_v27, %v3323_v19  ;;  %v922_v61 = vmul.f32 %v3276_v24, %v3327_v13 }
  0x6a   : > { %v1319_v59 = vadd.f32 %v6371_v3, %v1281_v53  ;;  %v451_v54 = vadd.f32 %v444_v60, %v320_v52  ;;  %v600_v43 = vmul.f32 %v3018_v18, %v6372_v30  ;;  %v6373_v47 = vld [vmem:[#allocation7_spill] sm:$0xff]  ;;  %v6374_v11 = vld [vmem:[#allocation92_spill] sm:$0xff]  ;;  %v852_v42 = vadd.f32 %v6375_v62, %v606_v20  ;;  %v6378_v62 = vld [vmem:[#allocation14_spill] sm:$0xff] }
  0x6b   : > { %v846_v46 = vmul.f32 %v6373_v47, %v3300_v6  ;;  %v1654_v5 = vadd.f32 %v6374_v11, %v1414_v17  ;;  %v960_v52 = vmul.f32 %v3293_v56, %v3573_v4  ;;  %v3679_v53 = vmul.f32 %v3059_v44, %v3656_v8  ;;  %v6377_v60 = vld [vmem:[#allocation103_spill] sm:$0xff]  ;;  %v6384_v24 = vld [vmem:[#allocation40_spill] sm:$0xff] }
  0x6c   : > { %v1357_v9 = vadd.f32 %v6376_v10, %v1319_v59  ;;  %v490_v3 = vadd.f32 %v483_v7, %v451_v54  ;;  %v890_v17 = vadd.f32 %v883_v33, %v852_v42  ;;  %v3684_v20 = vmul.f32 %v6378_v62, %v3302_v55  ;;  %v3690_v59 = vld [vmem:[#allocation2 + $0x63] sm:$0x7f] }
  0x6d   : > { %v1692_v11 = vadd.f32 %v6377_v60, %v1654_v5  ;;  %v3688_v6 = vmul.f32 %v6354_v2, %v3325_v35  ;;  %6381 = vst [vmem:[#allocation88_spill] sm:$0xff] %v3690_v59  ;;  %v6382_v7 = vld [vmem:[#allocation87_spill] sm:$0xff]  ;;  %v274_v5 = vmul.f32 %v2953_v51, %v6345_v32  ;;  %v6385_v33 = vld [vmem:[#allocation104_spill] sm:$0xff]  ;;  %v3700_v55 = vmul.f32 %v3321_v39, %v3339_v1 }
  0x6e   : > { %6379 = vst [vmem:[#allocation25_spill] sm:$0xff] %v3684_v20  ;;  %v1395_v54 = vadd.f32 %v6382_v7, %v1357_v9  ;;  %v529_v10 = vadd.f32 %v522_v63, %v490_v3  ;;  %v6383_v56 = vld [vmem:[#allocation31_spill] sm:$0xff]  ;;  %v928_v60 = vadd.f32 %v921_v36, %v890_v17  ;;  %v3713_v36 = vmul.f32 %v3368_v22, %v3690_v59 }
  0x6f   : > { %6380 = vst [vmem:[#allocation4_spill] sm:$0xff] %v3688_v6  ;;  %v261_v44 = vadd.f32 %v6384_v24, %v6383_v56  ;;  %v1730_v42 = vadd.f32 %v6385_v33, %v1692_v11  ;;  %v3704_v6 = vmul.f32 %v3350_v25, %v3586_v48  ;;  %v6386_v20 = vld [vmem:[#allocation91_spill] sm:$0xff]  ;;  %v294_v24 = vmul.f32 %v3052_v21, %v6365_v28 }
  0x70   : > { %v1635_v9 = vadd.f32 %v6386_v20, %v1395_v54  ;;  %v568_v63 = vadd.f32 %v561_v26, %v529_v10  ;;  %v6387_v56 = vld [vmem:[#allocation11_spill] sm:$0xff]  ;;  %v966_v11 = vadd.f32 %v3594_v58, %v928_v60  ;;  %v3717_v17 = vmul.f32 %v3394_v38, %v3375_v49  ;;  %v6390_v20 = vld [vmem:[#allocation93_spill] sm:$0xff]  ;;  %v6391_v10 = vld [vmem:[#allocation38_spill] sm:$0xff] }
  0x71   : > { %v281_v3 = vadd.f32 %v274_v5, %v261_v44  ;;  %v1768_v7 = vadd.f32 %v6387_v56, %v1730_v42  ;;  %v3719_v33 = vld [vmem:[#allocation2 + $0x64] sm:$0x7f]  ;;  %v314_v5 = vmul.f32 %v2972_v57, %v6391_v10  ;;  %v3728_v60 = vmul.f32 %v3414_v40, %v3377_v0  ;;  %v6394_v49 = vld [vmem:[#allocation97_spill] sm:$0xff] }
  0x72   : > { %6388 = vst [vmem:[#allocation80_spill] sm:$0xff] %v3717_v17  ;;  %6389 = vst [vmem:[#allocation27_spill] sm:$0xff] %v3719_v33  ;;  %v1673_v26 = vadd.f32 %v6390_v20, %v1635_v9  ;;  %v607_v44 = vadd.f32 %v600_v43, %v568_v63  ;;  %v1004_v58 = vadd.f32 %v3599_v31, %v966_v11  ;;  %v6396_v31 = vld [vmem:[#allocation81_spill] sm:$0xff]  ;;  %v6400_v20 = vld [vmem:[#allocation98_spill] sm:$0xff] }
  0x73   : > { %v301_v54 = vadd.f32 %v294_v24, %v281_v3  ;;  %v1806_v42 = vadd.f32 %v3548_v45, %v1768_v7  ;;  %6392 = vst [vmem:[#allocation92_spill] sm:$0xff] %v3728_v60  ;;  %v3732_v56 = vmul.f32 %v3419_v34, %v3379_v41  ;;  %v445_v63 = vmul.f32 %v6369_v12, %v3250_v15  ;;  %v6395_v45 = vld [vmem:[#allocation29_spill] sm:$0xff]  ;;  %v6398_v7 = vld [vmem:[#allocation83_spill] sm:$0xff] }
  0x74   : > { %v1711_v17 = vadd.f32 %v6394_v49, %v1673_v26  ;;  %v853_v9 = vadd.f32 %v846_v46, %v607_v44  ;;  %v1244_v3 = vadd.f32 %v6395_v45, %v1004_v58  ;;  %v3741_v24 = vmul.f32 %v6396_v31, %v3616_v37  ;;  %v6401_v26 = vld [vmem:[#allocation5_spill] sm:$0xff]  ;;  %v6407_v15 = vld [vmem:[#allocation39_spill] sm:$0xff] }
  0x75   : > { %6393 = vst [vmem:[#allocation15_spill] sm:$0xff] %v3732_v56  ;;  %v321_v43 = vadd.f32 %v314_v5, %v301_v54  ;;  %v2027_v57 = vadd.f32 %v3551_v23, %v1806_v42  ;;  %v3745_v11 = vmul.f32 %v6398_v7, %v3719_v33  ;;  %v484_v44 = vmul.f32 %v6401_v26, %v3278_v29  ;;  %v3753_v23 = vld [vmem:[%s5990_s2] ss:$0 sm:$0xff]  ;;  %v6403_v54 = vld [vmem:[#allocation108_spill] sm:$0xff]  ;;  %v6404_v42 = vld [vmem:[#allocation21_spill] sm:$0xff] }
  0x76   : > { %6397 = vst [vmem:[#allocation82_spill] sm:$0xff] %v3741_v24  ;;  %v1749_v56 = vadd.f32 %v6400_v20, %v1711_v17  ;;  %v891_v49 = vadd.f32 %v884_v14, %v853_v9  ;;  %6402 = vst [vmem:[#allocation14_spill] sm:$0xff] %v3753_v23  ;;  %v1282_v58 = vadd.f32 %v6404_v42, %v1244_v3  ;;  %v6405_v17 = vld [vmem:[#allocation55_spill] sm:$0xff]  ;;  %v6408_v24 = vld [vmem:[#allocation33_spill] sm:$0xff] }
  0x77   : > { %6399 = vst [vmem:[#allocation103_spill] sm:$0xff] %v3745_v11  ;;  %v452_v46 = vadd.f32 %v445_v63, %v321_v43  ;;  %v2046_v5 = vadd.f32 %v6403_v54, %v2027_v57  ;;  %v523_v45 = vmul.f32 %v3264_v50, %v6350_v16  ;;  %v562_v14 = vmul.f32 %v6405_v17, %v6372_v30  ;;  %v6406_v9 = vld [vmem:[#allocation99_spill] sm:$0xff]  ;;  %v6409_v26 = vld [vmem:[#allocation6_spill] sm:$0xff] }
  0x78   : > { %v1787_v43 = vadd.f32 %v6406_v9, %v1749_v56  ;;  %v929_v63 = vadd.f32 %v922_v61, %v891_v49  ;;  %v601_v11 = vmul.f32 %v3018_v18, %v6407_v15  ;;  %v1320_v57 = vadd.f32 %v6409_v26, %v1282_v58  ;;  %v6410_v61 = vld [vmem:[#allocation56_spill] sm:$0xff]  ;;  %v6411_v49 = vld [vmem:[#allocation35_spill] sm:$0xff] }
  0x79   : > { %v491_v20 = vadd.f32 %v484_v44, %v452_v46  ;;  %v2065_v60 = vadd.f32 %v6408_v24, %v2046_v5  ;;  %v847_v3 = vmul.f32 %v6373_v47, %v3323_v19  ;;  %v885_v54 = vmul.f32 %v6351_v27, %v3327_v13  ;;  %v6412_v44 = vld [vmem:[#allocation18_spill] sm:$0xff]  ;;  %v6413_v26 = vld [vmem:[#allocation60_spill] sm:$0xff]  ;;  %v6414_v58 = vld [vmem:[#allocation47_spill] sm:$0xff] }
  0x7a   : > { %v2211_v42 = vadd.f32 %v3753_v23, %v1787_v43  ;;  %v967_v17 = vadd.f32 %v960_v52, %v929_v63  ;;  %v923_v56 = vmul.f32 %v6410_v61, %v3573_v4  ;;  %v1358_v24 = vadd.f32 %v6412_v44, %v1320_v57  ;;  %v6415_v9 = vld [vmem:[#allocation19_spill] sm:$0xff] }
  0x7b   : > { %v530_v50 = vadd.f32 %v523_v45, %v491_v20  ;;  %v2084_v46 = vadd.f32 %v6411_v49, %v2065_v60  ;;  %v961_v5 = vmul.f32 %v6413_v26, %v3656_v8  ;;  %v999_v19 = vmul.f32 %v6415_v9, %v6414_v58  ;;  %v6416_v45 = vld [vmem:[#allocation17_spill] sm:$0xff]  ;;  %v6417_v20 = vld [vmem:[#allocation28_spill] sm:$0xff]  ;;  %v6418_v57 = vld [vmem:[#allocation3_spill] sm:$0xff] }
  0x7c   : > { %v2218_v47 = vmax.f32 %v2211_v42, 0.0  ;;  %v1005_v27 = vadd.f32 %v3679_v53, %v967_v17  ;;  %v1239_v52 = vmul.f32 %v6378_v62, %v3325_v35  ;;  %v1396_v61 = vadd.f32 %v6417_v20, %v1358_v24  ;;  %v6419_v9 = vld [vmem:[#allocation25_spill] sm:$0xff]  ;;  %v6424_v24 = vld [vmem:[#allocation4_spill] sm:$0xff] }
  0x7d   : > { %v569_v43 = vadd.f32 %v562_v14, %v530_v50  ;;  %v2103_v63 = vadd.f32 %v6416_v45, %v2084_v46  ;;  %v3787_v60 = vmul.f32 %v6354_v2, %v3339_v1  ;;  %v255_v49 = vmul.f32 %v6418_v57, %v6345_v32  ;;  %v3801_v53 = vld [vmem:[#allocation2 + $0x73] sm:$0x7f]  ;;  %v6422_v14 = vld [vmem:[#allocation32_spill] sm:$0xff] }
  0x7e   : > { %v2225_v44 = vmin.f32 %v2218_v47, 6.0  ;;  %v1245_v42 = vadd.f32 %v6419_v9, %v1005_v27  ;;  %v3794_v50 = vmul.f32 %v3321_v39, %v3586_v48  ;;  %6421 = vst [vmem:[#allocation31_spill] sm:$0xff] %v3801_v53  ;;  %v1636_v32 = vadd.f32 %v6422_v14, %v1396_v61  ;;  %v6423_v47 = vld [vmem:[#allocation36_spill] sm:$0xff]  ;;  %v6425_v57 = vld [vmem:[#allocation109_spill] sm:$0xff] }
  0x7f   : > { %v608_v26 = vadd.f32 %v601_v11, %v569_v43  ;;  %v2252_v17 = vadd.f32 %v3753_v23, %v2103_v63  ;;  %v262_v46 = vadd.f32 %v255_v49, %v6423_v47  ;;  %v275_v27 = vmul.f32 %v2953_v51, %v6365_v28  ;;  %v6428_v47 = vld [vmem:[#allocation26_spill] sm:$0xff] }
  0x80   : > { %6420 = vst [vmem:[#allocation87_spill] sm:$0xff] %v3794_v50  ;;  %v2232_v11 = vmul.f32 0.16666667, %v2225_v44  ;;  %v1283_v9 = vadd.f32 %v6424_v24, %v1245_v42  ;;  %v3811_v45 = vmul.f32 %v3350_v25, %v3690_v59  ;;  %v1674_v35 = vadd.f32 %v6425_v57, %v1636_v32  ;;  %v6427_v44 = vld [vmem:[#allocation20_spill] sm:$0xff]  ;;  %v6431_v24 = vld [vmem:[#allocation5_spill] sm:$0xff] }
  0x81   : > { %v854_v43 = vadd.f32 %v847_v3, %v608_v26  ;;  %v2259_v20 = vmax.f32 %v2252_v17, 0.0  ;;  %v282_v50 = vadd.f32 %v275_v27, %v262_v46  ;;  %v295_v61 = vmul.f32 %v3052_v21, %v6391_v10  ;;  %v3826_v3 = vld [vmem:[#allocation2 + $0x74] sm:$0x7f] }
  0x82   : > { %2239 = vst [vmem:[%s3799_s29] sm:$0x7f] %v2232_v11  ;;  %v1321_v63 = vadd.f32 %v3700_v55, %v1283_v9  ;;  %v3820_v51 = vmul.f32 %v3368_v22, %v3801_v53  ;;  %v3824_v28 = vmul.f32 %v3394_v38, %v3377_v0  ;;  %6426 = vst [vmem:[#allocation40_spill] sm:$0xff] %v3826_v3  ;;  %v6429_v46 = vld [vmem:[#allocation49_spill] sm:$0xff]  ;;  %v6444_v0 = vld [vmem:[#allocation19_spill] sm:$0xff] }
  0x83   : > { %v892_v49 = vadd.f32 %v885_v54, %v854_v43  ;;  %v2266_v26 = vmin.f32 %v2259_v20, 6.0  ;;  %v1712_v42 = vadd.f32 %v6427_v44, %v1674_v35  ;;  %v3831_v21 = vmul.f32 %v3414_v40, %v3379_v41  ;;  %v3853_v43 = vld [vmem:[#allocation2 + $0x82] sm:$0x7f]  ;;  %v6433_v20 = vld [vmem:[#allocation110_spill] sm:$0xff] }
  0x84   : > { %v302_v55 = vadd.f32 %v295_v61, %v282_v50  ;;  %v1359_v10 = vadd.f32 %v3704_v6, %v1321_v63  ;;  %v3836_v17 = vmul.f32 %v3419_v34, %v3616_v37  ;;  %v3840_v14 = vmul.f32 %v6396_v31, %v3719_v33  ;;  %6432 = vst [vmem:[#allocation91_spill] sm:$0xff] %v3853_v43  ;;  %v6434_v63 = vld [vmem:[#allocation54_spill] sm:$0xff] }
  0x85   : > { %v930_v54 = vadd.f32 %v923_v56, %v892_v49  ;;  %v2273_v32 = vmul.f32 0.16666667, %v2266_v26  ;;  %v1750_v35 = vadd.f32 %v6428_v47, %v1712_v42  ;;  %v446_v11 = vmul.f32 %v6369_v12, %v3278_v29  ;;  %v6435_v12 = vld [vmem:[#allocation55_spill] sm:$0xff]  ;;  %v6437_v42 = vld [vmem:[#allocation44_spill] sm:$0xff] }
  0x86   : > { %v322_v27 = vadd.f32 %v6429_v46, %v302_v55  ;;  %v1397_v50 = vadd.f32 %v3713_v36, %v1359_v10  ;;  %v3849_v56 = vmul.f32 %v6398_v7, %v3826_v3  ;;  %v485_v9 = vmul.f32 %v6431_v24, %v6350_v16  ;;  %v6438_v10 = vld [vmem:[#allocation7_spill] sm:$0xff] }
  0x87   : > { %v968_v6 = vadd.f32 %v961_v5, %v930_v54  ;;  %2643 = vst [vmem:[%s3799_s29 + $0x8] sm:$0x7f] %v2273_v32  ;;  %v1788_v57 = vadd.f32 %v6433_v20, %v1750_v35  ;;  %v524_v49 = vmul.f32 %v6434_v63, %v6372_v30  ;;  %v563_v36 = vmul.f32 %v6435_v12, %v6407_v15  ;;  %v6436_v5 = vld [vmem:[#allocation80_spill] sm:$0xff]  ;;  %v6439_v35 = vld [vmem:[#allocation13_spill] sm:$0xff]  ;;  %v6447_v29 = vld [vmem:[#allocation15_spill] sm:$0xff] }
  0x88   : > { %6430 = vst [vmem:[#allocation104_spill] sm:$0xff] %v3849_v56  ;;  %v453_v61 = vadd.f32 %v446_v11, %v322_v27  ;;  %v1637_v26 = vadd.f32 %v6436_v5, %v1397_v50  ;;  %v602_v55 = vmul.f32 %v3018_v18, %v6437_v42  ;;  %v848_v54 = vmul.f32 %v6438_v10, %v3327_v13  ;;  %v6440_v27 = vld [vmem:[#allocation56_spill] sm:$0xff]  ;;  %v6454_v56 = vld [vmem:[#allocation53_spill] sm:$0xff] }
  0x89   : > { %v1006_v44 = vadd.f32 %v999_v19, %v968_v6  ;;  %v2212_v32 = vadd.f32 %v3753_v23, %v1788_v57  ;;  %v886_v46 = vmul.f32 %v6439_v35, %v3573_v4  ;;  %v924_v11 = vmul.f32 %v6440_v27, %v3656_v8  ;;  %v3871_v24 = vld [vmem:[#allocation2 + $0x83] sm:$0x7f] }
  0x8a   : > { %v492_v47 = vadd.f32 %v485_v9, %v453_v61  ;;  %6441 = vst [vmem:[#allocation11_spill] sm:$0xff] %v3871_v24  ;;  %v6442_v20 = vld [vmem:[#allocation92_spill] sm:$0xff]  ;;  %v3878_v13 = vmul.f32 %v6444_v0, %v3853_v43  ;;  %v3882_v61 = vmul.f32 %v6378_v62, %v3339_v1  ;;  %v3886_v16 = vmul.f32 %v6354_v2, %v3586_v48 }
  0x8b   : > { %v1675_v50 = vadd.f32 %v6442_v20, %v1637_v26  ;;  %v1246_v19 = vadd.f32 %v1239_v52, %v1006_v44  ;;  %v6443_v6 = vld [vmem:[#allocation60_spill] sm:$0xff]  ;;  %v2219_v57 = vmax.f32 %v2212_v32, 0.0  ;;  %v3892_v44 = vmul.f32 %v3321_v39, %v3690_v59 }
  0x8c   : > { %v962_v5 = vmul.f32 %v6443_v6, %v6414_v58  ;;  %v531_v9 = vadd.f32 %v524_v49, %v492_v47  ;;  %6445 = vst [vmem:[#allocation93_spill] sm:$0xff] %v3882_v61  ;;  %6446 = vst [vmem:[#allocation38_spill] sm:$0xff] %v3886_v16  ;;  %v2677_v49 = vld [vmem:[%s5989_s1 + $0x9] ss:$0 sm:$0xff]  ;;  %v3900_v1 = vmul.f32 %v3350_v25, %v3801_v53 }
  0x8d   : > { %v1713_v26 = vadd.f32 %v6447_v29, %v1675_v50  ;;  %v1284_v52 = vadd.f32 %v3787_v60, %v1246_v19  ;;  %6448 = vst [vmem:[#allocation97_spill] sm:$0xff] %v3892_v44  ;;  %v486_v32 = vmul.f32 %v2677_v49, %v6372_v30  ;;  %v2226_v47 = vmin.f32 %v2219_v57, 6.0  ;;  %v3906_v60 = vld [vmem:[#allocation2 + $0x84] sm:$0x7f]  ;;  %v6452_v50 = vld [vmem:[#allocation82_spill] sm:$0xff] }
  0x8e   : > { %v570_v20 = vadd.f32 %v563_v36, %v531_v9  ;;  %6449 = vst [vmem:[#allocation29_spill] sm:$0xff] %v3900_v1  ;;  %v3904_v29 = vmul.f32 %v3368_v22, %v3871_v24  ;;  %6451 = vst [vmem:[#allocation83_spill] sm:$0xff] %v3906_v60  ;;  %v6453_v44 = vld [vmem:[#allocation87_spill] sm:$0xff]  ;;  %v525_v30 = vmul.f32 %v6434_v63, %v6407_v15 }
  0x8f   : > { %v1751_v19 = vadd.f32 %v6452_v50, %v1713_v26  ;;  %v1322_v16 = vadd.f32 %v6453_v44, %v1284_v52  ;;  %v493_v61 = vadd.f32 %v486_v32, %v6454_v56  ;;  %v2233_v36 = vmul.f32 0.16666667, %v2226_v47  ;;  %v3938_v47 = vld [vmem:[#allocation2 + $0x92] sm:$0x7f] }
  0x90   : > { %6450 = vst [vmem:[#allocation81_spill] sm:$0xff] %v3904_v29  ;;  %v609_v57 = vadd.f32 %v602_v55, %v570_v20  ;;  %v3915_v9 = vmul.f32 %v3394_v38, %v3379_v41  ;;  %v3919_v49 = vmul.f32 %v3414_v40, %v3616_v37  ;;  %v6455_v29 = vld [vmem:[#allocation103_spill] sm:$0xff]  ;;  %v564_v56 = vmul.f32 %v6435_v12, %v6437_v42 }
  0x91   : > { %v1789_v1 = vadd.f32 %v6455_v29, %v1751_v19  ;;  %v1360_v26 = vadd.f32 %v3811_v45, %v1322_v16  ;;  %v532_v52 = vadd.f32 %v525_v30, %v493_v61  ;;  %2637 = vst [vmem:[%s3799_s29 + $0x20] sm:$0x7f] %v2233_v36  ;;  %v3928_v55 = vmul.f32 %v3419_v34, %v3719_v33 }
  0x92   : > { %v855_v15 = vadd.f32 %v848_v54, %v609_v57  ;;  %v3932_v44 = vmul.f32 %v6396_v31, %v3826_v3  ;;  %v3936_v32 = vmul.f32 %v6398_v7, %v3906_v60  ;;  %6456 = vst [vmem:[#allocation98_spill] sm:$0xff] %v3938_v47  ;;  %v6457_v54 = vld [vmem:[#allocation45_spill] sm:$0xff]  ;;  %v849_v50 = vmul.f32 %v6438_v10, %v3573_v4 }
  0x93   : > { %v2213_v16 = vadd.f32 %v3753_v23, %v1789_v1  ;;  %v1398_v45 = vadd.f32 %v3820_v51, %v1360_v26  ;;  %v571_v61 = vadd.f32 %v564_v56, %v532_v52  ;;  %v603_v20 = vmul.f32 %v3018_v18, %v6457_v54 }
  0x94   : > { %v893_v29 = vadd.f32 %v886_v46, %v855_v15  ;;  %v887_v19 = vmul.f32 %v6439_v35, %v3656_v8  ;;  %v925_v30 = vmul.f32 %v6440_v27, %v6414_v58  ;;  %v963_v51 = vmul.f32 %v6443_v6, %v3853_v43  ;;  %v3959_v46 = vld [vmem:[#allocation2 + $0x93] sm:$0x7f] }
  0x95   : > { %v2220_v36 = vmax.f32 %v2213_v16, 0.0  ;;  %v1638_v57 = vadd.f32 %v3824_v28, %v1398_v45  ;;  %v610_v1 = vadd.f32 %v603_v20, %v571_v61  ;;  %v1001_v18 = vmul.f32 %v6444_v0, %v3938_v47  ;;  %6458 = vst [vmem:[#allocation108_spill] sm:$0xff] %v3959_v46  ;;  %v3972_v45 = vld [vmem:[#allocation2 + $0x94] sm:$0x7f] }
  0x96   : > { %v931_v26 = vadd.f32 %v924_v11, %v893_v29  ;;  %v1241_v10 = vmul.f32 %v6378_v62, %v3586_v48  ;;  %v1279_v35 = vmul.f32 %v6354_v2, %v3690_v59  ;;  %v526_v15 = vmul.f32 %v6434_v63, %v6437_v42  ;;  %6459 = vst [vmem:[#allocation21_spill] sm:$0xff] %v3972_v45  ;;  %v6460_v29 = vld [vmem:[#allocation65_spill] sm:$0xff] }
  0x97   : > { %v2227_v52 = vmin.f32 %v2220_v36, 6.0  ;;  %v1676_v56 = vadd.f32 %v3831_v21, %v1638_v57  ;;  %v856_v28 = vadd.f32 %v849_v50, %v610_v1  ;;  %v1317_v0 = vmul.f32 %v3321_v39, %v3801_v53  ;;  %v6461_v36 = vld [vmem:[#allocation93_spill] sm:$0xff] }
  0x98   : > { %v969_v11 = vadd.f32 %v962_v5, %v931_v26  ;;  %v3968_v62 = vmul.f32 %v3350_v25, %v3871_v24  ;;  %v565_v16 = vmul.f32 %v6435_v12, %v6457_v54  ;;  %v533_v50 = vadd.f32 %v526_v15, %v6460_v29  ;;  %v6463_v15 = vld [vmem:[#allocation16_spill] sm:$0xff] }
  0x99   : > { %v2234_v61 = vmul.f32 0.16666667, %v2227_v52  ;;  %v1714_v21 = vadd.f32 %v3836_v17, %v1676_v56  ;;  %v894_v20 = vadd.f32 %v887_v19, %v856_v28  ;;  %v3979_v42 = vmul.f32 %v3368_v22, %v3959_v46  ;;  %v6462_v52 = vld [vmem:[#allocation104_spill] sm:$0xff] }
  0x9a   : > { %v1007_v63 = vadd.f32 %v3878_v13, %v969_v11  ;;  %v3983_v5 = vmul.f32 %v3394_v38, %v3616_v37  ;;  %v3987_v12 = vmul.f32 %v3414_v40, %v3719_v33  ;;  %v3993_v19 = vmul.f32 %v3419_v34, %v3826_v3 }
  0x9b   : > { %2638 = vst [vmem:[%s3799_s29 + $0x40] sm:$0x7f] %v2234_v61  ;;  %v1752_v17 = vadd.f32 %v3840_v14, %v1714_v21  ;;  %v932_v54 = vadd.f32 %v925_v30, %v894_v20  ;;  %v572_v13 = vadd.f32 %v565_v16, %v533_v50  ;;  %v3998_v1 = vmul.f32 %v6396_v31, %v3906_v60  ;;  %v2678_v14 = vld [vmem:[%s5989_s1 + $0x2] ss:$0 sm:$0xff]  ;;  %v2679_v16 = vld [vmem:[%s5989_s1 + $0xa] ss:$0 sm:$0xff] }
  0x9c   : > { %v1247_v57 = vadd.f32 %v6461_v36, %v1007_v63  ;;  %v4002_v26 = vmul.f32 %v6398_v7, %v3972_v45  ;;  %v850_v30 = vmul.f32 %v2678_v14, %v3656_v8  ;;  %v888_v61 = vmul.f32 %v2679_v16, %v6414_v58  ;;  %v6464_v21 = vld [vmem:[#allocation38_spill] sm:$0xff]  ;;  %v4019_v63 = vld [vmem:[#allocation2 + $0xa3] sm:$0x7f] }
  0x9d   : > { %v1790_v56 = vadd.f32 %v6462_v52, %v1752_v17  ;;  %v970_v28 = vadd.f32 %v963_v51, %v932_v54  ;;  %v611_v11 = vadd.f32 %v6463_v15, %v572_v13  ;;  %v926_v29 = vmul.f32 %v6440_v27, %v3853_v43  ;;  %6465 = vst [vmem:[#allocation99_spill] sm:$0xff] %v4019_v63  ;;  %v2680_v51 = vld [vmem:[%s5989_s1 + $0x3] ss:$0 sm:$0xff]  ;;  %v4038_v52 = vld [vmem:[%s5989_s1 + $0x30] ss:$0 sm:$0xff]  ;;  %v6469_v16 = vld [vmem:[#allocation8_spill] sm:$0xff] }
  0x9e   : > { %v1285_v20 = vadd.f32 %v6464_v21, %v1247_v57  ;;  %v964_v50 = vmul.f32 %v6443_v6, %v3938_v47  ;;  %v1242_v17 = vmul.f32 %v2680_v51, %v3690_v59  ;;  %v1280_v36 = vmul.f32 %v6354_v2, %v3801_v53  ;;  %v6466_v57 = vld [vmem:[#allocation97_spill] sm:$0xff]  ;;  %v6471_v51 = vld [vmem:[#allocation43_spill] sm:$0xff]  ;;  %v6497_v59 = vld [vmem:[#allocation84_spill] sm:$0xff] }
  0x9f   : > { %v2214_v54 = vadd.f32 %v3753_v23, %v1790_v56  ;;  %v1008_v13 = vadd.f32 %v1001_v18, %v970_v28  ;;  %v857_v58 = vadd.f32 %v850_v30, %v611_v11  ;;  %v1318_v6 = vmul.f32 %v3321_v39, %v3871_v24  ;;  %v6467_v56 = vld [vmem:[#allocation48_spill] sm:$0xff]  ;;  %v6468_v39 = vld [vmem:[#allocation29_spill] sm:$0xff]  ;;  %v6494_v53 = vld [vmem:[#allocation79_spill] sm:$0xff] }
  0xa0   : > { %v1323_v27 = vadd.f32 %v6466_v57, %v1285_v20  ;;  %v4033_v14 = vmul.f32 %v3350_v25, %v3959_v46  ;;  %v502_v18 = vmul.f32 %v4038_v52, %v6467_v56  ;;  %v4044_v15 = vmul.f32 %v3368_v22, %v4019_v63  ;;  %v6470_v20 = vld [vmem:[#allocation51_spill] sm:$0xff]  ;;  %v6486_v63 = vld [vmem:[#allocation68_spill] sm:$0xff]  ;;  %v6490_v24 = vld [vmem:[#allocation73_spill] sm:$0xff] }
  0xa1   : > { %v2221_v30 = vmax.f32 %v2214_v54, 0.0  ;;  %v1248_v28 = vadd.f32 %v1241_v10, %v1008_v13  ;;  %v895_v2 = vadd.f32 %v888_v61, %v857_v58  ;;  %v4049_v25 = vmul.f32 %v3394_v38, %v3719_v33  ;;  %v4054_v10 = vld [vmem:[#allocation2 + $0xa4] sm:$0x7f]  ;;  %v6473_v61 = vld [vmem:[#allocation81_spill] sm:$0xff] }
  0xa2   : > { %v1361_v11 = vadd.f32 %v6468_v39, %v1323_v27  ;;  %v509_v21 = vadd.f32 %v502_v18, %v6469_v16  ;;  %v541_v57 = vmul.f32 %v6471_v51, %v6470_v20  ;;  %6472 = vst [vmem:[#allocation39_spill] sm:$0xff] %v4054_v10  ;;  %v4058_v22 = vmul.f32 %v3414_v40, %v3826_v3  ;;  %v6474_v27 = vld [vmem:[#allocation57_spill] sm:$0xff]  ;;  %v6475_v18 = vld [vmem:[#allocation46_spill] sm:$0xff]  ;;  %v6481_v51 = vld [vmem:[#allocation59_spill] sm:$0xff] }
  0xa3   : > { %v2228_v46 = vmin.f32 %v2221_v30, 6.0  ;;  %v1286_v47 = vadd.f32 %v1279_v35, %v1248_v28  ;;  %v933_v54 = vadd.f32 %v926_v29, %v895_v2  ;;  %v4063_v38 = vmul.f32 %v3419_v34, %v3906_v60  ;;  %v4079_v34 = vld [vmem:[%s5989_s1 + $0x48] ss:$0 sm:$0xff]  ;;  %v6477_v16 = vld [vmem:[#allocation37_spill] sm:$0xff]  ;;  %v6493_v3 = vld [vmem:[#allocation78_spill] sm:$0xff] }
  0xa4   : > { %v1399_v13 = vadd.f32 %v6473_v61, %v1361_v11  ;;  %v548_v58 = vadd.f32 %v541_v57, %v509_v21  ;;  %v580_v39 = vmul.f32 %v6475_v18, %v6474_v27  ;;  %v4069_v28 = vmul.f32 %v6396_v31, %v3972_v45  ;;  %v6478_v31 = vld [vmem:[#allocation22_spill] sm:$0xff]  ;;  %v6480_v21 = vld [vmem:[#allocation67_spill] sm:$0xff]  ;;  %v6489_v60 = vld [vmem:[#allocation72_spill] sm:$0xff] }
  0xa5   : > { %v2235_v30 = vmul.f32 0.16666667, %v2228_v46  ;;  %v1324_v35 = vadd.f32 %v1317_v0, %v1286_v47  ;;  %v971_v29 = vadd.f32 %v964_v50, %v933_v54  ;;  %v4074_v2 = vmul.f32 %v6398_v7, %v4054_v10  ;;  %v6479_v7 = vld [vmem:[#allocation62_spill] sm:$0xff] }
  0xa6   : > { %v1639_v40 = vadd.f32 %v3915_v9, %v1399_v13  ;;  %v587_v11 = vadd.f32 %v580_v39, %v548_v58  ;;  %v619_v47 = vmul.f32 %v4079_v34, %v6477_v16  ;;  %v4089_v9 = vld [vmem:[%s5989_s1 + $0x31] ss:$0 sm:$0xff]  ;;  %v940_v57 = vmul.f32 %v6481_v51, %v6480_v21  ;;  %v4104_v16 = vld [vmem:[%s5989_s1 + $0x32] ss:$0 sm:$0xff] }
  0xa7   : > { %6476 = vst [vmem:[#allocation33_spill] sm:$0xff] %v4074_v2  ;;  %2639 = vst [vmem:[%s3799_s29 + $0x60] sm:$0x7f] %v2235_v30  ;;  %v1362_v46 = vadd.f32 %v3968_v62, %v1324_v35  ;;  %v1009_v0 = vadd.f32 %v6478_v31, %v971_v29  ;;  %v902_v50 = vmul.f32 %v4089_v9, %v6479_v7  ;;  %v6482_v13 = vld [vmem:[#allocation69_spill] sm:$0xff]  ;;  %v6484_v62 = vld [vmem:[#allocation66_spill] sm:$0xff] }
  0xa8   : > { %v1677_v54 = vadd.f32 %v3919_v49, %v1639_v40  ;;  %v626_v61 = vadd.f32 %v619_v47, %v587_v11  ;;  %v6483_v58 = vld [vmem:[#allocation61_spill] sm:$0xff]  ;;  %v1016_v30 = vmul.f32 %v6484_v62, %v3573_v4  ;;  %v6485_v31 = vld [vmem:[#allocation63_spill] sm:$0xff]  ;;  %v6488_v47 = vld [vmem:[#allocation12_spill] sm:$0xff]  ;;  %v4125_v33 = vmul.f32 %v6494_v53, %v6493_v3 }
  0xa9   : > { %v978_v39 = vmul.f32 %v6483_v58, %v6482_v13  ;;  %v1400_v35 = vadd.f32 %v3979_v42, %v1362_v46  ;;  %v1249_v29 = vadd.f32 %v1242_v17, %v1009_v0  ;;  %v1294_v10 = vmul.f32 %v4104_v16, %v6485_v31  ;;  %v6487_v49 = vld [vmem:[#allocation71_spill] sm:$0xff]  ;;  %v6496_v2 = vld [vmem:[#allocation76_spill] sm:$0xff] }
  0xaa   : > { %v4110_v40 = vmul.f32 %v6487_v49, %v6486_v63  ;;  %v1715_v11 = vadd.f32 %v3928_v55, %v1677_v54  ;;  %v871_v45 = vadd.f32 %v6488_v47, %v626_v61  ;;  %v4116_v42 = vmul.f32 %v6490_v24, %v6489_v60  ;;  %v6491_v17 = vld [vmem:[#allocation75_spill] sm:$0xff]  ;;  %6495 = vst [vmem:[#allocation35_spill] sm:$0xff] %v4125_v33  ;;  %v4135_v47 = vld [vmem:[%s5989_s1 + $0x28] ss:$0 sm:$0xff]  ;;  %v6500_v33 = vld [vmem:[#allocation85_spill] sm:$0xff] }
  0xab   : > { %v4120_v46 = vmul.f32 %v6491_v17, %v3586_v48  ;;  %v1640_v0 = vadd.f32 %v3983_v5, %v1400_v35  ;;  %v1287_v43 = vadd.f32 %v1280_v36, %v1249_v29  ;;  %v4129_v55 = vmul.f32 %v6497_v59, %v6496_v2  ;;  %v6499_v29 = vld [vmem:[#allocation77_spill] sm:$0xff] }
  0xac   : > { %v1753_v54 = vadd.f32 %v3932_v44, %v1715_v11  ;;  %v909_v61 = vadd.f32 %v902_v50, %v871_v45  ;;  %v464_v5 = vmul.f32 %v4135_v47, %v6467_v56  ;;  %v503_v36 = vmul.f32 %v4038_v52, %v6470_v20  ;;  %v6502_v44 = vld [vmem:[#allocation89_spill] sm:$0xff]  ;;  %v4154_v56 = vld [vmem:[%s5989_s1 + $0x38] ss:$0 sm:$0xff] }
  0xad   : > { %6492 = vst [vmem:[#allocation6_spill] sm:$0xff] %v4120_v46  ;;  %6498 = vst [vmem:[#allocation18_spill] sm:$0xff] %v4129_v55  ;;  %v1678_v3 = vadd.f32 %v3987_v12, %v1640_v0  ;;  %v1325_v35 = vadd.f32 %v1318_v6, %v1287_v43  ;;  %v4144_v55 = vmul.f32 %v6500_v33, %v6499_v29  ;;  %v6505_v0 = vld [vmem:[#allocation90_spill] sm:$0xff] }
  0xae   : > { %v4148_v45 = vmul.f32 %v6502_v44, %v3379_v41  ;;  %v1791_v50 = vadd.f32 %v3936_v32, %v1753_v54  ;;  %v947_v11 = vadd.f32 %v940_v57, %v909_v61  ;;  %v510_v46 = vadd.f32 %v503_v36, %v464_v5  ;;  %6504 = vst [vmem:[#allocation28_spill] sm:$0xff] %v4154_v56  ;;  %v6508_v32 = vld [vmem:[#allocation96_spill] sm:$0xff]  ;;  %v4168_v54 = vld [vmem:[#allocation2 + $0x55] sm:$0x7f] }
  0xaf   : > { %6501 = vst [vmem:[#allocation47_spill] sm:$0xff] %v4144_v55  ;;  %v542_v43 = vmul.f32 %v4154_v56, %v6474_v27  ;;  %v1716_v12 = vadd.f32 %v3993_v19, %v1678_v3  ;;  %v1363_v6 = vadd.f32 %v4033_v14, %v1325_v35  ;;  %v4162_v55 = vmul.f32 %v6505_v0, %v3616_v37  ;;  %v4171_v44 = vld [vmem:[#allocation2 + $0x51] sm:$0x7f]  ;;  %v6511_v35 = vld [vmem:[#allocation95_spill] sm:$0xff] }
  0xb0   : > { %6503 = vst [vmem:[#allocation17_spill] sm:$0xff] %v4148_v45  ;;  %v6507_v45 = vld [vmem:[#allocation94_spill] sm:$0xff]  ;;  %v2215_v61 = vadd.f32 %v3753_v23, %v1791_v50  ;;  %v985_v5 = vadd.f32 %v978_v39, %v947_v11  ;;  %6510 = vst [vmem:[#allocation32_spill] sm:$0xff] %v4171_v44  ;;  %v581_v19 = vmul.f32 %v4171_v44, %v6475_v18  ;;  %v4185_v11 = vld [vmem:[#allocation2 + $0x61] sm:$0x7f] }
  0xb1   : > { %6506 = vst [vmem:[#allocation3_spill] sm:$0xff] %v4162_v55  ;;  %v4166_v57 = vmul.f32 %v6508_v32, %v6507_v45  ;;  %v549_v36 = vadd.f32 %v542_v43, %v510_v46  ;;  %v1754_v14 = vadd.f32 %v3998_v1, %v1716_v12  ;;  %v1401_v3 = vadd.f32 %v4044_v15, %v1363_v6  ;;  %v6512_v55 = vld [vmem:[#allocation102_spill] sm:$0xff]  ;;  %v6514_v45 = vld [vmem:[#allocation100_spill] sm:$0xff]  ;;  %v6517_v43 = vld [vmem:[#allocation101_spill] sm:$0xff] }
  0xb2   : > { %v4179_v56 = vmul.f32 %v6512_v55, %v6511_v35  ;;  %v2222_v50 = vmax.f32 %v2215_v61, 0.0  ;;  %v1023_v39 = vadd.f32 %v1016_v30, %v985_v5  ;;  %6516 = vst [vmem:[#allocation4_spill] sm:$0xff] %v4185_v11  ;;  %v620_v18 = vmul.f32 %v4185_v11, %v4079_v34  ;;  %v6518_v12 = vld [vmem:[#allocation106_spill] sm:$0xff] }
  0xb3   : > { %6509 = vst [vmem:[#allocation25_spill] sm:$0xff] %v4166_v57  ;;  %v6515_v57 = vld [vmem:[#allocation105_spill] sm:$0xff]  ;;  %v588_v46 = vadd.f32 %v581_v19, %v549_v36  ;;  %v1792_v1 = vadd.f32 %v4002_v26, %v1754_v14  ;;  %v1641_v15 = vadd.f32 %v4049_v25, %v1401_v3  ;;  %v4193_v6 = vmul.f32 %v6518_v12, %v6517_v43  ;;  %v6522_v30 = vld [vmem:[#allocation30_spill] sm:$0xff]  ;;  %v4203_v19 = vld [vmem:[%s5989_s1 + $0x29] ss:$0 sm:$0xff] }
  0xb4   : > { %6513 = vst [vmem:[#allocation36_spill] sm:$0xff] %v4179_v56  ;;  %v4183_v32 = vmul.f32 %v6515_v57, %v6514_v45  ;;  %v6520_v56 = vld [vmem:[#allocation107_spill] sm:$0xff]  ;;  %v2229_v61 = vmin.f32 %v2222_v50, 6.0  ;;  %v1263_v5 = vadd.f32 %v6522_v30, %v1023_v39  ;;  %v865_v26 = vmul.f32 %v4203_v19, %v6479_v7 }
  0xb5   : > { %6519 = vst [vmem:[#allocation109_spill] sm:$0xff] %v4193_v6  ;;  %v4197_v57 = vmul.f32 %v6520_v56, %v4168_v54  ;;  %v627_v36 = vadd.f32 %v620_v18, %v588_v46  ;;  %v2216_v25 = vadd.f32 %v3753_v23, %v1792_v1  ;;  %v1679_v14 = vadd.f32 %v4058_v22, %v1641_v15  ;;  %v4221_v22 = vld [vmem:[%s5989_s1 + $0x2a] ss:$0 sm:$0xff] }
  0xb6   : > { %v903_v3 = vmul.f32 %v4089_v9, %v6480_v21  ;;  %v941_v50 = vmul.f32 %v6481_v51, %v6482_v13  ;;  %v2236_v39 = vmul.f32 0.16666667, %v2229_v61  ;;  %v1301_v46 = vadd.f32 %v1294_v10, %v1263_v5  ;;  %v6523_v5 = vld [vmem:[#allocation88_spill] sm:$0xff] }
  0xb7   : > { %6521 = vst [vmem:[#allocation20_spill] sm:$0xff] %v4197_v57  ;;  %v872_v18 = vadd.f32 %v865_v26, %v627_v36  ;;  %v979_v30 = vmul.f32 %v6483_v58, %v3573_v4  ;;  %v2223_v57 = vmax.f32 %v2216_v25, 0.0  ;;  %v1717_v6 = vadd.f32 %v4063_v38, %v1679_v14  ;;  %v6525_v14 = vld [vmem:[#allocation6_spill] sm:$0xff] }
  0xb8   : > { %v1017_v7 = vmul.f32 %v6484_v62, %v3656_v8  ;;  %v1257_v51 = vmul.f32 %v4221_v22, %v6485_v31  ;;  %2640 = vst [vmem:[%s3799_s29 + $0x80] sm:$0x7f] %v2236_v39  ;;  %v1339_v10 = vadd.f32 %v4110_v40, %v1301_v46  ;;  %v1295_v58 = vmul.f32 %v4104_v16, %v6486_v63  ;;  %v4261_v46 = vld [vmem:[#allocation2 + $0x65] sm:$0x7f] }
  0xb9   : > { %v910_v1 = vadd.f32 %v903_v3, %v872_v18  ;;  %v1333_v38 = vmul.f32 %v6487_v49, %v6489_v60  ;;  %v2230_v15 = vmin.f32 %v2223_v57, 6.0  ;;  %v1755_v62 = vadd.f32 %v4069_v28, %v1717_v6  ;;  %v6524_v57 = vld [vmem:[#allocation33_spill] sm:$0xff] }
  0xba   : > { %v1371_v61 = vmul.f32 %v6490_v24, %v3586_v48  ;;  %v4236_v31 = vmul.f32 %v6491_v17, %v6523_v5  ;;  %v1377_v40 = vadd.f32 %v4116_v42, %v1339_v10  ;;  %v4241_v63 = vmul.f32 %v6494_v53, %v6496_v2 }
  0xbb   : > { %v948_v36 = vadd.f32 %v941_v50, %v910_v1  ;;  %v4245_v49 = vmul.f32 %v6497_v59, %v6499_v29  ;;  %v2237_v28 = vmul.f32 0.16666667, %v2230_v15  ;;  %v1793_v6 = vadd.f32 %v6524_v57, %v1755_v62  ;;  %v6526_v50 = vld [vmem:[#allocation89_spill] sm:$0xff]  ;;  %v6530_v1 = vld [vmem:[#allocation28_spill] sm:$0xff]  ;;  %v6531_v15 = vld [vmem:[#allocation35_spill] sm:$0xff] }
  0xbc   : > { %v465_v26 = vmul.f32 %v4135_v47, %v6470_v20  ;;  %v504_v25 = vmul.f32 %v4038_v52, %v6474_v27  ;;  %v1415_v42 = vadd.f32 %v6525_v14, %v1377_v40  ;;  %v4255_v2 = vmul.f32 %v6500_v33, %v3379_v41  ;;  %v6528_v20 = vld [vmem:[#allocation27_spill] sm:$0xff]  ;;  %v6535_v14 = vld [vmem:[#allocation105_spill] sm:$0xff] }
  0xbd   : > { %v986_v3 = vadd.f32 %v979_v30, %v948_v36  ;;  %v4259_v39 = vmul.f32 %v6526_v50, %v3616_v37  ;;  %2641 = vst [vmem:[%s3799_s29 + $0xa0] sm:$0x7f] %v2237_v28  ;;  %v2217_v18 = vadd.f32 %v3753_v23, %v1793_v6  ;;  %v4267_v10 = vmul.f32 %v6505_v0, %v6528_v20  ;;  %v6532_v36 = vld [vmem:[#allocation96_spill] sm:$0xff] }
  0xbe   : > { %v511_v27 = vadd.f32 %v504_v25, %v465_v26  ;;  %v543_v30 = vmul.f32 %v4171_v44, %v6530_v1  ;;  %v1655_v62 = vadd.f32 %v6531_v15, %v1415_v42  ;;  %v4274_v57 = vmul.f32 %v6532_v36, %v6511_v35  ;;  %v4287_v25 = vld [vmem:[%s5989_s1 + $0x40] ss:$0 sm:$0xff]  ;;  %v6537_v35 = vld [vmem:[#allocation18_spill] sm:$0xff] }
  0xbf   : > { %6527 = vst [vmem:[#allocation26_spill] sm:$0xff] %v4259_v39  ;;  %6529 = vst [vmem:[#allocation49_spill] sm:$0xff] %v4267_v10  ;;  %v1024_v40 = vadd.f32 %v1017_v7, %v986_v3  ;;  %v4278_v28 = vmul.f32 %v6512_v55, %v6514_v45  ;;  %v2224_v6 = vmax.f32 %v2217_v18, 0.0  ;;  %v4282_v23 = vmul.f32 %v6535_v14, %v6517_v43 }
  0xc0   : > { %6533 = vst [vmem:[#allocation5_spill] sm:$0xff] %v4274_v57  ;;  %v550_v26 = vadd.f32 %v543_v30, %v511_v27  ;;  %v582_v7 = vmul.f32 %v4287_v25, %v4185_v11  ;;  %v1693_v42 = vadd.f32 %v6537_v35, %v1655_v62  ;;  %v4294_v15 = vmul.f32 %v6518_v12, %v4168_v54  ;;  %v6541_v62 = vld [vmem:[#allocation47_spill] sm:$0xff] }
  0xc1   : > { %6534 = vst [vmem:[#allocation110_spill] sm:$0xff] %v4278_v28  ;;  %6536 = vst [vmem:[#allocation54_spill] sm:$0xff] %v4282_v23  ;;  %v1264_v3 = vadd.f32 %v1257_v51, %v1024_v40  ;;  %v4298_v18 = vmul.f32 %v6520_v56, %v4261_v46  ;;  %v2231_v27 = vmin.f32 %v2224_v6, 6.0  ;;  %v4300_v23 = vld [vmem:[#allocation2 + $0x71] sm:$0x7f]  ;;  %v866_v57 = vmul.f32 %v4203_v19, %v6480_v21 }
  0xc2   : > { %6538 = vst [vmem:[#allocation55_spill] sm:$0xff] %v4294_v15  ;;  %v589_v30 = vadd.f32 %v582_v7, %v550_v26  ;;  %6540 = vst [vmem:[#allocation44_spill] sm:$0xff] %v4300_v23  ;;  %v621_v28 = vmul.f32 %v4300_v23, %v4079_v34  ;;  %v1731_v51 = vadd.f32 %v6541_v62, %v1693_v42  ;;  %v4312_v6 = vld [vmem:[%s5989_s1 + $0x39] ss:$0 sm:$0xff]  ;;  %v4319_v21 = vld [vmem:[%s5989_s1 + $0x41] ss:$0 sm:$0xff] }
  0xc3   : > { %6539 = vst [vmem:[#allocation80_spill] sm:$0xff] %v4298_v18  ;;  %v1302_v40 = vadd.f32 %v1295_v58, %v1264_v3  ;;  %v904_v35 = vmul.f32 %v4089_v9, %v6482_v13  ;;  %v942_v26 = vmul.f32 %v4312_v6, %v3573_v4  ;;  %v2238_v7 = vmul.f32 0.16666667, %v2231_v27  ;;  %6542 = vst [vmem:[#allocation7_spill] sm:$0xff] %v4319_v21  ;;  %v4323_v42 = vld [vmem:[#allocation2 + $0x72] sm:$0x7f] }
  0xc4   : > { %v628_v18 = vadd.f32 %v621_v28, %v589_v30  ;;  %v980_v58 = vmul.f32 %v4319_v21, %v3656_v8  ;;  %6543 = vst [vmem:[#allocation13_spill] sm:$0xff] %v4323_v42  ;;  %v4328_v13 = vld [vmem:[%s5989_s1 + $0x49] ss:$0 sm:$0xff]  ;;  %v6545_v27 = vld [vmem:[#allocation17_spill] sm:$0xff]  ;;  %v1296_v10 = vmul.f32 %v4104_v16, %v6489_v60  ;;  %v4343_v21 = vld [vmem:[%s5989_s1 + $0x3a] ss:$0 sm:$0xff] }
  0xc5   : > { %6544 = vst [vmem:[#allocation56_spill] sm:$0xff] %v4328_v13  ;;  %v1018_v3 = vmul.f32 %v4328_v13, %v4323_v42  ;;  %v1769_v28 = vadd.f32 %v6545_v27, %v1731_v51  ;;  %v1340_v30 = vadd.f32 %v1333_v38, %v1302_v40  ;;  %v4333_v62 = vld [vmem:[#allocation2 + $0x33] sm:$0x7f]  ;;  %2642 = vst [vmem:[%s3799_s29 + $0xc0] sm:$0x7f] %v2238_v7  ;;  %v6548_v51 = vld [vmem:[#allocation31_spill] sm:$0xff] }
  0xc6   : > { %6546 = vst [vmem:[#allocation92_spill] sm:$0xff] %v4333_v62  ;;  %v1258_v15 = vmul.f32 %v4333_v62, %v4221_v22  ;;  %v873_v39 = vadd.f32 %v866_v57, %v628_v18  ;;  %v4347_v13 = vmul.f32 %v4343_v21, %v3586_v48  ;;  %v4351_v38 = vmul.f32 %v6490_v24, %v6523_v5  ;;  %v6549_v60 = vld [vmem:[#allocation3_spill] sm:$0xff] }
  0xc7   : > { %v4355_v40 = vmul.f32 %v6491_v17, %v6548_v51  ;;  %v1807_v7 = vadd.f32 %v6549_v60, %v1769_v28  ;;  %v1378_v57 = vadd.f32 %v1371_v61, %v1340_v30  ;;  %v4360_v18 = vmul.f32 %v6494_v53, %v6499_v29  ;;  %v6551_v28 = vld [vmem:[#allocation25_spill] sm:$0xff] }
  0xc8   : > { %6547 = vst [vmem:[#allocation60_spill] sm:$0xff] %v4351_v38  ;;  %v4364_v27 = vmul.f32 %v6497_v59, %v3379_v41  ;;  %v911_v62 = vadd.f32 %v904_v35, %v873_v39  ;;  %v4368_v24 = vmul.f32 %v6500_v33, %v3616_v37  ;;  %v4370_v38 = vld [vmem:[#allocation2 + $0x41] sm:$0x7f]  ;;  %v505_v61 = vmul.f32 %v4171_v44, %v4038_v52  ;;  %v6552_v59 = vld [vmem:[#allocation40_spill] sm:$0xff]  ;;  %v4386_v35 = vld [vmem:[#allocation2 + $0x75] sm:$0x7f] }
  0xc9   : > { %6550 = vst [vmem:[#allocation19_spill] sm:$0xff] %v4370_v38  ;;  %v466_v17 = vmul.f32 %v4370_v38, %v4135_v47  ;;  %v2028_v53 = vadd.f32 %v6551_v28, %v1807_v7  ;;  %v1416_v29 = vadd.f32 %v4236_v31, %v1378_v57  ;;  %v4380_v41 = vmul.f32 %v6526_v50, %v6528_v20  ;;  %v6553_v31 = vld [vmem:[#allocation36_spill] sm:$0xff]  ;;  %v4484_v38 = vld [vmem:[%s5989_s1 + $0x33] ss:$0 sm:$0xff] }
  0xca   : > { %v4384_v33 = vmul.f32 %v6505_v0, %v6552_v59  ;;  %v949_v39 = vadd.f32 %v942_v26, %v911_v62  ;;  %v4390_v30 = vmul.f32 %v6532_v36, %v6514_v45  ;;  %v544_v7 = vmul.f32 %v4185_v11, %v6530_v1 }
  0xcb   : > { %v512_v60 = vadd.f32 %v505_v61, %v466_v17  ;;  %v2047_v57 = vadd.f32 %v6553_v31, %v2028_v53  ;;  %v1656_v50 = vadd.f32 %v4241_v63, %v1416_v29  ;;  %v4398_v28 = vmul.f32 %v6512_v55, %v6517_v43  ;;  %v4416_v43 = vld [vmem:[#allocation2 + $0x81] sm:$0x7f] }
  0xcc   : > { %v4402_v0 = vmul.f32 %v6535_v14, %v4168_v54  ;;  %v987_v26 = vadd.f32 %v980_v58, %v949_v39  ;;  %v4406_v45 = vmul.f32 %v6518_v12, %v4261_v46  ;;  %v583_v62 = vmul.f32 %v4300_v23, %v4287_v25  ;;  %6558 = vst [vmem:[#allocation103_spill] sm:$0xff] %v4416_v43  ;;  %v4420_v61 = vld [vmem:[#allocation2 + $0x42] sm:$0x7f] }
  0xcd   : > { %6554 = vst [vmem:[#allocation15_spill] sm:$0xff] %v4398_v28  ;;  %v551_v36 = vadd.f32 %v544_v7, %v512_v60  ;;  %v2066_v17 = vadd.f32 %v4183_v32, %v2047_v57  ;;  %v1694_v63 = vadd.f32 %v4245_v49, %v1656_v50  ;;  %v4414_v55 = vmul.f32 %v6520_v56, %v4386_v35  ;;  %v6560_v49 = vld [vmem:[#allocation109_spill] sm:$0xff]  ;;  %v6561_v60 = vld [vmem:[#allocation7_spill] sm:$0xff]  ;;  %v6563_v50 = vld [vmem:[#allocation56_spill] sm:$0xff] }
  0xce   : > { %6555 = vst [vmem:[#allocation82_spill] sm:$0xff] %v4402_v0  ;;  %6556 = vst [vmem:[#allocation87_spill] sm:$0xff] %v4406_v45  ;;  %v622_v14 = vmul.f32 %v4416_v43, %v4079_v34  ;;  %v1025_v58 = vadd.f32 %v1018_v3, %v987_v26  ;;  %v867_v53 = vmul.f32 %v4420_v61, %v4203_v19  ;;  %v6562_v57 = vld [vmem:[#allocation91_spill] sm:$0xff]  ;;  %v6573_v0 = vld [vmem:[#allocation5_spill] sm:$0xff] }
  0xcf   : > { %6557 = vst [vmem:[#allocation53_spill] sm:$0xff] %v4414_v55  ;;  %v590_v12 = vadd.f32 %v583_v62, %v551_v36  ;;  %6559 = vst [vmem:[#allocation45_spill] sm:$0xff] %v4420_v61  ;;  %v905_v32 = vmul.f32 %v4089_v9, %v3573_v4  ;;  %v2085_v29 = vadd.f32 %v6560_v49, %v2066_v17  ;;  %v4434_v36 = vld [vmem:[#allocation2 + $0x43] sm:$0x7f]  ;;  %v4499_v28 = vld [vmem:[%s5989_s1 + $0x3b] ss:$0 sm:$0xff] }
  0xd0   : > { %v1732_v56 = vadd.f32 %v4255_v2, %v1694_v63  ;;  %v943_v39 = vmul.f32 %v4312_v6, %v3656_v8  ;;  %v981_v7 = vmul.f32 %v4323_v42, %v6561_v60  ;;  %v1265_v3 = vadd.f32 %v1258_v15, %v1025_v58  ;;  %6564 = vst [vmem:[#allocation65_spill] sm:$0xff] %v4434_v36  ;;  %v6565_v62 = vld [vmem:[#allocation20_spill] sm:$0xff]  ;;  %v6566_v2 = vld [vmem:[#allocation26_spill] sm:$0xff] }
  0xd1   : > { %v629_v31 = vadd.f32 %v622_v14, %v590_v12  ;;  %v1019_v26 = vmul.f32 %v6563_v50, %v6562_v57  ;;  %v4438_v4 = vmul.f32 %v4434_v36, %v4221_v22  ;;  %v2104_v17 = vadd.f32 %v6565_v62, %v2085_v29  ;;  %v4453_v12 = vld [vmem:[%s5989_s1 + $0x42] ss:$0 sm:$0xff]  ;;  %v4475_v36 = vld [vmem:[%s5989_s1 + $0x2b] ss:$0 sm:$0xff] }
  0xd2   : > { %v1770_v63 = vadd.f32 %v6566_v2, %v1732_v56  ;;  %v4444_v49 = vmul.f32 %v4104_v16, %v3586_v48  ;;  %v4448_v15 = vmul.f32 %v4343_v21, %v6523_v5  ;;  %v1303_v14 = vadd.f32 %v1296_v10, %v1265_v3  ;;  %v4462_v48 = vld [vmem:[%s5989_s1 + $0x4a] ss:$0 sm:$0xff]  ;;  %v6567_v56 = vld [vmem:[#allocation11_spill] sm:$0xff]  ;;  %v6568_v10 = vld [vmem:[#allocation14_spill] sm:$0xff] }
  0xd3   : > { %v874_v58 = vadd.f32 %v867_v53, %v629_v31  ;;  %v4457_v29 = vmul.f32 %v4453_v12, %v6548_v51  ;;  %v4466_v62 = vmul.f32 %v4462_v48, %v6567_v56  ;;  %v2253_v53 = vadd.f32 %v6568_v10, %v2104_v17  ;;  %v6569_v3 = vld [vmem:[#allocation49_spill] sm:$0xff]  ;;  %v4470_v2 = vld [vmem:[#allocation2 + $0x44] sm:$0x7f] }
  0xd4   : > { %v1808_v31 = vadd.f32 %v6569_v3, %v1770_v63  ;;  %6570 = vst [vmem:[#allocation93_spill] sm:$0xff] %v4470_v2  ;;  %v4479_v61 = vmul.f32 %v4475_v36, %v4470_v2  ;;  %v4488_v17 = vmul.f32 %v4484_v38, %v3616_v37  ;;  %v1341_v63 = vadd.f32 %v4347_v13, %v1303_v14  ;;  %v4508_v13 = vld [vmem:[%s5989_s1 + $0x43] ss:$0 sm:$0xff] }
  0xd5   : > { %v912_v3 = vadd.f32 %v905_v32, %v874_v58  ;;  %v467_v55 = vmul.f32 %v4171_v44, %v4135_v47  ;;  %v506_v45 = vmul.f32 %v4185_v11, %v4038_v52  ;;  %v2260_v2 = vmax.f32 %v2253_v53, 0.0  ;;  %v6575_v47 = vld [vmem:[#allocation60_spill] sm:$0xff] }
  0xd6   : > { %6571 = vst [vmem:[#allocation104_spill] sm:$0xff] %v4479_v61  ;;  %6572 = vst [vmem:[#allocation16_spill] sm:$0xff] %v4488_v17  ;;  %v2029_v61 = vadd.f32 %v6573_v0, %v1808_v31  ;;  %v4503_v37 = vmul.f32 %v4499_v28, %v6528_v20  ;;  %v4512_v52 = vmul.f32 %v4508_v13, %v6552_v59  ;;  %v6576_v31 = vld [vmem:[#allocation110_spill] sm:$0xff]  ;;  %v4521_v44 = vld [vmem:[%s5989_s1 + $0x4b] ss:$0 sm:$0xff] }
  0xd7   : > { %v1379_v0 = vadd.f32 %v6575_v47, %v1341_v63  ;;  %v950_v32 = vadd.f32 %v943_v39, %v912_v3  ;;  %v513_v14 = vadd.f32 %v506_v45, %v467_v55  ;;  %v545_v58 = vmul.f32 %v4300_v23, %v6530_v1  ;;  %v4530_v39 = vld [vmem:[%s5989_s1 + $0x2c] ss:$0 sm:$0xff]  ;;  %v2712_v45 = vld [vmem:[#allocation2 + $0x45] sm:$0x7f] }
  0xd8   : > { %6574 = vst [vmem:[#allocation38_spill] sm:$0xff] %v4503_v37  ;;  %v2267_v53 = vmin.f32 %v2260_v2, 6.0  ;;  %v2048_v11 = vadd.f32 %v6576_v31, %v2029_v61  ;;  %v6577_v37 = vld [vmem:[#allocation83_spill] sm:$0xff]  ;;  %v4533_v1 = vmul.f32 %v2712_v45, %v4530_v39  ;;  %v584_v3 = vmul.f32 %v4416_v43, %v4287_v25  ;;  %v6579_v31 = vld [vmem:[#allocation54_spill] sm:$0xff] }
  0xd9   : > { %v4525_v17 = vmul.f32 %v4521_v44, %v6577_v37  ;;  %v1417_v55 = vadd.f32 %v4355_v40, %v1379_v0  ;;  %v988_v61 = vadd.f32 %v981_v7, %v950_v32  ;;  %v4536_v2 = vld [vmem:[#allocation2 + $0x85] sm:$0x7f]  ;;  %v552_v63 = vadd.f32 %v545_v58, %v513_v14  ;;  %v4553_v40 = vld [vmem:[%s5989_s1 + $0x3c] ss:$0 sm:$0xff]  ;;  %v4560_v32 = vld [vmem:[#allocation2 + $0x91] sm:$0x7f] }
  0xda   : > { %v2274_v47 = vmul.f32 0.16666667, %v2267_v53  ;;  %v2067_v23 = vadd.f32 %v6579_v31, %v2048_v11  ;;  %v4557_v25 = vmul.f32 %v4553_v40, %v4261_v46  ;;  %6581 = vst [vmem:[#allocation29_spill] sm:$0xff] %v4560_v32  ;;  %v623_v14 = vmul.f32 %v4560_v32, %v4079_v34  ;;  %v6582_v58 = vld [vmem:[#allocation55_spill] sm:$0xff] }
  0xdb   : > { %6578 = vst [vmem:[#allocation97_spill] sm:$0xff] %v4525_v17  ;;  %v4544_v17 = vld [vmem:[%s5989_s1 + $0x34] ss:$0 sm:$0xff]  ;;  %v1657_v11 = vadd.f32 %v4360_v18, %v1417_v55  ;;  %v1026_v7 = vadd.f32 %v1019_v26, %v988_v61  ;;  %v591_v0 = vadd.f32 %v584_v3, %v552_v63  ;;  %v4569_v31 = vld [vmem:[%s5989_s1 + $0x44] ss:$0 sm:$0xff]  ;;  %v906_v3 = vmul.f32 %v4089_v9, %v3656_v8 }
  0xdc   : > { %v4548_v45 = vmul.f32 %v4544_v17, %v4168_v54  ;;  %6580 = vst [vmem:[#allocation48_spill] sm:$0xff] %v4557_v25  ;;  %2644 = vst [vmem:[%s3799_s29 + $0x28] sm:$0x7f] %v2274_v47  ;;  %v2086_v53 = vadd.f32 %v6582_v58, %v2067_v23  ;;  %v4573_v43 = vmul.f32 %v4569_v31, %v4386_v35  ;;  %v4578_v18 = vld [vmem:[%s5989_s1 + $0x4c] ss:$0 sm:$0xff] }
  0xdd   : > { %v4582_v34 = vmul.f32 %v4578_v18, %v4536_v2  ;;  %v4584_v26 = vld [vmem:[#allocation2 + $0x52] sm:$0x7f]  ;;  %v1695_v55 = vadd.f32 %v4364_v27, %v1657_v11  ;;  %v1266_v61 = vadd.f32 %v4438_v4, %v1026_v7  ;;  %v630_v63 = vadd.f32 %v623_v14, %v591_v0  ;;  %v6586_v47 = vld [vmem:[#allocation80_spill] sm:$0xff] }
  0xde   : > { %6583 = vst [vmem:[#allocation8_spill] sm:$0xff] %v4573_v43  ;;  %6585 = vst [vmem:[#allocation43_spill] sm:$0xff] %v4584_v26  ;;  %v868_v23 = vmul.f32 %v4584_v26, %v4203_v19  ;;  %v2105_v58 = vadd.f32 %v6586_v47, %v2086_v53  ;;  %v944_v32 = vmul.f32 %v4323_v42, %v4312_v6  ;;  %v6587_v43 = vld [vmem:[#allocation98_spill] sm:$0xff] }
  0xdf   : > { %6584 = vst [vmem:[#allocation51_spill] sm:$0xff] %v4582_v34  ;;  %v982_v34 = vmul.f32 %v6561_v60, %v6562_v57  ;;  %v1020_v25 = vmul.f32 %v6563_v50, %v6587_v43  ;;  %v1733_v26 = vadd.f32 %v4368_v24, %v1695_v55  ;;  %v1304_v27 = vadd.f32 %v4444_v49, %v1266_v61  ;;  %v4601_v11 = vld [vmem:[#allocation2 + $0x53] sm:$0x7f]  ;;  %v6589_v55 = vld [vmem:[#allocation108_spill] sm:$0xff] }
  0xe0   : > { %v875_v4 = vadd.f32 %v868_v23, %v630_v63  ;;  %6588 = vst [vmem:[#allocation81_spill] sm:$0xff] %v4601_v11  ;;  %v1260_v7 = vmul.f32 %v4601_v11, %v4221_v22  ;;  %v2254_v0 = vadd.f32 %v6568_v10, %v2105_v58  ;;  %v1298_v14 = vmul.f32 %v4104_v16, %v6523_v5  ;;  %v4620_v58 = vld [vmem:[#allocation2 + $0x54] sm:$0x7f] }
  0xe1   : > { %v1336_v53 = vmul.f32 %v4343_v21, %v6548_v51  ;;  %v4612_v47 = vmul.f32 %v4453_v12, %v6567_v56  ;;  %v1771_v24 = vadd.f32 %v4380_v41, %v1733_v26  ;;  %v1342_v49 = vadd.f32 %v4448_v15, %v1304_v27  ;;  %6590 = vst [vmem:[#allocation57_spill] sm:$0xff] %v4620_v58 }
  0xe2   : > { %v913_v23 = vadd.f32 %v906_v3, %v875_v4  ;;  %v4618_v61 = vmul.f32 %v4462_v48, %v6589_v55  ;;  %v2261_v63 = vmax.f32 %v2254_v0, 0.0  ;;  %v4624_v5 = vmul.f32 %v4620_v58, %v4475_v36  ;;  %v6593_v58 = vld [vmem:[#allocation58_spill] sm:$0xff] }
  0xe3   : > { %v4628_v11 = vmul.f32 %v4484_v38, %v6528_v20  ;;  %v869_v41 = vmul.f32 %v4203_v19, %v3656_v8  ;;  %v1809_v15 = vadd.f32 %v4384_v33, %v1771_v24  ;;  %v1380_v26 = vadd.f32 %v4457_v29, %v1342_v49 }
  0xe4   : > { %v951_v3 = vadd.f32 %v944_v32, %v913_v23  ;;  %v4636_v27 = vmul.f32 %v4499_v28, %v6552_v59  ;;  %v2268_v4 = vmin.f32 %v2261_v63, 6.0  ;;  %v4640_v0 = vmul.f32 %v4508_v13, %v6577_v37  ;;  %v6594_v32 = vld [vmem:[#allocation21_spill] sm:$0xff] }
  0xe5   : > { %6591 = vst [vmem:[#allocation46_spill] sm:$0xff] %v4628_v11  ;;  %v876_v11 = vadd.f32 %v869_v41, %v6593_v58  ;;  %v907_v8 = vmul.f32 %v4323_v42, %v4089_v9  ;;  %v2030_v19 = vadd.f32 %v4390_v30, %v1809_v15  ;;  %v1418_v33 = vadd.f32 %v4466_v62, %v1380_v26  ;;  %v2012_v23 = vld [vmem:[#allocation2 + $0x95] sm:$0x7f]  ;;  %v6595_v9 = vld [vmem:[#allocation15_spill] sm:$0xff]  ;;  %v6596_v30 = vld [vmem:[#allocation104_spill] sm:$0xff] }
  0xe6   : > { %6592 = vst [vmem:[#allocation37_spill] sm:$0xff] %v4640_v0  ;;  %v989_v29 = vadd.f32 %v982_v34, %v951_v3  ;;  %v4649_v24 = vmul.f32 %v4521_v44, %v6594_v32  ;;  %v2275_v49 = vmul.f32 0.16666667, %v2268_v4  ;;  %v4653_v63 = vmul.f32 %v4530_v39, %v4168_v54  ;;  %v6630_v42 = vld [vmem:[#allocation92_spill] sm:$0xff] }
  0xe7   : > { %v914_v0 = vadd.f32 %v907_v8, %v876_v11  ;;  %v945_v58 = vmul.f32 %v4312_v6, %v6562_v57  ;;  %v2049_v41 = vadd.f32 %v6595_v9, %v2030_v19  ;;  %v1658_v15 = vadd.f32 %v6596_v30, %v1418_v33  ;;  %v6597_v57 = vld [vmem:[#allocation82_spill] sm:$0xff]  ;;  %v4683_v9 = vld [vmem:[#allocation2 + $0x63] sm:$0x7f] }
  0xe8   : > { %v1027_v62 = vadd.f32 %v1020_v25, %v989_v29  ;;  %v4661_v34 = vmul.f32 %v4544_v17, %v4261_v46  ;;  %2645 = vst [vmem:[%s3799_s29 + $0x48] sm:$0x7f] %v2275_v49  ;;  %v4666_v26 = vmul.f32 %v4553_v40, %v4386_v35  ;;  %v4670_v54 = vmul.f32 %v4569_v31, %v4536_v2  ;;  %v6598_v25 = vld [vmem:[#allocation16_spill] sm:$0xff] }
  0xe9   : > { %v952_v11 = vadd.f32 %v945_v58, %v914_v0  ;;  %v983_v6 = vmul.f32 %v6561_v60, %v6587_v43  ;;  %v2068_v3 = vadd.f32 %v6597_v57, %v2049_v41  ;;  %v1696_v4 = vadd.f32 %v6598_v25, %v1658_v15  ;;  %v4679_v29 = vld [vmem:[#allocation2 + $0xa2] sm:$0x7f]  ;;  %6600 = vst [vmem:[#allocation62_spill] sm:$0xff] %v4683_v9 }
  0xea   : > { %v1267_v8 = vadd.f32 %v1260_v7, %v1027_v62  ;;  %v4677_v19 = vmul.f32 %v4578_v18, %v2012_v23  ;;  %6599 = vst [vmem:[#allocation22_spill] sm:$0xff] %v4679_v29  ;;  %v1021_v49 = vmul.f32 %v4679_v29, %v6563_v50  ;;  %v1261_v0 = vmul.f32 %v4683_v9, %v4221_v22  ;;  %v6601_v60 = vld [vmem:[#allocation87_spill] sm:$0xff]  ;;  %v6602_v7 = vld [vmem:[#allocation38_spill] sm:$0xff]  ;;  %v6608_v25 = vld [vmem:[#allocation24_spill] sm:$0xff] }
  0xeb   : > { %v990_v33 = vadd.f32 %v983_v6, %v952_v11  ;;  %v1299_v43 = vmul.f32 %v4104_v16, %v6548_v51  ;;  %v2087_v58 = vadd.f32 %v6601_v60, %v2068_v3  ;;  %v1734_v41 = vadd.f32 %v6602_v7, %v1696_v4  ;;  %v6603_v11 = vld [vmem:[#allocation99_spill] sm:$0xff]  ;;  %v6604_v16 = vld [vmem:[#allocation53_spill] sm:$0xff] }
  0xec   : > { %v1305_v30 = vadd.f32 %v1298_v14, %v1267_v8  ;;  %v1337_v15 = vmul.f32 %v4343_v21, %v6567_v56  ;;  %v1375_v50 = vmul.f32 %v4453_v12, %v6589_v55  ;;  %v1413_v6 = vmul.f32 %v4462_v48, %v6603_v11  ;;  %v6606_v56 = vld [vmem:[#allocation97_spill] sm:$0xff]  ;;  %v2013_v55 = vld [vmem:[#allocation2 + $0xa5] sm:$0x7f] }
  0xed   : > { %v1028_v62 = vadd.f32 %v1021_v49, %v990_v33  ;;  %v4699_v22 = vmul.f32 %v4475_v36, %v6528_v20  ;;  %v2106_v51 = vadd.f32 %v6604_v16, %v2087_v58  ;;  %v1772_v57 = vadd.f32 %v4512_v52, %v1734_v41  ;;  %v4718_v20 = vld [vmem:[%s5989_s1 + $0x68] ss:$0 sm:$0xff]  ;;  %v4720_v36 = vld [vmem:[#allocation2 + $0x40] sm:$0x7f]  ;;  %v4741_v8 = vld [vmem:[#allocation2 + $0x50] sm:$0x7f] }
  0xee   : > { %v1343_v3 = vadd.f32 %v1336_v53, %v1305_v30  ;;  %v4705_v14 = vmul.f32 %v4484_v38, %v6552_v59  ;;  %v4709_v12 = vmul.f32 %v4499_v28, %v6577_v37  ;;  %v4713_v48 = vmul.f32 %v4508_v13, %v6594_v32  ;;  %6605 = vst [vmem:[#allocation67_spill] sm:$0xff] %v4718_v20  ;;  %v6607_v37 = vld [vmem:[#allocation39_spill] sm:$0xff]  ;;  %v4790_v30 = vld [vmem:[%s5989_s1 + $0x5a] ss:$0 sm:$0xff]  ;;  %v6636_v9 = vld [vmem:[#allocation81_spill] sm:$0xff] }
  0xef   : > { %v1268_v21 = vadd.f32 %v1261_v0, %v1028_v62  ;;  %v391_v38 = vmul.f32 %v4720_v36, %v4718_v20  ;;  %v2255_v59 = vadd.f32 %v6568_v10, %v2106_v51  ;;  %v1810_v52 = vadd.f32 %v6606_v56, %v1772_v57  ;;  %v4739_v10 = vld [vmem:[%s5989_s1 + $0x70] ss:$0 sm:$0xff]  ;;  %v6614_v16 = vld [vmem:[#allocation46_spill] sm:$0xff]  ;;  %v4802_v57 = vld [vmem:[%s5989_s1 + $0x69] ss:$0 sm:$0xff] }
  0xf0   : > { %v1381_v28 = vadd.f32 %v4612_v47, %v1343_v3  ;;  %v4729_v13 = vmul.f32 %v4521_v44, %v6607_v37  ;;  %v4733_v32 = vmul.f32 %v4530_v39, %v4261_v46  ;;  %v411_v47 = vmul.f32 %v4741_v8, %v4739_v10  ;;  %v6615_v3 = vld [vmem:[#allocation19_spill] sm:$0xff]  ;;  %v6616_v37 = vld [vmem:[#allocation32_spill] sm:$0xff] }
  0xf1   : > { %v1306_v53 = vadd.f32 %v1299_v43, %v1268_v21  ;;  %v398_v4 = vadd.f32 %v391_v38, %v6608_v25  ;;  %v2262_v44 = vmax.f32 %v2255_v59, 0.0  ;;  %v2031_v33 = vadd.f32 %v4533_v1, %v1810_v52  ;;  %v4809_v38 = vld [vmem:[%s5989_s1 + $0x6a] ss:$0 sm:$0xff]  ;;  %v4814_v59 = vld [vmem:[%s5989_s1 + $0x72] ss:$0 sm:$0xff] }
  0xf2   : > { %v1419_v49 = vadd.f32 %v4618_v61, %v1381_v28  ;;  %v4749_v46 = vmul.f32 %v4544_v17, %v4386_v35  ;;  %v4753_v0 = vmul.f32 %v4553_v40, %v4536_v2  ;;  %v4756_v43 = vmul.f32 %v4569_v31, %v2012_v23  ;;  %v4766_v35 = vld [vmem:[%s5989_s1 + $0x52] ss:$0 sm:$0xff]  ;;  %v4772_v31 = vld [vmem:[%s5989_s1 + $0x59] ss:$0 sm:$0xff]  ;;  %v4774_v23 = vld [vmem:[#allocation2 + $0x21] sm:$0x7f] }
  0xf3   : > { %v1344_v39 = vadd.f32 %v1337_v15, %v1306_v53  ;;  %v418_v60 = vadd.f32 %v411_v47, %v398_v4  ;;  %v2269_v58 = vmin.f32 %v2262_v44, 6.0  ;;  %v2050_v7 = vadd.f32 %v4548_v45, %v2031_v33  ;;  %v6610_v2 = vld [vmem:[#allocation9_spill] sm:$0xff]  ;;  %6611 = vst [vmem:[#allocation69_spill] sm:$0xff] %v4774_v23  ;;  %v4795_v15 = vld [vmem:[%s5989_s1 + $0x62] ss:$0 sm:$0xff]  ;;  %v6618_v47 = vld [vmem:[#allocation8_spill] sm:$0xff] }
  0xf4   : > { %v1659_v1 = vadd.f32 %v4624_v5, %v1419_v49  ;;  %v4761_v61 = vmul.f32 %v4578_v18, %v2013_v55  ;;  %v676_v45 = vmul.f32 %v4774_v23, %v4772_v31  ;;  %v4781_v18 = vld [vmem:[%s5989_s1 + $0x61] ss:$0 sm:$0xff]  ;;  %v4783_v5 = vld [vmem:[#allocation2 + $0x31] sm:$0x7f]  ;;  %v754_v21 = vmul.f32 %v4802_v57, %v6615_v3  ;;  %v4840_v49 = vld [vmem:[#allocation2 + $0x22] sm:$0x7f] }
  0xf5   : > { %v1382_v17 = vadd.f32 %v1375_v50, %v1344_v39  ;;  %v644_v40 = vadd.f32 %v6610_v2, %v418_v60  ;;  %6612 = vst [vmem:[#allocation61_spill] sm:$0xff] %v4783_v5  ;;  %v715_v41 = vmul.f32 %v4783_v5, %v4781_v18  ;;  %v2276_v62 = vmul.f32 0.16666667, %v2269_v58  ;;  %v6613_v50 = vld [vmem:[#allocation48_spill] sm:$0xff]  ;;  %v4819_v28 = vld [vmem:[%s5989_s1 + $0x71] ss:$0 sm:$0xff] }
  0xf6   : > { %6609 = vst [vmem:[#allocation59_spill] sm:$0xff] %v4761_v61  ;;  %v2069_v11 = vadd.f32 %v6613_v50, %v2050_v7  ;;  %v1697_v51 = vadd.f32 %v6614_v16, %v1659_v1  ;;  %v793_v53 = vmul.f32 %v4819_v28, %v6616_v37  ;;  %v4823_v55 = vld [vmem:[#allocation2 + $0x12] sm:$0x7f]  ;;  %6619 = vst [vmem:[#allocation63_spill] sm:$0xff] %v4840_v49  ;;  %v4851_v7 = vld [vmem:[%s5989_s1 + $0x63] ss:$0 sm:$0xff] }
  0xf7   : > { %v1420_v56 = vadd.f32 %v1413_v6, %v1382_v17  ;;  %v683_v52 = vadd.f32 %v676_v45, %v644_v40  ;;  %6617 = vst [vmem:[#allocation66_spill] sm:$0xff] %v4823_v55  ;;  %v1034_v25 = vmul.f32 %v4823_v55, %v4766_v35  ;;  %v4830_v4 = vld [vmem:[%s5989_s1 + $0x53] ss:$0 sm:$0xff]  ;;  %v4835_v6 = vld [vmem:[%s5989_s1 + $0x5b] ss:$0 sm:$0xff]  ;;  %v1072_v39 = vmul.f32 %v4840_v49, %v4790_v30  ;;  %v6623_v40 = vld [vmem:[#allocation43_spill] sm:$0xff] }
  0xf8   : > { %2646 = vst [vmem:[%s3799_s29 + $0x68] sm:$0x7f] %v2276_v62  ;;  %v2088_v44 = vadd.f32 %v6618_v47, %v2069_v11  ;;  %v1735_v33 = vadd.f32 %v4636_v27, %v1697_v51  ;;  %v4844_v60 = vld [vmem:[#allocation2 + $0x32] sm:$0x7f]  ;;  %6621 = vst [vmem:[#allocation71_spill] sm:$0xff] %v4851_v7  ;;  %v4860_v45 = vmul.f32 %v6623_v40, %v4814_v59 }
  0xf9   : > { %6620 = vst [vmem:[#allocation68_spill] sm:$0xff] %v4844_v60  ;;  %v1110_v58 = vmul.f32 %v4844_v60, %v4795_v15  ;;  %v1660_v1 = vadd.f32 %v4699_v22, %v1420_v56  ;;  %v722_v17 = vadd.f32 %v715_v41, %v683_v52  ;;  %v6622_v27 = vld [vmem:[#allocation45_spill] sm:$0xff]  ;;  %v4865_v62 = vld [vmem:[%s5989_s1 + $0x6b] ss:$0 sm:$0xff]  ;;  %v6625_v22 = vld [vmem:[#allocation51_spill] sm:$0xff] }
  0xfa   : > { %v4856_v2 = vmul.f32 %v6622_v27, %v4809_v38  ;;  %v4870_v50 = vld [vmem:[%s5989_s1 + $0x73] ss:$0 sm:$0xff]  ;;  %v2107_v41 = vadd.f32 %v6625_v22, %v2088_v44  ;;  %v4880_v52 = vld [vmem:[#allocation2 + $0x23] sm:$0x7f]  ;;  %v4889_v44 = vmul.f32 %v6630_v42, %v4851_v7  ;;  %v4899_v22 = vld [vmem:[%s5989_s1 + $0x5c] ss:$0 sm:$0xff] }
  0xfb   : > { %6624 = vst [vmem:[#allocation12_spill] sm:$0xff] %v4870_v50  ;;  %v6626_v11 = vld [vmem:[#allocation37_spill] sm:$0xff]  ;;  %6628 = vst [vmem:[#allocation73_spill] sm:$0xff] %v4880_v52  ;;  %v4884_v47 = vmul.f32 %v4880_v52, %v4835_v6  ;;  %v1698_v55 = vadd.f32 %v4705_v14, %v1660_v1  ;;  %v761_v29 = vadd.f32 %v754_v21, %v722_v17  ;;  %v4911_v21 = vld [vmem:[%s5990_s2] ss:$0 sm:$0xff] }
  0xfc   : > { %v1773_v16 = vadd.f32 %v6626_v11, %v1735_v33  ;;  %v4874_v51 = vld [vmem:[#allocation2 + $0x13] sm:$0x7f]  ;;  %6631 = vst [vmem:[#allocation78_spill] sm:$0xff] %v4889_v44  ;;  %v4904_v11 = vld [vmem:[%s5989_s1 + $0x60] ss:$0 sm:$0xff]  ;;  %v2256_v1 = vadd.f32 %v4911_v21, %v2107_v41 }
  0xfd   : > { %6627 = vst [vmem:[#allocation72_spill] sm:$0xff] %v4874_v51  ;;  %v4878_v56 = vmul.f32 %v4874_v51, %v4830_v4  ;;  %6629 = vst [vmem:[#allocation75_spill] sm:$0xff] %v4884_v47  ;;  %v4894_v33 = vld [vmem:[%s5989_s1 + $0x54] ss:$0 sm:$0xff]  ;;  %v372_v14 = vmul.f32 %v4904_v11, %v4720_v36  ;;  %v4921_v47 = vmul.f32 %v6636_v9, %v4870_v50  ;;  %v4927_v7 = vld [vmem:[%s5989_s1 + $0x64] ss:$0 sm:$0xff] }
  0xfe   : > { %6632 = vst [vmem:[#allocation79_spill] sm:$0xff] %v4894_v33  ;;  %6633 = vst [vmem:[#allocation76_spill] sm:$0xff] %v4904_v11  ;;  %v1811_v17 = vadd.f32 %v4649_v24, %v1773_v16  ;;  %v6634_v51 = vld [vmem:[#allocation65_spill] sm:$0xff]  ;;  %v1736_v61 = vadd.f32 %v4709_v12, %v1698_v55  ;;  %v800_v36 = vadd.f32 %v793_v53, %v761_v29  ;;  %v4932_v24 = vld [vmem:[%s5989_s1 + $0x6c] ss:$0 sm:$0xff]  ;;  %v2263_v50 = vmax.f32 %v2256_v1, 0.0 }
  0xff   : > { %v4917_v44 = vmul.f32 %v6634_v51, %v4865_v62  ;;  %6637 = vst [vmem:[#allocation77_spill] sm:$0xff] %v4921_v47  ;;  %6638 = vst [vmem:[#allocation85_spill] sm:$0xff] %v4927_v7  ;;  %v6639_v41 = vld [vmem:[#allocation23_spill] sm:$0xff]  ;;  %v4938_v12 = vld [vmem:[#allocation2 + $0x14] sm:$0x7f] }
 0x100   : > { %v379_v16 = vadd.f32 %v372_v14, %v6639_v41  ;;  %v2032_v47 = vadd.f32 %v4653_v63, %v1811_v17  ;;  %6640 = vst [vmem:[#allocation90_spill] sm:$0xff] %v4938_v12  ;;  %v4942_v29 = vmul.f32 %v4938_v12, %v4894_v33  ;;  %v4944_v53 = vld [vmem:[#allocation2 + $0x24] sm:$0x7f]  ;;  %v1774_v14 = vadd.f32 %v4713_v48, %v1736_v61  ;;  %v4954_v1 = vld [vmem:[%s5989_s1 + $0x74] ss:$0 sm:$0xff] }
 0x101   : > { %6635 = vst [vmem:[#allocation84_spill] sm:$0xff] %v4917_v44  ;;  %v392_v44 = vmul.f32 %v4741_v8, %v4718_v20  ;;  %6642 = vst [vmem:[#allocation95_spill] sm:$0xff] %v4944_v53  ;;  %v4948_v55 = vmul.f32 %v4944_v53, %v4899_v22  ;;  %v1041_v41 = vadd.f32 %v1034_v25, %v800_v36  ;;  %v4956_v17 = vld [vmem:[#allocation2 + $0x60] sm:$0x7f]  ;;  %v4961_v20 = vld [vmem:[#allocation2 + $0x34] sm:$0x7f] }
 0x102   : > { %6641 = vst [vmem:[#allocation94_spill] sm:$0xff] %v4942_v29  ;;  %v412_v12 = vmul.f32 %v4956_v17, %v4739_v10  ;;  %v2270_v29 = vmin.f32 %v2263_v50, 6.0  ;;  %v2051_v33 = vadd.f32 %v4661_v34, %v2032_v47  ;;  %6644 = vst [vmem:[#allocation100_spill] sm:$0xff] %v4961_v20  ;;  %v4965_v48 = vmul.f32 %v4961_v20, %v4927_v7  ;;  %v6646_v61 = vld [vmem:[#allocation93_spill] sm:$0xff] }
 0x103   : > { %6643 = vst [vmem:[#allocation102_spill] sm:$0xff] %v4948_v55  ;;  %v399_v63 = vadd.f32 %v392_v44, %v379_v16  ;;  %v4969_v25 = vmul.f32 %v6646_v61, %v4932_v24  ;;  %v1812_v44 = vadd.f32 %v4729_v13, %v1774_v14  ;;  %v1079_v36 = vadd.f32 %v1072_v39, %v1041_v41  ;;  %v4975_v50 = vld [vmem:[%s5989_s1 + $0x51] ss:$0 sm:$0xff] }
 0x104   : > { %6645 = vst [vmem:[#allocation101_spill] sm:$0xff] %v4965_v48  ;;  %v638_v34 = vmul.f32 %v4975_v50, %v4774_v23  ;;  %v2277_v47 = vmul.f32 0.16666667, %v2270_v29  ;;  %v2070_v55 = vadd.f32 %v4666_v26, %v2051_v33  ;;  %v6648_v48 = vld [vmem:[#allocation57_spill] sm:$0xff]  ;;  %v677_v13 = vmul.f32 %v4783_v5, %v4772_v31  ;;  %v6650_v33 = vld [vmem:[#allocation4_spill] sm:$0xff] }
 0x105   : > { %6647 = vst [vmem:[#allocation106_spill] sm:$0xff] %v4969_v25  ;;  %v419_v16 = vadd.f32 %v412_v12, %v399_v63  ;;  %v4982_v7 = vmul.f32 %v6648_v48, %v4954_v1  ;;  %v2033_v39 = vadd.f32 %v4733_v32, %v1812_v44  ;;  %v1117_v12 = vadd.f32 %v1110_v58, %v1079_v36 }
 0x106   : > { %v716_v41 = vmul.f32 %v4781_v18, %v6615_v3  ;;  %2647 = vst [vmem:[%s3799_s29 + $0x88] sm:$0x7f] %v2277_v47  ;;  %v2089_v63 = vadd.f32 %v4670_v54, %v2070_v55  ;;  %v755_v26 = vmul.f32 %v4802_v57, %v6616_v37  ;;  %v794_v29 = vmul.f32 %v4819_v28, %v6650_v33 }
 0x107   : > { %6649 = vst [vmem:[#allocation107_spill] sm:$0xff] %v4982_v7  ;;  %v645_v14 = vadd.f32 %v638_v34, %v419_v16  ;;  %v1035_v23 = vmul.f32 %v4840_v49, %v4766_v35  ;;  %v2052_v7 = vadd.f32 %v4749_v46, %v2033_v39  ;;  %v1155_v32 = vadd.f32 %v4856_v2, %v1117_v12  ;;  %v5006_v16 = vld [vmem:[#allocation2 + $0x62] sm:$0x7f]  ;;  %v6653_v12 = vld [vmem:[#allocation34_spill] sm:$0xff] }
 0x108   : > { %v1073_v44 = vmul.f32 %v4844_v60, %v4790_v30  ;;  %v2108_v36 = vadd.f32 %v4677_v19, %v2089_v63  ;;  %v1111_v54 = vmul.f32 %v6622_v27, %v4795_v15  ;;  %v1149_v55 = vmul.f32 %v6623_v40, %v4809_v38  ;;  %6651 = vst [vmem:[#allocation30_spill] sm:$0xff] %v5006_v16 }
 0x109   : > { %v684_v58 = vadd.f32 %v677_v13, %v645_v14  ;;  %v1187_v34 = vmul.f32 %v5006_v16, %v4814_v59  ;;  %v2071_v46 = vadd.f32 %v4753_v0, %v2052_v7  ;;  %v1193_v2 = vadd.f32 %v4860_v45, %v1155_v32  ;;  %v6654_v14 = vld [vmem:[#allocation42_spill] sm:$0xff] }
 0x10a   : > { %v5014_v13 = vmul.f32 %v4880_v52, %v4830_v4  ;;  %v2257_v19 = vadd.f32 %v4911_v21, %v2108_v36  ;;  %v5019_v39 = vmul.f32 %v6630_v42, %v4835_v6  ;;  %v360_v63 = vadd.f32 %v6654_v14, %v6653_v12  ;;  %v6659_v14 = vld [vmem:[#allocation59_spill] sm:$0xff] }
 0x10b   : > { %v723_v47 = vadd.f32 %v716_v41, %v684_v58  ;;  %v373_v49 = vmul.f32 %v4904_v11, %v4741_v8  ;;  %v2090_v0 = vadd.f32 %v4756_v43, %v2071_v46  ;;  %v1433_v7 = vadd.f32 %v4878_v56, %v1193_v2  ;;  %v6655_v41 = vld [vmem:[#allocation71_spill] sm:$0xff]  ;;  %v6661_v56 = vld [vmem:[#allocation12_spill] sm:$0xff] }
 0x10c   : > { %6652 = vst [vmem:[#allocation88_spill] sm:$0xff] %v5019_v39  ;;  %v5029_v32 = vmul.f32 %v6634_v51, %v6655_v41  ;;  %v2264_v58 = vmax.f32 %v2257_v19, 0.0  ;;  %v5033_v36 = vmul.f32 %v6636_v9, %v4865_v62  ;;  %v6658_v39 = vld [vmem:[#allocation67_spill] sm:$0xff] }
 0x10d   : > { %v762_v45 = vadd.f32 %v755_v26, %v723_v47  ;;  %v380_v52 = vadd.f32 %v373_v49, %v360_v63  ;;  %v393_v12 = vmul.f32 %v4956_v17, %v6658_v39  ;;  %v2109_v25 = vadd.f32 %v6659_v14, %v2090_v0  ;;  %v6660_v11 = vld [vmem:[#allocation75_spill] sm:$0xff]  ;;  %v6662_v26 = vld [vmem:[#allocation62_spill] sm:$0xff]  ;;  %v2746_v49 = vld [vmem:[#allocation2 + $0x70] sm:$0x7f] }
 0x10e   : > { %6656 = vst [vmem:[#allocation33_spill] sm:$0xff] %v5029_v32  ;;  %6657 = vst [vmem:[#allocation6_spill] sm:$0xff] %v5033_v36  ;;  %v1471_v43 = vadd.f32 %v6660_v11, %v1433_v7  ;;  %v5041_v2 = vmul.f32 %v6662_v26, %v6661_v56  ;;  %v2271_v47 = vmin.f32 %v2264_v58, 6.0  ;;  %v6663_v32 = vld [vmem:[#allocation79_spill] sm:$0xff]  ;;  %v413_v63 = vmul.f32 %v2746_v49, %v4739_v10  ;;  %v6665_v0 = vld [vmem:[#allocation78_spill] sm:$0xff] }
 0x10f   : > { %v801_v46 = vadd.f32 %v794_v29, %v762_v45  ;;  %v5045_v19 = vmul.f32 %v4944_v53, %v6663_v32  ;;  %v400_v36 = vadd.f32 %v393_v12, %v380_v52  ;;  %v2258_v39 = vadd.f32 %v4911_v21, %v2109_v25  ;;  %v6667_v45 = vld [vmem:[#allocation85_spill] sm:$0xff]  ;;  %v6669_v10 = vld [vmem:[#allocation84_spill] sm:$0xff] }
 0x110   : > { %v1509_v14 = vadd.f32 %v6665_v0, %v1471_v43  ;;  %v5052_v29 = vmul.f32 %v4961_v20, %v4899_v22  ;;  %v2278_v7 = vmul.f32 0.16666667, %v2271_v47  ;;  %v5056_v58 = vmul.f32 %v6646_v61, %v6667_v45  ;;  %v5066_v43 = vld [vmem:[#allocation2 + $0x64] sm:$0x7f] }
 0x111   : > { %6664 = vst [vmem:[#allocation89_spill] sm:$0xff] %v5045_v19  ;;  %v1042_v11 = vadd.f32 %v1035_v23, %v801_v46  ;;  %v420_v53 = vadd.f32 %v413_v63, %v400_v36  ;;  %v639_v52 = vmul.f32 %v4975_v50, %v4783_v5  ;;  %v2265_v12 = vmax.f32 %v2258_v39, 0.0 }
 0x112   : > { %6666 = vst [vmem:[#allocation27_spill] sm:$0xff] %v5052_v29  ;;  %6668 = vst [vmem:[#allocation28_spill] sm:$0xff] %v5056_v58  ;;  %v1547_v19 = vadd.f32 %v6669_v10, %v1509_v14  ;;  %v5063_v23 = vmul.f32 %v6648_v48, %v4932_v24  ;;  %v5070_v46 = vmul.f32 %v5066_v43, %v4954_v1  ;;  %v6673_v10 = vld [vmem:[#allocation44_spill] sm:$0xff] }
 0x113   : > { %v1080_v25 = vadd.f32 %v1073_v44, %v1042_v11  ;;  %2648 = vst [vmem:[%s3799_s29 + $0xa8] sm:$0x7f] %v2278_v7  ;;  %v646_v47 = vadd.f32 %v639_v52, %v420_v53  ;;  %v678_v36 = vmul.f32 %v4772_v31, %v6615_v3  ;;  %v717_v39 = vmul.f32 %v4781_v18, %v6616_v37  ;;  %v6672_v44 = vld [vmem:[#allocation77_spill] sm:$0xff] }
 0x114   : > { %6670 = vst [vmem:[#allocation35_spill] sm:$0xff] %v5063_v23  ;;  %6671 = vst [vmem:[#allocation96_spill] sm:$0xff] %v5070_v46  ;;  %v2272_v63 = vmin.f32 %v2265_v12, 6.0  ;;  %v1585_v0 = vadd.f32 %v6672_v44, %v1547_v19  ;;  %v756_v11 = vmul.f32 %v4802_v57, %v6650_v33  ;;  %v795_v5 = vmul.f32 %v4819_v28, %v6673_v10  ;;  %v6674_v23 = vld [vmem:[#allocation94_spill] sm:$0xff] }
 0x115   : > { %v1118_v14 = vadd.f32 %v1111_v54, %v1080_v25  ;;  %v685_v7 = vadd.f32 %v678_v36, %v646_v47  ;;  %v1036_v53 = vmul.f32 %v4844_v60, %v4766_v35  ;;  %v1074_v52 = vmul.f32 %v6622_v27, %v4790_v30  ;;  %v6675_v47 = vld [vmem:[#allocation13_spill] sm:$0xff]  ;;  %v6676_v60 = vld [vmem:[#allocation102_spill] sm:$0xff] }
 0x116   : > { %v2279_v46 = vmul.f32 0.16666667, %v2272_v63  ;;  %v1825_v12 = vadd.f32 %v6674_v23, %v1585_v0  ;;  %v1112_v54 = vmul.f32 %v6623_v40, %v4795_v15  ;;  %v1150_v25 = vmul.f32 %v5006_v16, %v4809_v38  ;;  %v2748_v23 = vld [vmem:[%s5989_s1 + $0x58] ss:$0 sm:$0xff] }
 0x117   : > { %v1156_v58 = vadd.f32 %v1149_v55, %v1118_v14  ;;  %v724_v19 = vadd.f32 %v717_v39, %v685_v7  ;;  %v1188_v36 = vmul.f32 %v6675_v47, %v4814_v59  ;;  %v5094_v44 = vmul.f32 %v6630_v42, %v4830_v4 }
 0x118   : > { %2649 = vst [vmem:[%s3799_s29 + $0xc8] sm:$0x7f] %v2279_v46  ;;  %v1863_v63 = vadd.f32 %v6676_v60, %v1825_v12  ;;  %v5100_v55 = vmul.f32 %v6634_v51, %v4835_v6  ;;  %v354_v39 = vmul.f32 %v2748_v23, %v4741_v8  ;;  %v5108_v14 = vmul.f32 %v6636_v9, %v6655_v41  ;;  %v5114_v60 = vld [vmem:[#allocation2 + $0x73] sm:$0x7f]  ;;  %v6683_v12 = vld [vmem:[#allocation76_spill] sm:$0xff] }
 0x119   : > { %v1194_v29 = vadd.f32 %v1187_v34, %v1156_v58  ;;  %v763_v0 = vadd.f32 %v756_v11, %v724_v19  ;;  %v5112_v42 = vmul.f32 %v6662_v26, %v4865_v62  ;;  %6679 = vst [vmem:[#allocation47_spill] sm:$0xff] %v5114_v60  ;;  %v5118_v34 = vmul.f32 %v5114_v60, %v6661_v56  ;;  %v6681_v58 = vld [vmem:[#allocation101_spill] sm:$0xff] }
 0x11a   : > { %6677 = vst [vmem:[#allocation105_spill] sm:$0xff] %v5108_v14  ;;  %v1901_v46 = vadd.f32 %v6681_v58, %v1863_v63  ;;  %v6682_v8 = vld [vmem:[#allocation41_spill] sm:$0xff]  ;;  %v374_v19 = vmul.f32 %v4956_v17, %v6683_v12  ;;  %v5127_v14 = vmul.f32 %v4961_v20, %v6663_v32  ;;  %v6685_v63 = vld [vmem:[#allocation106_spill] sm:$0xff] }
 0x11b   : > { %6678 = vst [vmem:[#allocation18_spill] sm:$0xff] %v5112_v42  ;;  %6680 = vst [vmem:[#allocation17_spill] sm:$0xff] %v5118_v34  ;;  %v1434_v7 = vadd.f32 %v5014_v13, %v1194_v29  ;;  %v361_v11 = vadd.f32 %v354_v39, %v6682_v8  ;;  %v802_v23 = vadd.f32 %v795_v5, %v763_v0  ;;  %v6686_v29 = vld [vmem:[#allocation88_spill] sm:$0xff]  ;;  %v6687_v8 = vld [vmem:[#allocation67_spill] sm:$0xff] }
 0x11c   : > { %v5131_v42 = vmul.f32 %v6646_v61, %v4899_v22  ;;  %v5135_v34 = vmul.f32 %v6648_v48, %v6667_v45  ;;  %v1939_v13 = vadd.f32 %v6685_v63, %v1901_v46  ;;  %v394_v17 = vmul.f32 %v2746_v49, %v6687_v8  ;;  %v5144_v12 = vld [vmem:[#allocation2 + $0x74] sm:$0x7f]  ;;  %v6691_v46 = vld [vmem:[#allocation107_spill] sm:$0xff] }
 0x11d   : > { %v1472_v39 = vadd.f32 %v6686_v29, %v1434_v7  ;;  %v381_v58 = vadd.f32 %v374_v19, %v361_v11  ;;  %v1043_v5 = vadd.f32 %v1036_v53, %v802_v23  ;;  %v5142_v0 = vmul.f32 %v5066_v43, %v4932_v24  ;;  %6689 = vst [vmem:[#allocation25_spill] sm:$0xff] %v5144_v12  ;;  %v6692_v7 = vld [vmem:[#allocation33_spill] sm:$0xff]  ;;  %v6693_v8 = vld [vmem:[#allocation103_spill] sm:$0xff] }
 0x11e   : > { %6684 = vst [vmem:[#allocation31_spill] sm:$0xff] %v5135_v34  ;;  %v5148_v20 = vmul.f32 %v5144_v12, %v4954_v1  ;;  %v640_v34 = vmul.f32 %v4975_v50, %v6615_v3  ;;  %v1977_v63 = vadd.f32 %v6691_v46, %v1939_v13  ;;  %v679_v49 = vmul.f32 %v4772_v31, %v6616_v37  ;;  %v6694_v50 = vld [vmem:[#allocation6_spill] sm:$0xff] }
 0x11f   : > { %6688 = vst [vmem:[#allocation3_spill] sm:$0xff] %v5142_v0  ;;  %v1510_v11 = vadd.f32 %v6692_v7, %v1472_v39  ;;  %v401_v19 = vadd.f32 %v394_v17, %v381_v58  ;;  %v1081_v53 = vadd.f32 %v1074_v52, %v1043_v5  ;;  %v718_v23 = vmul.f32 %v4781_v18, %v6650_v33  ;;  %v6695_v46 = vld [vmem:[#allocation50_spill] sm:$0xff] }
 0x120   : > { %6690 = vst [vmem:[#allocation40_spill] sm:$0xff] %v5148_v20  ;;  %v757_v29 = vmul.f32 %v4802_v57, %v6673_v10  ;;  %v796_v20 = vmul.f32 %v4819_v28, %v6693_v8  ;;  %v2294_v3 = vadd.f32 %v4911_v21, %v1977_v63  ;;  %v1037_v58 = vmul.f32 %v6622_v27, %v4766_v35 }
 0x121   : > { %v1548_v13 = vadd.f32 %v6694_v50, %v1510_v11  ;;  %v421_v39 = vadd.f32 %v6695_v46, %v401_v19  ;;  %v1119_v37 = vadd.f32 %v1112_v54, %v1081_v53  ;;  %v1075_v52 = vmul.f32 %v6623_v40, %v4790_v30  ;;  %v5178_v19 = vld [vmem:[#allocation2 + $0x82] sm:$0x7f] }
 0x122   : > { %v5171_v17 = vmul.f32 %v5006_v16, %v4795_v15  ;;  %v5175_v5 = vmul.f32 %v6675_v47, %v4809_v38  ;;  %v2301_v63 = vmax.f32 %v2294_v3, 0.0  ;;  %6696 = vst [vmem:[#allocation36_spill] sm:$0xff] %v5178_v19  ;;  %v5182_v27 = vmul.f32 %v5178_v19, %v4814_v59 }
 0x123   : > { %v1586_v7 = vadd.f32 %v5041_v2, %v1548_v13  ;;  %v647_v11 = vadd.f32 %v640_v34, %v421_v39  ;;  %v1157_v54 = vadd.f32 %v1150_v25, %v1119_v37  ;;  %v5186_v53 = vmul.f32 %v6634_v51, %v4830_v4  ;;  %v6698_v34 = vld [vmem:[#allocation89_spill] sm:$0xff]  ;;  %v6699_v37 = vld [vmem:[#allocation64_spill] sm:$0xff] }
 0x124   : > { %v5190_v50 = vmul.f32 %v6636_v9, %v4835_v6  ;;  %v680_v3 = vmul.f32 %v4772_v31, %v6650_v33  ;;  %v2308_v2 = vmin.f32 %v2301_v63, 6.0  ;;  %v5197_v39 = vmul.f32 %v6662_v26, %v6655_v41  ;;  %v6700_v33 = vld [vmem:[#allocation27_spill] sm:$0xff] }
 0x125   : > { %v1826_v13 = vadd.f32 %v6698_v34, %v1586_v7  ;;  %v686_v46 = vadd.f32 %v679_v49, %v647_v11  ;;  %v1195_v25 = vadd.f32 %v1188_v36, %v1157_v54  ;;  %v5201_v51 = vmul.f32 %v5114_v60, %v4865_v62  ;;  %v5207_v34 = vld [vmem:[#allocation2 + $0x83] sm:$0x7f] }
 0x126   : > { %6697 = vst [vmem:[#allocation109_spill] sm:$0xff] %v5190_v50  ;;  %v687_v0 = vadd.f32 %v680_v3, %v6699_v37  ;;  %v719_v50 = vmul.f32 %v4781_v18, %v6673_v10  ;;  %v2315_v31 = vmul.f32 0.16666667, %v2308_v2  ;;  %6701 = vst [vmem:[#allocation7_spill] sm:$0xff] %v5207_v34  ;;  %v5211_v49 = vmul.f32 %v5207_v34, %v6661_v56  ;;  %v6703_v3 = vld [vmem:[#allocation28_spill] sm:$0xff]  ;;  %v6708_v37 = vld [vmem:[#allocation35_spill] sm:$0xff] }
 0x127   : > { %v1864_v63 = vadd.f32 %v6700_v33, %v1826_v13  ;;  %v725_v7 = vadd.f32 %v718_v23, %v686_v46  ;;  %v1435_v36 = vadd.f32 %v5094_v44, %v1195_v25  ;;  %v5216_v11 = vmul.f32 %v6646_v61, %v6663_v32  ;;  %v5238_v33 = vld [vmem:[#allocation2 + $0x84] sm:$0x7f] }
 0x128   : > { %v726_v54 = vadd.f32 %v719_v50, %v687_v0  ;;  %v758_v10 = vmul.f32 %v4802_v57, %v6693_v8  ;;  %2650 = vst [vmem:[%s3799_s29 + $0x10] sm:$0x7f] %v2315_v31  ;;  %v5224_v13 = vmul.f32 %v6648_v48, %v4899_v22  ;;  %v5228_v46 = vmul.f32 %v5066_v43, %v6667_v45  ;;  %v6707_v50 = vld [vmem:[#allocation29_spill] sm:$0xff] }
 0x129   : > { %6702 = vst [vmem:[#allocation91_spill] sm:$0xff] %v5216_v11  ;;  %v1902_v2 = vadd.f32 %v6703_v3, %v1864_v63  ;;  %v764_v23 = vadd.f32 %v757_v29, %v725_v7  ;;  %v1473_v44 = vadd.f32 %v5100_v55, %v1435_v36  ;;  %v5233_v61 = vmul.f32 %v5144_v12, %v4932_v24  ;;  %v6711_v7 = vld [vmem:[#allocation105_spill] sm:$0xff] }
 0x12a   : > { %6704 = vst [vmem:[#allocation56_spill] sm:$0xff] %v5224_v13  ;;  %6705 = vst [vmem:[#allocation20_spill] sm:$0xff] %v5228_v46  ;;  %v765_v0 = vadd.f32 %v758_v10, %v726_v54  ;;  %v797_v25 = vmul.f32 %v4819_v28, %v6707_v50  ;;  %v5242_v63 = vmul.f32 %v5238_v33, %v4954_v1  ;;  %v6715_v46 = vld [vmem:[#allocation17_spill] sm:$0xff] }
 0x12b   : > { %6706 = vst [vmem:[#allocation26_spill] sm:$0xff] %v5233_v61  ;;  %v1940_v29 = vadd.f32 %v6708_v37, %v1902_v2  ;;  %v803_v31 = vadd.f32 %v796_v20, %v764_v23  ;;  %6709 = vst [vmem:[#allocation11_spill] sm:$0xff] %v5238_v33  ;;  %v1038_v55 = vmul.f32 %v6623_v40, %v4766_v35  ;;  %v6712_v2 = vld [vmem:[#allocation96_spill] sm:$0xff]  ;;  %v5254_v61 = vld [vmem:[#allocation2 + $0x92] sm:$0x7f] }
 0x12c   : > { %6710 = vst [vmem:[#allocation14_spill] sm:$0xff] %v5242_v63  ;;  %v1511_v36 = vadd.f32 %v6711_v7, %v1473_v44  ;;  %v804_v3 = vadd.f32 %v797_v25, %v765_v0  ;;  %v1076_v54 = vmul.f32 %v5006_v16, %v4790_v30  ;;  %v1114_v10 = vmul.f32 %v6675_v47, %v4795_v15  ;;  %v6714_v63 = vld [vmem:[#allocation18_spill] sm:$0xff] }
 0x12d   : > { %v1978_v20 = vadd.f32 %v6712_v2, %v1940_v29  ;;  %v1044_v23 = vadd.f32 %v1037_v58, %v803_v31  ;;  %v1152_v37 = vmul.f32 %v5178_v19, %v4809_v38  ;;  %6713 = vst [vmem:[#allocation49_spill] sm:$0xff] %v5254_v61  ;;  %v1190_v40 = vmul.f32 %v5254_v61, %v4814_v59 }
 0x12e   : > { %v1549_v44 = vadd.f32 %v6714_v63, %v1511_v36  ;;  %v1045_v0 = vadd.f32 %v1038_v55, %v804_v3  ;;  %v1430_v25 = vmul.f32 %v6636_v9, %v4830_v4  ;;  %v1468_v7 = vmul.f32 %v6662_v26, %v4835_v6  ;;  %v5273_v9 = vld [vmem:[#allocation2 + $0x93] sm:$0x7f] }
 0x12f   : > { %v2295_v29 = vadd.f32 %v4911_v21, %v1978_v20  ;;  %v1082_v58 = vadd.f32 %v1075_v52, %v1044_v23  ;;  %v1506_v31 = vmul.f32 %v5114_v60, %v6655_v41  ;;  %v720_v2 = vmul.f32 %v4781_v18, %v6693_v8  ;;  %6716 = vst [vmem:[#allocation5_spill] sm:$0xff] %v5273_v9  ;;  %v6717_v3 = vld [vmem:[#allocation70_spill] sm:$0xff] }
 0x130   : > { %v1587_v13 = vadd.f32 %v6715_v46, %v1549_v44  ;;  %v1083_v11 = vadd.f32 %v1076_v54, %v1045_v0  ;;  %v5271_v63 = vmul.f32 %v5207_v34, %v4865_v62  ;;  %v5277_v55 = vmul.f32 %v5273_v9, %v6661_v56 }
 0x131   : > { %v2302_v52 = vmax.f32 %v2295_v29, 0.0  ;;  %v1120_v36 = vadd.f32 %v5171_v17, %v1082_v58  ;;  %v727_v20 = vadd.f32 %v720_v2, %v6717_v3  ;;  %v759_v18 = vmul.f32 %v4802_v57, %v6707_v50  ;;  %v5293_v29 = vld [vmem:[#allocation2 + $0xa1] sm:$0x7f] }
 0x132   : > { %v1827_v8 = vadd.f32 %v5127_v14, %v1587_v13  ;;  %v1121_v46 = vadd.f32 %v1114_v10, %v1083_v11  ;;  %v5286_v54 = vmul.f32 %v6648_v48, %v6663_v32  ;;  %v5290_v23 = vmul.f32 %v5066_v43, %v4899_v22 }
 0x133   : > { %v2309_v44 = vmin.f32 %v2302_v52, 6.0  ;;  %v1158_v0 = vadd.f32 %v5175_v5, %v1120_v36  ;;  %v766_v17 = vadd.f32 %v759_v18, %v727_v20  ;;  %v798_v57 = vmul.f32 %v5293_v29, %v4819_v28  ;;  %v6718_v52 = vld [vmem:[#allocation31_spill] sm:$0xff] }
 0x134   : > { %v1865_v14 = vadd.f32 %v5131_v42, %v1827_v8  ;;  %v1159_v11 = vadd.f32 %v1152_v37, %v1121_v46  ;;  %v5300_v48 = vmul.f32 %v5144_v12, %v6667_v45  ;;  %v5304_v13 = vmul.f32 %v5238_v33, %v4932_v24  ;;  %v5310_v42 = vld [vmem:[#allocation2 + $0x94] sm:$0x7f]  ;;  %v6720_v46 = vld [vmem:[#allocation3_spill] sm:$0xff] }
 0x135   : > { %v2316_v10 = vmul.f32 0.16666667, %v2309_v44  ;;  %v1196_v5 = vadd.f32 %v5182_v27, %v1158_v0  ;;  %v805_v58 = vadd.f32 %v798_v57, %v766_v17  ;;  %v1039_v2 = vmul.f32 %v5006_v16, %v4766_v35  ;;  %6719 = vst [vmem:[#allocation60_spill] sm:$0xff] %v5310_v42  ;;  %v6721_v17 = vld [vmem:[#allocation22_spill] sm:$0xff] }
 0x136   : > { %v1903_v28 = vadd.f32 %v6718_v52, %v1865_v14  ;;  %v1197_v36 = vadd.f32 %v1190_v40, %v1159_v11  ;;  %v5314_v37 = vmul.f32 %v5310_v42, %v4954_v1  ;;  %v1077_v3 = vmul.f32 %v6675_v47, %v4790_v30  ;;  %v5327_v40 = vld [vmem:[%s5989_s1 + $0x81] ss:$0 sm:$0xff]  ;;  %v6722_v14 = vld [vmem:[#allocation109_spill] sm:$0xff] }
 0x137   : > { %2651 = vst [vmem:[%s3799_s29 + $0x30] sm:$0x7f] %v2316_v10  ;;  %v1436_v20 = vadd.f32 %v5186_v53, %v1196_v5  ;;  %v1046_v27 = vadd.f32 %v1039_v2, %v805_v58  ;;  %v1115_v18 = vmul.f32 %v5178_v19, %v4795_v15  ;;  %v1153_v8 = vmul.f32 %v5254_v61, %v4809_v38  ;;  %v6723_v2 = vld [vmem:[#allocation40_spill] sm:$0xff] }
 0x138   : > { %v1941_v44 = vadd.f32 %v6720_v46, %v1903_v28  ;;  %v1437_v0 = vadd.f32 %v1430_v25, %v1197_v36  ;;  %v1191_v57 = vmul.f32 %v6721_v17, %v4814_v59  ;;  %v1431_v53 = vmul.f32 %v6662_v26, %v4830_v4  ;;  %v6725_v46 = vld [vmem:[#allocation74_spill] sm:$0xff] }
 0x139   : > { %v1474_v11 = vadd.f32 %v6722_v14, %v1436_v20  ;;  %v1084_v10 = vadd.f32 %v1077_v3, %v1046_v27  ;;  %v1469_v5 = vmul.f32 %v5114_v60, %v4835_v6  ;;  %v1040_v58 = vmul.f32 %v6675_v47, %v4766_v35  ;;  %v6724_v20 = vld [vmem:[#allocation86_spill] sm:$0xff]  ;;  %v5351_v35 = vld [vmem:[%s5989_s1 + $0x89] ss:$0 sm:$0xff] }
 0x13a   : > { %v1979_v52 = vadd.f32 %v6723_v2, %v1941_v44  ;;  %v1475_v16 = vadd.f32 %v1468_v7, %v1437_v0  ;;  %v1507_v25 = vmul.f32 %v5207_v34, %v6655_v41  ;;  %v1097_v28 = vmul.f32 %v5178_v19, %v5327_v40  ;;  %v838_v14 = vld [vmem:[#allocation2 + $0xb2] sm:$0x7f] }
 0x13b   : > { %v1512_v26 = vadd.f32 %v5197_v39, %v1474_v11  ;;  %v1122_v36 = vadd.f32 %v1115_v18, %v1084_v10  ;;  %v1047_v3 = vadd.f32 %v1040_v58, %v6724_v20  ;;  %v1078_v27 = vmul.f32 %v5178_v19, %v4790_v30  ;;  %v5363_v10 = vld [vmem:[%s5989_s1 + $0x91] ss:$0 sm:$0xff]  ;;  %v6727_v20 = vld [vmem:[#allocation91_spill] sm:$0xff] }
 0x13c   : > { %v2296_v47 = vadd.f32 %v4911_v21, %v1979_v52  ;;  %v1513_v7 = vadd.f32 %v1506_v31, %v1475_v16  ;;  %v1104_v44 = vadd.f32 %v1097_v28, %v6725_v46  ;;  %v1135_v0 = vmul.f32 %v5254_v61, %v5351_v35 }
 0x13d   : > { %v1550_v39 = vadd.f32 %v5201_v51, %v1512_v26  ;;  %v1160_v18 = vadd.f32 %v1153_v8, %v1122_v36  ;;  %v1085_v11 = vadd.f32 %v1078_v27, %v1047_v3  ;;  %v1116_v30 = vmul.f32 %v5254_v61, %v4795_v15  ;;  %v5374_v15 = vld [vmem:[%s5989_s1 + $0x99] ss:$0 sm:$0xff] }
 0x13e   : > { %v2303_v58 = vmax.f32 %v2296_v47, 0.0  ;;  %v1551_v16 = vadd.f32 %v5271_v63, %v1513_v7  ;;  %v1142_v31 = vadd.f32 %v1135_v0, %v1104_v44  ;;  %v1173_v2 = vmul.f32 %v6721_v17, %v5363_v10  ;;  %6726 = vst [vmem:[#allocation110_spill] sm:$0xff] %v5374_v15  ;;  %v5379_v63 = vld [vmem:[%s5989_s1 + $0x7a] ss:$0 sm:$0xff]  ;;  %v5388_v47 = vld [vmem:[%s5989_s1 + $0x82] ss:$0 sm:$0xff] }
 0x13f   : > { %v1588_v51 = vadd.f32 %v5211_v49, %v1550_v39  ;;  %v1198_v8 = vadd.f32 %v1191_v57, %v1160_v18  ;;  %v1123_v52 = vadd.f32 %v1116_v30, %v1085_v11  ;;  %v1154_v28 = vmul.f32 %v6721_v17, %v4809_v38  ;;  %v6728_v0 = vld [vmem:[#allocation56_spill] sm:$0xff] }
 0x140   : > { %v2310_v26 = vmin.f32 %v2303_v58, 6.0  ;;  %v1589_v36 = vadd.f32 %v5277_v55, %v1551_v16  ;;  %v1180_v49 = vadd.f32 %v1173_v2, %v1142_v31  ;;  %v1211_v57 = vmul.f32 %v5374_v15, %v838_v14  ;;  %v6729_v58 = vld [vmem:[#allocation20_spill] sm:$0xff] }
 0x141   : > { %v1828_v3 = vadd.f32 %v6727_v20, %v1588_v51  ;;  %v1438_v38 = vadd.f32 %v1431_v53, %v1198_v8  ;;  %v1161_v17 = vadd.f32 %v1154_v28, %v1123_v52  ;;  %v1192_v27 = vmul.f32 %v4814_v59, %v838_v14  ;;  %v5411_v51 = vld [vmem:[#allocation2 + $0xa3] sm:$0x7f]  ;;  %v6732_v28 = vld [vmem:[#allocation26_spill] sm:$0xff] }
 0x142   : > { %v2317_v7 = vmul.f32 0.16666667, %v2310_v26  ;;  %v1829_v46 = vadd.f32 %v5286_v54, %v1589_v36  ;;  %v1218_v44 = vadd.f32 %v1211_v57, %v1180_v49  ;;  %v1451_v55 = vmul.f32 %v5114_v60, %v5379_v63  ;;  %6731 = vst [vmem:[#allocation54_spill] sm:$0xff] %v5411_v51 }
 0x143   : > { %v1866_v39 = vadd.f32 %v6728_v0, %v1828_v3  ;;  %v1476_v18 = vadd.f32 %v1469_v5, %v1438_v38  ;;  %v1199_v11 = vadd.f32 %v1192_v27, %v1161_v17  ;;  %v1432_v53 = vmul.f32 %v5114_v60, %v4830_v4  ;;  %v5408_v4 = vld [vmem:[%s5989_s1 + $0x8a] ss:$0 sm:$0xff]  ;;  %v6734_v27 = vld [vmem:[#allocation14_spill] sm:$0xff] }
 0x144   : > { %2652 = vst [vmem:[%s3799_s29 + $0x50] sm:$0x7f] %v2317_v7  ;;  %v1867_v59 = vadd.f32 %v5290_v23, %v1829_v46  ;;  %v1545_v14 = vmul.f32 %v5273_v9, %v4865_v62  ;;  %v1458_v30 = vadd.f32 %v1451_v55, %v1218_v44  ;;  %v1489_v54 = vmul.f32 %v5207_v34, %v5388_v47  ;;  %v5436_v55 = vld [vmem:[%s5989_s1 + $0x9a] ss:$0 sm:$0xff] }
 0x145   : > { %v1904_v16 = vadd.f32 %v6729_v58, %v1866_v39  ;;  %v1514_v31 = vadd.f32 %v1507_v25, %v1476_v18  ;;  %v1439_v2 = vadd.f32 %v1432_v53, %v1199_v11  ;;  %v1470_v5 = vmul.f32 %v5207_v34, %v4835_v6  ;;  %6730 = vst [vmem:[#allocation83_spill] sm:$0xff] %v5408_v4  ;;  %v1230_v6 = vld [vmem:[#allocation2 + $0xb3] sm:$0x7f] }
 0x146   : > { %v1905_v23 = vadd.f32 %v5300_v48, %v1867_v59  ;;  %v1583_v8 = vmul.f32 %v5411_v51, %v6661_v56  ;;  %v1496_v52 = vadd.f32 %v1489_v54, %v1458_v30  ;;  %v1527_v25 = vmul.f32 %v5273_v9, %v5408_v4  ;;  %v5423_v48 = vld [vmem:[%s5989_s1 + $0x92] ss:$0 sm:$0xff]  ;;  %6735 = vst [vmem:[#allocation80_spill] sm:$0xff] %v5436_v55  ;;  %v5659_v60 = vld [vmem:[#allocation2 + $0x35] sm:$0x7f] }
 0x147   : > { %v1942_v26 = vadd.f32 %v6732_v28, %v1904_v16  ;;  %v1552_v36 = vadd.f32 %v1545_v14, %v1514_v31  ;;  %v1477_v49 = vadd.f32 %v1470_v5, %v1439_v2  ;;  %v1508_v57 = vmul.f32 %v5273_v9, %v6655_v41  ;;  %6733 = vst [vmem:[#allocation55_spill] sm:$0xff] %v5423_v48  ;;  %v5636_v9 = vld [vmem:[#allocation2 + $0x54] sm:$0x7f] }
 0x148   : > { %v1943_v20 = vadd.f32 %v5304_v13, %v1905_v23  ;;  %v1823_v3 = vmul.f32 %v5066_v43, %v6663_v32  ;;  %v1534_v38 = vadd.f32 %v1527_v25, %v1496_v52  ;;  %v1565_v17 = vmul.f32 %v5411_v51, %v5423_v48  ;;  %v5456_v23 = vld [vmem:[#allocation2 + $0xa4] sm:$0x7f] }
 0x149   : > { %v1980_v7 = vadd.f32 %v6734_v27, %v1942_v26  ;;  %v1590_v46 = vadd.f32 %v1583_v8, %v1552_v36  ;;  %v1515_v44 = vadd.f32 %v1508_v57, %v1477_v49  ;;  %v1546_v41 = vmul.f32 %v5411_v51, %v4865_v62  ;;  %v5447_v62 = vld [vmem:[%s5989_s1 + $0x7b] ss:$0 sm:$0xff]  ;;  %6736 = vst [vmem:[#allocation98_spill] sm:$0xff] %v5456_v23  ;;  %v6737_v49 = vld [vmem:[#allocation69_spill] sm:$0xff]  ;;  %v5630_v51 = vld [vmem:[#allocation2 + $0x44] sm:$0x7f] }
 0x14a   : > { %v1981_v13 = vadd.f32 %v5314_v37, %v1943_v20  ;;  %v1861_v0 = vmul.f32 %v5144_v12, %v4899_v22  ;;  %v1572_v39 = vadd.f32 %v1565_v17, %v1534_v38  ;;  %v1603_v18 = vmul.f32 %v5436_v55, %v1230_v6  ;;  %v5481_v38 = vld [vmem:[%s5989_s1 + $0x88] ss:$0 sm:$0xff]  ;;  %v6738_v17 = vld [vmem:[#allocation61_spill] sm:$0xff] }
 0x14b   : > { %v2297_v11 = vadd.f32 %v4911_v21, %v1980_v7  ;;  %v1830_v53 = vadd.f32 %v1823_v3, %v1590_v46  ;;  %v1553_v59 = vadd.f32 %v1546_v41, %v1515_v44  ;;  %v1584_v14 = vmul.f32 %v6661_v56, %v1230_v6  ;;  %v5467_v6 = vld [vmem:[%s5989_s1 + $0x83] ss:$0 sm:$0xff]  ;;  %v1622_v44 = vld [vmem:[#allocation2 + $0xb4] sm:$0x7f] }
 0x14c   : > { %v2298_v30 = vadd.f32 %v4911_v21, %v1981_v13  ;;  %v1899_v37 = vmul.f32 %v5238_v33, %v6667_v45  ;;  %v1937_v54 = vmul.f32 %v5310_v42, %v4932_v24  ;;  %v1610_v58 = vadd.f32 %v1603_v18, %v1572_v39  ;;  %v6739_v13 = vld [vmem:[#allocation10_spill] sm:$0xff]  ;;  %v5486_v39 = vld [vmem:[#allocation2 + $0x81] sm:$0x7f] }
 0x14d   : > { %v2304_v16 = vmax.f32 %v2297_v11, 0.0  ;;  %v1868_v31 = vadd.f32 %v1861_v0, %v1830_v53  ;;  %v1591_v2 = vadd.f32 %v1584_v14, %v1553_v59  ;;  %v1824_v56 = vmul.f32 %v5144_v12, %v6663_v32  ;;  %v5472_v32 = vld [vmem:[%s5989_s1 + $0x80] ss:$0 sm:$0xff]  ;;  %6740 = vst [vmem:[#allocation108_spill] sm:$0xff] %v5486_v39 }
 0x14e   : > { %v2305_v5 = vmax.f32 %v2298_v30, 0.0  ;;  %v1975_v8 = vmul.f32 %v5456_v23, %v4954_v1  ;;  %v1843_v52 = vmul.f32 %v5144_v12, %v5447_v62  ;;  %v1862_v25 = vmul.f32 %v5238_v33, %v4899_v22  ;;  %v2778_v12 = vld [vmem:[#allocation2 + $0x25] sm:$0x7f] }
 0x14f   : > { %v2311_v28 = vmin.f32 %v2304_v16, 6.0  ;;  %v1906_v26 = vadd.f32 %v1899_v37, %v1868_v31  ;;  %v1831_v36 = vadd.f32 %v1824_v56, %v1591_v2  ;;  %v696_v57 = vmul.f32 %v5472_v32, %v6737_v49  ;;  %v5498_v37 = vld [vmem:[%s5989_s1 + $0x90] ss:$0 sm:$0xff]  ;;  %v6742_v16 = vld [vmem:[#allocation52_spill] sm:$0xff] }
 0x150   : > { %v2312_v20 = vmin.f32 %v2305_v5, 6.0  ;;  %v1850_v3 = vadd.f32 %v1843_v52, %v1610_v58  ;;  %v1900_v22 = vmul.f32 %v5310_v42, %v6667_v45  ;;  %v735_v27 = vmul.f32 %v5481_v38, %v6738_v17  ;;  %6741 = vst [vmem:[#allocation58_spill] sm:$0xff] %v5498_v37  ;;  %v5511_v5 = vld [vmem:[%s5989_s1 + $0x8b] ss:$0 sm:$0xff] }
 0x151   : > { %v2318_v7 = vmul.f32 0.16666667, %v2311_v28  ;;  %v1944_v46 = vadd.f32 %v1937_v54, %v1906_v26  ;;  %v1869_v41 = vadd.f32 %v1862_v25, %v1831_v36  ;;  %v703_v0 = vadd.f32 %v696_v57, %v6739_v13  ;;  %v5500_v54 = vld [vmem:[#allocation2 + $0x41] sm:$0x7f]  ;;  %v5516_v25 = vld [vmem:[%s5989_s1 + $0x98] ss:$0 sm:$0xff] }
 0x152   : > { %v740_v45 = vmul.f32 %v5486_v39, %v5481_v38  ;;  %v2319_v18 = vmul.f32 0.16666667, %v2312_v20  ;;  %v1881_v11 = vmul.f32 %v5238_v33, %v5467_v6  ;;  %v1938_v53 = vmul.f32 %v5456_v23, %v4932_v24  ;;  %v5518_v28 = vld [vmem:[#allocation2 + $0x51] sm:$0x7f]  ;;  %v5529_v57 = vld [vmem:[%s5989_s1 + $0x79] ss:$0 sm:$0xff] }
 0x153   : > { %2653 = vst [vmem:[%s3799_s29 + $0x70] sm:$0x7f] %v2318_v7  ;;  %v1982_v59 = vadd.f32 %v1975_v8, %v1944_v46  ;;  %v1907_v14 = vadd.f32 %v1900_v22, %v1869_v41  ;;  %v742_v30 = vadd.f32 %v735_v27, %v703_v0  ;;  %v774_v58 = vmul.f32 %v5500_v54, %v5498_v37  ;;  %v6743_v20 = vld [vmem:[#allocation66_spill] sm:$0xff] }
 0x154   : > { %v747_v31 = vadd.f32 %v740_v45, %v6742_v16  ;;  %2654 = vst [vmem:[%s3799_s29 + $0x90] sm:$0x7f] %v2319_v18  ;;  %v1888_v2 = vadd.f32 %v1881_v11, %v1850_v3  ;;  %v1976_v24 = vmul.f32 %v4954_v1, %v1622_v44  ;;  %v813_v26 = vmul.f32 %v5518_v28, %v5516_v25  ;;  %v6744_v18 = vld [vmem:[#allocation63_spill] sm:$0xff] }
 0x155   : > { %v2299_v56 = vadd.f32 %v4911_v21, %v1982_v59  ;;  %v1945_v8 = vadd.f32 %v1938_v53, %v1907_v14  ;;  %v781_v52 = vadd.f32 %v774_v58, %v742_v30  ;;  %v779_v1 = vmul.f32 %v5498_v37, %v6707_v50  ;;  %v5536_v50 = vld [vmem:[%s5989_s1 + $0x93] ss:$0 sm:$0xff]  ;;  %v6745_v14 = vld [vmem:[#allocation68_spill] sm:$0xff] }
 0x156   : > { %v1919_v36 = vmul.f32 %v5310_v42, %v5511_v5  ;;  %v1053_v3 = vmul.f32 %v5529_v57, %v6743_v20  ;;  %v1091_v11 = vmul.f32 %v6744_v18, %v5327_v40  ;;  %v818_v53 = vmul.f32 %v5516_v25, %v5293_v29  ;;  %v5569_v20 = vld [vmem:[#allocation2 + $0x52] sm:$0x7f] }
 0x157   : > { %v2306_v22 = vmax.f32 %v2299_v56, 0.0  ;;  %v1983_v27 = vadd.f32 %v1976_v24, %v1945_v8  ;;  %v820_v7 = vadd.f32 %v813_v26, %v781_v52  ;;  %v786_v46 = vadd.f32 %v779_v1, %v747_v31  ;;  %v5562_v8 = vld [vmem:[%s5989_s1 + $0x9b] ss:$0 sm:$0xff]  ;;  %v5564_v1 = vld [vmem:[#allocation2 + $0x42] sm:$0x7f] }
 0x158   : > { %v1926_v41 = vadd.f32 %v1919_v36, %v1888_v2  ;;  %v1957_v59 = vmul.f32 %v5456_v23, %v5536_v50  ;;  %v1129_v30 = vmul.f32 %v6745_v14, %v5351_v35  ;;  %v697_v29 = vmul.f32 %v5472_v32, %v6738_v17 }
 0x159   : > { %v2313_v13 = vmin.f32 %v2306_v22, 6.0  ;;  %v2300_v0 = vadd.f32 %v4911_v21, %v1983_v27  ;;  %v1060_v45 = vadd.f32 %v1053_v3, %v820_v7  ;;  %v5550_v21 = vld [vmem:[%s5989_s1 + $0x78] ss:$0 sm:$0xff]  ;;  %v5556_v56 = vadd.f32 %v818_v53, %v786_v46 }
 0x15a   : > { %v658_v2 = vmul.f32 %v5550_v21, %v6737_v49  ;;  %v1964_v24 = vadd.f32 %v1957_v59, %v1926_v41  ;;  %v1167_v36 = vmul.f32 %v5564_v1, %v5363_v10  ;;  %v1995_v49 = vmul.f32 %v5562_v8, %v1622_v44  ;;  %v6747_v41 = vld [vmem:[#allocation72_spill] sm:$0xff]  ;;  %v5581_v44 = vld [vmem:[#allocation2 + $0x33] sm:$0x7f]  ;;  %v5588_v59 = vld [vmem:[%s5989_s1 + $0x7c] ss:$0 sm:$0xff] }
 0x15b   : > { %v2320_v58 = vmul.f32 0.16666667, %v2313_v13  ;;  %v2307_v16 = vmax.f32 %v2300_v0, 0.0  ;;  %v1098_v31 = vadd.f32 %v1091_v11, %v1060_v45  ;;  %6746 = vst [vmem:[#allocation21_spill] sm:$0xff] %v5556_v56  ;;  %v1205_v3 = vmul.f32 %v5569_v20, %v5374_v15  ;;  %v6748_v0 = vld [vmem:[#allocation73_spill] sm:$0xff] }
 0x15c   : > { %v704_v22 = vadd.f32 %v697_v29, %v658_v2  ;;  %v736_v27 = vmul.f32 %v5500_v54, %v5481_v38  ;;  %v1445_v13 = vmul.f32 %v6747_v41, %v5379_v63  ;;  %v1483_v45 = vmul.f32 %v6748_v0, %v5388_v47  ;;  %v2777_v56 = vld [vmem:[#allocation2 + $0x15] sm:$0x7f] }
 0x15d   : > { %2655 = vst [vmem:[%s3799_s29 + $0xb0] sm:$0x7f] %v2320_v58  ;;  %v2314_v52 = vmin.f32 %v2307_v16, 6.0  ;;  %v1136_v26 = vadd.f32 %v1129_v30, %v1098_v31  ;;  %v5579_v11 = vadd.f32 %v1995_v49, %v1964_v24  ;;  %v1521_v53 = vmul.f32 %v5581_v44, %v5408_v4  ;;  %v5593_v31 = vld [vmem:[#allocation2 + $0x43] sm:$0x7f] }
 0x15e   : > { %v743_v30 = vadd.f32 %v736_v27, %v704_v22  ;;  %v775_v58 = vmul.f32 %v5518_v28, %v5498_v37  ;;  %v1559_v2 = vmul.f32 %v5593_v31, %v5423_v48  ;;  %v5597_v24 = vld [vmem:[#allocation2 + $0x53] sm:$0x7f]  ;;  %v6753_v22 = vld [vmem:[#allocation100_spill] sm:$0xff]  ;;  %v5614_v27 = vld [vmem:[%s5989_s1 + $0x84] ss:$0 sm:$0xff]  ;;  %v5640_v33 = vmul.f32 %v5636_v9, %v5562_v8 }
 0x15f   : > { %v2321_v7 = vmul.f32 0.16666667, %v2314_v52  ;;  %v1174_v46 = vadd.f32 %v1167_v36, %v1136_v26  ;;  %6749 = vst [vmem:[#allocation15_spill] sm:$0xff] %v5579_v11  ;;  %6750 = vst [vmem:[#allocation104_spill] sm:$0xff] %v5597_v24  ;;  %v1597_v29 = vmul.f32 %v5597_v24, %v5436_v55  ;;  %v6751_v52 = vld [vmem:[#allocation90_spill] sm:$0xff]  ;;  %v6752_v36 = vld [vmem:[#allocation95_spill] sm:$0xff]  ;;  %v5634_v11 = vmul.f32 %v5630_v51, %v5536_v50 }
 0x160   : > { %v1837_v26 = vmul.f32 %v6751_v52, %v5447_v62  ;;  %v5605_v49 = vmul.f32 %v6752_v36, %v5467_v6  ;;  %v782_v41 = vadd.f32 %v775_v58, %v743_v30  ;;  %v5626_v52 = vld [vmem:[#allocation2 + $0x61] sm:$0x7f]  ;;  %6756 = vst [vmem:[#allocation87_spill] sm:$0xff] %v5640_v33  ;;  %v5643_v30 = vmul.f32 %v2777_v56, %v5588_v59  ;;  %v5675_v33 = vld [vmem:[#allocation2 + $0x55] sm:$0x7f] }
 0x161   : > { %2656 = vst [vmem:[%s3799_s29 + $0xd0] sm:$0x7f] %v2321_v7  ;;  %v1212_v16 = vadd.f32 %v1205_v3, %v1174_v46  ;;  %v5609_v3 = vmul.f32 %v6753_v22, %v5511_v5  ;;  %v5619_v7 = vld [vmem:[%s5989_s1 + $0x8c] ss:$0 sm:$0xff]  ;;  %v5624_v46 = vld [vmem:[%s5989_s1 + $0x94] ss:$0 sm:$0xff]  ;;  %v814_v23 = vmul.f32 %v5626_v52, %v5516_v25  ;;  %v659_v61 = vmul.f32 %v5550_v21, %v6738_v17 }
 0x162   : > { %6754 = vst [vmem:[#allocation82_spill] sm:$0xff] %v5624_v46  ;;  %6755 = vst [vmem:[#allocation16_spill] sm:$0xff] %v5634_v11  ;;  %v698_v34 = vmul.f32 %v5500_v54, %v5472_v32  ;;  %v5657_v56 = vmul.f32 %v2778_v12, %v5614_v27  ;;  %v1130_v39 = vmul.f32 %v5564_v1, %v5351_v35 }
 0x163   : > { %v1452_v42 = vadd.f32 %v1445_v13, %v1212_v16  ;;  %6757 = vst [vmem:[#allocation38_spill] sm:$0xff] %v5643_v30  ;;  %v5648_v13 = vld [vmem:[%s5989_s1 + $0x9c] ss:$0 sm:$0xff]  ;;  %v821_v58 = vadd.f32 %v814_v23, %v782_v41  ;;  %v1054_v16 = vmul.f32 %v5529_v57, %v6744_v18  ;;  %v5663_v30 = vmul.f32 %v5659_v60, %v5619_v7  ;;  %v5665_v23 = vld [vmem:[#allocation2 + $0x45] sm:$0x7f] }
 0x164   : > { %6758 = vst [vmem:[#allocation99_spill] sm:$0xff] %v5648_v13  ;;  %6759 = vst [vmem:[#allocation53_spill] sm:$0xff] %v5657_v56  ;;  %v5669_v18 = vmul.f32 %v5665_v23, %v5624_v46  ;;  %v737_v41 = vmul.f32 %v5518_v28, %v5481_v38  ;;  %v1446_v11 = vmul.f32 %v6748_v0, %v5379_v63 }
 0x165   : > { %v1490_v19 = vadd.f32 %v1483_v45, %v1452_v42  ;;  %6760 = vst [vmem:[#allocation97_spill] sm:$0xff] %v5663_v30  ;;  %v1061_v17 = vadd.f32 %v1054_v16, %v821_v58  ;;  %v1092_v42 = vmul.f32 %v6745_v14, %v5327_v40  ;;  %v705_v45 = vadd.f32 %v698_v34, %v659_v61 }
 0x166   : > { %6761 = vst [vmem:[#allocation39_spill] sm:$0xff] %v5669_v18  ;;  %6762 = vst [vmem:[#allocation24_spill] sm:$0xff] %v5675_v33  ;;  %v5679_v30 = vmul.f32 %v5675_v33, %v5648_v13  ;;  %v1168_v58 = vmul.f32 %v5569_v20, %v5363_v10  ;;  %v6764_v18 = vld [vmem:[#allocation30_spill] sm:$0xff]  ;;  %v1522_v13 = vmul.f32 %v5593_v31, %v5408_v4 }
 0x167   : > { %v1528_v56 = vadd.f32 %v1521_v53, %v1490_v19  ;;  %v1099_v16 = vadd.f32 %v1092_v42, %v1061_v17  ;;  %v1206_v34 = vmul.f32 %v6764_v18, %v5374_v15  ;;  %v744_v61 = vadd.f32 %v737_v41, %v705_v45  ;;  %v5697_v15 = vld [vmem:[#allocation2 + $0x71] sm:$0x7f] }
 0x168   : > { %6763 = vst [vmem:[#allocation9_spill] sm:$0xff] %v5679_v30  ;;  %v776_v19 = vmul.f32 %v5626_v52, %v5498_v37  ;;  %v1484_v30 = vmul.f32 %v5581_v44, %v5388_v47  ;;  %v1560_v17 = vmul.f32 %v5597_v24, %v5423_v48  ;;  %v815_v45 = vmul.f32 %v5697_v15, %v5516_v25 }
 0x169   : > { %v1566_v53 = vadd.f32 %v1559_v2, %v1528_v56  ;;  %v1137_v33 = vadd.f32 %v1130_v39, %v1099_v16  ;;  %v5701_v56 = vld [vmem:[#allocation2 + $0x63] sm:$0x7f]  ;;  %v1838_v41 = vmul.f32 %v6752_v36, %v5447_v62  ;;  %v5709_v39 = vmul.f32 %v6753_v22, %v5467_v6 }
 0x16a   : > { %v783_v42 = vadd.f32 %v776_v19, %v744_v61  ;;  %v1598_v0 = vmul.f32 %v5701_v56, %v5436_v55  ;;  %v5713_v61 = vmul.f32 %v5630_v51, %v5511_v5  ;;  %v5719_v55 = vmul.f32 %v5636_v9, %v5536_v50 }
 0x16b   : > { %v1604_v2 = vadd.f32 %v1597_v29, %v1566_v53  ;;  %6765 = vst [vmem:[#allocation48_spill] sm:$0xff] %v5709_v39  ;;  %v1175_v16 = vadd.f32 %v1168_v58, %v1137_v33  ;;  %v1055_v29 = vmul.f32 %v5529_v57, %v6745_v14  ;;  %v5723_v36 = vmul.f32 %v5066_v43, %v5562_v8 }
 0x16c   : > { %v822_v19 = vadd.f32 %v815_v45, %v783_v42  ;;  %6766 = vst [vmem:[#allocation46_spill] sm:$0xff] %v5719_v55  ;;  %v1093_v33 = vmul.f32 %v5564_v1, %v5327_v40  ;;  %v660_v42 = vmul.f32 %v5550_v21, %v5500_v54  ;;  %v699_v14 = vmul.f32 %v5518_v28, %v5472_v32 }
 0x16d   : > { %v1844_v53 = vadd.f32 %v1837_v26, %v1604_v2  ;;  %6767 = vst [vmem:[#allocation19_spill] sm:$0xff] %v5723_v36  ;;  %v1213_v58 = vadd.f32 %v1206_v34, %v1175_v16  ;;  %v5733_v45 = vmul.f32 %v2778_v12, %v5588_v59  ;;  %v5737_v2 = vmul.f32 %v5659_v60, %v5614_v27  ;;  %v6771_v12 = vld [vmem:[#allocation24_spill] sm:$0xff] }
 0x16e   : > { %v1062_v39 = vadd.f32 %v1055_v29, %v822_v19  ;;  %v1131_v36 = vmul.f32 %v5569_v20, %v5351_v35  ;;  %v706_v19 = vadd.f32 %v699_v14, %v660_v42  ;;  %v738_v54 = vmul.f32 %v5626_v52, %v5481_v38  ;;  %v6775_v14 = vld [vmem:[#allocation99_spill] sm:$0xff] }
 0x16f   : > { %v1882_v26 = vadd.f32 %v5605_v49, %v1844_v53  ;;  %6768 = vst [vmem:[#allocation32_spill] sm:$0xff] %v5733_v45  ;;  %6769 = vst [vmem:[#allocation8_spill] sm:$0xff] %v5737_v2  ;;  %v1453_v34 = vadd.f32 %v1446_v11, %v1213_v58  ;;  %v5746_v49 = vmul.f32 %v5665_v23, %v5619_v7  ;;  %v6773_v58 = vld [vmem:[#allocation16_spill] sm:$0xff] }
 0x170   : > { %v1100_v16 = vadd.f32 %v1093_v33, %v1062_v39  ;;  %v5750_v53 = vmul.f32 %v6771_v12, %v5624_v46  ;;  %v1169_v2 = vmul.f32 %v6764_v18, %v5363_v10  ;;  %v745_v39 = vadd.f32 %v738_v54, %v706_v19  ;;  %v6778_v19 = vld [vmem:[#allocation108_spill] sm:$0xff] }
 0x171   : > { %v1920_v29 = vadd.f32 %v5609_v3, %v1882_v26  ;;  %6770 = vst [vmem:[#allocation45_spill] sm:$0xff] %v5746_v49  ;;  %v1491_v45 = vadd.f32 %v1484_v30, %v1453_v34  ;;  %v777_v33 = vmul.f32 %v5697_v15, %v5498_v37  ;;  %v5757_v3 = vld [vmem:[#allocation2 + $0x65] sm:$0x7f]  ;;  %v5763_v49 = vld [vmem:[#allocation2 + $0x72] sm:$0x7f]  ;;  %v1447_v30 = vmul.f32 %v5581_v44, %v5379_v63 }
 0x172   : > { %6772 = vst [vmem:[#allocation43_spill] sm:$0xff] %v5750_v53  ;;  %v1138_v11 = vadd.f32 %v1131_v36, %v1100_v16  ;;  %6774 = vst [vmem:[#allocation51_spill] sm:$0xff] %v5757_v3  ;;  %v5761_v26 = vmul.f32 %v5757_v3, %v6775_v14  ;;  %v6777_v53 = vld [vmem:[#allocation110_spill] sm:$0xff]  ;;  %v816_v54 = vmul.f32 %v5516_v25, %v6778_v19 }
 0x173   : > { %v1958_v42 = vadd.f32 %v6773_v58, %v1920_v29  ;;  %v1207_v46 = vmul.f32 %v5763_v49, %v6777_v53  ;;  %v1529_v36 = vadd.f32 %v1522_v13, %v1491_v45  ;;  %v784_v16 = vadd.f32 %v777_v33, %v745_v39  ;;  %v6779_v29 = vld [vmem:[#allocation87_spill] sm:$0xff]  ;;  %v6780_v45 = vld [vmem:[#allocation38_spill] sm:$0xff] }
 0x174   : > { %6776 = vst [vmem:[#allocation37_spill] sm:$0xff] %v5761_v26  ;;  %v1176_v34 = vadd.f32 %v1169_v2, %v1138_v11  ;;  %v1485_v14 = vmul.f32 %v5593_v31, %v5388_v47  ;;  %v1523_v26 = vmul.f32 %v5597_v24, %v5408_v4  ;;  %v1561_v3 = vmul.f32 %v5701_v56, %v5423_v48  ;;  %v6781_v11 = vld [vmem:[#allocation80_spill] sm:$0xff]  ;;  %v6782_v39 = vld [vmem:[#allocation47_spill] sm:$0xff] }
 0x175   : > { %v1996_v58 = vadd.f32 %v6779_v29, %v1958_v42  ;;  %v1567_v55 = vadd.f32 %v1560_v17, %v1529_v36  ;;  %v823_v44 = vadd.f32 %v816_v54, %v784_v16  ;;  %v1056_v13 = vmul.f32 %v5564_v1, %v5529_v57  ;;  %v6783_v17 = vld [vmem:[#allocation53_spill] sm:$0xff] }
 0x176   : > { %v1214_v37 = vadd.f32 %v1207_v46, %v1176_v34  ;;  %v1599_v33 = vmul.f32 %v6782_v39, %v6781_v11  ;;  %v1839_v42 = vmul.f32 %v6753_v22, %v5447_v62  ;;  %v1877_v29 = vmul.f32 %v5630_v51, %v5467_v6 }
 0x177   : > { %v2122_v2 = vadd.f32 %v6780_v45, %v1996_v58  ;;  %v1605_v4 = vadd.f32 %v1598_v0, %v1567_v55  ;;  %v1063_v48 = vadd.f32 %v1056_v13, %v823_v44  ;;  %v1094_v46 = vmul.f32 %v5569_v20, %v5327_v40  ;;  %v6784_v0 = vld [vmem:[#allocation97_spill] sm:$0xff] }
 0x178   : > { %v1454_v24 = vadd.f32 %v1447_v30, %v1214_v37  ;;  %v1915_v1 = vmul.f32 %v5636_v9, %v5511_v5  ;;  %v5794_v34 = vmul.f32 %v5066_v43, %v5536_v50  ;;  %v1132_v22 = vmul.f32 %v6764_v18, %v5351_v35  ;;  %v6785_v58 = vld [vmem:[#allocation25_spill] sm:$0xff]  ;;  %v6786_v18 = vld [vmem:[#allocation48_spill] sm:$0xff] }
 0x179   : > { %v2141_v36 = vadd.f32 %v6783_v17, %v2122_v2  ;;  %v1845_v16 = vadd.f32 %v1838_v41, %v1605_v4  ;;  %v1101_v55 = vadd.f32 %v1094_v46, %v1063_v48  ;;  %v661_v37 = vmul.f32 %v5550_v21, %v5518_v28  ;;  %v6787_v21 = vld [vmem:[#allocation39_spill] sm:$0xff] }
 0x17a   : > { %v1492_v54 = vadd.f32 %v1485_v14, %v1454_v24  ;;  %v5803_v44 = vmul.f32 %v6785_v58, %v5562_v8  ;;  %v5807_v13 = vmul.f32 %v5659_v60, %v5588_v59  ;;  %v700_v45 = vmul.f32 %v5626_v52, %v5472_v32 }
 0x17b   : > { %v2160_v30 = vadd.f32 %v6784_v0, %v2141_v36  ;;  %v1883_v4 = vadd.f32 %v6786_v18, %v1845_v16  ;;  %v1139_v48 = vadd.f32 %v1132_v22, %v1101_v55  ;;  %v1170_v28 = vmul.f32 %v5763_v49, %v5363_v10  ;;  %v6789_v36 = vld [vmem:[#allocation9_spill] sm:$0xff]  ;;  %v6790_v55 = vld [vmem:[#allocation58_spill] sm:$0xff] }
 0x17c   : > { %v1530_v24 = vadd.f32 %v1523_v26, %v1492_v54  ;;  %v5817_v14 = vmul.f32 %v5665_v23, %v5614_v27  ;;  %v707_v2 = vadd.f32 %v700_v45, %v661_v37  ;;  %v739_v60 = vmul.f32 %v5697_v15, %v5481_v38  ;;  %v6788_v26 = vld [vmem:[#allocation36_spill] sm:$0xff]  ;;  %v6791_v0 = vld [vmem:[#allocation46_spill] sm:$0xff] }
 0x17d   : > { %v2179_v41 = vadd.f32 %v6787_v21, %v2160_v30  ;;  %v1921_v46 = vadd.f32 %v5713_v61, %v1883_v4  ;;  %v1177_v52 = vadd.f32 %v1170_v28, %v1139_v48  ;;  %v1208_v17 = vmul.f32 %v6788_v26, %v6777_v53  ;;  %v6792_v18 = vld [vmem:[#allocation82_spill] sm:$0xff]  ;;  %v6793_v4 = vld [vmem:[#allocation51_spill] sm:$0xff] }
 0x17e   : > { %v1568_v32 = vadd.f32 %v1561_v3, %v1530_v24  ;;  %v5827_v16 = vmul.f32 %v6771_v12, %v5619_v7  ;;  %v746_v54 = vadd.f32 %v739_v60, %v707_v2  ;;  %v778_v37 = vmul.f32 %v6790_v55, %v6778_v19  ;;  %v5837_v3 = vld [vmem:[%s5990_s2] ss:$0 sm:$0xff]  ;;  %v2787_v19 = vld [vmem:[#allocation2 + $0x91] sm:$0x7f] }
 0x17f   : > { %v2198_v22 = vadd.f32 %v6789_v36, %v2179_v41  ;;  %v1959_v30 = vadd.f32 %v6791_v0, %v1921_v46  ;;  %v1215_v38 = vadd.f32 %v1208_v17, %v1177_v52  ;;  %v1448_v61 = vmul.f32 %v5593_v31, %v5379_v63  ;;  %v6795_v31 = vld [vmem:[#allocation104_spill] sm:$0xff]  ;;  %v6796_v52 = vld [vmem:[#allocation99_spill] sm:$0xff] }
 0x180   : > { %v1606_v15 = vadd.f32 %v1599_v33, %v1568_v32  ;;  %v5842_v24 = vmul.f32 %v6793_v4, %v6792_v18  ;;  %v785_v48 = vadd.f32 %v778_v37, %v746_v54  ;;  %v817_v28 = vmul.f32 %v2787_v19, %v5516_v25  ;;  %v6794_v33 = vld [vmem:[#allocation19_spill] sm:$0xff]  ;;  %v5848_v32 = vld [vmem:[#allocation2 + $0x75] sm:$0x7f]  ;;  %v6797_v54 = vld [vmem:[#allocation32_spill] sm:$0xff] }
 0x181   : > { %v2336_v45 = vadd.f32 %v5837_v3, %v2198_v22  ;;  %v1997_v21 = vadd.f32 %v6794_v33, %v1959_v30  ;;  %v1455_v2 = vadd.f32 %v1448_v61, %v1215_v38  ;;  %v1486_v60 = vmul.f32 %v6795_v31, %v5388_v47 }
 0x182   : > { %v1846_v41 = vadd.f32 %v1839_v42, %v1606_v15  ;;  %v5852_v17 = vmul.f32 %v5848_v32, %v6796_v52  ;;  %v824_v36 = vadd.f32 %v817_v28, %v785_v48  ;;  %v1057_v22 = vmul.f32 %v5569_v20, %v5529_v57  ;;  %v6798_v42 = vld [vmem:[#allocation83_spill] sm:$0xff]  ;;  %v6800_v48 = vld [vmem:[#allocation8_spill] sm:$0xff] }
 0x183   : > { %v2343_v46 = vmax.f32 %v2336_v45, 0.0  ;;  %v2123_v25 = vadd.f32 %v6797_v54, %v1997_v21  ;;  %v1493_v37 = vadd.f32 %v1486_v60, %v1455_v2  ;;  %v1524_v0 = vmul.f32 %v5701_v56, %v6798_v42  ;;  %v6799_v15 = vld [vmem:[#allocation55_spill] sm:$0xff]  ;;  %v6802_v54 = vld [vmem:[#allocation45_spill] sm:$0xff] }
 0x184   : > { %v1884_v55 = vadd.f32 %v1877_v29, %v1846_v41  ;;  %v1562_v38 = vmul.f32 %v6782_v39, %v6799_v15  ;;  %v1064_v61 = vadd.f32 %v1057_v22, %v824_v36  ;;  %v2789_v45 = vld [vmem:[#allocation2 + $0x62] sm:$0x7f]  ;;  %v1840_v2 = vmul.f32 %v5630_v51, %v5447_v62 }
 0x185   : > { %v2350_v30 = vmin.f32 %v2343_v46, 6.0  ;;  %v1095_v19 = vmul.f32 %v2789_v45, %v5327_v40  ;;  %v2142_v28 = vadd.f32 %v6800_v48, %v2123_v25  ;;  %v1531_v20 = vadd.f32 %v1524_v0, %v1493_v37  ;;  %v6801_v21 = vld [vmem:[#allocation7_spill] sm:$0xff]  ;;  %v6804_v48 = vld [vmem:[#allocation49_spill] sm:$0xff] }
 0x186   : > { %v1922_v33 = vadd.f32 %v1915_v1, %v1884_v55  ;;  %v1600_v29 = vmul.f32 %v6801_v21, %v6781_v11  ;;  %v1133_v46 = vmul.f32 %v5763_v49, %v5351_v35  ;;  %v1878_v1 = vmul.f32 %v5636_v9, %v5467_v6  ;;  %v6803_v0 = vld [vmem:[#allocation43_spill] sm:$0xff] }
 0x187   : > { %v2357_v41 = vmul.f32 0.16666667, %v2350_v30  ;;  %v1102_v60 = vadd.f32 %v1095_v19, %v1064_v61  ;;  %v2161_v36 = vadd.f32 %v6802_v54, %v2142_v28  ;;  %v1569_v52 = vadd.f32 %v1562_v38, %v1531_v20 }
 0x188   : > { %v1960_v22 = vadd.f32 %v5794_v34, %v1922_v33  ;;  %v1916_v25 = vmul.f32 %v5066_v43, %v5511_v5  ;;  %v1171_v51 = vmul.f32 %v6788_v26, %v5363_v10  ;;  %v1058_v37 = vmul.f32 %v2789_v45, %v5529_v57  ;;  %v6805_v33 = vld [vmem:[#allocation21_spill] sm:$0xff] }
 0x189   : > { %2657 = vst [vmem:[%s3799_s29 + $0x18] sm:$0x7f] %v2357_v41  ;;  %v1140_v55 = vadd.f32 %v1133_v46, %v1102_v60  ;;  %v2180_v30 = vadd.f32 %v6803_v0, %v2161_v36  ;;  %v1607_v19 = vadd.f32 %v1600_v29, %v1569_v52  ;;  %v1954_v34 = vmul.f32 %v6785_v58, %v5536_v50  ;;  %v6806_v41 = vld [vmem:[#allocation37_spill] sm:$0xff]  ;;  %v2790_v0 = vld [vmem:[#allocation2 + $0xa2] sm:$0x7f] }
 0x18a   : > { %v1998_v61 = vadd.f32 %v5803_v44, %v1960_v22  ;;  %v1209_v28 = vmul.f32 %v6804_v48, %v6777_v53  ;;  %v1065_v43 = vadd.f32 %v1058_v37, %v6805_v33  ;;  %v1096_v20 = vmul.f32 %v5763_v49, %v5327_v40  ;;  %v6807_v44 = vld [vmem:[#allocation11_spill] sm:$0xff] }
 0x18b   : > { %v1178_v38 = vadd.f32 %v1171_v51, %v1140_v55  ;;  %v2199_v60 = vadd.f32 %v6806_v41, %v2180_v30  ;;  %v1847_v45 = vadd.f32 %v1840_v2, %v1607_v19  ;;  %v1992_v52 = vmul.f32 %v6807_v44, %v5562_v8 }
 0x18c   : > { %v2124_v57 = vadd.f32 %v5807_v13, %v1998_v61  ;;  %v1449_v58 = vmul.f32 %v6795_v31, %v5379_v63  ;;  %v1103_v46 = vadd.f32 %v1096_v20, %v1065_v43  ;;  %v1134_v54 = vmul.f32 %v6788_v26, %v5351_v35 }
 0x18d   : > { %v1216_v29 = vadd.f32 %v1209_v28, %v1178_v38  ;;  %v2337_v36 = vadd.f32 %v5837_v3, %v2199_v60  ;;  %v1885_v49 = vadd.f32 %v1878_v1, %v1847_v45  ;;  %v2118_v13 = vmul.f32 %v5665_v23, %v5588_v59  ;;  %v2791_v60 = vld [vmem:[#allocation2 + $0x73] sm:$0x7f] }
 0x18e   : > { %v2143_v40 = vadd.f32 %v5817_v14, %v2124_v57  ;;  %v1487_v22 = vmul.f32 %v5701_v56, %v5388_v47  ;;  %v1141_v55 = vadd.f32 %v1134_v54, %v1103_v46  ;;  %v1172_v31 = vmul.f32 %v6804_v48, %v5363_v10 }
 0x18f   : > { %v1456_v2 = vadd.f32 %v1449_v58, %v1216_v29  ;;  %v2344_v51 = vmax.f32 %v2337_v36, 0.0  ;;  %v1923_v35 = vadd.f32 %v1916_v25, %v1885_v49  ;;  %v2137_v26 = vmul.f32 %v6771_v12, %v5614_v27  ;;  %v6810_v49 = vld [vmem:[#allocation15_spill] sm:$0xff] }
 0x190   : > { %v2162_v37 = vadd.f32 %v5827_v16, %v2143_v40  ;;  %v1525_v1 = vmul.f32 %v6782_v39, %v6798_v42  ;;  %v1179_v23 = vadd.f32 %v1172_v31, %v1141_v55  ;;  %v1210_v30 = vmul.f32 %v2790_v0, %v6777_v53  ;;  %v2793_v55 = vld [vmem:[#allocation2 + $0x64] sm:$0x7f] }
 0x191   : > { %v1494_v14 = vadd.f32 %v1487_v22, %v1456_v2  ;;  %v2351_v61 = vmin.f32 %v2344_v51, 6.0  ;;  %v1961_v10 = vadd.f32 %v1954_v34, %v1923_v35  ;;  %v2156_v16 = vmul.f32 %v6793_v4, %v5619_v7  ;;  %v6808_v34 = vld [vmem:[#allocation5_spill] sm:$0xff] }
 0x192   : > { %v2181_v19 = vadd.f32 %v5842_v24, %v2162_v37  ;;  %v1563_v38 = vmul.f32 %v6801_v21, %v6799_v15  ;;  %v1217_v48 = vadd.f32 %v1210_v30, %v1179_v23  ;;  %v1450_v39 = vmul.f32 %v5701_v56, %v5379_v63  ;;  %v5925_v63 = vld [vmem:[#allocation2 + $0x85] sm:$0x7f]  ;;  %v6811_v30 = vld [vmem:[#allocation54_spill] sm:$0xff] }
 0x193   : > { %v1532_v25 = vadd.f32 %v1525_v1, %v1494_v14  ;;  %v2358_v28 = vmul.f32 0.16666667, %v2351_v61  ;;  %v1999_v53 = vadd.f32 %v1992_v52, %v1961_v10  ;;  %v2175_v24 = vmul.f32 %v5848_v32, %v6792_v18  ;;  %v6809_v56 = vld [vmem:[#allocation99_spill] sm:$0xff]  ;;  %v2794_v1 = vld [vmem:[#allocation2 + $0x95] sm:$0x7f] }
 0x194   : > { %v2200_v33 = vadd.f32 %v5852_v17, %v2181_v19  ;;  %v1601_v20 = vmul.f32 %v6808_v34, %v6781_v11  ;;  %v1457_v41 = vadd.f32 %v1450_v39, %v1217_v48  ;;  %v1488_v57 = vmul.f32 %v2791_v60, %v5388_v47  ;;  %v2014_v19 = vld [vmem:[#allocation2 + $0xb5] sm:$0x7f] }
 0x195   : > { %v1570_v43 = vadd.f32 %v1563_v38, %v1532_v25  ;;  %2658 = vst [vmem:[%s3799_s29 + $0x38] sm:$0x7f] %v2358_v28  ;;  %v2125_v29 = vadd.f32 %v2118_v13, %v1999_v53  ;;  %v2194_v17 = vmul.f32 %v5925_v63, %v6809_v56  ;;  %v2121_v52 = vmul.f32 %v5848_v32, %v5588_v59 }
 0x196   : > { %v2338_v45 = vadd.f32 %v5837_v3, %v2200_v33  ;;  %v1841_v46 = vmul.f32 %v5636_v9, %v5447_v62  ;;  %v1495_v54 = vadd.f32 %v1488_v57, %v1457_v41  ;;  %v1526_v47 = vmul.f32 %v6801_v21, %v6798_v42 }
 0x197   : > { %v1608_v58 = vadd.f32 %v1601_v20, %v1570_v43  ;;  %v2144_v40 = vadd.f32 %v2137_v26, %v2125_v29  ;;  %v2128_v13 = vadd.f32 %v2121_v52, %v6810_v49  ;;  %v2140_v2 = vmul.f32 %v5925_v63, %v5614_v27  ;;  %v2795_v26 = vld [vmem:[#allocation2 + $0x74] sm:$0x7f]  ;;  %v6812_v20 = vld [vmem:[#allocation60_spill] sm:$0xff] }
 0x198   : > { %v2345_v36 = vmax.f32 %v2338_v45, 0.0  ;;  %v1879_v31 = vmul.f32 %v2793_v55, %v5467_v6  ;;  %v1533_v51 = vadd.f32 %v1526_v47, %v1495_v54  ;;  %v1564_v37 = vmul.f32 %v6808_v34, %v6799_v15  ;;  %v2796_v15 = vld [vmem:[#allocation2 + $0xa5] sm:$0x7f] }
 0x199   : > { %v1848_v22 = vadd.f32 %v1841_v46, %v1608_v58  ;;  %v2163_v35 = vadd.f32 %v2156_v16, %v2144_v40  ;;  %v2147_v14 = vadd.f32 %v2140_v2, %v2128_v13  ;;  %v2159_v42 = vmul.f32 %v2794_v1, %v5619_v7 }
 0x19a   : > { %v2352_v9 = vmin.f32 %v2345_v36, 6.0  ;;  %v1917_v23 = vmul.f32 %v2795_v26, %v5511_v5  ;;  %v1571_v0 = vadd.f32 %v1564_v37, %v1533_v51  ;;  %v1602_v61 = vmul.f32 %v6811_v30, %v6781_v11 }
 0x19b   : > { %v1886_v21 = vadd.f32 %v1879_v31, %v1848_v22  ;;  %v2182_v25 = vadd.f32 %v2175_v24, %v2163_v35  ;;  %v2166_v38 = vadd.f32 %v2159_v42, %v2147_v14  ;;  %v2178_v16 = vmul.f32 %v2796_v15, %v6792_v18 }
 0x19c   : > { %v2359_v10 = vmul.f32 0.16666667, %v2352_v9  ;;  %v1955_v39 = vmul.f32 %v6807_v44, %v5536_v50  ;;  %v1609_v28 = vadd.f32 %v1602_v61, %v1571_v0  ;;  %v1842_v33 = vmul.f32 %v2793_v55, %v5447_v62 }
 0x19d   : > { %v1924_v48 = vadd.f32 %v1917_v23, %v1886_v21  ;;  %v2201_v53 = vadd.f32 %v2194_v17, %v2182_v25  ;;  %v2185_v43 = vadd.f32 %v2178_v16, %v2166_v38  ;;  %v2197_v34 = vmul.f32 %v6809_v56, %v2014_v19 }
 0x19e   : > { %2659 = vst [vmem:[%s3799_s29 + $0x58] sm:$0x7f] %v2359_v10  ;;  %v1993_v24 = vmul.f32 %v6812_v20, %v5562_v8  ;;  %v1849_v41 = vadd.f32 %v1842_v33, %v1609_v28  ;;  %v1880_v60 = vmul.f32 %v2795_v26, %v5467_v6  ;;  %v2119_v52 = vmul.f32 %v6771_v12, %v5588_v59 }
 0x19f   : > { %v1962_v11 = vadd.f32 %v1955_v39, %v1924_v48  ;;  %v2339_v57 = vadd.f32 %v5837_v3, %v2201_v53  ;;  %v2204_v45 = vadd.f32 %v2197_v34, %v2185_v43  ;;  %v1918_v17 = vmul.f32 %v6807_v44, %v5511_v5  ;;  %v6813_v44 = vld [vmem:[#allocation98_spill] sm:$0xff] }
 0x1a0   : > { %v1887_v62 = vadd.f32 %v1880_v60, %v1849_v41  ;;  %v2138_v47 = vmul.f32 %v6793_v4, %v5614_v27  ;;  %v1956_v36 = vmul.f32 %v6812_v20, %v5536_v50  ;;  %v2157_v12 = vmul.f32 %v5848_v32, %v5619_v7 }
 0x1a1   : > { %v2000_v29 = vadd.f32 %v1993_v24, %v1962_v11  ;;  %v2346_v58 = vmax.f32 %v2339_v57, 0.0  ;;  %v2342_v46 = vadd.f32 %v5837_v3, %v2204_v45  ;;  %v1994_v2 = vmul.f32 %v6813_v44, %v5562_v8 }
 0x1a2   : > { %v1925_v6 = vadd.f32 %v1918_v17, %v1887_v62  ;;  %v2176_v51 = vmul.f32 %v5925_v63, %v6792_v18  ;;  %v2120_v50 = vmul.f32 %v6793_v4, %v5588_v59  ;;  %v2195_v14 = vmul.f32 %v2794_v1, %v6809_v56 }
 0x1a3   : > { %v2126_v54 = vadd.f32 %v2119_v52, %v2000_v29  ;;  %v2353_v40 = vmin.f32 %v2346_v58, 6.0  ;;  %v2349_v49 = vmax.f32 %v2342_v46, 0.0  ;;  %v2139_v8 = vmul.f32 %v5848_v32, %v5614_v27 }
 0x1a4   : > { %v1963_v5 = vadd.f32 %v1956_v36, %v1925_v6  ;;  %v2158_v23 = vmul.f32 %v5925_v63, %v5619_v7  ;;  %v2177_v4 = vmul.f32 %v2794_v1, %v6792_v18  ;;  %v2196_v19 = vmul.f32 %v2796_v15, %v6809_v56 }
 0x1a5   : > { %v2145_v13 = vadd.f32 %v2138_v47, %v2126_v54  ;;  %v2360_v22 = vmul.f32 0.16666667, %v2353_v40  ;;  %v2356_v55 = vmin.f32 %v2349_v49, 6.0 }
 0x1a6   : > { %v2001_v37 = vadd.f32 %v1994_v2, %v1963_v5 }
 0x1a7   : > { %v2164_v31 = vadd.f32 %v2157_v12, %v2145_v13  ;;  %2660 = vst [vmem:[%s3799_s29 + $0x78] sm:$0x7f] %v2360_v22  ;;  %v2363_v9 = vmul.f32 0.16666667, %v2356_v55 }
 0x1a8   : > { %v2127_v42 = vadd.f32 %v2120_v50, %v2001_v37 }
 0x1a9   : > { %v2183_v35 = vadd.f32 %v2176_v51, %v2164_v31  ;;  %2663 = vst [vmem:[%s3799_s29 + $0xd8] sm:$0x7f] %v2363_v9 }
 0x1aa   : > { %v2146_v26 = vadd.f32 %v2139_v8, %v2127_v42 }
 0x1ab   : > { %v2202_v21 = vadd.f32 %v2195_v14, %v2183_v35 }
 0x1ac   : > { %v2165_v59 = vadd.f32 %v2158_v23, %v2146_v26 }
 0x1ad   : > { %v2340_v0 = vadd.f32 %v5837_v3, %v2202_v21 }
 0x1ae   : > { %v2184_v61 = vadd.f32 %v2177_v4, %v2165_v59 }
 0x1af   : > { %v2347_v30 = vmax.f32 %v2340_v0, 0.0 }
 0x1b0   : > { %v2203_v25 = vadd.f32 %v2196_v19, %v2184_v61 }
 0x1b1   : > { %v2354_v10 = vmin.f32 %v2347_v30, 6.0 }
 0x1b2   : > { %v2341_v27 = vadd.f32 %v5837_v3, %v2203_v25 }
 0x1b3   : > { %v2361_v38 = vmul.f32 0.16666667, %v2354_v10 }
 0x1b4   : > { %v2348_v32 = vmax.f32 %v2341_v27, 0.0 }
 0x1b5   : > { %2661 = vst [vmem:[%s3799_s29 + $0x98] sm:$0x7f] %v2361_v38 }
 0x1b6   : > { %v2355_v16 = vmin.f32 %v2348_v32, 6.0 }
 0x1b8   : > { %v2362_v48 = vmul.f32 0.16666667, %v2355_v16 }
 0x1ba   : > { %2662 = vst [vmem:[%s3799_s29 + $0xb8] sm:$0x7f] %v2362_v48 }
 0x1bb PF: > { %s13_s12 = sadd.s32 1, %s2803_s12  }
 0x1bc   : > { %p10_p4 = scmp.ge.s32.totalorder %s13_s12, 4  }
 0x1be   :  { %12 = sbr.rel (!%p10_p4) target bundleno = 1 (0x1), region = 110 }

</bundles_post_ra>
